<compile_context>
chip_gen: v7x
topology: tpu7x:2x2x1
jax: 0.10.0
libtpu: 0.0.40
codegen_flags: <defaults>
</compile_context>

<pallas_src>
import jax
import jax.numpy as jnp
from jax import lax
from jax.experimental import pallas as pl
from jax.experimental.pallas import tpu as pltpu


# Packed-slab row offsets (multiples of 8 -> sublane-aligned in-kernel slices).
_W2_OFF = 0        # rows   0..149 : conv2 weights (150,128), cols 0..15 real
_F1W_OFF = 152     # rows 152..407 : fc1 weights   (256,128), cols 0..119 real
_F2W_OFF = 408     # rows 408..535 : fc2 weights   (128,128), 120x84 real
_F3W_OFF = 536     # rows 536..663 : fc3 weights   (128,128), 84x10 real
_BIAS_OFF = 664    # rows 664..667 : conv2_b, fc1_b, fc2_b, fc3_b (one row each)
_SLAB_ROWS = 672


# ----------------------------- fused kernel --------------------------------

def _lenet_kernel(x_ref, w1t_ref, slab_ref, o_ref):
    # x_ref:    (B, 28, 168)  lane = image_h*6 + cout_replica, dim1 = image_w
    # w1t_ref:  (26, 144)     row kw*5+kh holds conv1 w[c,kh,kw] tiled over oh;
    #                         row 25 holds the tiled conv1 bias
    # slab_ref: (672, 128)    packed conv2/fc weights + biases
    B = x_ref.shape[0]
    f32 = jnp.float32

    # ---- conv1 (5x5, 1->6): lane-dense accumulator (lane = oh*6 + cout) ----
    acc = jnp.zeros((B, 24, 144), f32)
    for kw in range(5):
        for kh in range(5):
            t = kw * 5 + kh
            # contiguous window: s[b, ow, oh*6+c] = x[b, oh+kh, ow+kw]
            s = x_ref[:, kw:kw + 24, kh * 6:kh * 6 + 144]
            acc = acc + s * w1t_ref[t:t + 1, :]
    y1 = jnp.maximum(acc + w1t_ref[25:26, :], 0.0)          # (B, 24, 144)

    # pool over ow (2nd-minor pairs, lane-preserving)
    y1 = y1.reshape(B, 12, 2, 144)
    y1 = jnp.maximum(y1[:, :, 0, :], y1[:, :, 1, :])        # (B, 12, 144)

    # pool over oh (lane groups of 6) and re-layout to NHWC (B, 12, 12, 6)
    cols = []
    for k in range(12):
        lo = y1[:, :, 12 * k:12 * k + 6]
        hi = y1[:, :, 12 * k + 6:12 * k + 12]
        cols.append(jnp.maximum(lo, hi))                    # (B, 12, 6) [b, ow2, c]
    p1 = jnp.concatenate(cols, axis=1).reshape(B, 12, 12, 6)  # [b, oh2, ow2, c]

    # ---- conv2 (5x5, 6->16): single K=150 matmul over an in-VMEM im2col ----
    pieces = []
    for ki in range(5):
        for kj in range(5):
            s = p1[:, ki:ki + 8, kj:kj + 8, :]              # (B, 8, 8, 6)
            pieces.append(s.reshape(B * 64, 6))
    im2col = jnp.concatenate(pieces, axis=-1)               # (B*64, 150)
    w2 = slab_ref[_W2_OFF:_W2_OFF + 150, :]
    b2 = slab_ref[_BIAS_OFF:_BIAS_OFF + 1, :]
    y2 = jnp.maximum(jnp.dot(im2col, w2, preferred_element_type=f32) + b2, 0.0)
    y2 = y2[:, :16].reshape(B, 8, 8, 16)                    # NHWC

    # 2x2 max-pool (lane-preserving reshapes, C minor)
    y2 = y2.reshape(B * 4, 2, 8, 16)
    y2 = jnp.maximum(y2[:, 0], y2[:, 1])
    y2 = y2.reshape(B * 4, 4, 2, 16)
    p2 = jnp.maximum(y2[:, :, 0, :], y2[:, :, 1, :]).reshape(B, 4, 4, 16)

    # ---- FC head: three full-width matmuls (K=256 / 128 / 128) -------------
    h_in = jnp.concatenate(
        [p2[:, hh, ww, :] for hh in range(4) for ww in range(4)], axis=-1)  # (B,256)

    f1w = slab_ref[_F1W_OFF:_F1W_OFF + 256, :]
    f1b = slab_ref[_BIAS_OFF + 1:_BIAS_OFF + 2, :]
    h = jnp.maximum(jnp.dot(h_in, f1w, preferred_element_type=f32) + f1b, 0.0)

    f2w = slab_ref[_F2W_OFF:_F2W_OFF + 128, :]
    f2b = slab_ref[_BIAS_OFF + 2:_BIAS_OFF + 3, :]
    h = jnp.maximum(jnp.dot(h, f2w, preferred_element_type=f32) + f2b, 0.0)

    f3w = slab_ref[_F3W_OFF:_F3W_OFF + 128, :]
    f3b = slab_ref[_BIAS_OFF + 3:_BIAS_OFF + 4, :]
    logits = (jnp.dot(h, f3w, preferred_element_type=f32) + f3b)[:, :10]

    # stable log_softmax over exactly the 10 real classes
    m = jnp.max(logits, axis=-1, keepdims=True)
    sh = logits - m
    lse = jnp.log(jnp.sum(jnp.exp(sh), axis=-1, keepdims=True))
    o_ref[...] = (sh - lse).astype(o_ref.dtype)


# ------------------------------ wrapper -------------------------------------

@jax.jit
def net_forward(x_nchw, params):
    """Full Net.forward.  x_nchw: (B, 1, 28, 28) float32 -> (B, 10) log-probs."""
    B = x_nchw.shape[0]
    f32 = jnp.float32

    # input: drop C=1, swap H<->W, expand lanes so lane = image_h*6 + c_replica
    xt = jnp.transpose(x_nchw[:, 0, :, :], (0, 2, 1))       # (B, 28, 28) [b, w, h]
    x_exp = jnp.repeat(xt, 6, axis=-1)                      # (B, 28, 168)

    # conv1 tap table: row kw*5+kh, lane oh*6+c = conv1_w[c, 0, kh, kw]
    w1 = jnp.transpose(params["conv1_w"][:, 0, :, :], (2, 1, 0))   # (5,5,6) [kw,kh,c]
    w1 = jnp.tile(w1.reshape(25, 1, 6), (1, 24, 1)).reshape(25, 144)
    b1 = jnp.tile(params["conv1_b"].reshape(1, 1, 6), (1, 24, 1)).reshape(1, 144)
    w1t = jnp.concatenate([w1, b1], axis=0)                 # (26, 144)

    # packed weight slab (conv2 + fc1..3 + biases), 128 lanes wide, zero pads
    def pad2(a, rows, cols=128):
        return jnp.pad(a, ((0, rows - a.shape[0]), (0, cols - a.shape[1])))

    w2k = jnp.transpose(params["conv2_w"], (2, 3, 1, 0)).reshape(150, 16)
    f1w = params["fc1_w"].reshape(16, 4, 4, 120).transpose(1, 2, 0, 3).reshape(256, 120)
    slab = jnp.concatenate([
        pad2(w2k, 152),                          # rows   0..151
        pad2(f1w, 256),                          # rows 152..407
        pad2(params["fc2_w"], 128),              # rows 408..535
        pad2(params["fc3_w"], 128),              # rows 536..663
        pad2(params["conv2_b"].reshape(1, 16), 1),
        pad2(params["fc1_b"], 1),
        pad2(params["fc2_b"], 1),
        pad2(params["fc3_b"], 1),
        jnp.zeros((4, 128), f32),
    ], axis=0)
    assert slab.shape == (_SLAB_ROWS, 128)

    return pl.pallas_call(
        _lenet_kernel,
        out_shape=jax.ShapeDtypeStruct((B, 10), f32),
        grid=(1,),
        in_specs=[
            pl.BlockSpec((B, 28, 168), lambda i: (0, 0, 0)),
            pl.BlockSpec((26, 144), lambda i: (0, 0)),
            pl.BlockSpec((_SLAB_ROWS, 128), lambda i: (0, 0)),
        ],
        out_specs=pl.BlockSpec((B, 10), lambda i: (0, 0)),
        compiler_params=pltpu.CompilerParams(
            dimension_semantics=("arbitrary",)),
    )(x_exp, w1t, slab)


# --------------------------- reference (pure JAX) ---------------------------

def net_forward_ref(x_nchw, params):
    x = jnp.transpose(x_nchw, (0, 2, 3, 1))
    for wk, bk in (("conv1_w", "conv1_b"), ("conv2_w", "conv2_b")):
        w = jnp.transpose(params[wk], (2, 3, 1, 0))          # OIHW -> HWIO
        x = lax.conv_general_dilated(x, w, (1, 1), "VALID",
                                     dimension_numbers=("NHWC", "HWIO", "NHWC"))
        x = jnp.maximum(x + params[bk].reshape(1, 1, 1, -1), 0.0)
        x = lax.reduce_window(x, -jnp.inf, lax.max,
                              (1, 2, 2, 1), (1, 2, 2, 1), "VALID")
    B = x.shape[0]
    x = jnp.transpose(x, (0, 3, 1, 2)).reshape(B, -1)        # NCHW flatten
    x = jnp.maximum(x @ params["fc1_w"] + params["fc1_b"], 0.0)
    x = jnp.maximum(x @ params["fc2_w"] + params["fc2_b"], 0.0)
    logits = x @ params["fc3_w"] + params["fc3_b"]
    return jax.nn.log_softmax(logits, axis=-1)


# ------------------------------- main ---------------------------------------

def init_params(key):
    ks = jax.random.split(key, 10)
    f32 = jnp.float32
    return {
        # conv weights in PyTorch OIHW layout.
        "conv1_w": 0.1 * jax.random.normal(ks[0], (6, 1, 5, 5), f32),
        "conv1_b": 0.1 * jax.random.normal(ks[1], (6,), f32),
        "conv2_w": 0.1 * jax.random.normal(ks[2], (16, 6, 5, 5), f32),
        "conv2_b": 0.1 * jax.random.normal(ks[3], (16,), f32),
        # fc weights stored pre-transposed: (in, out); biases as (1, out).
        "fc1_w": 0.1 * jax.random.normal(ks[4], (16 * 4 * 4, 120), f32),
        "fc1_b": 0.1 * jax.random.normal(ks[5], (1, 120), f32),
        "fc2_w": 0.1 * jax.random.normal(ks[6], (120, 84), f32),
        "fc2_b": 0.1 * jax.random.normal(ks[7], (1, 84), f32),
        "fc3_w": 0.1 * jax.random.normal(ks[8], (84, 10), f32),
        "fc3_b": 0.1 * jax.random.normal(ks[9], (1, 10), f32),
    }


if __name__ == "__main__":
    key = jax.random.PRNGKey(0)
    kx, kp = jax.random.split(key)
    params = init_params(kp)

    # MNIST-sized input (28x28 is required by the 16*4*4 fc1 input dim).
    x = jax.random.normal(kx, (2, 1, 28, 28), jnp.float32)

    out = jax.block_until_ready(net_forward(x, params))
    ref = jax.block_until_ready(net_forward_ref(x, params))

    assert out.shape == (2, 10), out.shape
    err = jnp.max(jnp.abs(out - ref))
    assert jnp.allclose(out, ref, atol=5e-4, rtol=5e-4), f"max abs err {err}"
    # log_softmax rows sum (in prob space) to ~1
    assert jnp.allclose(jnp.sum(jnp.exp(out), axis=-1), 1.0, atol=1e-4)

    print("KERNEL_OK")
</pallas_src>

<mosaic_0001>
module attributes {stable_mosaic.version = 11 : i64} {
  func.func @_lenet_kernel(%arg0: i32, %arg1: memref<2x28x168xf32, #tpu.memory_space<vmem>>, %arg2: memref<26x144xf32, #tpu.memory_space<vmem>>, %arg3: memref<672x128xf32, #tpu.memory_space<vmem>>, %arg4: memref<2x10xf32, #tpu.memory_space<vmem>>) attributes {dimension_semantics = [#tpu.dimension_semantics<arbitrary>], iteration_bounds = array<i64: 1>, scalar_prefetch = 0 : i64, scratch_operands = 0 : i64, tpu.core_type = #tpu.core_type<tc>, window_params = [{pipeline_mode = #tpu.pipeline_mode<synchronous>, transform_indices = @transform_0, window_bounds = array<i64: 2, 28, 168>}, {pipeline_mode = #tpu.pipeline_mode<synchronous>, transform_indices = @transform_1, window_bounds = array<i64: 26, 144>}, {pipeline_mode = #tpu.pipeline_mode<synchronous>, transform_indices = @transform_2, window_bounds = array<i64: 672, 128>}, {pipeline_mode = #tpu.pipeline_mode<synchronous>, transform_indices = @transform_3, window_bounds = array<i64: 2, 10>}]} {
    %cst = arith.constant 0.000000e+00 : f32
    %0 = vector.broadcast %cst : f32 to vector<2x24x144xf32>
    %c0 = arith.constant 0 : index
    %c0_0 = arith.constant 0 : index
    %c0_1 = arith.constant 0 : index
    %1 = vector.load %arg1[%c0, %c0_0, %c0_1] : memref<2x28x168xf32, #tpu.memory_space<vmem>>, vector<2x24x144xf32>
    %c0_2 = arith.constant 0 : index
    %c0_3 = arith.constant 0 : index
    %2 = vector.load %arg2[%c0_2, %c0_3] : memref<26x144xf32, #tpu.memory_space<vmem>>, vector<1x144xf32>
    %3 = vector.shape_cast %2 : vector<1x144xf32> to vector<1x1x144xf32>
    %4 = vector.broadcast %3 : vector<1x1x144xf32> to vector<2x24x144xf32>
    %5 = arith.mulf %1, %4 : vector<2x24x144xf32>
    %6 = arith.addf %0, %5 : vector<2x24x144xf32>
    %c0_4 = arith.constant 0 : index
    %c0_5 = arith.constant 0 : index
    %c6 = arith.constant 6 : index
    %7 = vector.load %arg1[%c0_4, %c0_5, %c6] : memref<2x28x168xf32, #tpu.memory_space<vmem>>, vector<2x24x144xf32>
    %c1 = arith.constant 1 : index
    %c0_6 = arith.constant 0 : index
    %8 = vector.load %arg2[%c1, %c0_6] : memref<26x144xf32, #tpu.memory_space<vmem>>, vector<1x144xf32>
    %9 = vector.shape_cast %8 : vector<1x144xf32> to vector<1x1x144xf32>
    %10 = vector.broadcast %9 : vector<1x1x144xf32> to vector<2x24x144xf32>
    %11 = arith.mulf %7, %10 : vector<2x24x144xf32>
    %12 = arith.addf %6, %11 : vector<2x24x144xf32>
    %c0_7 = arith.constant 0 : index
    %c0_8 = arith.constant 0 : index
    %c12 = arith.constant 12 : index
    %13 = vector.load %arg1[%c0_7, %c0_8, %c12] : memref<2x28x168xf32, #tpu.memory_space<vmem>>, vector<2x24x144xf32>
    %c2 = arith.constant 2 : index
    %c0_9 = arith.constant 0 : index
    %14 = vector.load %arg2[%c2, %c0_9] : memref<26x144xf32, #tpu.memory_space<vmem>>, vector<1x144xf32>
    %15 = vector.shape_cast %14 : vector<1x144xf32> to vector<1x1x144xf32>
    %16 = vector.broadcast %15 : vector<1x1x144xf32> to vector<2x24x144xf32>
    %17 = arith.mulf %13, %16 : vector<2x24x144xf32>
    %18 = arith.addf %12, %17 : vector<2x24x144xf32>
    %c0_10 = arith.constant 0 : index
    %c0_11 = arith.constant 0 : index
    %c18 = arith.constant 18 : index
    %19 = vector.load %arg1[%c0_10, %c0_11, %c18] : memref<2x28x168xf32, #tpu.memory_space<vmem>>, vector<2x24x144xf32>
    %c3 = arith.constant 3 : index
    %c0_12 = arith.constant 0 : index
    %20 = vector.load %arg2[%c3, %c0_12] : memref<26x144xf32, #tpu.memory_space<vmem>>, vector<1x144xf32>
    %21 = vector.shape_cast %20 : vector<1x144xf32> to vector<1x1x144xf32>
    %22 = vector.broadcast %21 : vector<1x1x144xf32> to vector<2x24x144xf32>
    %23 = arith.mulf %19, %22 : vector<2x24x144xf32>
    %24 = arith.addf %18, %23 : vector<2x24x144xf32>
    %c0_13 = arith.constant 0 : index
    %c0_14 = arith.constant 0 : index
    %c24 = arith.constant 24 : index
    %25 = vector.load %arg1[%c0_13, %c0_14, %c24] : memref<2x28x168xf32, #tpu.memory_space<vmem>>, vector<2x24x144xf32>
    %c4 = arith.constant 4 : index
    %c0_15 = arith.constant 0 : index
    %26 = vector.load %arg2[%c4, %c0_15] : memref<26x144xf32, #tpu.memory_space<vmem>>, vector<1x144xf32>
    %27 = vector.shape_cast %26 : vector<1x144xf32> to vector<1x1x144xf32>
    %28 = vector.broadcast %27 : vector<1x1x144xf32> to vector<2x24x144xf32>
    %29 = arith.mulf %25, %28 : vector<2x24x144xf32>
    %30 = arith.addf %24, %29 : vector<2x24x144xf32>
    %c0_16 = arith.constant 0 : index
    %c1_17 = arith.constant 1 : index
    %c0_18 = arith.constant 0 : index
    %31 = vector.load %arg1[%c0_16, %c1_17, %c0_18] : memref<2x28x168xf32, #tpu.memory_space<vmem>>, vector<2x24x144xf32>
    %c5 = arith.constant 5 : index
    %c0_19 = arith.constant 0 : index
    %32 = vector.load %arg2[%c5, %c0_19] : memref<26x144xf32, #tpu.memory_space<vmem>>, vector<1x144xf32>
    %33 = vector.shape_cast %32 : vector<1x144xf32> to vector<1x1x144xf32>
    %34 = vector.broadcast %33 : vector<1x1x144xf32> to vector<2x24x144xf32>
    %35 = arith.mulf %31, %34 : vector<2x24x144xf32>
    %36 = arith.addf %30, %35 : vector<2x24x144xf32>
    %c0_20 = arith.constant 0 : index
    %c1_21 = arith.constant 1 : index
    %c6_22 = arith.constant 6 : index
    %37 = vector.load %arg1[%c0_20, %c1_21, %c6_22] : memref<2x28x168xf32, #tpu.memory_space<vmem>>, vector<2x24x144xf32>
    %c6_23 = arith.constant 6 : index
    %c0_24 = arith.constant 0 : index
    %38 = vector.load %arg2[%c6_23, %c0_24] : memref<26x144xf32, #tpu.memory_space<vmem>>, vector<1x144xf32>
    %39 = vector.shape_cast %38 : vector<1x144xf32> to vector<1x1x144xf32>
    %40 = vector.broadcast %39 : vector<1x1x144xf32> to vector<2x24x144xf32>
    %41 = arith.mulf %37, %40 : vector<2x24x144xf32>
    %42 = arith.addf %36, %41 : vector<2x24x144xf32>
    %c0_25 = arith.constant 0 : index
    %c1_26 = arith.constant 1 : index
    %c12_27 = arith.constant 12 : index
    %43 = vector.load %arg1[%c0_25, %c1_26, %c12_27] : memref<2x28x168xf32, #tpu.memory_space<vmem>>, vector<2x24x144xf32>
    %c7 = arith.constant 7 : index
    %c0_28 = arith.constant 0 : index
    %44 = vector.load %arg2[%c7, %c0_28] : memref<26x144xf32, #tpu.memory_space<vmem>>, vector<1x144xf32>
    %45 = vector.shape_cast %44 : vector<1x144xf32> to vector<1x1x144xf32>
    %46 = vector.broadcast %45 : vector<1x1x144xf32> to vector<2x24x144xf32>
    %47 = arith.mulf %43, %46 : vector<2x24x144xf32>
    %48 = arith.addf %42, %47 : vector<2x24x144xf32>
    %c0_29 = arith.constant 0 : index
    %c1_30 = arith.constant 1 : index
    %c18_31 = arith.constant 18 : index
    %49 = vector.load %arg1[%c0_29, %c1_30, %c18_31] : memref<2x28x168xf32, #tpu.memory_space<vmem>>, vector<2x24x144xf32>
    %c8 = arith.constant 8 : index
    %c0_32 = arith.constant 0 : index
    %50 = vector.load %arg2[%c8, %c0_32] : memref<26x144xf32, #tpu.memory_space<vmem>>, vector<1x144xf32>
    %51 = vector.shape_cast %50 : vector<1x144xf32> to vector<1x1x144xf32>
    %52 = vector.broadcast %51 : vector<1x1x144xf32> to vector<2x24x144xf32>
    %53 = arith.mulf %49, %52 : vector<2x24x144xf32>
    %54 = arith.addf %48, %53 : vector<2x24x144xf32>
    %c0_33 = arith.constant 0 : index
    %c1_34 = arith.constant 1 : index
    %c24_35 = arith.constant 24 : index
    %55 = vector.load %arg1[%c0_33, %c1_34, %c24_35] : memref<2x28x168xf32, #tpu.memory_space<vmem>>, vector<2x24x144xf32>
    %c9 = arith.constant 9 : index
    %c0_36 = arith.constant 0 : index
    %56 = vector.load %arg2[%c9, %c0_36] : memref<26x144xf32, #tpu.memory_space<vmem>>, vector<1x144xf32>
    %57 = vector.shape_cast %56 : vector<1x144xf32> to vector<1x1x144xf32>
    %58 = vector.broadcast %57 : vector<1x1x144xf32> to vector<2x24x144xf32>
    %59 = arith.mulf %55, %58 : vector<2x24x144xf32>
    %60 = arith.addf %54, %59 : vector<2x24x144xf32>
    %c0_37 = arith.constant 0 : index
    %c2_38 = arith.constant 2 : index
    %c0_39 = arith.constant 0 : index
    %61 = vector.load %arg1[%c0_37, %c2_38, %c0_39] : memref<2x28x168xf32, #tpu.memory_space<vmem>>, vector<2x24x144xf32>
    %c10 = arith.constant 10 : index
    %c0_40 = arith.constant 0 : index
    %62 = vector.load %arg2[%c10, %c0_40] : memref<26x144xf32, #tpu.memory_space<vmem>>, vector<1x144xf32>
    %63 = vector.shape_cast %62 : vector<1x144xf32> to vector<1x1x144xf32>
    %64 = vector.broadcast %63 : vector<1x1x144xf32> to vector<2x24x144xf32>
    %65 = arith.mulf %61, %64 : vector<2x24x144xf32>
    %66 = arith.addf %60, %65 : vector<2x24x144xf32>
    %c0_41 = arith.constant 0 : index
    %c2_42 = arith.constant 2 : index
    %c6_43 = arith.constant 6 : index
    %67 = vector.load %arg1[%c0_41, %c2_42, %c6_43] : memref<2x28x168xf32, #tpu.memory_space<vmem>>, vector<2x24x144xf32>
    %c11 = arith.constant 11 : index
    %c0_44 = arith.constant 0 : index
    %68 = vector.load %arg2[%c11, %c0_44] : memref<26x144xf32, #tpu.memory_space<vmem>>, vector<1x144xf32>
    %69 = vector.shape_cast %68 : vector<1x144xf32> to vector<1x1x144xf32>
    %70 = vector.broadcast %69 : vector<1x1x144xf32> to vector<2x24x144xf32>
    %71 = arith.mulf %67, %70 : vector<2x24x144xf32>
    %72 = arith.addf %66, %71 : vector<2x24x144xf32>
    %c0_45 = arith.constant 0 : index
    %c2_46 = arith.constant 2 : index
    %c12_47 = arith.constant 12 : index
    %73 = vector.load %arg1[%c0_45, %c2_46, %c12_47] : memref<2x28x168xf32, #tpu.memory_space<vmem>>, vector<2x24x144xf32>
    %c12_48 = arith.constant 12 : index
    %c0_49 = arith.constant 0 : index
    %74 = vector.load %arg2[%c12_48, %c0_49] : memref<26x144xf32, #tpu.memory_space<vmem>>, vector<1x144xf32>
    %75 = vector.shape_cast %74 : vector<1x144xf32> to vector<1x1x144xf32>
    %76 = vector.broadcast %75 : vector<1x1x144xf32> to vector<2x24x144xf32>
    %77 = arith.mulf %73, %76 : vector<2x24x144xf32>
    %78 = arith.addf %72, %77 : vector<2x24x144xf32>
    %c0_50 = arith.constant 0 : index
    %c2_51 = arith.constant 2 : index
    %c18_52 = arith.constant 18 : index
    %79 = vector.load %arg1[%c0_50, %c2_51, %c18_52] : memref<2x28x168xf32, #tpu.memory_space<vmem>>, vector<2x24x144xf32>
    %c13 = arith.constant 13 : index
    %c0_53 = arith.constant 0 : index
    %80 = vector.load %arg2[%c13, %c0_53] : memref<26x144xf32, #tpu.memory_space<vmem>>, vector<1x144xf32>
    %81 = vector.shape_cast %80 : vector<1x144xf32> to vector<1x1x144xf32>
    %82 = vector.broadcast %81 : vector<1x1x144xf32> to vector<2x24x144xf32>
    %83 = arith.mulf %79, %82 : vector<2x24x144xf32>
    %84 = arith.addf %78, %83 : vector<2x24x144xf32>
    %c0_54 = arith.constant 0 : index
    %c2_55 = arith.constant 2 : index
    %c24_56 = arith.constant 24 : index
    %85 = vector.load %arg1[%c0_54, %c2_55, %c24_56] : memref<2x28x168xf32, #tpu.memory_space<vmem>>, vector<2x24x144xf32>
    %c14 = arith.constant 14 : index
    %c0_57 = arith.constant 0 : index
    %86 = vector.load %arg2[%c14, %c0_57] : memref<26x144xf32, #tpu.memory_space<vmem>>, vector<1x144xf32>
    %87 = vector.shape_cast %86 : vector<1x144xf32> to vector<1x1x144xf32>
    %88 = vector.broadcast %87 : vector<1x1x144xf32> to vector<2x24x144xf32>
    %89 = arith.mulf %85, %88 : vector<2x24x144xf32>
    %90 = arith.addf %84, %89 : vector<2x24x144xf32>
    %c0_58 = arith.constant 0 : index
    %c3_59 = arith.constant 3 : index
    %c0_60 = arith.constant 0 : index
    %91 = vector.load %arg1[%c0_58, %c3_59, %c0_60] : memref<2x28x168xf32, #tpu.memory_space<vmem>>, vector<2x24x144xf32>
    %c15 = arith.constant 15 : index
    %c0_61 = arith.constant 0 : index
    %92 = vector.load %arg2[%c15, %c0_61] : memref<26x144xf32, #tpu.memory_space<vmem>>, vector<1x144xf32>
    %93 = vector.shape_cast %92 : vector<1x144xf32> to vector<1x1x144xf32>
    %94 = vector.broadcast %93 : vector<1x1x144xf32> to vector<2x24x144xf32>
    %95 = arith.mulf %91, %94 : vector<2x24x144xf32>
    %96 = arith.addf %90, %95 : vector<2x24x144xf32>
    %c0_62 = arith.constant 0 : index
    %c3_63 = arith.constant 3 : index
    %c6_64 = arith.constant 6 : index
    %97 = vector.load %arg1[%c0_62, %c3_63, %c6_64] : memref<2x28x168xf32, #tpu.memory_space<vmem>>, vector<2x24x144xf32>
    %c16 = arith.constant 16 : index
    %c0_65 = arith.constant 0 : index
    %98 = vector.load %arg2[%c16, %c0_65] : memref<26x144xf32, #tpu.memory_space<vmem>>, vector<1x144xf32>
    %99 = vector.shape_cast %98 : vector<1x144xf32> to vector<1x1x144xf32>
    %100 = vector.broadcast %99 : vector<1x1x144xf32> to vector<2x24x144xf32>
    %101 = arith.mulf %97, %100 : vector<2x24x144xf32>
    %102 = arith.addf %96, %101 : vector<2x24x144xf32>
    %c0_66 = arith.constant 0 : index
    %c3_67 = arith.constant 3 : index
    %c12_68 = arith.constant 12 : index
    %103 = vector.load %arg1[%c0_66, %c3_67, %c12_68] : memref<2x28x168xf32, #tpu.memory_space<vmem>>, vector<2x24x144xf32>
    %c17 = arith.constant 17 : index
    %c0_69 = arith.constant 0 : index
    %104 = vector.load %arg2[%c17, %c0_69] : memref<26x144xf32, #tpu.memory_space<vmem>>, vector<1x144xf32>
    %105 = vector.shape_cast %104 : vector<1x144xf32> to vector<1x1x144xf32>
    %106 = vector.broadcast %105 : vector<1x1x144xf32> to vector<2x24x144xf32>
    %107 = arith.mulf %103, %106 : vector<2x24x144xf32>
    %108 = arith.addf %102, %107 : vector<2x24x144xf32>
    %c0_70 = arith.constant 0 : index
    %c3_71 = arith.constant 3 : index
    %c18_72 = arith.constant 18 : index
    %109 = vector.load %arg1[%c0_70, %c3_71, %c18_72] : memref<2x28x168xf32, #tpu.memory_space<vmem>>, vector<2x24x144xf32>
    %c18_73 = arith.constant 18 : index
    %c0_74 = arith.constant 0 : index
    %110 = vector.load %arg2[%c18_73, %c0_74] : memref<26x144xf32, #tpu.memory_space<vmem>>, vector<1x144xf32>
    %111 = vector.shape_cast %110 : vector<1x144xf32> to vector<1x1x144xf32>
    %112 = vector.broadcast %111 : vector<1x1x144xf32> to vector<2x24x144xf32>
    %113 = arith.mulf %109, %112 : vector<2x24x144xf32>
    %114 = arith.addf %108, %113 : vector<2x24x144xf32>
    %c0_75 = arith.constant 0 : index
    %c3_76 = arith.constant 3 : index
    %c24_77 = arith.constant 24 : index
    %115 = vector.load %arg1[%c0_75, %c3_76, %c24_77] : memref<2x28x168xf32, #tpu.memory_space<vmem>>, vector<2x24x144xf32>
    %c19 = arith.constant 19 : index
    %c0_78 = arith.constant 0 : index
    %116 = vector.load %arg2[%c19, %c0_78] : memref<26x144xf32, #tpu.memory_space<vmem>>, vector<1x144xf32>
    %117 = vector.shape_cast %116 : vector<1x144xf32> to vector<1x1x144xf32>
    %118 = vector.broadcast %117 : vector<1x1x144xf32> to vector<2x24x144xf32>
    %119 = arith.mulf %115, %118 : vector<2x24x144xf32>
    %120 = arith.addf %114, %119 : vector<2x24x144xf32>
    %c0_79 = arith.constant 0 : index
    %c4_80 = arith.constant 4 : index
    %c0_81 = arith.constant 0 : index
    %121 = vector.load %arg1[%c0_79, %c4_80, %c0_81] : memref<2x28x168xf32, #tpu.memory_space<vmem>>, vector<2x24x144xf32>
    %c20 = arith.constant 20 : index
    %c0_82 = arith.constant 0 : index
    %122 = vector.load %arg2[%c20, %c0_82] : memref<26x144xf32, #tpu.memory_space<vmem>>, vector<1x144xf32>
    %123 = vector.shape_cast %122 : vector<1x144xf32> to vector<1x1x144xf32>
    %124 = vector.broadcast %123 : vector<1x1x144xf32> to vector<2x24x144xf32>
    %125 = arith.mulf %121, %124 : vector<2x24x144xf32>
    %126 = arith.addf %120, %125 : vector<2x24x144xf32>
    %c0_83 = arith.constant 0 : index
    %c4_84 = arith.constant 4 : index
    %c6_85 = arith.constant 6 : index
    %127 = vector.load %arg1[%c0_83, %c4_84, %c6_85] : memref<2x28x168xf32, #tpu.memory_space<vmem>>, vector<2x24x144xf32>
    %c21 = arith.constant 21 : index
    %c0_86 = arith.constant 0 : index
    %128 = vector.load %arg2[%c21, %c0_86] : memref<26x144xf32, #tpu.memory_space<vmem>>, vector<1x144xf32>
    %129 = vector.shape_cast %128 : vector<1x144xf32> to vector<1x1x144xf32>
    %130 = vector.broadcast %129 : vector<1x1x144xf32> to vector<2x24x144xf32>
    %131 = arith.mulf %127, %130 : vector<2x24x144xf32>
    %132 = arith.addf %126, %131 : vector<2x24x144xf32>
    %c0_87 = arith.constant 0 : index
    %c4_88 = arith.constant 4 : index
    %c12_89 = arith.constant 12 : index
    %133 = vector.load %arg1[%c0_87, %c4_88, %c12_89] : memref<2x28x168xf32, #tpu.memory_space<vmem>>, vector<2x24x144xf32>
    %c22 = arith.constant 22 : index
    %c0_90 = arith.constant 0 : index
    %134 = vector.load %arg2[%c22, %c0_90] : memref<26x144xf32, #tpu.memory_space<vmem>>, vector<1x144xf32>
    %135 = vector.shape_cast %134 : vector<1x144xf32> to vector<1x1x144xf32>
    %136 = vector.broadcast %135 : vector<1x1x144xf32> to vector<2x24x144xf32>
    %137 = arith.mulf %133, %136 : vector<2x24x144xf32>
    %138 = arith.addf %132, %137 : vector<2x24x144xf32>
    %c0_91 = arith.constant 0 : index
    %c4_92 = arith.constant 4 : index
    %c18_93 = arith.constant 18 : index
    %139 = vector.load %arg1[%c0_91, %c4_92, %c18_93] : memref<2x28x168xf32, #tpu.memory_space<vmem>>, vector<2x24x144xf32>
    %c23 = arith.constant 23 : index
    %c0_94 = arith.constant 0 : index
    %140 = vector.load %arg2[%c23, %c0_94] : memref<26x144xf32, #tpu.memory_space<vmem>>, vector<1x144xf32>
    %141 = vector.shape_cast %140 : vector<1x144xf32> to vector<1x1x144xf32>
    %142 = vector.broadcast %141 : vector<1x1x144xf32> to vector<2x24x144xf32>
    %143 = arith.mulf %139, %142 : vector<2x24x144xf32>
    %144 = arith.addf %138, %143 : vector<2x24x144xf32>
    %c0_95 = arith.constant 0 : index
    %c4_96 = arith.constant 4 : index
    %c24_97 = arith.constant 24 : index
    %145 = vector.load %arg1[%c0_95, %c4_96, %c24_97] : memref<2x28x168xf32, #tpu.memory_space<vmem>>, vector<2x24x144xf32>
    %c24_98 = arith.constant 24 : index
    %c0_99 = arith.constant 0 : index
    %146 = vector.load %arg2[%c24_98, %c0_99] : memref<26x144xf32, #tpu.memory_space<vmem>>, vector<1x144xf32>
    %147 = vector.shape_cast %146 : vector<1x144xf32> to vector<1x1x144xf32>
    %148 = vector.broadcast %147 : vector<1x1x144xf32> to vector<2x24x144xf32>
    %149 = arith.mulf %145, %148 : vector<2x24x144xf32>
    %150 = arith.addf %144, %149 : vector<2x24x144xf32>
    %c25 = arith.constant 25 : index
    %c0_100 = arith.constant 0 : index
    %151 = vector.load %arg2[%c25, %c0_100] : memref<26x144xf32, #tpu.memory_space<vmem>>, vector<1x144xf32>
    %152 = vector.shape_cast %151 : vector<1x144xf32> to vector<1x1x144xf32>
    %153 = vector.broadcast %152 : vector<1x1x144xf32> to vector<2x24x144xf32>
    %154 = arith.addf %150, %153 : vector<2x24x144xf32>
    %cst_101 = arith.constant 0.000000e+00 : f32
    %155 = vector.broadcast %cst_101 : f32 to vector<2x24x144xf32>
    %156 = arith.maximumf %154, %155 : vector<2x24x144xf32>
    %157 = vector.shape_cast %156 : vector<2x24x144xf32> to vector<2x12x2x144xf32>
    %158 = vector.extract_strided_slice %157 {offsets = [0, 0, 0, 0], sizes = [2, 12, 1, 144], strides = [1, 1, 1, 1]} : vector<2x12x2x144xf32> to vector<2x12x1x144xf32>
    %159 = vector.shape_cast %158 : vector<2x12x1x144xf32> to vector<2x12x144xf32>
    %160 = vector.extract_strided_slice %157 {offsets = [0, 0, 1, 0], sizes = [2, 12, 1, 144], strides = [1, 1, 1, 1]} : vector<2x12x2x144xf32> to vector<2x12x1x144xf32>
    %161 = vector.shape_cast %160 : vector<2x12x1x144xf32> to vector<2x12x144xf32>
    %162 = arith.maximumf %159, %161 : vector<2x12x144xf32>
    %163 = vector.extract_strided_slice %162 {offsets = [0, 0, 0], sizes = [2, 12, 6], strides = [1, 1, 1]} : vector<2x12x144xf32> to vector<2x12x6xf32>
    %164 = vector.extract_strided_slice %162 {offsets = [0, 0, 6], sizes = [2, 12, 6], strides = [1, 1, 1]} : vector<2x12x144xf32> to vector<2x12x6xf32>
    %165 = arith.maximumf %163, %164 : vector<2x12x6xf32>
    %166 = vector.extract_strided_slice %162 {offsets = [0, 0, 12], sizes = [2, 12, 6], strides = [1, 1, 1]} : vector<2x12x144xf32> to vector<2x12x6xf32>
    %167 = vector.extract_strided_slice %162 {offsets = [0, 0, 18], sizes = [2, 12, 6], strides = [1, 1, 1]} : vector<2x12x144xf32> to vector<2x12x6xf32>
    %168 = arith.maximumf %166, %167 : vector<2x12x6xf32>
    %169 = vector.extract_strided_slice %162 {offsets = [0, 0, 24], sizes = [2, 12, 6], strides = [1, 1, 1]} : vector<2x12x144xf32> to vector<2x12x6xf32>
    %170 = vector.extract_strided_slice %162 {offsets = [0, 0, 30], sizes = [2, 12, 6], strides = [1, 1, 1]} : vector<2x12x144xf32> to vector<2x12x6xf32>
    %171 = arith.maximumf %169, %170 : vector<2x12x6xf32>
    %172 = vector.extract_strided_slice %162 {offsets = [0, 0, 36], sizes = [2, 12, 6], strides = [1, 1, 1]} : vector<2x12x144xf32> to vector<2x12x6xf32>
    %173 = vector.extract_strided_slice %162 {offsets = [0, 0, 42], sizes = [2, 12, 6], strides = [1, 1, 1]} : vector<2x12x144xf32> to vector<2x12x6xf32>
    %174 = arith.maximumf %172, %173 : vector<2x12x6xf32>
    %175 = vector.extract_strided_slice %162 {offsets = [0, 0, 48], sizes = [2, 12, 6], strides = [1, 1, 1]} : vector<2x12x144xf32> to vector<2x12x6xf32>
    %176 = vector.extract_strided_slice %162 {offsets = [0, 0, 54], sizes = [2, 12, 6], strides = [1, 1, 1]} : vector<2x12x144xf32> to vector<2x12x6xf32>
    %177 = arith.maximumf %175, %176 : vector<2x12x6xf32>
    %178 = vector.extract_strided_slice %162 {offsets = [0, 0, 60], sizes = [2, 12, 6], strides = [1, 1, 1]} : vector<2x12x144xf32> to vector<2x12x6xf32>
    %179 = vector.extract_strided_slice %162 {offsets = [0, 0, 66], sizes = [2, 12, 6], strides = [1, 1, 1]} : vector<2x12x144xf32> to vector<2x12x6xf32>
    %180 = arith.maximumf %178, %179 : vector<2x12x6xf32>
    %181 = vector.extract_strided_slice %162 {offsets = [0, 0, 72], sizes = [2, 12, 6], strides = [1, 1, 1]} : vector<2x12x144xf32> to vector<2x12x6xf32>
    %182 = vector.extract_strided_slice %162 {offsets = [0, 0, 78], sizes = [2, 12, 6], strides = [1, 1, 1]} : vector<2x12x144xf32> to vector<2x12x6xf32>
    %183 = arith.maximumf %181, %182 : vector<2x12x6xf32>
    %184 = vector.extract_strided_slice %162 {offsets = [0, 0, 84], sizes = [2, 12, 6], strides = [1, 1, 1]} : vector<2x12x144xf32> to vector<2x12x6xf32>
    %185 = vector.extract_strided_slice %162 {offsets = [0, 0, 90], sizes = [2, 12, 6], strides = [1, 1, 1]} : vector<2x12x144xf32> to vector<2x12x6xf32>
    %186 = arith.maximumf %184, %185 : vector<2x12x6xf32>
    %187 = vector.extract_strided_slice %162 {offsets = [0, 0, 96], sizes = [2, 12, 6], strides = [1, 1, 1]} : vector<2x12x144xf32> to vector<2x12x6xf32>
    %188 = vector.extract_strided_slice %162 {offsets = [0, 0, 102], sizes = [2, 12, 6], strides = [1, 1, 1]} : vector<2x12x144xf32> to vector<2x12x6xf32>
    %189 = arith.maximumf %187, %188 : vector<2x12x6xf32>
    %190 = vector.extract_strided_slice %162 {offsets = [0, 0, 108], sizes = [2, 12, 6], strides = [1, 1, 1]} : vector<2x12x144xf32> to vector<2x12x6xf32>
    %191 = vector.extract_strided_slice %162 {offsets = [0, 0, 114], sizes = [2, 12, 6], strides = [1, 1, 1]} : vector<2x12x144xf32> to vector<2x12x6xf32>
    %192 = arith.maximumf %190, %191 : vector<2x12x6xf32>
    %193 = vector.extract_strided_slice %162 {offsets = [0, 0, 120], sizes = [2, 12, 6], strides = [1, 1, 1]} : vector<2x12x144xf32> to vector<2x12x6xf32>
    %194 = vector.extract_strided_slice %162 {offsets = [0, 0, 126], sizes = [2, 12, 6], strides = [1, 1, 1]} : vector<2x12x144xf32> to vector<2x12x6xf32>
    %195 = arith.maximumf %193, %194 : vector<2x12x6xf32>
    %196 = vector.extract_strided_slice %162 {offsets = [0, 0, 132], sizes = [2, 12, 6], strides = [1, 1, 1]} : vector<2x12x144xf32> to vector<2x12x6xf32>
    %197 = vector.extract_strided_slice %162 {offsets = [0, 0, 138], sizes = [2, 12, 6], strides = [1, 1, 1]} : vector<2x12x144xf32> to vector<2x12x6xf32>
    %198 = arith.maximumf %196, %197 : vector<2x12x6xf32>
    %199 = tpu.concatenate %165, %168, %171, %174, %177, %180, %183, %186, %189, %192, %195, %198 in 1 : vector<2x12x6xf32>, vector<2x12x6xf32>, vector<2x12x6xf32>, vector<2x12x6xf32>, vector<2x12x6xf32>, vector<2x12x6xf32>, vector<2x12x6xf32>, vector<2x12x6xf32>, vector<2x12x6xf32>, vector<2x12x6xf32>, vector<2x12x6xf32>, vector<2x12x6xf32> -> vector<2x144x6xf32>
    %200 = vector.shape_cast %199 : vector<2x144x6xf32> to vector<2x12x12x6xf32>
    %201 = vector.extract_strided_slice %200 {offsets = [0, 0, 0, 0], sizes = [2, 8, 8, 6], strides = [1, 1, 1, 1]} : vector<2x12x12x6xf32> to vector<2x8x8x6xf32>
    %202 = vector.shape_cast %201 : vector<2x8x8x6xf32> to vector<128x6xf32>
    %203 = vector.extract_strided_slice %200 {offsets = [0, 0, 1, 0], sizes = [2, 8, 8, 6], strides = [1, 1, 1, 1]} : vector<2x12x12x6xf32> to vector<2x8x8x6xf32>
    %204 = vector.shape_cast %203 : vector<2x8x8x6xf32> to vector<128x6xf32>
    %205 = vector.extract_strided_slice %200 {offsets = [0, 0, 2, 0], sizes = [2, 8, 8, 6], strides = [1, 1, 1, 1]} : vector<2x12x12x6xf32> to vector<2x8x8x6xf32>
    %206 = vector.shape_cast %205 : vector<2x8x8x6xf32> to vector<128x6xf32>
    %207 = vector.extract_strided_slice %200 {offsets = [0, 0, 3, 0], sizes = [2, 8, 8, 6], strides = [1, 1, 1, 1]} : vector<2x12x12x6xf32> to vector<2x8x8x6xf32>
    %208 = vector.shape_cast %207 : vector<2x8x8x6xf32> to vector<128x6xf32>
    %209 = vector.extract_strided_slice %200 {offsets = [0, 0, 4, 0], sizes = [2, 8, 8, 6], strides = [1, 1, 1, 1]} : vector<2x12x12x6xf32> to vector<2x8x8x6xf32>
    %210 = vector.shape_cast %209 : vector<2x8x8x6xf32> to vector<128x6xf32>
    %211 = vector.extract_strided_slice %200 {offsets = [0, 1, 0, 0], sizes = [2, 8, 8, 6], strides = [1, 1, 1, 1]} : vector<2x12x12x6xf32> to vector<2x8x8x6xf32>
    %212 = vector.shape_cast %211 : vector<2x8x8x6xf32> to vector<128x6xf32>
    %213 = vector.extract_strided_slice %200 {offsets = [0, 1, 1, 0], sizes = [2, 8, 8, 6], strides = [1, 1, 1, 1]} : vector<2x12x12x6xf32> to vector<2x8x8x6xf32>
    %214 = vector.shape_cast %213 : vector<2x8x8x6xf32> to vector<128x6xf32>
    %215 = vector.extract_strided_slice %200 {offsets = [0, 1, 2, 0], sizes = [2, 8, 8, 6], strides = [1, 1, 1, 1]} : vector<2x12x12x6xf32> to vector<2x8x8x6xf32>
    %216 = vector.shape_cast %215 : vector<2x8x8x6xf32> to vector<128x6xf32>
    %217 = vector.extract_strided_slice %200 {offsets = [0, 1, 3, 0], sizes = [2, 8, 8, 6], strides = [1, 1, 1, 1]} : vector<2x12x12x6xf32> to vector<2x8x8x6xf32>
    %218 = vector.shape_cast %217 : vector<2x8x8x6xf32> to vector<128x6xf32>
    %219 = vector.extract_strided_slice %200 {offsets = [0, 1, 4, 0], sizes = [2, 8, 8, 6], strides = [1, 1, 1, 1]} : vector<2x12x12x6xf32> to vector<2x8x8x6xf32>
    %220 = vector.shape_cast %219 : vector<2x8x8x6xf32> to vector<128x6xf32>
    %221 = vector.extract_strided_slice %200 {offsets = [0, 2, 0, 0], sizes = [2, 8, 8, 6], strides = [1, 1, 1, 1]} : vector<2x12x12x6xf32> to vector<2x8x8x6xf32>
    %222 = vector.shape_cast %221 : vector<2x8x8x6xf32> to vector<128x6xf32>
    %223 = vector.extract_strided_slice %200 {offsets = [0, 2, 1, 0], sizes = [2, 8, 8, 6], strides = [1, 1, 1, 1]} : vector<2x12x12x6xf32> to vector<2x8x8x6xf32>
    %224 = vector.shape_cast %223 : vector<2x8x8x6xf32> to vector<128x6xf32>
    %225 = vector.extract_strided_slice %200 {offsets = [0, 2, 2, 0], sizes = [2, 8, 8, 6], strides = [1, 1, 1, 1]} : vector<2x12x12x6xf32> to vector<2x8x8x6xf32>
    %226 = vector.shape_cast %225 : vector<2x8x8x6xf32> to vector<128x6xf32>
    %227 = vector.extract_strided_slice %200 {offsets = [0, 2, 3, 0], sizes = [2, 8, 8, 6], strides = [1, 1, 1, 1]} : vector<2x12x12x6xf32> to vector<2x8x8x6xf32>
    %228 = vector.shape_cast %227 : vector<2x8x8x6xf32> to vector<128x6xf32>
    %229 = vector.extract_strided_slice %200 {offsets = [0, 2, 4, 0], sizes = [2, 8, 8, 6], strides = [1, 1, 1, 1]} : vector<2x12x12x6xf32> to vector<2x8x8x6xf32>
    %230 = vector.shape_cast %229 : vector<2x8x8x6xf32> to vector<128x6xf32>
    %231 = vector.extract_strided_slice %200 {offsets = [0, 3, 0, 0], sizes = [2, 8, 8, 6], strides = [1, 1, 1, 1]} : vector<2x12x12x6xf32> to vector<2x8x8x6xf32>
    %232 = vector.shape_cast %231 : vector<2x8x8x6xf32> to vector<128x6xf32>
    %233 = vector.extract_strided_slice %200 {offsets = [0, 3, 1, 0], sizes = [2, 8, 8, 6], strides = [1, 1, 1, 1]} : vector<2x12x12x6xf32> to vector<2x8x8x6xf32>
    %234 = vector.shape_cast %233 : vector<2x8x8x6xf32> to vector<128x6xf32>
    %235 = vector.extract_strided_slice %200 {offsets = [0, 3, 2, 0], sizes = [2, 8, 8, 6], strides = [1, 1, 1, 1]} : vector<2x12x12x6xf32> to vector<2x8x8x6xf32>
    %236 = vector.shape_cast %235 : vector<2x8x8x6xf32> to vector<128x6xf32>
    %237 = vector.extract_strided_slice %200 {offsets = [0, 3, 3, 0], sizes = [2, 8, 8, 6], strides = [1, 1, 1, 1]} : vector<2x12x12x6xf32> to vector<2x8x8x6xf32>
    %238 = vector.shape_cast %237 : vector<2x8x8x6xf32> to vector<128x6xf32>
    %239 = vector.extract_strided_slice %200 {offsets = [0, 3, 4, 0], sizes = [2, 8, 8, 6], strides = [1, 1, 1, 1]} : vector<2x12x12x6xf32> to vector<2x8x8x6xf32>
    %240 = vector.shape_cast %239 : vector<2x8x8x6xf32> to vector<128x6xf32>
    %241 = vector.extract_strided_slice %200 {offsets = [0, 4, 0, 0], sizes = [2, 8, 8, 6], strides = [1, 1, 1, 1]} : vector<2x12x12x6xf32> to vector<2x8x8x6xf32>
    %242 = vector.shape_cast %241 : vector<2x8x8x6xf32> to vector<128x6xf32>
    %243 = vector.extract_strided_slice %200 {offsets = [0, 4, 1, 0], sizes = [2, 8, 8, 6], strides = [1, 1, 1, 1]} : vector<2x12x12x6xf32> to vector<2x8x8x6xf32>
    %244 = vector.shape_cast %243 : vector<2x8x8x6xf32> to vector<128x6xf32>
    %245 = vector.extract_strided_slice %200 {offsets = [0, 4, 2, 0], sizes = [2, 8, 8, 6], strides = [1, 1, 1, 1]} : vector<2x12x12x6xf32> to vector<2x8x8x6xf32>
    %246 = vector.shape_cast %245 : vector<2x8x8x6xf32> to vector<128x6xf32>
    %247 = vector.extract_strided_slice %200 {offsets = [0, 4, 3, 0], sizes = [2, 8, 8, 6], strides = [1, 1, 1, 1]} : vector<2x12x12x6xf32> to vector<2x8x8x6xf32>
    %248 = vector.shape_cast %247 : vector<2x8x8x6xf32> to vector<128x6xf32>
    %249 = vector.extract_strided_slice %200 {offsets = [0, 4, 4, 0], sizes = [2, 8, 8, 6], strides = [1, 1, 1, 1]} : vector<2x12x12x6xf32> to vector<2x8x8x6xf32>
    %250 = vector.shape_cast %249 : vector<2x8x8x6xf32> to vector<128x6xf32>
    %251 = tpu.concatenate %202, %204, %206, %208, %210, %212, %214, %216, %218, %220, %222, %224, %226, %228, %230, %232 in 1 : vector<128x6xf32>, vector<128x6xf32>, vector<128x6xf32>, vector<128x6xf32>, vector<128x6xf32>, vector<128x6xf32>, vector<128x6xf32>, vector<128x6xf32>, vector<128x6xf32>, vector<128x6xf32>, vector<128x6xf32>, vector<128x6xf32>, vector<128x6xf32>, vector<128x6xf32>, vector<128x6xf32>, vector<128x6xf32> -> vector<128x96xf32>
    %252 = tpu.concatenate %234, %236, %238, %240, %242, %244, %246, %248, %250 in 1 : vector<128x6xf32>, vector<128x6xf32>, vector<128x6xf32>, vector<128x6xf32>, vector<128x6xf32>, vector<128x6xf32>, vector<128x6xf32>, vector<128x6xf32>, vector<128x6xf32> -> vector<128x54xf32>
    %253 = tpu.concatenate %251, %252 in 1 : vector<128x96xf32>, vector<128x54xf32> -> vector<128x150xf32>
    %c0_102 = arith.constant 0 : index
    %c0_103 = arith.constant 0 : index
    %254 = vector.load %arg3[%c0_102, %c0_103] : memref<672x128xf32, #tpu.memory_space<vmem>>, vector<150x128xf32>
    %c664 = arith.constant 664 : index
    %c0_104 = arith.constant 0 : index
    %255 = vector.load %arg3[%c664, %c0_104] : memref<672x128xf32, #tpu.memory_space<vmem>>, vector<1x128xf32>
    %cst_105 = arith.constant dense<0.000000e+00> : vector<128x128xf32>
    %256 = tpu.matmul %253, %254, %cst_105 {dimension_numbers = #tpu.dot_dimension_numbers<[1], [0], [0], [1], [0, 0, 1, 1], [], []>} : vector<128x150xf32>, vector<150x128xf32>, vector<128x128xf32> -> vector<128x128xf32>
    %257 = vector.broadcast %255 : vector<1x128xf32> to vector<128x128xf32>
    %258 = arith.addf %256, %257 : vector<128x128xf32>
    %cst_106 = arith.constant 0.000000e+00 : f32
    %259 = vector.broadcast %cst_106 : f32 to vector<128x128xf32>
    %260 = arith.maximumf %258, %259 : vector<128x128xf32>
    %261 = vector.extract_strided_slice %260 {offsets = [0, 0], sizes = [128, 16], strides = [1, 1]} : vector<128x128xf32> to vector<128x16xf32>
    %262 = vector.shape_cast %261 : vector<128x16xf32> to vector<2x8x8x16xf32>
    %263 = vector.shape_cast %262 : vector<2x8x8x16xf32> to vector<8x2x8x16xf32>
    %264 = vector.extract_strided_slice %263 {offsets = [0, 0, 0, 0], sizes = [8, 1, 8, 16], strides = [1, 1, 1, 1]} : vector<8x2x8x16xf32> to vector<8x1x8x16xf32>
    %265 = vector.shape_cast %264 : vector<8x1x8x16xf32> to vector<8x8x16xf32>
    %266 = vector.extract_strided_slice %263 {offsets = [0, 1, 0, 0], sizes = [8, 1, 8, 16], strides = [1, 1, 1, 1]} : vector<8x2x8x16xf32> to vector<8x1x8x16xf32>
    %267 = vector.shape_cast %266 : vector<8x1x8x16xf32> to vector<8x8x16xf32>
    %268 = arith.maximumf %265, %267 : vector<8x8x16xf32>
    %269 = vector.shape_cast %268 : vector<8x8x16xf32> to vector<8x4x2x16xf32>
    %270 = vector.extract_strided_slice %269 {offsets = [0, 0, 0, 0], sizes = [8, 4, 1, 16], strides = [1, 1, 1, 1]} : vector<8x4x2x16xf32> to vector<8x4x1x16xf32>
    %271 = vector.shape_cast %270 : vector<8x4x1x16xf32> to vector<8x4x16xf32>
    %272 = vector.extract_strided_slice %269 {offsets = [0, 0, 1, 0], sizes = [8, 4, 1, 16], strides = [1, 1, 1, 1]} : vector<8x4x2x16xf32> to vector<8x4x1x16xf32>
    %273 = vector.shape_cast %272 : vector<8x4x1x16xf32> to vector<8x4x16xf32>
    %274 = arith.maximumf %271, %273 : vector<8x4x16xf32>
    %275 = vector.shape_cast %274 : vector<8x4x16xf32> to vector<2x4x4x16xf32>
    %276 = vector.extract_strided_slice %275 {offsets = [0, 0, 0, 0], sizes = [2, 1, 1, 16], strides = [1, 1, 1, 1]} : vector<2x4x4x16xf32> to vector<2x1x1x16xf32>
    %277 = vector.shape_cast %276 : vector<2x1x1x16xf32> to vector<2x16xf32>
    %278 = vector.extract_strided_slice %275 {offsets = [0, 0, 1, 0], sizes = [2, 1, 1, 16], strides = [1, 1, 1, 1]} : vector<2x4x4x16xf32> to vector<2x1x1x16xf32>
    %279 = vector.shape_cast %278 : vector<2x1x1x16xf32> to vector<2x16xf32>
    %280 = vector.extract_strided_slice %275 {offsets = [0, 0, 2, 0], sizes = [2, 1, 1, 16], strides = [1, 1, 1, 1]} : vector<2x4x4x16xf32> to vector<2x1x1x16xf32>
    %281 = vector.shape_cast %280 : vector<2x1x1x16xf32> to vector<2x16xf32>
    %282 = vector.extract_strided_slice %275 {offsets = [0, 0, 3, 0], sizes = [2, 1, 1, 16], strides = [1, 1, 1, 1]} : vector<2x4x4x16xf32> to vector<2x1x1x16xf32>
    %283 = vector.shape_cast %282 : vector<2x1x1x16xf32> to vector<2x16xf32>
    %284 = vector.extract_strided_slice %275 {offsets = [0, 1, 0, 0], sizes = [2, 1, 1, 16], strides = [1, 1, 1, 1]} : vector<2x4x4x16xf32> to vector<2x1x1x16xf32>
    %285 = vector.shape_cast %284 : vector<2x1x1x16xf32> to vector<2x16xf32>
    %286 = vector.extract_strided_slice %275 {offsets = [0, 1, 1, 0], sizes = [2, 1, 1, 16], strides = [1, 1, 1, 1]} : vector<2x4x4x16xf32> to vector<2x1x1x16xf32>
    %287 = vector.shape_cast %286 : vector<2x1x1x16xf32> to vector<2x16xf32>
    %288 = vector.extract_strided_slice %275 {offsets = [0, 1, 2, 0], sizes = [2, 1, 1, 16], strides = [1, 1, 1, 1]} : vector<2x4x4x16xf32> to vector<2x1x1x16xf32>
    %289 = vector.shape_cast %288 : vector<2x1x1x16xf32> to vector<2x16xf32>
    %290 = vector.extract_strided_slice %275 {offsets = [0, 1, 3, 0], sizes = [2, 1, 1, 16], strides = [1, 1, 1, 1]} : vector<2x4x4x16xf32> to vector<2x1x1x16xf32>
    %291 = vector.shape_cast %290 : vector<2x1x1x16xf32> to vector<2x16xf32>
    %292 = vector.extract_strided_slice %275 {offsets = [0, 2, 0, 0], sizes = [2, 1, 1, 16], strides = [1, 1, 1, 1]} : vector<2x4x4x16xf32> to vector<2x1x1x16xf32>
    %293 = vector.shape_cast %292 : vector<2x1x1x16xf32> to vector<2x16xf32>
    %294 = vector.extract_strided_slice %275 {offsets = [0, 2, 1, 0], sizes = [2, 1, 1, 16], strides = [1, 1, 1, 1]} : vector<2x4x4x16xf32> to vector<2x1x1x16xf32>
    %295 = vector.shape_cast %294 : vector<2x1x1x16xf32> to vector<2x16xf32>
    %296 = vector.extract_strided_slice %275 {offsets = [0, 2, 2, 0], sizes = [2, 1, 1, 16], strides = [1, 1, 1, 1]} : vector<2x4x4x16xf32> to vector<2x1x1x16xf32>
    %297 = vector.shape_cast %296 : vector<2x1x1x16xf32> to vector<2x16xf32>
    %298 = vector.extract_strided_slice %275 {offsets = [0, 2, 3, 0], sizes = [2, 1, 1, 16], strides = [1, 1, 1, 1]} : vector<2x4x4x16xf32> to vector<2x1x1x16xf32>
    %299 = vector.shape_cast %298 : vector<2x1x1x16xf32> to vector<2x16xf32>
    %300 = vector.extract_strided_slice %275 {offsets = [0, 3, 0, 0], sizes = [2, 1, 1, 16], strides = [1, 1, 1, 1]} : vector<2x4x4x16xf32> to vector<2x1x1x16xf32>
    %301 = vector.shape_cast %300 : vector<2x1x1x16xf32> to vector<2x16xf32>
    %302 = vector.extract_strided_slice %275 {offsets = [0, 3, 1, 0], sizes = [2, 1, 1, 16], strides = [1, 1, 1, 1]} : vector<2x4x4x16xf32> to vector<2x1x1x16xf32>
    %303 = vector.shape_cast %302 : vector<2x1x1x16xf32> to vector<2x16xf32>
    %304 = vector.extract_strided_slice %275 {offsets = [0, 3, 2, 0], sizes = [2, 1, 1, 16], strides = [1, 1, 1, 1]} : vector<2x4x4x16xf32> to vector<2x1x1x16xf32>
    %305 = vector.shape_cast %304 : vector<2x1x1x16xf32> to vector<2x16xf32>
    %306 = vector.extract_strided_slice %275 {offsets = [0, 3, 3, 0], sizes = [2, 1, 1, 16], strides = [1, 1, 1, 1]} : vector<2x4x4x16xf32> to vector<2x1x1x16xf32>
    %307 = vector.shape_cast %306 : vector<2x1x1x16xf32> to vector<2x16xf32>
    %308 = tpu.concatenate %277, %279, %281, %283, %285, %287, %289, %291, %293, %295, %297, %299, %301, %303, %305, %307 in 1 : vector<2x16xf32>, vector<2x16xf32>, vector<2x16xf32>, vector<2x16xf32>, vector<2x16xf32>, vector<2x16xf32>, vector<2x16xf32>, vector<2x16xf32>, vector<2x16xf32>, vector<2x16xf32>, vector<2x16xf32>, vector<2x16xf32>, vector<2x16xf32>, vector<2x16xf32>, vector<2x16xf32>, vector<2x16xf32> -> vector<2x256xf32>
    %c152 = arith.constant 152 : index
    %c0_107 = arith.constant 0 : index
    %309 = vector.load %arg3[%c152, %c0_107] : memref<672x128xf32, #tpu.memory_space<vmem>>, vector<256x128xf32>
    %c665 = arith.constant 665 : index
    %c0_108 = arith.constant 0 : index
    %310 = vector.load %arg3[%c665, %c0_108] : memref<672x128xf32, #tpu.memory_space<vmem>>, vector<1x128xf32>
    %cst_109 = arith.constant dense<0.000000e+00> : vector<2x128xf32>
    %311 = tpu.matmul %308, %309, %cst_109 {dimension_numbers = #tpu.dot_dimension_numbers<[1], [0], [0], [1], [0, 0, 1, 1], [], []>} : vector<2x256xf32>, vector<256x128xf32>, vector<2x128xf32> -> vector<2x128xf32>
    %312 = vector.broadcast %310 : vector<1x128xf32> to vector<2x128xf32>
    %313 = arith.addf %311, %312 : vector<2x128xf32>
    %cst_110 = arith.constant 0.000000e+00 : f32
    %314 = vector.broadcast %cst_110 : f32 to vector<2x128xf32>
    %315 = arith.maximumf %313, %314 : vector<2x128xf32>
    %c408 = arith.constant 408 : index
    %c0_111 = arith.constant 0 : index
    %316 = vector.load %arg3[%c408, %c0_111] : memref<672x128xf32, #tpu.memory_space<vmem>>, vector<128x128xf32>
    %c666 = arith.constant 666 : index
    %c0_112 = arith.constant 0 : index
    %317 = vector.load %arg3[%c666, %c0_112] : memref<672x128xf32, #tpu.memory_space<vmem>>, vector<1x128xf32>
    %cst_113 = arith.constant dense<0.000000e+00> : vector<2x128xf32>
    %318 = tpu.matmul %315, %316, %cst_113 {dimension_numbers = #tpu.dot_dimension_numbers<[1], [0], [0], [1], [0, 0, 1, 1], [], []>} : vector<2x128xf32>, vector<128x128xf32>, vector<2x128xf32> -> vector<2x128xf32>
    %319 = vector.broadcast %317 : vector<1x128xf32> to vector<2x128xf32>
    %320 = arith.addf %318, %319 : vector<2x128xf32>
    %cst_114 = arith.constant 0.000000e+00 : f32
    %321 = vector.broadcast %cst_114 : f32 to vector<2x128xf32>
    %322 = arith.maximumf %320, %321 : vector<2x128xf32>
    %c536 = arith.constant 536 : index
    %c0_115 = arith.constant 0 : index
    %323 = vector.load %arg3[%c536, %c0_115] : memref<672x128xf32, #tpu.memory_space<vmem>>, vector<128x128xf32>
    %c667 = arith.constant 667 : index
    %c0_116 = arith.constant 0 : index
    %324 = vector.load %arg3[%c667, %c0_116] : memref<672x128xf32, #tpu.memory_space<vmem>>, vector<1x128xf32>
    %cst_117 = arith.constant dense<0.000000e+00> : vector<2x128xf32>
    %325 = tpu.matmul %322, %323, %cst_117 {dimension_numbers = #tpu.dot_dimension_numbers<[1], [0], [0], [1], [0, 0, 1, 1], [], []>} : vector<2x128xf32>, vector<128x128xf32>, vector<2x128xf32> -> vector<2x128xf32>
    %326 = vector.broadcast %324 : vector<1x128xf32> to vector<2x128xf32>
    %327 = arith.addf %325, %326 : vector<2x128xf32>
    %328 = vector.extract_strided_slice %327 {offsets = [0, 0], sizes = [2, 10], strides = [1, 1]} : vector<2x128xf32> to vector<2x10xf32>
    %cst_118 = arith.constant dense<0xFF800000> : vector<2xf32>
    %329 = vector.multi_reduction <maximumf>, %328, %cst_118 [1] : vector<2x10xf32> to vector<2xf32>
    %330 = vector.shape_cast %329 : vector<2xf32> to vector<2x1xf32>
    %331 = vector.broadcast %330 : vector<2x1xf32> to vector<2x10xf32>
    %332 = arith.subf %328, %331 : vector<2x10xf32>
    %333 = math.exp %332 : vector<2x10xf32>
    %cst_119 = arith.constant dense<0.000000e+00> : vector<2xf32>
    %334 = vector.multi_reduction <add>, %333, %cst_119 [1] : vector<2x10xf32> to vector<2xf32>
    %335 = vector.shape_cast %334 : vector<2xf32> to vector<2x1xf32>
    %336 = math.log %335 : vector<2x1xf32>
    %337 = vector.broadcast %336 : vector<2x1xf32> to vector<2x10xf32>
    %338 = arith.subf %332, %337 : vector<2x10xf32>
    %c0_120 = arith.constant 0 : index
    %c0_121 = arith.constant 0 : index
    %339 = vector.load %arg4[%c0_120, %c0_121] : memref<2x10xf32, #tpu.memory_space<vmem>>, vector<2x10xf32>
    tpu.vector_store %arg4[%c0_120, %c0_121], %338 {strides = array<i32>} : memref<2x10xf32, #tpu.memory_space<vmem>>, vector<2x10xf32>,
    return
  }
  func.func @transform_0(%arg0: i32) -> (i32, i32, i32) {
    %c0_i32 = arith.constant 0 : i32
    %c0_i32_0 = arith.constant 0 : i32
    %c0_i32_1 = arith.constant 0 : i32
    %c0_i32_2 = arith.constant 0 : i32
    return %c0_i32, %c0_i32_0, %c0_i32_1 : i32, i32, i32
  }
  func.func @transform_1(%arg0: i32) -> (i32, i32) {
    %c0_i32 = arith.constant 0 : i32
    %c0_i32_0 = arith.constant 0 : i32
    %c0_i32_1 = arith.constant 0 : i32
    return %c0_i32, %c0_i32_0 : i32, i32
  }
  func.func @transform_2(%arg0: i32) -> (i32, i32) {
    %c0_i32 = arith.constant 0 : i32
    %c0_i32_0 = arith.constant 0 : i32
    %c0_i32_1 = arith.constant 0 : i32
    return %c0_i32, %c0_i32_0 : i32, i32
  }
  func.func @transform_3(%arg0: i32) -> (i32, i32) {
    %c0_i32 = arith.constant 0 : i32
    %c0_i32_0 = arith.constant 0 : i32
    %c0_i32_1 = arith.constant 0 : i32
    return %c0_i32, %c0_i32_0 : i32, i32
  }
}

</mosaic_0001>

<bundles_post_ra>
// kernel: tile.11
= control target key start
LH: loop header
LB: loop body
LE: loop exit
PB: predicated region body
PF: predicated region fallthrough
CT: control target
= control target key end

     0   :  { %vm3_vm0 = vcmask 203776   ;;  %s344_s0 = inlined_call_operand.vmem [shape: f32[25,24,1,1,6], index: 0, kind: input, shape index: {}]   ;;  %s345_s1 = inlined_call_operand.vmem [shape: f32[25,144], index: 1, kind: output, shape index: {}]  }
   0x1   :  { %v2_v0 = vld [vmem:[%s344_s0] sm:$0x3f]   ;;  %v120_v1 = vld [vmem:[%s344_s0 + $0x8] sm:$0x3f]   ;;  %v122_v2 = vld [vmem:[%s344_s0 + $0x10] sm:$0x3f]  }
   0x2   :  { %4 = vst.msk [vmem:[%s345_s1] sm:$0x3f] %vm3_vm0, %v2_v0   ;;  %121 = vst.msk [vmem:[%s345_s1 + $0x6] sm:$0x3f] %vm3_vm0, %v120_v1   ;;  %v124_v3 = vld [vmem:[%s344_s0 + $0x18] sm:$0x3f]  }
   0x3   :  { %123 = vst.msk [vmem:[%s345_s1 + $0xc] sm:$0x3f] %vm3_vm0, %v122_v2   ;;  %v126_v4 = vld [vmem:[%s344_s0 + $0x20] sm:$0x3f]   ;;  %v128_v5 = vld [vmem:[%s344_s0 + $0x28] sm:$0x3f]  }
   0x4   :  { %125 = vst.msk [vmem:[%s345_s1 + $0x12] sm:$0x3f] %vm3_vm0, %v124_v3   ;;  %127 = vst.msk [vmem:[%s345_s1 + $0x18] sm:$0x3f] %vm3_vm0, %v126_v4   ;;  %v130_v6 = vld [vmem:[%s344_s0 + $0x30] sm:$0x3f]  }
   0x5   :  { %129 = vst.msk [vmem:[%s345_s1 + $0x1e] sm:$0x3f] %vm3_vm0, %v128_v5   ;;  %v132_v7 = vld [vmem:[%s344_s0 + $0x38] sm:$0x3f]   ;;  %v134_v8 = vld [vmem:[%s344_s0 + $0x40] sm:$0x3f]  }
   0x6   :  { %131 = vst.msk [vmem:[%s345_s1 + $0x24] sm:$0x3f] %vm3_vm0, %v130_v6   ;;  %133 = vst.msk [vmem:[%s345_s1 + $0x2a] sm:$0x3f] %vm3_vm0, %v132_v7   ;;  %v136_v9 = vld [vmem:[%s344_s0 + $0x48] sm:$0x3f]  }
   0x7   :  { %135 = vst.msk [vmem:[%s345_s1 + $0x30] sm:$0x3f] %vm3_vm0, %v134_v8   ;;  %v138_v10 = vld [vmem:[%s344_s0 + $0x50] sm:$0x3f]   ;;  %v140_v11 = vld [vmem:[%s344_s0 + $0x58] sm:$0x3f]  }
   0x8   :  { %137 = vst.msk [vmem:[%s345_s1 + $0x36] sm:$0x3f] %vm3_vm0, %v136_v9   ;;  %139 = vst.msk [vmem:[%s345_s1 + $0x3c] sm:$0x3f] %vm3_vm0, %v138_v10   ;;  %v142_v12 = vld [vmem:[%s344_s0 + $0x60] sm:$0x3f]  }
   0x9   :  { %141 = vst.msk [vmem:[%s345_s1 + $0x42] sm:$0x3f] %vm3_vm0, %v140_v11   ;;  %v144_v13 = vld [vmem:[%s344_s0 + $0x68] sm:$0x3f]   ;;  %v146_v14 = vld [vmem:[%s344_s0 + $0x70] sm:$0x3f]  }
   0xa   :  { %143 = vst.msk [vmem:[%s345_s1 + $0x48] sm:$0x3f] %vm3_vm0, %v142_v12   ;;  %145 = vst.msk [vmem:[%s345_s1 + $0x4e] sm:$0x3f] %vm3_vm0, %v144_v13   ;;  %v148_v15 = vld [vmem:[%s344_s0 + $0x78] sm:$0x3f]  }
   0xb   :  { %147 = vst.msk [vmem:[%s345_s1 + $0x54] sm:$0x3f] %vm3_vm0, %v146_v14   ;;  %v150_v16 = vld [vmem:[%s344_s0 + $0x80] sm:$0x3f]   ;;  %v152_v17 = vld [vmem:[%s344_s0 + $0x88] sm:$0x3f]  }
   0xc   :  { %149 = vst.msk [vmem:[%s345_s1 + $0x5a] sm:$0x3f] %vm3_vm0, %v148_v15   ;;  %151 = vst.msk [vmem:[%s345_s1 + $0x60] sm:$0x3f] %vm3_vm0, %v150_v16   ;;  %v154_v18 = vld [vmem:[%s344_s0 + $0x90] sm:$0x3f]  }
   0xd   :  { %153 = vst.msk [vmem:[%s345_s1 + $0x66] sm:$0x3f] %vm3_vm0, %v152_v17   ;;  %v156_v19 = vld [vmem:[%s344_s0 + $0x98] sm:$0x3f]   ;;  %v158_v20 = vld [vmem:[%s344_s0 + $0xa0] sm:$0x3f]  }
   0xe   :  { %155 = vst.msk [vmem:[%s345_s1 + $0x6c] sm:$0x3f] %vm3_vm0, %v154_v18   ;;  %157 = vst.msk [vmem:[%s345_s1 + $0x72] sm:$0x3f] %vm3_vm0, %v156_v19   ;;  %v160_v21 = vld [vmem:[%s344_s0 + $0xa8] sm:$0x3f]  }
   0xf   :  { %159 = vst.msk [vmem:[%s345_s1 + $0x78] sm:$0x3f] %vm3_vm0, %v158_v20   ;;  %v162_v22 = vld [vmem:[%s344_s0 + $0xb0] sm:$0x3f]   ;;  %v164_v23 = vld [vmem:[%s344_s0 + $0xb8] sm:$0x3f]  }
  0x10   :  { %161 = vst.msk [vmem:[%s345_s1 + $0x7e] sm:$0x3f] %vm3_vm0, %v160_v21   ;;  %163 = vst.msk [vmem:[%s345_s1 + $0x84] sm:$0x3f] %vm3_vm0, %v162_v22  }
  0x11   :  { %165 = vst.msk [vmem:[%s345_s1 + $0x8a] sm:$0x3f] %vm3_vm0, %v164_v23  }

// kernel: net_forward.1
= control target key start
LH: loop header
LB: loop body
LE: loop exit
PB: predicated region body
PF: predicated region fallthrough
CT: control target
= control target key end

     0   :  { %v29_v0 = vlaneseq  ;;  %s8783_s16 = smov 6   ;;  %s8784_s17 = smov 12   ;;  %s16557_s0 = inlined_call_operand.vmem [shape: f32[2,28,168], index: 0, kind: input, shape index: {}]   ;;  %s16558_s1 = inlined_call_operand.vmem [shape: f32[26,144], index: 1, kind: input, shape index: {}]   ;;  %s16559_s2 = inlined_call_operand.vmem [shape: f32[672,128], index: 2, kind: input, shape index: {}]   ;;  %s16560_s3 = inlined_call_operand.hbm [shape: f32[2,10], index: 3, kind: output, shape index: {}]  }
   0x1   :  { %v7630_v2 = vld [vmem:[%s16558_s1 + $0x1] ss:$8 sm:$0x3]  ;;  %v7631_v3 = vld [vmem:[%s16558_s1 + $0x2] ss:$8 sm:$0x3] }
   0x2   :  { %v8841_v1 = vshrl.u32 %v29_v0, 7  ;;  %v7632_v10 = vld [vmem:[%s16558_s1 + $0x3] ss:$8 sm:$0x3] }
   0x3   :  { %v7633_v13 = vld [vmem:[%s16558_s1 + $0x4] ss:$8 sm:$0x3] }
   0x4   :  { %16980 = vst [vmem:[#allocation5_spill] sm:$0xff] %v8841_v1  ;;  %v8850_v4 = vsub.s32 0, %v8841_v1  ;;  %v8853_v5 = vsub.s32 1, %v8841_v1 }
   0x6   :  { %16981 = vst [vmem:[#allocation6_spill] sm:$0xff] %v8850_v4  ;;  %16982 = vst [vmem:[#allocation7_spill] sm:$0xff] %v8853_v5  ;;  %v69_v6 = vrot.slane %v7630_v2, %v8850_v4  ;;  %v167_v7 = vrot.slane %v7631_v3, %v8850_v4  ;;  %v73_v8 = vrot.slane %v7630_v2, %v8853_v5 }
   0x7   :  { %v171_v9 = vrot.slane %v7631_v3, %v8853_v5  ;;  %v265_v11 = vrot.slane %v7632_v10, %v8850_v4  ;;  %v269_v12 = vrot.slane %v7632_v10, %v8853_v5 }
   0x8   :  { %74 = vrot.lane.b32.xlu0 %v69_v6, %s8783_s16  ;;  %172 = vrot.lane.b32.xlu1 %v167_v7, %s8784_s17 }
   0xc   :  { %76 = vrot.lane.b32.xlu0 %v73_v8, %s8783_s16  ;;  %174 = vrot.lane.b32.xlu1 %v171_v9, %s8784_s17 }
   0xd   :  { %8 = vsyncpa [#allocation3], 0  ;;  %s8785_s22 = smov 18   ;;  %v363_v14 = vrot.slane %v7633_v13, %v8850_v4  ;;  %v367_v15 = vrot.slane %v7633_v13, %v8853_v5  ;;  %v7635_v16 = vld [vmem:[%s16558_s1 + $0x6] ss:$8 sm:$0x3] }
   0xe   :  { %s8786_s25 = smov 24   ;;  %v567_v17 = vrot.slane %v7635_v16, %v8850_v4  ;;  %v571_v18 = vrot.slane %v7635_v16, %v8853_v5  ;;  %v7636_v19 = vld [vmem:[%s16558_s1 + $0x7] ss:$8 sm:$0x3]  ;;  %v8992_v0 = vld [vmem:[%s16557_s0 + $0x10] sm:$0xff]  ;;  %vm78_vm0 = vcmask 48128  }
   0xf   :  { %v699_v20 = vrot.slane %v7636_v19, %v8850_v4  ;;  %v703_v21 = vrot.slane %v7636_v19, %v8853_v5  ;;  %v7637_v22 = vld [vmem:[%s16558_s1 + $0x10] ss:$8 sm:$0x3]  ;;  %v7638_v25 = vld [vmem:[%s16558_s1 + $0x11] ss:$8 sm:$0x3] }
  0x10   :  { %270 = vrot.lane.b32.xlu0 %v265_v11, %s8785_s22  ;;  %272 = vrot.lane.b32.xlu1 %v269_v12, %s8785_s22  ;;  %v831_v23 = vrot.slane %v7637_v22, %v8850_v4  ;;  %v835_v24 = vrot.slane %v7637_v22, %v8853_v5  ;;  %v963_v26 = vrot.slane %v7638_v25, %v8850_v4  ;;  %v7640_v28 = vld [vmem:[%s16558_s1 + $0x13] ss:$8 sm:$0x3]  ;;  %v7641_v31 = vld [vmem:[%s16558_s1 + $0x14] ss:$8 sm:$0x3] }
  0x11   :  { %v967_v27 = vrot.slane %v7638_v25, %v8853_v5  ;;  %v1201_v29 = vrot.slane %v7640_v28, %v8850_v4  ;;  %v1205_v30 = vrot.slane %v7640_v28, %v8853_v5  ;;  %v1333_v32 = vrot.slane %v7641_v31, %v8850_v4  ;;  %v7642_v34 = vld [vmem:[%s16558_s1 + $0x15] ss:$8 sm:$0x3]  ;;  %v7643_v37 = vld [vmem:[%s16558_s1 + $0x16] ss:$8 sm:$0x3] }
  0x12   :  { %v1337_v33 = vrot.slane %v7641_v31, %v8853_v5  ;;  %v1465_v35 = vrot.slane %v7642_v34, %v8850_v4  ;;  %v1469_v36 = vrot.slane %v7642_v34, %v8853_v5  ;;  %v1597_v38 = vrot.slane %v7643_v37, %v8850_v4  ;;  %v7645_v40 = vld [vmem:[%s16558_s1 + $0x20] ss:$8 sm:$0x3]  ;;  %v7646_v43 = vld [vmem:[%s16558_s1 + $0x21] ss:$8 sm:$0x3] }
  0x13   :  { %v1601_v39 = vrot.slane %v7643_v37, %v8853_v5  ;;  %v1835_v41 = vrot.slane %v7645_v40, %v8850_v4  ;;  %v1839_v42 = vrot.slane %v7645_v40, %v8853_v5  ;;  %v1967_v44 = vrot.slane %v7646_v43, %v8850_v4  ;;  %v7647_v46 = vld [vmem:[%s16558_s1 + $0x22] ss:$8 sm:$0x3]  ;;  %v7648_v49 = vld [vmem:[%s16558_s1 + $0x23] ss:$8 sm:$0x3] }
  0x14   :  { %368 = vrot.lane.b32.xlu0 %v363_v14, %s8786_s25  ;;  %370 = vrot.lane.b32.xlu1 %v367_v15, %s8786_s25  ;;  %v1971_v45 = vrot.slane %v7646_v43, %v8853_v5  ;;  %v2099_v47 = vrot.slane %v7647_v46, %v8850_v4  ;;  %v2103_v48 = vrot.slane %v7647_v46, %v8853_v5  ;;  %v7650_v52 = vld [vmem:[%s16558_s1 + $0x25] ss:$8 sm:$0x3]  ;;  %v7651_v55 = vld [vmem:[%s16558_s1 + $0x26] ss:$8 sm:$0x3] }
  0x15   :  { %v2231_v50 = vrot.slane %v7648_v49, %v8850_v4  ;;  %v2235_v51 = vrot.slane %v7648_v49, %v8853_v5  ;;  %v2469_v53 = vrot.slane %v7650_v52, %v8850_v4  ;;  %v2473_v54 = vrot.slane %v7650_v52, %v8853_v5  ;;  %v7652_v58 = vld [vmem:[%s16558_s1 + $0x27] ss:$8 sm:$0x3]  ;;  %v7653_v61 = vld [vmem:[%s16558_s1 + $0x30] ss:$8 sm:$0x3] }
  0x16   :  { %v2601_v56 = vrot.slane %v7651_v55, %v8850_v4  ;;  %v2605_v57 = vrot.slane %v7651_v55, %v8853_v5  ;;  %v2733_v59 = vrot.slane %v7652_v58, %v8850_v4  ;;  %v2737_v60 = vrot.slane %v7652_v58, %v8853_v5  ;;  %v9003_v7 = vld [vmem:[%s16557_s0] sm:$0xff]  ;;  %s8787_s10 = smov 122   ;;  %v9009_v8 = vld [vmem:[%s16557_s0 + $0x18] sm:$0xff]  ;;  %v9025_v14 = vld [vmem:[%s16557_s0 + $0x8] sm:$0xff]  ;;  %s8788_s19 = smov 116  }
  0x17   :  { %v2865_v62 = vrot.slane %v7653_v61, %v8850_v4  ;;  %v2869_v63 = vrot.slane %v7653_v61, %v8853_v5  ;;  %vm176_vm1 = vcmask 97280   ;;  %vm274_vm2 = vcmask 146432   ;;  %s8789_s23 = smov 110   ;;  %s8790_s24 = smov 104   ;;  %v9364_v1 = vld [vmem:[%s16557_s0 + $0x30] sm:$0x3] }
  0x18   :  { %572 = vrot.lane.b32.xlu0 %v567_v17, %s8783_s16  ;;  %574 = vrot.lane.b32.xlu1 %v571_v18, %s8783_s16  ;;  %v9033_v17 = vld [vmem:[%s16557_s0 + $0x20] sm:$0xff]  ;;  %vm16814_vm3 = vcmask 195584   ;;  %vm508_vm4 = vcmask 1046528   ;;  %vm16807_vm5 = vcmask 1045504   ;;  %17006 = vst [vmem:[#allocation31_spill] sm:$0xff] %v9364_v1  ;;  %vm1776_vm6 = vcmask 1044480  }
  0x19   :  { %vm130_vm7 = vcmask 998400   ;;  %vm228_vm8 = vcmask 949248   ;;  %vm326_vm9 = vcmask 900096   ;;  %vm424_vm10 = vcmask 850944   ;;  %s8794_s15 = smov 68   ;;  %s8795_s18 = smov 56  }
  0x1a   :  { %vm2410_vm11 = vcmask 1043456   ;;  %vm16975_vm12 = vcmask 1041409   ;;  %vm3822_vm13 = vcmask 1042434   ;;  %vm3824_vm14 = vcmask 1043459   ;;  %s8796_s20 = smov 44   ;;  %s8797_s21 = smov 32  }
  0x1b   :  { %vm3826_vm15 = vcmask 1044484   ;;  %s8798_s26 = smov 124   ;;  %s8799_s27 = smov 118  }
  0x1c   :  { %704 = vrot.lane.b32.xlu0 %v699_v20, %s8784_s17  ;;  %706 = vrot.lane.b32.xlu1 %v703_v21, %s8784_s17  ;;  %v9049_v21 = vld [vmem:[%s16557_s0 + $0x28] sm:$0xff]  ;;  %s8801_s28 = smov 8   ;;  %s8802_s29 = smov 30  }
  0x1d   :  { %s8803_s30 = smov 36   ;;  %s8804_s4 = smov 42  }
  0x1e   :  { %s8805_s5 = smov 48   ;;  %s8810_s14 = smov 72  }
  0x1f   :  { %s8811_s6 = smov 78  }
  0x20   :  { %836 = vrot.lane.b32.xlu0 %v831_v23, %s8785_s22  ;;  %838 = vrot.lane.b32.xlu1 %v835_v24, %s8785_s22 }
  0x24   :  { %968 = vrot.lane.b32.xlu0 %v963_v26, %s8786_s25  ;;  %970 = vrot.lane.b32.xlu1 %v967_v27, %s8786_s25 }
  0x28   :  { %1206 = vrot.lane.b32.xlu0 %v1201_v29, %s8783_s16  ;;  %1208 = vrot.lane.b32.xlu1 %v1205_v30, %s8783_s16 }
  0x2c   :  { %1338 = vrot.lane.b32.xlu0 %v1333_v32, %s8784_s17  ;;  %1340 = vrot.lane.b32.xlu1 %v1337_v33, %s8784_s17 }
  0x30   :  { %1470 = vrot.lane.b32.xlu0 %v1465_v35, %s8785_s22  ;;  %1472 = vrot.lane.b32.xlu1 %v1469_v36, %s8785_s22 }
  0x34   :  { %1602 = vrot.lane.b32.xlu0 %v1597_v38, %s8786_s25  ;;  %1604 = vrot.lane.b32.xlu1 %v1601_v39, %s8786_s25 }
  0x38   :  { %1840 = vrot.lane.b32.xlu0 %v1835_v41, %s8783_s16  ;;  %1842 = vrot.lane.b32.xlu1 %v1839_v42, %s8783_s16 }
  0x3c   :  { %1972 = vrot.lane.b32.xlu0 %v1967_v44, %s8784_s17  ;;  %1974 = vrot.lane.b32.xlu1 %v1971_v45, %s8784_s17 }
  0x40   :  { %2104 = vrot.lane.b32.xlu0 %v2099_v47, %s8785_s22  ;;  %2106 = vrot.lane.b32.xlu1 %v2103_v48, %s8785_s22 }
  0x44   :  { %2236 = vrot.lane.b32.xlu0 %v2231_v50, %s8786_s25  ;;  %2238 = vrot.lane.b32.xlu1 %v2235_v51, %s8786_s25  ;;  %v9119_v50 = vld [vmem:[%s16557_s0] sm:$0xfe] }
  0x48   :  { %2474 = vrot.lane.b32.xlu0 %v2469_v53, %s8783_s16  ;;  %2476 = vrot.lane.b32.xlu1 %v2473_v54, %s8783_s16 }
  0x4c   :  { %2606 = vrot.lane.b32.xlu0 %v2601_v56, %s8784_s17  ;;  %2608 = vrot.lane.b32.xlu1 %v2605_v57, %s8784_s17 }
  0x50   :  { %2738 = vrot.lane.b32.xlu0 %v2733_v59, %s8785_s22  ;;  %2740 = vrot.lane.b32.xlu1 %v2737_v60, %s8785_s22 }
  0x54   :  { %2870 = vrot.lane.b32.xlu0 %v2865_v62, %s8786_s25  ;;  %2872 = vrot.lane.b32.xlu1 %v2869_v63, %s8786_s25 }
  0x7a   :  { %v8994_v2 = vpop.permute.xlu0 %74  ;;  %v8998_v6 = vpop.permute.xlu1 %172 }
  0x7b   :  { %v84_v3 = vmul.f32 %v8994_v2, %v8992_v0  ;;  %v82_v11 = vmul.f32 %v8994_v2, %v9003_v7  ;;  %v182_v13 = vmul.f32 %v8998_v6, %v8992_v0  ;;  %v86_v19 = vmul.f32 %v8994_v2, %v9033_v17 }
  0x7c   :  { %v180_v23 = vmul.f32 %v8998_v6, %v9003_v7  ;;  %v184_v31 = vmul.f32 %v8998_v6, %v9033_v17 }
  0x7d   :  { %110 = vrot.lane.b32.xlu0 %v84_v3, %s8787_s10 }
  0x7e   :  { %v77_v9 = vpop.permute.xlu0 %76  ;;  %v175_v15 = vpop.permute.xlu1 %174 }
  0x7f   :  { %v9013_v10 = vsel %vm78_vm0, %v8994_v2, %v77_v9  ;;  %v9037_v18 = vsel %vm176_vm1, %v8998_v6, %v175_v15 }
  0x80   :  { %v85_v12 = vmul.f32 %v9013_v10, %v9009_v8  ;;  %v83_v16 = vmul.f32 %v9013_v10, %v9025_v14  ;;  %v183_v20 = vmul.f32 %v9037_v18, %v9009_v8  ;;  %v87_v24 = vmul.f32 %v9013_v10, %v9049_v21 }
  0x81   :  { %106 = vrot.lane.b32.xlu0 %v82_v11, %s8787_s10  ;;  %v181_v29 = vmul.f32 %v9037_v18, %v9025_v14  ;;  %v185_v36 = vmul.f32 %v9037_v18, %v9049_v21  ;;  %v9155_v11 = vld [vmem:[%s16557_s0 + $0x8] sm:$0xfe] }
  0x82   :  { %112 = vrot.lane.b32.xlu1 %v85_v12, %s8787_s10  ;;  %v9052_v22 = vpop.permute.xlu0 %270  ;;  %v273_v25 = vpop.permute.xlu1 %272 }
  0x83   :  { %v280_v26 = vmul.f32 %v9052_v22, %v8992_v0  ;;  %v9064_v27 = vsel %vm274_vm2, %v9052_v22, %v273_v25  ;;  %v278_v34 = vmul.f32 %v9052_v22, %v9003_v7  ;;  %v282_v44 = vmul.f32 %v9052_v22, %v9033_v17 }
  0x84   :  { %v281_v30 = vmul.f32 %v9064_v27, %v9009_v8  ;;  %v279_v41 = vmul.f32 %v9064_v27, %v9025_v14  ;;  %v283_v51 = vmul.f32 %v9064_v27, %v9049_v21 }
  0x85   :  { %208 = vrot.lane.b32.xlu0 %v182_v13, %s8788_s19 }
  0x86   :  { %108 = vrot.lane.b32.xlu1 %v83_v16, %s8787_s10  ;;  %v9066_v28 = vpop.permute.xlu0 %368  ;;  %v371_v33 = vpop.permute.xlu1 %370 }
  0x87   :  { %16983 = vst [vmem:[#allocation8_spill] sm:$0xff] %v9066_v28  ;;  %v378_v38 = vmul.f32 %v9066_v28, %v8992_v0  ;;  %v9092_v39 = vsel %vm16814_vm3, %v9066_v28, %v371_v33  ;;  %v376_v49 = vmul.f32 %v9066_v28, %v9003_v7  ;;  %v380_v57 = vmul.f32 %v9066_v28, %v9033_v17 }
  0x88   :  { %16986 = vst [vmem:[#allocation11_spill] sm:$0xff] %v9092_v39  ;;  %v379_v43 = vmul.f32 %v9092_v39, %v9009_v8  ;;  %v377_v61 = vmul.f32 %v9092_v39, %v9025_v14  ;;  %v381_v15 = vmul.f32 %v9092_v39, %v9049_v21 }
  0x89   :  { %114 = vrot.lane.b32.xlu0 %v86_v19, %s8787_s10 }
  0x8a   :  { %210 = vrot.lane.b32.xlu1 %v183_v20, %s8788_s19  ;;  %v9076_v32 = vpop.permute.xlu0 %572  ;;  %v575_v37 = vpop.permute.xlu1 %574 }
  0x8b   :  { %16984 = vst [vmem:[#allocation9_spill] sm:$0xff] %v9076_v32  ;;  %v581_v47 = vmul.f32 %v9076_v32, %v8992_v0  ;;  %v583_v48 = vmul.f32 %v9076_v32, %v9033_v17  ;;  %v9125_v52 = vsel %vm78_vm0, %v9076_v32, %v575_v37  ;;  %v579_v55 = vmul.f32 %v9076_v32, %v9119_v50 }
  0x8c   :  { %16989 = vst [vmem:[#allocation14_spill] sm:$0xff] %v9125_v52  ;;  %v582_v58 = vmul.f32 %v9125_v52, %v9009_v8  ;;  %v584_v59 = vmul.f32 %v9125_v52, %v9049_v21  ;;  %v580_v20 = vmul.f32 %v9125_v52, %v9155_v11 }
  0x8d   :  { %204 = vrot.lane.b32.xlu0 %v180_v23, %s8788_s19  ;;  %v612_v53 = vrot.slane %v581_v47, 1  ;;  %v617_v54 = vrot.slane %v583_v48, 1  ;;  %v611_v63 = vrot.slane %v579_v55, 1  ;;  %v9171_v23 = vld [vmem:[%s16557_s0 + $0x30] sm:$0x1] }
  0x8e   :  { %116 = vrot.lane.b32.xlu1 %v87_v24, %s8787_s10  ;;  %v9082_v35 = vpop.permute.xlu0 %704  ;;  %v707_v42 = vpop.permute.xlu1 %706  ;;  %v615_v12 = vrot.slane %v582_v58, 1  ;;  %v619_v13 = vrot.slane %v584_v59, 1 }
  0x8f   :  { %16985 = vst [vmem:[#allocation10_spill] sm:$0xff] %v9082_v35  ;;  %v618_v62 = vsel %vm508_vm4, %v612_v53, %v617_v54  ;;  %v713_v3 = vmul.f32 %v9082_v35, %v8992_v0  ;;  %v9150_v9 = vmul.f32 %v9082_v35, %v9033_v17  ;;  %v9161_v16 = vsel %vm176_vm1, %v9082_v35, %v707_v42 }
  0x90   :  { %16991 = vst [vmem:[#allocation16_spill] sm:$0xff] %v9161_v16  ;;  %v613_v25 = vsel %vm508_vm4, %v611_v63, %v612_v53  ;;  %v9183_v33 = vmul.f32 %v9161_v16, %v9049_v21  ;;  %v711_v48 = vmul.f32 %v9082_v35, %v9119_v50  ;;  %v712_v63 = vmul.f32 %v9161_v16, %v9155_v11 }
  0x91   :  { %306 = vrot.lane.b32.xlu0 %v280_v26, %s8789_s23  ;;  %v744_v26 = vrot.slane %v713_v3, 1 }
  0x92   :  { %206 = vrot.lane.b32.xlu1 %v181_v29, %s8788_s19  ;;  %v9094_v40 = vpop.permute.xlu0 %836  ;;  %v9104_v45 = vpop.permute.xlu1 %838  ;;  %v749_v29 = vrot.slane %v9150_v9, 1  ;;  %v743_v59 = vrot.slane %v711_v48, 1 }
  0x93   :  { %16987 = vst [vmem:[#allocation12_spill] sm:$0xff] %v9094_v40  ;;  %v845_v53 = vmul.f32 %v9094_v40, %v8992_v0  ;;  %v9211_v55 = vmul.f32 %v9094_v40, %v9033_v17  ;;  %v9226_v9 = vsel %vm274_vm2, %v9094_v40, %v9104_v45 }
  0x94   :  { %v750_v37 = vsel %vm508_vm4, %v744_v26, %v749_v29  ;;  %16995 = vst [vmem:[#allocation20_spill] sm:$0xff] %v9226_v9  ;;  %v9238_v45 = vmul.f32 %v9226_v9, %v9049_v21 }
  0x95   :  { %212 = vrot.lane.b32.xlu0 %v184_v31, %s8788_s19  ;;  %v714_v31 = vmul.f32 %v9161_v16, %v9009_v8 }
  0x96   :  { %308 = vrot.lane.b32.xlu1 %v281_v30, %s8789_s23  ;;  %v9107_v46 = vpop.permute.xlu0 %968  ;;  %v9131_v56 = vpop.permute.xlu1 %970  ;;  %v620_v30 = vsel %vm508_vm4, %v615_v12, %v619_v13  ;;  %v883_v48 = vrot.slane %v9238_v45, 1 }
  0x97   :  { %16988 = vst [vmem:[#allocation13_spill] sm:$0xff] %v9107_v46  ;;  %v747_v42 = vrot.slane %v714_v31, 1  ;;  %v846_v31 = vmul.f32 %v9226_v9, %v9009_v8 }
  0x99   :  { %302 = vrot.lane.b32.xlu0 %v278_v34, %s8789_s23  ;;  %v585_v34 = vmul.f32 %v9076_v32, %v9171_v23 }
  0x9a   :  { %214 = vrot.lane.b32.xlu1 %v185_v36, %s8788_s19  ;;  %v9139_v60 = vpop.permute.xlu0 %1206  ;;  %v9163_v19 = vpop.permute.xlu1 %1208  ;;  %v614_v36 = vrot.slane %v580_v20, 1  ;;  %v717_v20 = vmul.f32 %v9082_v35, %v9171_v23 }
  0x9b   :  { %16990 = vst [vmem:[#allocation15_spill] sm:$0xff] %v9139_v60  ;;  %v621_v47 = vrot.slane %v585_v34, 1 }
  0x9d   :  { %404 = vrot.lane.b32.xlu0 %v378_v38, %s8790_s24  ;;  %v9193_v38 = vld [vmem:[%s16557_s0 + $0x38] sm:$0x1]  ;;  %v622_v58 = vsel %vm508_vm4, %v617_v54, %v621_v47  ;;  %v881_v54 = vrot.slane %v9211_v55, 1  ;;  %v879_v47 = vrot.slane %v846_v31, 1  ;;  %v977_v55 = vmul.f32 %v9107_v46, %v8992_v0 }
  0x9e   :  { %304 = vrot.lane.b32.xlu1 %v279_v41, %s8789_s23  ;;  %v9173_v24 = vpop.permute.xlu0 %1338  ;;  %v9195_v41 = vpop.permute.xlu1 %1340 }
  0x9f   :  { %16992 = vst [vmem:[#allocation17_spill] sm:$0xff] %v9173_v24 }
  0xa1   :  { %310 = vrot.lane.b32.xlu0 %v282_v44, %s8789_s23 }
  0xa2   :  { %406 = vrot.lane.b32.xlu1 %v379_v43, %s8790_s24  ;;  %v751_v43 = vrot.slane %v9183_v33, 1  ;;  %v9198_v44 = vpop.permute.xlu0 %1470 }
  0xa3   :  { %16993 = vst [vmem:[#allocation18_spill] sm:$0xff] %v9198_v44  ;;  %v1479_v35 = vmul.f32 %v9198_v44, %v8992_v0 }
  0xa5   :  { %400 = vrot.lane.b32.xlu0 %v376_v49, %s8790_s24  ;;  %v616_v49 = vsel %vm508_vm4, %v614_v36, %v615_v12  ;;  %v876_v12 = vrot.slane %v845_v53, 1  ;;  %v753_v36 = vrot.slane %v717_v20, 1  ;;  %v1008_v20 = vrot.slane %v977_v55, 1 }
  0xa6   :  { %312 = vrot.lane.b32.xlu1 %v283_v51, %s8789_s23  ;;  %v586_v51 = vmul.f32 %v9125_v52, %v9193_v38  ;;  %v9220_v3 = vpop.permute.xlu0 %1602  ;;  %v850_v55 = vmul.f32 %v9226_v9, %v9193_v38 }
  0xa7   :  { %16994 = vst [vmem:[#allocation19_spill] sm:$0xff] %v9220_v3  ;;  %v882_v33 = vsel %vm508_vm4, %v876_v12, %v881_v54 }
  0xa9   :  { %408 = vrot.lane.b32.xlu0 %v380_v57, %s8790_s24  ;;  %v752_v57 = vsel %vm508_vm4, %v747_v42, %v751_v43 }
  0xaa   :  { %402 = vrot.lane.b32.xlu1 %v377_v61, %s8790_s24  ;;  %v9215_v61 = vpop.permute.xlu1 %1472  ;;  %v9244_v34 = vpop.permute.xlu0 %1840 }
  0xab   :  { %16996 = vst [vmem:[#allocation21_spill] sm:$0xff] %v9244_v34 }
  0xad   :  { %643 = vrot.lane.b32.xlu0 %v618_v62, %s8787_s10  ;;  %v623_v62 = vrot.slane %v586_v51, 1  ;;  %v754_v51 = vsel %vm508_vm4, %v749_v29, %v753_v36  ;;  %v9270_v29 = vsel %vm16814_vm3, %v9107_v46, %v9131_v56 }
  0xae   :  { %410 = vrot.lane.b32.xlu1 %v381_v15, %s8790_s24  ;;  %v745_v15 = vsel %vm508_vm4, %v743_v59, %v744_v26  ;;  %v9242_v26 = vpop.permute.xlu1 %1604  ;;  %16998 = vst [vmem:[#allocation23_spill] sm:$0xff] %v9270_v29  ;;  %v980_v56 = vmul.f32 %v9270_v29, %v9049_v21 }
  0xb1   :  { %639 = vrot.lane.b32.xlu0 %v613_v25, %s8787_s10  ;;  %v624_v25 = vsel %vm508_vm4, %v619_v13, %v623_v62  ;;  %v843_v13 = vmul.f32 %v9094_v40, %v9119_v50  ;;  %v844_v62 = vmul.f32 %v9226_v9, %v9155_v11 }
  0xb2   :  { %645 = vrot.lane.b32.xlu1 %v620_v30, %s8787_s10  ;;  %v746_v30 = vrot.slane %v712_v63, 1  ;;  %v9265_v63 = vpop.permute.xlu0 %1972 }
  0xb3   :  { %v875_v53 = vrot.slane %v843_v13, 1  ;;  %16997 = vst [vmem:[#allocation22_spill] sm:$0xff] %v9265_v63  ;;  %v878_v45 = vrot.slane %v844_v62, 1 }
  0xb5   :  { %775 = vrot.lane.b32.xlu0 %v750_v37, %s8788_s19  ;;  %v748_v37 = vsel %vm508_vm4, %v746_v30, %v747_v42  ;;  %v884_v42 = vsel %vm508_vm4, %v879_v47, %v883_v48  ;;  %v849_v30 = vmul.f32 %v9094_v40, %v9171_v23 }
  0xb6   :  { %641 = vrot.lane.b32.xlu1 %v616_v49, %s8787_s10  ;;  %v718_v49 = vmul.f32 %v9161_v16, %v9193_v38 }
  0xb8   :  { %v755_v59 = vrot.slane %v718_v49, 1  ;;  %v975_v49 = vmul.f32 %v9107_v46, %v9119_v50 }
  0xb9   :  { %647 = vrot.lane.b32.xlu0 %v622_v58, %s8787_s10  ;;  %v9259_v58 = vpop.permute.xlu1 %1842 }
  0xba   :  { %777 = vrot.lane.b32.xlu1 %v752_v57, %s8788_s19  ;;  %v979_v57 = vmul.f32 %v9107_v46, %v9033_v17  ;;  %v756_v31 = vsel %vm508_vm4, %v751_v43, %v755_v59  ;;  %v880_v43 = vsel %vm508_vm4, %v878_v45, %v879_v47  ;;  %v981_v59 = vmul.f32 %v9107_v46, %v9171_v23 }
  0xbb   :  { %v887_v47 = vrot.slane %v850_v55, 1 }
  0xbc   :  { %v1017_v45 = vrot.slane %v981_v59, 1 }
  0xbd   :  { %771 = vrot.lane.b32.xlu0 %v745_v15, %s8788_s19  ;;  %v877_v15 = vsel %vm508_vm4, %v875_v53, %v876_v12  ;;  %v9283_v36 = vpop.permute.xlu1 %1974  ;;  %v9285_v12 = vpop.permute.xlu0 %2104  ;;  %v1015_v53 = vrot.slane %v980_v56, 1  ;;  %v1217_v56 = vmul.f32 %v9139_v60, %v9033_v17 }
  0xbe   :  { %649 = vrot.lane.b32.xlu1 %v624_v25, %s8787_s10  ;;  %v1013_v25 = vrot.slane %v979_v57, 1  ;;  %16999 = vst [vmem:[#allocation24_spill] sm:$0xff] %v9285_v12 }
  0xbf   :  { %v1251_v59 = vrot.slane %v1217_v56, 2 }
  0xc0   :  { %v1014_v13 = vsel %vm508_vm4, %v1008_v20, %v1013_v25 }
  0xc1   :  { %907 = vrot.lane.b32.xlu0 %v882_v33, %s8789_s23  ;;  %v978_v33 = vmul.f32 %v9270_v29, %v9009_v8  ;;  %v9298_v62 = vpop.permute.xlu1 %2106 }
  0xc2   :  { %773 = vrot.lane.b32.xlu1 %v748_v37, %s8788_s19  ;;  %v885_v37 = vrot.slane %v849_v30, 1  ;;  %v976_v30 = vmul.f32 %v9270_v29, %v9155_v11 }
  0xc4   :  { %v886_v57 = vsel %vm508_vm4, %v881_v54, %v885_v37  ;;  %v1010_v37 = vrot.slane %v976_v30, 1 }
  0xc5   :  { %779 = vrot.lane.b32.xlu0 %v754_v51, %s8788_s19  ;;  %v1011_v51 = vrot.slane %v978_v33, 1  ;;  %v1215_v33 = vmul.f32 %v9139_v60, %v8992_v0  ;;  %v9327_v55 = vpop.permute.xlu1 %2238 }
  0xc6   :  { %909 = vrot.lane.b32.xlu1 %v884_v42, %s8789_s23  ;;  %v1007_v42 = vrot.slane %v975_v49, 1  ;;  %v982_v49 = vmul.f32 %v9270_v29, %v9193_v38  ;;  %v9369_v29 = vsel %vm176_vm1, %v9173_v24, %v9195_v41 }
  0xc7   :  { %17007 = vst [vmem:[#allocation32_spill] sm:$0xff] %v9369_v29  ;;  %v1348_v9 = vmul.f32 %v9369_v29, %v9009_v8  ;;  %v9382_v41 = vmul.f32 %v9369_v29, %v9049_v21 }
  0xc8   :  { %v1009_v54 = vsel %vm508_vm4, %v1007_v42, %v1008_v20  ;;  %v9324_v20 = vsel %vm78_vm0, %v9139_v60, %v9163_v19  ;;  %v1246_v42 = vrot.slane %v1215_v33, 2  ;;  %v1019_v19 = vrot.slane %v982_v49, 1 }
  0xc9   :  { %903 = vrot.lane.b32.xlu0 %v877_v15, %s8789_s23  ;;  %v1016_v15 = vsel %vm508_vm4, %v1011_v51, %v1015_v53  ;;  %17001 = vst [vmem:[#allocation26_spill] sm:$0xff] %v9324_v20  ;;  %v1216_v30 = vmul.f32 %v9324_v20, %v9009_v8  ;;  %v9347_v56 = vpop.permute.xlu1 %2476 }
  0xca   :  { %781 = vrot.lane.b32.xlu1 %v756_v31, %s8788_s19  ;;  %v9304_v31 = vpop.permute.xlu0 %2236  ;;  %17004 = vst [vmem:[#allocation29_spill] sm:$0xff] %v9347_v56 }
  0xcb   :  { %v1249_v49 = vrot.slane %v1216_v30, 2 }
  0xcd   :  { %1039 = vrot.lane.b32.xlu0 %v1014_v13, %s8790_s24  ;;  %v888_v13 = vsel %vm508_vm4, %v883_v48, %v887_v47  ;;  %v1012_v47 = vsel %vm508_vm4, %v1010_v37, %v1011_v51  ;;  %v1347_v51 = vmul.f32 %v9173_v24, %v8992_v0  ;;  %v1020_v37 = vsel %vm508_vm4, %v1015_v53, %v1019_v19 }
  0xce   :  { %905 = vrot.lane.b32.xlu1 %v880_v43, %s8789_s23  ;;  %v9319_v43 = vld [vmem:[%s16557_s0] sm:$0xfc]  ;;  %v9329_v48 = vpop.permute.xlu0 %2474 }
  0xcf   :  { %17000 = vst [vmem:[#allocation25_spill] sm:$0xff] %v9319_v43  ;;  %17002 = vst [vmem:[#allocation27_spill] sm:$0xff] %v9329_v48  ;;  %v1378_v19 = vrot.slane %v1347_v51, 2 }
  0xd1   :  { %911 = vrot.lane.b32.xlu0 %v886_v57, %s8789_s23  ;;  %v1018_v57 = vsel %vm508_vm4, %v1013_v25, %v1017_v45  ;;  %v9344_v25 = vld [vmem:[%s16557_s0 + $0x8] sm:$0xfc]  ;;  %v1252_v45 = vsel %vm16807_vm5, %v1246_v42, %v1251_v59 }
  0xd2   :  { %1041 = vrot.lane.b32.xlu1 %v1016_v15, %s8790_s24  ;;  %v1213_v15 = vmul.f32 %v9139_v60, %v9319_v43  ;;  %17003 = vst [vmem:[#allocation28_spill] sm:$0xff] %v9344_v25 }
  0xd4   :  { %v1245_v33 = vrot.slane %v1213_v15, 2  ;;  %v1214_v15 = vmul.f32 %v9324_v20, %v9344_v25 }
  0xd5   :  { %1035 = vrot.lane.b32.xlu0 %v1009_v54, %s8790_s24  ;;  %v1218_v54 = vmul.f32 %v9324_v20, %v9049_v21 }
  0xd6   :  { %913 = vrot.lane.b32.xlu1 %v888_v13, %s8789_s23  ;;  %v9353_v13 = vmul.f32 %v9173_v24, %v9033_v17  ;;  %v1247_v53 = vsel %vm16807_vm5, %v1245_v33, %v1246_v42  ;;  %v1248_v46 = vrot.slane %v1214_v15, 2  ;;  %v9385_v42 = vpop.permute.xlu1 %2608  ;;  %v9390_v33 = vld [vmem:[%s16557_s0 + $0x38] sm:$0x3]  ;;  %v1345_v15 = vmul.f32 %v9173_v24, %v9319_v43 }
  0xd7   :  { %17008 = vst [vmem:[#allocation33_spill] sm:$0xff] %v9385_v42  ;;  %17009 = vst [vmem:[#allocation34_spill] sm:$0xff] %v9390_v33  ;;  %v1220_v40 = vmul.f32 %v9324_v20, %v9390_v33 }
  0xd8   :  { %v1383_v30 = vrot.slane %v9353_v13, 2 }
  0xd9   :  { %1043 = vrot.lane.b32.xlu0 %v1018_v57, %s8790_s24  ;;  %v1253_v57 = vrot.slane %v1218_v54, 2  ;;  %v1219_v54 = vmul.f32 %v9139_v60, %v9364_v1  ;;  %v1385_v60 = vrot.slane %v9382_v41, 2  ;;  %v9421_v41 = vsel %vm274_vm2, %v9198_v44, %v9215_v61 }
  0xda   :  { %1037 = vrot.lane.b32.xlu1 %v1012_v47, %s8790_s24  ;;  %v9357_v47 = vpop.permute.xlu0 %2606  ;;  %v1384_v13 = vsel %vm16807_vm5, %v1378_v19, %v1383_v30  ;;  %v9404_v16 = vpop.permute.xlu1 %2740  ;;  %17013 = vst [vmem:[#allocation38_spill] sm:$0xff] %v9421_v41  ;;  %v9434_v61 = vmul.f32 %v9421_v41, %v9049_v21 }
  0xdb   :  { %17005 = vst [vmem:[#allocation30_spill] sm:$0xff] %v9357_v47  ;;  %17011 = vst [vmem:[#allocation36_spill] sm:$0xff] %v9404_v16  ;;  %v1615_v16 = vmul.f32 %v9220_v3, %v9364_v1 }
  0xdd   :  { %1277 = vrot.lane.b32.xlu0 %v1252_v45, %s8787_s10  ;;  %v1254_v45 = vsel %vm16807_vm5, %v1249_v49, %v1253_v57 }
  0xde   :  { %1045 = vrot.lane.b32.xlu1 %v1020_v37, %s8790_s24  ;;  %v9392_v51 = vpop.permute.xlu0 %2738  ;;  %v1255_v37 = vrot.slane %v1219_v54, 2  ;;  %v1377_v54 = vrot.slane %v1345_v15, 2  ;;  %v1510_v15 = vrot.slane %v1479_v35, 2  ;;  %v9437_v35 = vpop.permute.xlu1 %2872 }
  0xdf   :  { %17010 = vst [vmem:[#allocation35_spill] sm:$0xff] %v9392_v51  ;;  %17014 = vst [vmem:[#allocation39_spill] sm:$0xff] %v9437_v35 }
  0xe0   :  { %v1256_v51 = vsel %vm16807_vm5, %v1251_v59, %v1255_v37  ;;  %v1346_v59 = vmul.f32 %v9369_v29, %v9344_v25  ;;  %v1379_v37 = vsel %vm16807_vm5, %v1377_v54, %v1378_v19 }
  0xe1   :  { %1273 = vrot.lane.b32.xlu0 %v1247_v53, %s8787_s10  ;;  %v1250_v53 = vsel %vm16807_vm5, %v1248_v46, %v1249_v49  ;;  %v1257_v49 = vrot.slane %v1220_v40, 2 }
  0xe2   :  { %1279 = vrot.lane.b32.xlu1 %v1254_v45, %s8787_s10  ;;  %v1381_v45 = vrot.slane %v1348_v9, 2  ;;  %v9414_v9 = vpop.permute.xlu0 %2870  ;;  %v1380_v20 = vrot.slane %v1346_v59, 2  ;;  %v1517_v59 = vrot.slane %v9434_v61, 2  ;;  %v1478_v61 = vmul.f32 %v9421_v41, %v9344_v25 }
  0xe3   :  { %17012 = vst [vmem:[#allocation37_spill] sm:$0xff] %v9414_v9  ;;  %v1258_v40 = vsel %vm16807_vm5, %v1253_v57, %v1257_v49  ;;  %v1480_v9 = vmul.f32 %v9421_v41, %v9009_v8  ;;  %v1477_v57 = vmul.f32 %v9198_v44, %v9319_v43 }
  0xe4   :  { %v1386_v46 = vsel %vm16807_vm5, %v1381_v45, %v1385_v60  ;;  %v1512_v35 = vrot.slane %v1478_v61, 2 }
  0xe5   :  { %1409 = vrot.lane.b32.xlu0 %v1384_v13, %s8788_s19  ;;  %v9410_v13 = vmul.f32 %v9198_v44, %v9033_v17  ;;  %v1513_v49 = vrot.slane %v1480_v9, 2 }
  0xe6   :  { %1275 = vrot.lane.b32.xlu1 %v1250_v53, %s8787_s10  ;;  %v1351_v53 = vmul.f32 %v9173_v24, %v9364_v1  ;;  %v1509_v24 = vrot.slane %v1477_v57, 2 }
  0xe8   :  { %v1511_v57 = vsel %vm16807_vm5, %v1509_v24, %v1510_v15 }
  0xe9   :  { %1281 = vrot.lane.b32.xlu0 %v1256_v51, %s8787_s10  ;;  %v1515_v51 = vrot.slane %v9410_v13, 2  ;;  %v1387_v13 = vrot.slane %v1351_v53, 2 }
  0xea   :  { %1411 = vrot.lane.b32.xlu1 %v1386_v46, %s8788_s19  ;;  %v1382_v46 = vsel %vm16807_vm5, %v1380_v20, %v1381_v45  ;;  %v1613_v20 = vmul.f32 %v9220_v3, %v9033_v17  ;;  %v1518_v45 = vsel %vm16807_vm5, %v1513_v49, %v1517_v59 }
  0xeb   :  { %v1516_v54 = vsel %vm16807_vm5, %v1510_v15, %v1515_v51  ;;  %v1388_v53 = vsel %vm16807_vm5, %v1383_v30, %v1387_v13 }
  0xed   :  { %1405 = vrot.lane.b32.xlu0 %v1379_v37, %s8788_s19  ;;  %v1352_v37 = vmul.f32 %v9369_v29, %v9390_v33 }
  0xee   :  { %1283 = vrot.lane.b32.xlu1 %v1258_v40, %s8787_s10 }
  0xef   :  { %v9439_v19 = vpop.permute.xlu0 %110  ;;  %v1389_v9 = vrot.slane %v1352_v37, 2  ;;  %v1483_v37 = vmul.f32 %v9198_v44, %v9364_v1 }
  0xf0   :  { %17015 = vst [vmem:[#allocation40_spill] sm:$0xff] %v9439_v19 }
  0xf1   :  { %1541 = vrot.lane.b32.xlu0 %v1516_v54, %s8789_s23  ;;  %v1611_v54 = vmul.f32 %v9220_v3, %v8992_v0  ;;  %v1390_v29 = vsel %vm16807_vm5, %v1385_v60, %v1389_v9  ;;  %v1514_v60 = vsel %vm16807_vm5, %v1512_v35, %v1513_v49 }
  0xf2   :  { %1407 = vrot.lane.b32.xlu1 %v1382_v46, %s8788_s19  ;;  %v9466_v46 = vsel %vm16814_vm3, %v9220_v3, %v9242_v26 }
  0xf3   :  { %v9450_v40 = vpop.permute.xlu0 %106  ;;  %17017 = vst [vmem:[#allocation42_spill] sm:$0xff] %v9466_v46  ;;  %v1612_v26 = vmul.f32 %v9466_v46, %v9009_v8 }
  0xf4   :  { %v9452_v19 = vpop.permute.xlu1 %112 }
  0xf5   :  { %17016 = vst [vmem:[#allocation41_spill] sm:$0xff] %v9452_v19  ;;  %1413 = vrot.lane.b32.xlu0 %v1388_v53, %s8788_s19  ;;  %v1642_v53 = vrot.slane %v1611_v54, 2  ;;  %v1647_v19 = vrot.slane %v1613_v20, 2  ;;  %v1519_v54 = vrot.slane %v1483_v37, 2  ;;  %v1609_v20 = vmul.f32 %v9220_v3, %v9319_v43 }
  0xf6   :  { %1543 = vrot.lane.b32.xlu1 %v1518_v45, %s8789_s23  ;;  %v1614_v45 = vmul.f32 %v9466_v46, %v9049_v21  ;;  %v1645_v9 = vrot.slane %v1612_v26, 2  ;;  %v1610_v26 = vmul.f32 %v9466_v46, %v9344_v25  ;;  %v9580_v3 = vsel %vm176_vm1, %v9265_v63, %v9283_v36 }
  0xf7   :  { %v9469_v30 = vpop.permute.xlu0 %208  ;;  %v1648_v15 = vsel %vm16807_vm5, %v1642_v53, %v1647_v19  ;;  %v1520_v37 = vsel %vm16807_vm5, %v1515_v51, %v1519_v54  ;;  %v1641_v44 = vrot.slane %v1609_v20, 2  ;;  %v1651_v54 = vrot.slane %v1615_v16, 2  ;;  %17024 = vst [vmem:[#allocation49_spill] sm:$0xff] %v9580_v3 }
  0xf8   :  { %17018 = vst [vmem:[#allocation43_spill] sm:$0xff] %v9469_v30  ;;  %v9471_v13 = vpop.permute.xlu1 %108  ;;  %v1649_v61 = vrot.slane %v1614_v45, 2  ;;  %v1849_v20 = vmul.f32 %v9244_v34, %v8992_v0  ;;  %v9626_v39 = vmul.f32 %v9580_v3, %v9009_v8 }
  0xf9   :  { %1537 = vrot.lane.b32.xlu0 %v1511_v57, %s8789_s23  ;;  %v1484_v57 = vmul.f32 %v9421_v41, %v9390_v33  ;;  %v1643_v51 = vsel %vm16807_vm5, %v1641_v44, %v1642_v53  ;;  %v9525_v44 = vsel %vm78_vm0, %v9244_v34, %v9259_v58 }
  0xfa   :  { %1415 = vrot.lane.b32.xlu1 %v1390_v29, %s8788_s19  ;;  %v1650_v35 = vsel %vm16807_vm5, %v1645_v9, %v1649_v61  ;;  %17021 = vst [vmem:[#allocation46_spill] sm:$0xff] %v9525_v44  ;;  %v9538_v58 = vmul.f32 %v9525_v44, %v9009_v8 }
  0xfb   :  { %v9483_v30 = vpop.permute.xlu0 %114  ;;  %v1521_v49 = vrot.slane %v1484_v57, 2 }
  0xfc   :  { %v9485_v24 = vpop.permute.xlu1 %210 }
  0xfd   :  { %17019 = vst [vmem:[#allocation44_spill] sm:$0xff] %v9485_v24  ;;  %1673 = vrot.lane.b32.xlu0 %v1648_v15, %s8790_s24  ;;  %v1522_v57 = vsel %vm16807_vm5, %v1517_v59, %v1521_v49 }
  0xfe   :  { %1539 = vrot.lane.b32.xlu1 %v1514_v60, %s8789_s23  ;;  %v9516_v60 = vmul.f32 %v9244_v34, %v9033_v17 }
  0xff   :  { %v9495_v29 = vpop.permute.xlu0 %204 }
 0x100   :  { %v9497_v24 = vpop.permute.xlu1 %116  ;;  %v16588_v59 = vrot.slane %v9516_v60, 3 }
 0x101   :  { %1545 = vrot.lane.b32.xlu0 %v1520_v37, %s8789_s23  ;;  %v1644_v37 = vrot.slane %v1610_v26, 2 }
 0x102   :  { %1675 = vrot.lane.b32.xlu1 %v1650_v35, %s8790_s24  ;;  %v1616_v35 = vmul.f32 %v9466_v46, %v9390_v33  ;;  %v1883_v46 = vrot.slane %v9538_v58, 3 }
 0x103   :  { %v9507_v45 = vpop.permute.xlu0 %306  ;;  %v1646_v49 = vsel %vm16807_vm5, %v1644_v37, %v1645_v9 }
 0x104   :  { %17020 = vst [vmem:[#allocation45_spill] sm:$0xff] %v9507_v45  ;;  %v9509_v15 = vpop.permute.xlu1 %206  ;;  %v1652_v45 = vsel %vm16807_vm5, %v1647_v19, %v1651_v54  ;;  %v1653_v26 = vrot.slane %v1616_v35, 2  ;;  %v9547_v19 = vld [vmem:[%s16557_s0] sm:$0xf8]  ;;  %v9567_v35 = vld [vmem:[%s16557_s0 + $0x8] sm:$0xf8] }
 0x105   :  { %1669 = vrot.lane.b32.xlu0 %v1643_v51, %s8790_s24  ;;  %v1880_v51 = vrot.slane %v1849_v20, 3  ;;  %v9560_v20 = vld [vmem:[%s16557_s0 + $0x50] sm:$0xff]  ;;  %v1847_v37 = vmul.f32 %v9244_v34, %v9547_v19  ;;  %v1848_v47 = vmul.f32 %v9525_v44, %v9567_v35 }
 0x106   :  { %1547 = vrot.lane.b32.xlu1 %v1522_v57, %s8789_s23  ;;  %v9542_v57 = vmul.f32 %v9525_v44, %v9049_v21  ;;  %v90_v42 = vmul.f32 %v8994_v2, %v9560_v20 }
 0x107   :  { %v9528_v16 = vpop.permute.xlu0 %212  ;;  %v1886_v9 = vsel %vm1776_vm6, %v1880_v51, %v16588_v59  ;;  %v1654_v59 = vsel %vm16807_vm5, %v1649_v61, %v1653_v26  ;;  %v9593_v61 = vld [vmem:[%s16557_s0 + $0x30] sm:$0x7]  ;;  %v1879_v58 = vrot.slane %v1847_v37, 3  ;;  %v1882_v25 = vrot.slane %v1848_v47, 3 }
 0x108   :  { %17022 = vst [vmem:[#allocation47_spill] sm:$0xff] %v9528_v16  ;;  %v9530_v53 = vpop.permute.xlu1 %308  ;;  %17026 = vst [vmem:[#allocation51_spill] sm:$0xff] %v9593_v61  ;;  %v17029_v37 = vrot.slane %v9542_v57, 3  ;;  %v1853_v48 = vmul.f32 %v9244_v34, %v9593_v61 }
 0x109   :  { %17023 = vst [vmem:[#allocation48_spill] sm:$0xff] %v9530_v53  ;;  %1677 = vrot.lane.b32.xlu0 %v1652_v45, %s8790_s24  ;;  %v9604_v53 = vld [vmem:[%s16557_s0 + $0x58] sm:$0xff]  ;;  %v1881_v33 = vsel %vm1776_vm6, %v1879_v58, %v1880_v51  ;;  %v9658_v51 = vmul.f32 %v9580_v3, %v9049_v21 }
 0x10a   :  { %1671 = vrot.lane.b32.xlu1 %v1646_v49, %s8790_s24  ;;  %v27_v49 = vld [vmem:[%s16558_s1] ss:$8 sm:$0x3]  ;;  %v1888_v32 = vsel %vm1776_vm6, %v1883_v46, %v17029_v37  ;;  %v1889_v58 = vrot.slane %v1853_v48, 3 }
 0x10b   :  { %v9550_v54 = vpop.permute.xlu0 %302  ;;  %v9599_v36 = vrot.slane %v27_v49, %v8853_v5  ;;  %v9613_v52 = vrot.slane %v27_v49, %v8850_v4 }
 0x10c   :  { %v9552_v45 = vpop.permute.xlu1 %214 }
 0x10d   :  { %1911 = vrot.lane.b32.xlu0 %v1886_v9, %s8787_s10  ;;  %v9588_v9 = vmul.f32 %v9265_v63, %v8992_v0  ;;  %17027 = vst [vmem:[#allocation52_spill] sm:$0xff] %v9599_v36  ;;  %17028 = vst [vmem:[#allocation53_spill] sm:$0xff] %v9613_v52  ;;  %v40_v56 = vmul.f32 %v9599_v36, %v9025_v14  ;;  %v91_v14 = vmul.f32 %v9013_v10, %v9604_v53 }
 0x10e   :  { %1679 = vrot.lane.b32.xlu1 %v1654_v59, %s8790_s24  ;;  %v7634_v59 = vld [vmem:[%s16558_s1 + $0x5] ss:$8 sm:$0x3] }
 0x10f   :  { %v9582_v41 = vpop.permute.xlu0 %404  ;;  %v9629_v49 = vrot.slane %v7634_v59, %v8853_v5  ;;  %v9639_v37 = vrot.slane %v7634_v59, %v8850_v4  ;;  %v131_v59 = vsel %vm130_vm7, %v9450_v40, %v9471_v13  ;;  %v150_v40 = vadd.f32 %v9471_v13, %v40_v56 }
 0x110   :  { %17025 = vst [vmem:[#allocation50_spill] sm:$0xff] %v9582_v41  ;;  %v305_v26 = vpop.permute.xlu1 %304  ;;  %v9608_v41 = vmul.f32 %v9265_v63, %v9033_v17  ;;  %v1884_v13 = vsel %vm1776_vm6, %v1882_v25, %v1883_v46  ;;  %v17039_v46 = vrot.slane %v9516_v60, 3  ;;  %v17040_v60 = vrot.slane %v9626_v39, 3 }
 0x111   :  { %122 = vrot.lane.b32.xlu0 %v90_v42, %s8787_s10  ;;  %17030 = vst [vmem:[#allocation54_spill] sm:$0xff] %v9629_v49  ;;  %v39_v42 = vmul.f32 %v9613_v52, %v9003_v7  ;;  %17032 = vst [vmem:[#allocation56_spill] sm:$0xff] %v9639_v37  ;;  %v9648_v7 = vld [vmem:[%s16557_s0 + $0x38] sm:$0x7]  ;;  %v477_v43 = vmul.f32 %v9629_v49, %v9155_v11  ;;  %v476_v47 = vmul.f32 %v9639_v37, %v9119_v50 }
 0x112   :  { %1913 = vrot.lane.b32.xlu1 %v1888_v32, %s8787_s10  ;;  %v9666_v32 = vmul.f32 %v9629_v49, %v9009_v8  ;;  %v1854_v50 = vmul.f32 %v9525_v44, %v9648_v7  ;;  %v248_v5 = vadd.f32 %v9509_v15, %v150_v40  ;;  %v327_v44 = vsel %vm326_vm9, %v9550_v54, %v305_v26  ;;  %v9702_v54 = vld [vmem:[%s16557_s0 + $0x40] sm:$0xff] }
 0x113   :  { %v9633_v28 = vpop.permute.xlu0 %310  ;;  %v149_v48 = vadd.f32 %v131_v59, %v39_v42  ;;  %v16626_v42 = vrot.slane %v9658_v51, 3  ;;  %v509_v59 = vrot.slane %v476_v47, 1 }
 0x114   :  { %17031 = vst [vmem:[#allocation55_spill] sm:$0xff] %v9633_v28  ;;  %v9641_v34 = vpop.permute.xlu1 %406  ;;  %17034 = vst [vmem:[#allocation58_spill] sm:$0xff] %v9666_v32  ;;  %v17038_v28 = vrot.slane %v9588_v9, 3  ;;  %v16620_v4 = vrot.slane %v9666_v32, 1  ;;  %v346_v16 = vadd.f32 %v305_v26, %v248_v5  ;;  %v1891_v47 = vrot.slane %v1854_v50, 3 }
 0x115   :  { %17033 = vst [vmem:[#allocation57_spill] sm:$0xff] %v9641_v34  ;;  %1907 = vrot.lane.b32.xlu0 %v1881_v33, %s8787_s10  ;;  %v229_v33 = vsel %vm228_vm8, %v9495_v29, %v9509_v15  ;;  %v17037_v34 = vrot.slane %v9608_v41, 3  ;;  %v512_v29 = vrot.slane %v477_v43, 1  ;;  %v1890_v15 = vsel %vm1776_vm6, %v17039_v46, %v1889_v58 }
 0x116   :  { %124 = vrot.lane.b32.xlu1 %v91_v14, %s8787_s10  ;;  %v9676_v14 = vmul.f32 %v9639_v37, %v8992_v0 }
 0x117   :  { %v401_v1 = vpop.permute.xlu0 %400  ;;  %v2018_v56 = vsel %vm1776_vm6, %v17038_v28, %v17037_v34  ;;  %v514_v5 = vsel %vm508_vm4, %v512_v29, %v16620_v4 }
 0x118   :  { %17035 = vst [vmem:[#allocation59_spill] sm:$0xff] %v9676_v14  ;;  %v9678_v11 = vpop.permute.xlu1 %312  ;;  %v16621_v34 = vrot.slane %v9676_v14, 1 }
 0x119   :  { %17036 = vst [vmem:[#allocation60_spill] sm:$0xff] %v9678_v11  ;;  %2043 = vrot.lane.b32.xlu0 %v2018_v56, %s8788_s19  ;;  %v247_v11 = vadd.f32 %v229_v33, %v149_v48  ;;  %v1979_v56 = vmul.f32 %v9265_v63, %v9547_v19 }
 0x11a   :  { %1909 = vrot.lane.b32.xlu1 %v1884_v13, %s8787_s10  ;;  %v511_v58 = vsel %vm508_vm4, %v509_v59, %v16621_v34  ;;  %v17042_v13 = vrot.slane %v9542_v57, 3  ;;  %v9737_v59 = vld [vmem:[%s16557_s0 + $0x48] sm:$0xff] }
 0x11b   :  { %v9693_v28 = vpop.permute.xlu0 %408  ;;  %v345_v43 = vadd.f32 %v327_v44, %v247_v11  ;;  %v2020_v44 = vsel %vm1776_vm6, %v17040_v60, %v16626_v42  ;;  %v2011_v57 = vrot.slane %v1979_v56, 3 }
 0x11c   :  { %v403_v25 = vpop.permute.xlu1 %402  ;;  %v1892_v29 = vsel %vm1776_vm6, %v17042_v13, %v1891_v47  ;;  %v9750_v47 = vmul.f32 %v9285_v12, %v8992_v0 }
 0x11d   :  { %v425_v26 = vsel %vm424_vm10, %v401_v1, %v403_v25  ;;  %v444_v40 = vadd.f32 %v403_v25, %v346_v16  ;;  %1915 = vrot.lane.b32.xlu0 %v1890_v15, %s8787_s10  ;;  %v88_v1 = vmul.f32 %v8994_v2, %v9702_v54  ;;  %v188_v25 = vmul.f32 %v8998_v6, %v9560_v20 }
 0x11e   :  { %v443_v11 = vadd.f32 %v425_v26, %v345_v43  ;;  %2045 = vrot.lane.b32.xlu1 %v2020_v44, %s8788_s19  ;;  %v89_v15 = vmul.f32 %v9013_v10, %v9737_v59  ;;  %v1980_v26 = vmul.f32 %v9580_v3, %v9567_v35  ;;  %v17046_v44 = vrot.slane %v9588_v9, 3 }
 0x11f   :  { %v9718_v33 = vpop.permute.xlu0 %643  ;;  %v9722_v16 = vadd.f32 %v514_v5, %v444_v40  ;;  %v9754_v5 = vmul.f32 %v9285_v12, %v9033_v17  ;;  %v9762_v40 = vsel %vm274_vm2, %v9285_v12, %v9298_v62 }
 0x120   :  { %17041 = vst [vmem:[#allocation61_spill] sm:$0xff] %v9718_v33  ;;  %v9724_v50 = vpop.permute.xlu1 %410  ;;  %v9726_v48 = vadd.f32 %v511_v58, %v443_v11  ;;  %17044 = vst [vmem:[#allocation63_spill] sm:$0xff] %v9762_v40  ;;  %v2013_v58 = vsel %vm1776_vm6, %v2011_v57, %v17046_v44  ;;  %v189_v11 = vmul.f32 %v9037_v18, %v9604_v53  ;;  %v2014_v62 = vrot.slane %v1980_v26, 3  ;;  %v9933_v33 = vld [vmem:[%s16557_s0 + $0x28] sm:$0xff] }
 0x121   :  { %118 = vrot.lane.b32.xlu0 %v88_v1, %s8787_s10  ;;  %v16623_v1 = vrot.slane %v9750_v47, 3  ;;  %v16622_v56 = vrot.slane %v9754_v5, 3  ;;  %v9779_v13 = vmul.f32 %v9762_v40, %v9009_v8  ;;  %v9798_v8 = vld [vmem:[%s16557_s0 + $0x60] sm:$0xff]  ;;  %v1985_v57 = vmul.f32 %v9265_v63, %v9593_v61 }
 0x122   :  { %1917 = vrot.lane.b32.xlu1 %v1892_v29, %s8787_s10  ;;  %v9783_v29 = vmul.f32 %v9762_v40, %v9049_v21  ;;  %17048 = vst [vmem:[#allocation66_spill] sm:$0xff] %v9798_v8  ;;  %v17049_v26 = vrot.slane %v9626_v39, 3  ;;  %v92_v34 = vmul.f32 %v8994_v2, %v9798_v8  ;;  %v2112_v63 = vmul.f32 %v9762_v40, %v9567_v35 }
 0x123   :  { %v9740_v43 = vpop.permute.xlu0 %639  ;;  %v9961_v14 = vmul.f32 %v9762_v40, %v9648_v7 }
 0x124   :  { %v9744_v46 = vpop.permute.xlu1 %645  ;;  %v2016_v44 = vsel %vm1776_vm6, %v2014_v62, %v17049_v26  ;;  %v9824_v62 = vld [vmem:[%s16557_s0 + $0x68] sm:$0xff] }
 0x125   :  { %17043 = vst [vmem:[#allocation62_spill] sm:$0xff] %v9744_v46  ;;  %220 = vrot.lane.b32.xlu0 %v188_v25, %s8788_s19  ;;  %17050 = vst [vmem:[#allocation67_spill] sm:$0xff] %v9824_v62  ;;  %v17057_v46 = vrot.slane %v9750_v47, 3 }
 0x126   :  { %120 = vrot.lane.b32.xlu1 %v89_v15, %s8787_s10  ;;  %v2150_v15 = vsel %vm1776_vm6, %v16623_v1, %v16622_v56  ;;  %v2021_v1 = vrot.slane %v1985_v57, 3 }
 0x127   :  { %v9765_v60 = vpop.permute.xlu0 %775 }
 0x128   :  { %17045 = vst [vmem:[#allocation64_spill] sm:$0xff] %v9765_v60  ;;  %v9767_v0 = vpop.permute.xlu1 %641  ;;  %v7639_v60 = vld [vmem:[%s16558_s1 + $0x12] ss:$8 sm:$0x3] }
 0x129   :  { %2039 = vrot.lane.b32.xlu0 %v2013_v58, %s8788_s19  ;;  %v16625_v58 = vrot.slane %v9779_v13, 3 }
 0x12a   :  { %222 = vrot.lane.b32.xlu1 %v189_v11, %s8788_s19  ;;  %v16624_v11 = vrot.slane %v9783_v29, 3 }
 0x12b   :  { %v9786_v9 = vpop.permute.xlu0 %647 }
 0x12c   :  { %v9788_v25 = vpop.permute.xlu1 %777  ;;  %v2152_v39 = vsel %vm1776_vm6, %v16625_v58, %v16624_v11  ;;  %v482_v58 = vmul.f32 %v9639_v37, %v9171_v23  ;;  %v9860_v23 = vmul.f32 %v8998_v6, %v9798_v8 }
 0x12d   :  { %17047 = vst [vmem:[#allocation65_spill] sm:$0xff] %v9788_v25  ;;  %2175 = vrot.lane.b32.xlu0 %v2150_v15, %s8789_s23  ;;  %v1986_v15 = vmul.f32 %v9580_v3, %v9648_v7 }
 0x12e   :  { %2041 = vrot.lane.b32.xlu1 %v2016_v44, %s8788_s19  ;;  %v93_v44 = vmul.f32 %v9013_v10, %v9824_v62  ;;  %v9854_v10 = vmul.f32 %v9629_v49, %v9049_v21 }
 0x12f   :  { %v9809_v4 = vpop.permute.xlu0 %771  ;;  %v2023_v11 = vrot.slane %v1986_v15, 3 }
 0x130   :  { %v9813_v56 = vpop.permute.xlu1 %649 }
 0x131   :  { %126 = vrot.lane.b32.xlu0 %v92_v34, %s8787_s10  ;;  %v17052_v34 = vrot.slane %v9608_v41, 3  ;;  %v186_v41 = vmul.f32 %v8998_v6, %v9702_v54  ;;  %v9875_v6 = vsel %vm16814_vm3, %v9304_v31, %v9327_v55  ;;  %v187_v55 = vmul.f32 %v9037_v18, %v9737_v59 }
 0x132   :  { %2177 = vrot.lane.b32.xlu1 %v2152_v39, %s8789_s23  ;;  %v2111_v39 = vmul.f32 %v9285_v12, %v9547_v19 }
 0x133   :  { %v9829_v2 = vpop.permute.xlu0 %907  ;;  %v2022_v26 = vsel %vm1776_vm6, %v17052_v34, %v2021_v1  ;;  %v9850_v1 = vmul.f32 %v9639_v37, %v9033_v17  ;;  %v43_v34 = vmul.f32 %v9613_v52, %v9033_v17  ;;  %v17055_v37 = vrot.slane %v9658_v51, 3 }
 0x134   :  { %17051 = vst [vmem:[#allocation68_spill] sm:$0xff] %v9829_v2  ;;  %v9831_v57 = vpop.permute.xlu1 %773  ;;  %v519_v2 = vrot.slane %v482_v58, 1  ;;  %v2143_v17 = vrot.slane %v2111_v39, 3  ;;  %v2117_v52 = vmul.f32 %v9285_v12, %v9593_v61  ;;  %v17062_v12 = vld [vmem:[#allocation7_spill] sm:$0xff] }
 0x135   :  { %2047 = vrot.lane.b32.xlu0 %v2022_v26, %s8788_s19  ;;  %17053 = vst [vmem:[#allocation69_spill] sm:$0xff] %v9850_v1  ;;  %v44_v26 = vmul.f32 %v9599_v36, %v9049_v21  ;;  %v2024_v3 = vsel %vm1776_vm6, %v17055_v37, %v2023_v11  ;;  %v9881_v21 = vld [vmem:[%s16557_s0 + $0x10] sm:$0xff]  ;;  %v286_v37 = vmul.f32 %v9052_v22, %v9560_v20 }
 0x136   :  { %128 = vrot.lane.b32.xlu1 %v93_v44, %s8787_s10  ;;  %v483_v44 = vmul.f32 %v9629_v49, %v9193_v38  ;;  %v9885_v38 = vmul.f32 %v9881_v21, %v9304_v31  ;;  %v9904_v11 = vmul.f32 %v9037_v18, %v9824_v62  ;;  %v133_v18 = vsel %vm130_vm7, %v9483_v30, %v9497_v24  ;;  %v17058_v62 = vld [vmem:[#allocation47_spill] sm:$0xff] }
 0x137   :  { %v9844_v42 = vpop.permute.xlu0 %779  ;;  %v9937_v30 = vmul.f32 %v9933_v33, %v9875_v6  ;;  %v2145_v32 = vsel %vm1776_vm6, %v2143_v17, %v17057_v46  ;;  %v154_v36 = vadd.f32 %v9497_v24, %v44_v26  ;;  %v231_v8 = vsel %vm228_vm8, %v17058_v62, %v9552_v45  ;;  %v17064_v62 = vld [vmem:[#allocation60_spill] sm:$0xff]  ;;  %v17065_v61 = vld [vmem:[#allocation55_spill] sm:$0xff] }
 0x138   :  { %v9856_v15 = vpop.permute.xlu1 %909  ;;  %v521_v25 = vrot.slane %v483_v44, 1  ;;  %v17056_v44 = vrot.slane %v9850_v1, 1  ;;  %v153_v47 = vadd.f32 %v133_v18, %v43_v34  ;;  %v2146_v17 = vrot.slane %v2112_v63, 3 }
 0x139   :  { %17054 = vst [vmem:[#allocation70_spill] sm:$0xff] %v9856_v15  ;;  %216 = vrot.lane.b32.xlu0 %v186_v41, %s8788_s19  ;;  %v287_v15 = vmul.f32 %v9064_v27, %v9604_v53  ;;  %v9924_v41 = vld [vmem:[%s16557_s0 + $0x18] sm:$0xff]  ;;  %v9964_v24 = vrot.slane %v7639_v60, %v17062_v12  ;;  %v252_v26 = vadd.f32 %v9552_v45, %v154_v36  ;;  %v17066_v18 = vrot.slane %v9854_v10, 1  ;;  %v17067_v12 = vld [vmem:[#allocation25_spill] sm:$0xff] }
 0x13a   :  { %2049 = vrot.lane.b32.xlu1 %v2024_v3, %s8788_s19  ;;  %v9896_v3 = vld [vmem:[%s16557_s0 + $0x20] sm:$0xff]  ;;  %v9928_v39 = vmul.f32 %v9924_v41, %v9875_v6  ;;  %v251_v63 = vadd.f32 %v231_v8, %v153_v47 }
 0x13b   :  { %v9887_v51 = vpop.permute.xlu0 %903  ;;  %v9900_v58 = vmul.f32 %v9896_v3, %v9304_v31  ;;  %17063 = vst [vmem:[#allocation72_spill] sm:$0xff] %v9964_v24  ;;  %v522_v40 = vsel %vm508_vm4, %v17066_v18, %v521_v25  ;;  %v350_v36 = vadd.f32 %v17064_v62, %v252_v26  ;;  %v17068_v47 = vld [vmem:[#allocation28_spill] sm:$0xff] }
 0x13c   :  { %v9908_v49 = vpop.permute.xlu1 %781  ;;  %v1111_v25 = vmul.f32 %v9964_v24, %v17068_v47  ;;  %v17073_v47 = vrot.slane %v9928_v39, 3 }
 0x13d   :  { %318 = vrot.lane.b32.xlu0 %v286_v37, %s8789_s23  ;;  %v520_v37 = vsel %vm508_vm4, %v17056_v44, %v519_v2  ;;  %v10001_v2 = vmul.f32 %v9924_v41, %v9964_v24  ;;  %v448_v34 = vadd.f32 %v9724_v50, %v350_v36 }
 0x13e   :  { %218 = vrot.lane.b32.xlu1 %v187_v55, %s8788_s19  ;;  %v17060_v55 = vld [vmem:[#allocation6_spill] sm:$0xff] }
 0x13f   :  { %v9953_v1 = vpop.permute.xlu0 %1039  ;;  %v9957_v44 = vrot.slane %v7639_v60, %v17060_v55  ;;  %v2153_v60 = vrot.slane %v2117_v52, 3  ;;  %v17069_v52 = vrot.slane %v9900_v58, 3 }
 0x140   :  { %17059 = vst [vmem:[#allocation47_spill] sm:$0xff] %v9953_v1  ;;  %v906_v46 = vpop.permute.xlu1 %905  ;;  %v329_v1 = vsel %vm326_vm9, %v17065_v61, %v17064_v62  ;;  %v427_v61 = vsel %vm424_vm10, %v9693_v28, %v9724_v50  ;;  %v17071_v62 = vrot.slane %v9779_v13, 3 }
 0x141   :  { %17061 = vst [vmem:[#allocation71_spill] sm:$0xff] %v9957_v44  ;;  %2171 = vrot.lane.b32.xlu0 %v2145_v32, %s8789_s23  ;;  %v1110_v45 = vmul.f32 %v9957_v44, %v17067_v12  ;;  %v9985_v8 = vmul.f32 %v9881_v21, %v9957_v44  ;;  %v349_v18 = vadd.f32 %v329_v1, %v251_v63  ;;  %v17070_v12 = vrot.slane %v9885_v38, 3 }
 0x142   :  { %320 = vrot.lane.b32.xlu1 %v287_v15, %s8789_s23  ;;  %v2148_v28 = vsel %vm1776_vm6, %v2146_v17, %v17071_v62  ;;  %v663_v1 = vsel %vm130_vm7, %v9740_v43, %v9767_v0  ;;  %v17072_v63 = vrot.slane %v9937_v30, 3  ;;  %v2155_v17 = vrot.slane %v9961_v14, 3 }
 0x143   :  { %v912_v32 = vpop.permute.xlu0 %911  ;;  %v2282_v26 = vsel %vm1776_vm6, %v17070_v12, %v17069_v52  ;;  %v447_v52 = vadd.f32 %v427_v61, %v349_v18  ;;  %v17074_v12 = vrot.slane %v9754_v5, 3  ;;  %v10020_v43 = vmul.f32 %v9896_v3, %v9957_v44 }
 0x144   :  { %v9989_v15 = vpop.permute.xlu1 %1041  ;;  %v2284_v13 = vsel %vm1776_vm6, %v17073_v47, %v17072_v63  ;;  %v1143_v36 = vrot.slane %v1110_v45, 2  ;;  %v795_v62 = vsel %vm228_vm8, %v9809_v4, %v9831_v57  ;;  %v16656_v61 = vrot.slane %v9985_v8, 2  ;;  %v17075_v63 = vld [vmem:[#allocation31_spill] sm:$0xff]  ;;  %v17076_v45 = vld [vmem:[#allocation34_spill] sm:$0xff] }
 0x145   :  { %2307 = vrot.lane.b32.xlu0 %v2282_v26, %s8790_s24  ;;  %v2154_v50 = vsel %vm1776_vm6, %v17074_v12, %v2153_v60  ;;  %v682_v26 = vadd.f32 %v9767_v0, %v9722_v16  ;;  %v1146_v18 = vrot.slane %v1111_v25, 2  ;;  %v681_v5 = vadd.f32 %v663_v1, %v9726_v48 }
 0x146   :  { %2173 = vrot.lane.b32.xlu1 %v2148_v28, %s8789_s23  ;;  %v16654_v60 = vrot.slane %v10001_v2, 2  ;;  %v1116_v47 = vmul.f32 %v9957_v44, %v17075_v63  ;;  %v1117_v12 = vmul.f32 %v9964_v24, %v17076_v45  ;;  %v554_v16 = vadd.f32 %v522_v40, %v448_v34 }
 0x147   :  { %v1036_v14 = vpop.permute.xlu0 %1035  ;;  %v665_v4 = vsel %vm130_vm7, %v9786_v9, %v9813_v56  ;;  %v814_v0 = vadd.f32 %v9831_v57, %v682_v26  ;;  %v927_v25 = vsel %vm326_vm9, %v9887_v51, %v906_v46  ;;  %v553_v48 = vadd.f32 %v520_v37, %v447_v52 }
 0x148   :  { %v914_v28 = vpop.permute.xlu1 %913  ;;  %v813_v1 = vadd.f32 %v795_v62, %v681_v5  ;;  %v10045_v63 = vmul.f32 %v9933_v33, %v9964_v24  ;;  %v1145_v40 = vsel %vm16807_vm5, %v1143_v36, %v16656_v61  ;;  %v686_v9 = vadd.f32 %v9813_v56, %v554_v16 }
 0x149   :  { %224 = vrot.lane.b32.xlu0 %v9860_v23, %s8788_s19  ;;  %v797_v57 = vsel %vm228_vm8, %v9844_v42, %v9908_v49  ;;  %v946_v51 = vadd.f32 %v906_v46, %v814_v0  ;;  %v1148_v37 = vsel %vm16807_vm5, %v1146_v18, %v16654_v60  ;;  %v685_v34 = vadd.f32 %v665_v4, %v553_v48 }
 0x14a   :  { %2309 = vrot.lane.b32.xlu1 %v2284_v13, %s8790_s24  ;;  %v945_v13 = vadd.f32 %v927_v25, %v813_v1  ;;  %v1153_v26 = vrot.slane %v1116_v47, 2  ;;  %v1155_v62 = vrot.slane %v1117_v12, 2  ;;  %v818_v5 = vadd.f32 %v9908_v49, %v686_v9 }
 0x14b   :  { %v1044_v23 = vpop.permute.xlu0 %1043  ;;  %v929_v36 = vsel %vm326_vm9, %v912_v32, %v914_v28  ;;  %v817_v42 = vadd.f32 %v797_v57, %v685_v34  ;;  %v16655_v18 = vrot.slane %v10045_v63, 2  ;;  %v284_v49 = vmul.f32 %v9052_v22, %v9702_v54  ;;  %v17079_v57 = vld [vmem:[#allocation8_spill] sm:$0xff] }
 0x14c   :  { %v1038_v52 = vpop.permute.xlu1 %1037  ;;  %v950_v16 = vadd.f32 %v914_v28, %v818_v5  ;;  %v16657_v32 = vrot.slane %v10020_v43, 2  ;;  %v2243_v0 = vmul.f32 %v9304_v31, %v9547_v19  ;;  %v17078_v48 = vrot.slane %v9783_v29, 3 }
 0x14d   :  { %v1059_v56 = vsel %vm424_vm10, %v1036_v14, %v1038_v52  ;;  %v1078_v45 = vadd.f32 %v1038_v52, %v946_v51  ;;  %2179 = vrot.lane.b32.xlu0 %v2154_v50, %s8789_s23  ;;  %v949_v14 = vadd.f32 %v929_v36, %v817_v42  ;;  %v384_v51 = vmul.f32 %v17079_v57, %v9560_v20  ;;  %v17084_v36 = vld [vmem:[#allocation11_spill] sm:$0xff] }
 0x14e   :  { %v1077_v46 = vadd.f32 %v1059_v56, %v945_v13  ;;  %226 = vrot.lane.b32.xlu1 %v9904_v11, %s8788_s19  ;;  %v1156_v11 = vsel %vm16807_vm5, %v16655_v18, %v1155_v62  ;;  %v2156_v1 = vsel %vm1776_vm6, %v17078_v48, %v2155_v17  ;;  %v285_v29 = vmul.f32 %v9064_v27, %v9737_v59 }
 0x14f   :  { %v10064_v4 = vpop.permute.xlu0 %1277  ;;  %v10069_v47 = vadd.f32 %v1148_v37, %v1078_v45  ;;  %v2275_v17 = vrot.slane %v2243_v0, 3  ;;  %v2244_v13 = vmul.f32 %v9875_v6, %v9567_v35  ;;  %v17083_v62 = vrot.slane %v9885_v38, 3  ;;  %v17085_v45 = vld [vmem:[#allocation51_spill] sm:$0xff] }
 0x150   :  { %v1046_v12 = vpop.permute.xlu1 %1045  ;;  %v10071_v50 = vadd.f32 %v1145_v40, %v1077_v46  ;;  %v1154_v40 = vsel %vm16807_vm5, %v16657_v32, %v1153_v26  ;;  %v385_v56 = vmul.f32 %v17084_v36, %v9604_v53  ;;  %v2249_v42 = vmul.f32 %v9304_v31, %v17085_v45 }
 0x151   :  { %v1061_v28 = vsel %vm424_vm10, %v1044_v23, %v1046_v12  ;;  %v1082_v25 = vadd.f32 %v1046_v12, %v950_v16  ;;  %314 = vrot.lane.b32.xlu0 %v284_v49, %s8789_s23  ;;  %v2277_v5 = vsel %vm1776_vm6, %v2275_v17, %v17083_v62  ;;  %v2278_v46 = vrot.slane %v2244_v13, 3  ;;  %v17087_v16 = vld [vmem:[#allocation66_spill] sm:$0xff] }
 0x152   :  { %17077 = vst [vmem:[#allocation60_spill] sm:$0xff] %v10071_v50  ;;  %v1081_v9 = vadd.f32 %v1061_v28, %v949_v14  ;;  %2181 = vrot.lane.b32.xlu1 %v2156_v1, %s8789_s23  ;;  %v288_v49 = vmul.f32 %v9052_v22, %v17087_v16  ;;  %v2285_v38 = vrot.slane %v2249_v42, 3  ;;  %v17089_v12 = vrot.slane %v9928_v39, 3  ;;  %v17093_v1 = vld [vmem:[#allocation67_spill] sm:$0xff] }
 0x153   :  { %v10087_v19 = vpop.permute.xlu0 %1273  ;;  %v10091_v23 = vadd.f32 %v1156_v11, %v1082_v25  ;;  %v2250_v11 = vmul.f32 %v9875_v6, %v9648_v7  ;;  %v17092_v22 = vrot.slane %v9900_v58, 3  ;;  %v387_v60 = vmul.f32 %v17084_v36, %v17093_v1 }
 0x154   :  { %v10093_v37 = vpop.permute.xlu1 %1279  ;;  %v10097_v34 = vadd.f32 %v1154_v40, %v1081_v9  ;;  %v2280_v0 = vsel %vm1776_vm6, %v2278_v46, %v17089_v12  ;;  %v289_v40 = vmul.f32 %v9064_v27, %v17093_v1  ;;  %v17094_v9 = vld [vmem:[#allocation27_spill] sm:$0xff]  ;;  %v382_v27 = vmul.f32 %v17079_v57, %v9702_v54  ;;  %v17101_v12 = vld [vmem:[#allocation9_spill] sm:$0xff] }
 0x155   :  { %17080 = vst [vmem:[#allocation55_spill] sm:$0xff] %v10091_v23  ;;  %416 = vrot.lane.b32.xlu0 %v384_v51, %s8790_s24  ;;  %v2286_v48 = vsel %vm1776_vm6, %v17092_v22, %v2285_v38  ;;  %v2483_v39 = vmul.f32 %v9881_v21, %v17094_v9  ;;  %v10142_v51 = vmul.f32 %v9896_v3, %v17094_v9  ;;  %v2287_v7 = vrot.slane %v2250_v11, 3 }
 0x156   :  { %17081 = vst [vmem:[#allocation25_spill] sm:$0xff] %v10097_v34  ;;  %316 = vrot.lane.b32.xlu1 %v285_v29, %s8789_s23  ;;  %v17095_v29 = vld [vmem:[#allocation29_spill] sm:$0xff]  ;;  %v383_v38 = vmul.f32 %v17084_v36, %v9737_v59  ;;  %v10184_v11 = vmul.f32 %v17101_v12, %v17087_v16 }
 0x157   :  { %v10103_v52 = vpop.permute.xlu0 %1409  ;;  %v10148_v17 = vsel %vm78_vm0, %v17094_v9, %v17095_v29  ;;  %v2514_v62 = vrot.slane %v2483_v39, 4  ;;  %v386_v39 = vmul.f32 %v17079_v57, %v17087_v16 }
 0x158   :  { %17082 = vst [vmem:[#allocation28_spill] sm:$0xff] %v10103_v52  ;;  %v10105_v26 = vpop.permute.xlu1 %1275  ;;  %v2484_v42 = vmul.f32 %v9924_v41, %v10148_v17  ;;  %v10166_v46 = vmul.f32 %v9933_v33, %v10148_v17 }
 0x159   :  { %2303 = vrot.lane.b32.xlu0 %v2277_v5, %s8790_s24  ;;  %v16659_v5 = vrot.slane %v10142_v51, 4 }
 0x15a   :  { %418 = vrot.lane.b32.xlu1 %v385_v56, %s8790_s24  ;;  %v17098_v56 = vrot.slane %v9937_v30, 3  ;;  %v2517_v22 = vrot.slane %v2484_v42, 4  ;;  %v17104_v42 = vld [vmem:[#allocation14_spill] sm:$0xff] }
 0x15b   :  { %v10116_v35 = vpop.permute.xlu0 %1281  ;;  %v2520_v30 = vsel %vm2410_vm11, %v2514_v62, %v16659_v5  ;;  %v10214_v57 = vmul.f32 %v17104_v42, %v17093_v1 }
 0x15c   :  { %17086 = vst [vmem:[#allocation31_spill] sm:$0xff] %v10116_v35  ;;  %v10120_v14 = vpop.permute.xlu1 %1411  ;;  %v2288_v45 = vsel %vm1776_vm6, %v17098_v56, %v2287_v7 }
 0x15d   :  { %17088 = vst [vmem:[#allocation34_spill] sm:$0xff] %v10120_v14  ;;  %322 = vrot.lane.b32.xlu0 %v288_v49, %s8789_s23 }
 0x15e   :  { %2305 = vrot.lane.b32.xlu1 %v2280_v0, %s8790_s24  ;;  %v10180_v0 = vmul.f32 %v17101_v12, %v9560_v20 }
 0x15f   :  { %v10129_v28 = vpop.permute.xlu0 %1405 }
 0x160   :  { %17090 = vst [vmem:[#allocation8_spill] sm:$0xff] %v10129_v28  ;;  %v10131_v25 = vpop.permute.xlu1 %1283  ;;  %v16665_v29 = vrot.slane %v10180_v0, 1 }
 0x161   :  { %17091 = vst [vmem:[#allocation11_spill] sm:$0xff] %v10131_v25  ;;  %2311 = vrot.lane.b32.xlu0 %v2286_v48, %s8790_s24  ;;  %v16658_v48 = vrot.slane %v10166_v46, 4 }
 0x162   :  { %324 = vrot.lane.b32.xlu1 %v289_v40, %s8789_s23  ;;  %v10191_v40 = vld [vmem:[%s16557_s0] sm:$0xf0] }
 0x163   :  { %v10151_v58 = vpop.permute.xlu0 %1541  ;;  %v2481_v56 = vmul.f32 %v17094_v9, %v10191_v40 }
 0x164   :  { %17096 = vst [vmem:[#allocation51_spill] sm:$0xff] %v10151_v58  ;;  %v10155_v13 = vpop.permute.xlu1 %1407 }
 0x165   :  { %17097 = vst [vmem:[#allocation66_spill] sm:$0xff] %v10155_v13  ;;  %412 = vrot.lane.b32.xlu0 %v382_v27, %s8790_s24  ;;  %v16664_v27 = vrot.slane %v10184_v11, 1  ;;  %v2513_v32 = vrot.slane %v2481_v56, 4  ;;  %v10249_v56 = vld [vmem:[%s16557_s0 + $0x30] sm:$0xf] }
 0x166   :  { %2313 = vrot.lane.b32.xlu1 %v2288_v45, %s8790_s24  ;;  %v2522_v45 = vsel %vm2410_vm11, %v2517_v22, %v16658_v48 }
 0x167   :  { %v10169_v54 = vpop.permute.xlu0 %1413  ;;  %v632_v61 = vsel %vm508_vm4, %v16665_v29, %v16664_v27  ;;  %v17108_v27 = vld [vmem:[#allocation33_spill] sm:$0xff]  ;;  %v2515_v24 = vsel %vm2410_vm11, %v2513_v32, %v2514_v62 }
 0x168   :  { %17099 = vst [vmem:[#allocation67_spill] sm:$0xff] %v10169_v54  ;;  %v10171_v49 = vpop.permute.xlu1 %1543  ;;  %v10283_v62 = vld [vmem:[%s16557_s0 + $0x40] sm:$0xfe] }
 0x169   :  { %17100 = vst [vmem:[#allocation27_spill] sm:$0xff] %v10171_v49  ;;  %2545 = vrot.lane.b32.xlu0 %v2520_v30, %s8787_s10  ;;  %v10210_v30 = vmul.f32 %v17104_v42, %v9604_v53  ;;  %v2487_v49 = vmul.f32 %v17094_v9, %v10249_v56 }
 0x16a   :  { %414 = vrot.lane.b32.xlu1 %v383_v38, %s8790_s24  ;;  %v10220_v38 = vld [vmem:[%s16557_s0 + $0x8] sm:$0xf0] }
 0x16b   :  { %v10194_v59 = vpop.permute.xlu0 %1537  ;;  %v2482_v44 = vmul.f32 %v10148_v17, %v10220_v38  ;;  %v17112_v34 = vrot.slane %v10210_v30, 1  ;;  %v2523_v54 = vrot.slane %v2487_v49, 4  ;;  %v10312_v49 = vld [vmem:[%s16557_s0 + $0x48] sm:$0xfe] }
 0x16c   :  { %17102 = vst [vmem:[#allocation29_spill] sm:$0xff] %v10194_v59  ;;  %v10198_v7 = vpop.permute.xlu1 %1415 }
 0x16d   :  { %17103 = vst [vmem:[#allocation9_spill] sm:$0xff] %v10198_v7  ;;  %420 = vrot.lane.b32.xlu0 %v386_v39, %s8790_s24  ;;  %v587_v7 = vmul.f32 %v17101_v12, %v10283_v62 }
 0x16e   :  { %2547 = vrot.lane.b32.xlu1 %v2522_v45, %s8787_s10  ;;  %v17107_v45 = vld [vmem:[#allocation30_spill] sm:$0xff] }
 0x16f   :  { %v10222_v39 = vpop.permute.xlu0 %1673  ;;  %v10235_v48 = vmul.f32 %v9881_v21, %v17107_v45  ;;  %v10239_v5 = vmul.f32 %v9896_v3, %v17107_v45  ;;  %v10254_v29 = vsel %vm176_vm1, %v17107_v45, %v17108_v27  ;;  %v17111_v27 = vrot.slane %v10214_v57, 1 }
 0x170   :  { %17105 = vst [vmem:[#allocation14_spill] sm:$0xff] %v10222_v39  ;;  %v10226_v18 = vpop.permute.xlu1 %1539  ;;  %v10278_v32 = vmul.f32 %v9933_v33, %v10254_v29 }
 0x171   :  { %17106 = vst [vmem:[#allocation73_spill] sm:$0xff] %v10226_v18  ;;  %655 = vrot.lane.b32.xlu0 %v632_v61, %s8787_s10  ;;  %v16671_v39 = vrot.slane %v10235_v48, 4  ;;  %v16670_v58 = vrot.slane %v10239_v5, 4 }
 0x172   :  { %422 = vrot.lane.b32.xlu1 %v387_v60, %s8790_s24  ;;  %v634_v60 = vsel %vm508_vm4, %v17112_v34, %v17111_v27  ;;  %v17119_v25 = vrot.slane %v10278_v32, 4 }
 0x173   :  { %v10257_v61 = vpop.permute.xlu0 %1545  ;;  %v2652_v27 = vsel %vm2410_vm11, %v16671_v39, %v16670_v58 }
 0x174   :  { %17109 = vst [vmem:[#allocation30_spill] sm:$0xff] %v10257_v61  ;;  %v10259_v36 = vpop.permute.xlu1 %1675  ;;  %v2516_v61 = vrot.slane %v2482_v44, 4 }
 0x175   :  { %17110 = vst [vmem:[#allocation33_spill] sm:$0xff] %v10259_v36  ;;  %2541 = vrot.lane.b32.xlu0 %v2515_v24, %s8787_s10  ;;  %v10274_v36 = vmul.f32 %v9924_v41, %v10254_v29  ;;  %v10289_v24 = vld [vmem:[%s16557_s0 + $0x38] sm:$0xf] }
 0x176   :  { %657 = vrot.lane.b32.xlu1 %v634_v60, %s8787_s10  ;;  %v2518_v60 = vsel %vm2410_vm11, %v2516_v61, %v2517_v22  ;;  %v17117_v22 = vrot.slane %v10142_v51, 4  ;;  %v625_v61 = vrot.slane %v587_v7, 1  ;;  %v588_v51 = vmul.f32 %v17104_v42, %v10312_v49 }
 0x177   :  { %v10291_v44 = vpop.permute.xlu0 %1669  ;;  %v2649_v23 = vrot.slane %v10274_v36, 4 }
 0x178   :  { %17113 = vst [vmem:[#allocation74_spill] sm:$0xff] %v10291_v44  ;;  %v10293_v34 = vpop.permute.xlu1 %1547  ;;  %v2524_v36 = vsel %vm2410_vm11, %v17117_v22, %v2523_v54  ;;  %v17122_v22 = vrot.slane %v10180_v0, 1 }
 0x179   :  { %17114 = vst [vmem:[#allocation75_spill] sm:$0xff] %v10293_v34  ;;  %2677 = vrot.lane.b32.xlu0 %v2652_v27, %s8788_s19  ;;  %v2488_v34 = vmul.f32 %v10148_v17, %v10289_v24  ;;  %v17118_v27 = vld [vmem:[#allocation10_spill] sm:$0xff] }
 0x17a   :  { %2543 = vrot.lane.b32.xlu1 %v2518_v60, %s8787_s10  ;;  %v10323_v35 = vmul.f32 %v17118_v27, %v9560_v20  ;;  %v10327_v60 = vmul.f32 %v17118_v27, %v17087_v16  ;;  %v627_v14 = vsel %vm508_vm4, %v625_v61, %v17122_v22 }
 0x17b   :  { %v10314_v58 = vpop.permute.xlu0 %1677  ;;  %v2525_v52 = vrot.slane %v2488_v34, 4  ;;  %v17123_v34 = vrot.slane %v10166_v46, 4  ;;  %v17127_v46 = vld [vmem:[#allocation35_spill] sm:$0xff] }
 0x17c   :  { %17115 = vst [vmem:[#allocation76_spill] sm:$0xff] %v10314_v58  ;;  %v10316_v39 = vpop.permute.xlu1 %1671  ;;  %v2654_v58 = vsel %vm2410_vm11, %v2649_v23, %v17119_v25  ;;  %v16677_v44 = vrot.slane %v10327_v60, 1  ;;  %v2613_v25 = vmul.f32 %v17107_v45, %v10191_v40 }
 0x17d   :  { %17116 = vst [vmem:[#allocation77_spill] sm:$0xff] %v10316_v39  ;;  %2549 = vrot.lane.b32.xlu0 %v2524_v36, %s8787_s10  ;;  %v16678_v36 = vrot.slane %v10323_v35, 1 }
 0x17e   :  { %2679 = vrot.lane.b32.xlu1 %v2654_v58, %s8788_s19  ;;  %v2526_v58 = vsel %vm2410_vm11, %v17123_v34, %v2525_v52  ;;  %v10375_v34 = vmul.f32 %v9896_v3, %v17127_v46 }
 0x17f   :  { %v10336_v54 = vpop.permute.xlu0 %1911  ;;  %v764_v52 = vsel %vm508_vm4, %v16678_v36, %v16677_v44  ;;  %v10388_v44 = vld [vmem:[%s16557_s0 + $0x70] sm:$0x1]  ;;  %v17129_v36 = vld [vmem:[#allocation36_spill] sm:$0xff] }
 0x180   :  { %17120 = vst [vmem:[#allocation10_spill] sm:$0xff] %v10336_v54  ;;  %v10338_v7 = vpop.permute.xlu1 %1679  ;;  %v628_v54 = vrot.slane %v588_v51, 1  ;;  %v10371_v51 = vmul.f32 %v9881_v21, %v17127_v46  ;;  %v16683_v18 = vrot.slane %v10375_v34, 4  ;;  %v593_v50 = vmul.f32 %v17101_v12, %v10388_v44  ;;  %v10425_v12 = vld [vmem:[%s16557_s0 + $0x78] sm:$0x1] }
 0x181   :  { %17121 = vst [vmem:[#allocation78_spill] sm:$0xff] %v10338_v7  ;;  %651 = vrot.lane.b32.xlu0 %v627_v14, %s8787_s10  ;;  %v17124_v7 = vld [vmem:[#allocation16_spill] sm:$0xff]  ;;  %v2645_v14 = vrot.slane %v2613_v25, 4  ;;  %v2614_v25 = vmul.f32 %v10254_v29, %v10220_v38 }
 0x182   :  { %v10353_v39 = vmul.f32 %v17124_v7, %v9604_v53  ;;  %v10357_v0 = vmul.f32 %v17124_v7, %v17093_v1  ;;  %2551 = vrot.lane.b32.xlu1 %v2526_v58, %s8787_s10  ;;  %v17128_v58 = vrot.slane %v10210_v30, 1  ;;  %v16684_v59 = vrot.slane %v10371_v51, 4 }
 0x183   :  { %v10360_v61 = vpop.permute.xlu0 %122 }
 0x184   :  { %17125 = vst [vmem:[#allocation16_spill] sm:$0xff] %v10360_v61  ;;  %v10362_v22 = vpop.permute.xlu1 %1913  ;;  %v630_v61 = vsel %vm508_vm4, %v628_v54, %v17128_v58  ;;  %v17133_v58 = vrot.slane %v10235_v48, 4 }
 0x185   :  { %17126 = vst [vmem:[#allocation79_spill] sm:$0xff] %v10362_v22  ;;  %787 = vrot.lane.b32.xlu0 %v764_v52, %s8788_s19  ;;  %v10393_v52 = vsel %vm274_vm2, %v17127_v46, %v17129_v36  ;;  %v17134_v36 = vrot.slane %v10357_v0, 1 }
 0x186   :  { %17130 = vst [vmem:[#allocation35_spill] sm:$0xff] %v10393_v52  ;;  %653 = vrot.lane.b32.xlu1 %v630_v61, %s8787_s10  ;;  %v2647_v22 = vsel %vm2410_vm11, %v2645_v14, %v17133_v58  ;;  %v17135_v61 = vrot.slane %v10353_v39, 1  ;;  %v10415_v48 = vmul.f32 %v9924_v41, %v10393_v52  ;;  %v10419_v14 = vmul.f32 %v9933_v33, %v10393_v52 }
 0x187   :  { %v10396_v30 = vpop.permute.xlu0 %1907 }
 0x188   :  { %17131 = vst [vmem:[#allocation36_spill] sm:$0xff] %v10396_v30  ;;  %v10398_v54 = vpop.permute.xlu1 %124  ;;  %v766_v30 = vsel %vm508_vm4, %v17135_v61, %v17134_v36  ;;  %v635_v36 = vrot.slane %v593_v50, 1  ;;  %v2619_v61 = vmul.f32 %v17107_v45, %v10249_v56  ;;  %v16687_v28 = vrot.slane %v10415_v48, 4 }
 0x189   :  { %17132 = vst [vmem:[#allocation80_spill] sm:$0xff] %v10398_v54  ;;  %2673 = vrot.lane.b32.xlu0 %v2647_v22, %s8788_s19  ;;  %v2648_v54 = vrot.slane %v2614_v25, 4  ;;  %v2784_v25 = vsel %vm2410_vm11, %v16684_v59, %v16683_v18  ;;  %v17140_v50 = vrot.slane %v10184_v11, 1 }
 0x18a   :  { %789 = vrot.lane.b32.xlu1 %v766_v30, %s8788_s19 }
 0x18b   :  { %v10427_v22 = vpop.permute.xlu0 %2043  ;;  %v2650_v30 = vsel %vm2410_vm11, %v2648_v54, %v2649_v23  ;;  %v636_v59 = vsel %vm508_vm4, %v17140_v50, %v635_v36  ;;  %v719_v23 = vmul.f32 %v17118_v27, %v10283_v62 }
 0x18c   :  { %17136 = vst [vmem:[#allocation81_spill] sm:$0xff] %v10427_v22  ;;  %v10429_v58 = vpop.permute.xlu1 %1909  ;;  %v16686_v22 = vrot.slane %v10419_v14, 4 }
 0x18d   :  { %17137 = vst [vmem:[#allocation82_spill] sm:$0xff] %v10429_v58  ;;  %2809 = vrot.lane.b32.xlu0 %v2784_v25, %s8789_s23  ;;  %v594_v58 = vmul.f32 %v17104_v42, %v10425_v12  ;;  %v2655_v25 = vrot.slane %v2619_v61, 4  ;;  %v17143_v61 = vrot.slane %v10239_v5, 4  ;;  %v757_v50 = vrot.slane %v719_v23, 1 }
 0x18e   :  { %2675 = vrot.lane.b32.xlu1 %v2650_v30, %s8788_s19  ;;  %v2786_v42 = vsel %vm2410_vm11, %v16687_v28, %v16686_v22  ;;  %v2620_v30 = vmul.f32 %v10254_v29, %v10289_v24  ;;  %v720_v5 = vmul.f32 %v17124_v7, %v10312_v49  ;;  %v17148_v23 = vrot.slane %v10323_v35, 1 }
 0x18f   :  { %v10445_v13 = vpop.permute.xlu0 %1915  ;;  %v637_v54 = vrot.slane %v594_v58, 1 }
 0x190   :  { %17138 = vst [vmem:[#allocation83_spill] sm:$0xff] %v10445_v13  ;;  %v10447_v18 = vpop.permute.xlu1 %2045  ;;  %v2657_v28 = vrot.slane %v2620_v30, 4  ;;  %v17149_v30 = vrot.slane %v10278_v32, 4 }
 0x191   :  { %17139 = vst [vmem:[#allocation84_spill] sm:$0xff] %v10447_v18  ;;  %659 = vrot.lane.b32.xlu0 %v636_v59, %s8787_s10  ;;  %v2656_v59 = vsel %vm2410_vm11, %v17143_v61, %v2655_v25  ;;  %v17144_v18 = vld [vmem:[#allocation12_spill] sm:$0xff]  ;;  %v759_v61 = vsel %vm508_vm4, %v757_v50, %v17148_v23 }
 0x192   :  { %2811 = vrot.lane.b32.xlu1 %v2786_v42, %s8789_s23  ;;  %v10472_v13 = vmul.f32 %v17144_v18, %v9560_v20  ;;  %v10476_v58 = vmul.f32 %v17144_v18, %v17087_v16  ;;  %v17145_v42 = vrot.slane %v10214_v57, 1 }
 0x193   :  { %v10463_v11 = vpop.permute.xlu0 %118 }
 0x194   :  { %17141 = vst [vmem:[#allocation85_spill] sm:$0xff] %v10463_v11  ;;  %v10465_v36 = vpop.permute.xlu1 %1917  ;;  %v638_v22 = vsel %vm508_vm4, %v17145_v42, %v637_v54  ;;  %v16690_v57 = vrot.slane %v10476_v58, 1  ;;  %v2745_v54 = vmul.f32 %v17127_v46, %v10191_v40  ;;  %v760_v42 = vrot.slane %v720_v5, 1  ;;  %v17153_v5 = vld [vmem:[#allocation37_spill] sm:$0xff] }
 0x195   :  { %17142 = vst [vmem:[#allocation86_spill] sm:$0xff] %v10465_v36  ;;  %2681 = vrot.lane.b32.xlu0 %v2656_v59, %s8788_s19  ;;  %v16691_v59 = vrot.slane %v10472_v13, 1 }
 0x196   :  { %661 = vrot.lane.b32.xlu1 %v638_v22, %s8787_s10  ;;  %v2658_v22 = vsel %vm2410_vm11, %v17149_v30, %v2657_v28  ;;  %v2777_v32 = vrot.slane %v2745_v54, 4  ;;  %v17154_v30 = vrot.slane %v10353_v39, 1  ;;  %v2746_v54 = vmul.f32 %v10393_v52, %v10220_v38 }
 0x197   :  { %v10485_v25 = vpop.permute.xlu0 %220  ;;  %v896_v28 = vsel %vm508_vm4, %v16691_v59, %v16690_v57  ;;  %v17155_v57 = vld [vmem:[#allocation39_spill] sm:$0xff]  ;;  %v17159_v39 = vrot.slane %v10371_v51, 4 }
 0x198   :  { %17146 = vst [vmem:[#allocation12_spill] sm:$0xff] %v10485_v25  ;;  %v10487_v20 = vpop.permute.xlu1 %120  ;;  %v17150_v25 = vld [vmem:[#allocation20_spill] sm:$0xff] }
 0x199   :  { %17147 = vst [vmem:[#allocation87_spill] sm:$0xff] %v10487_v20  ;;  %783 = vrot.lane.b32.xlu0 %v759_v61, %s8788_s19  ;;  %v10502_v11 = vmul.f32 %v17150_v25, %v9604_v53  ;;  %v10506_v35 = vmul.f32 %v17150_v25, %v17093_v1  ;;  %v10520_v53 = vmul.f32 %v9881_v21, %v17153_v5 }
 0x19a   :  { %2683 = vrot.lane.b32.xlu1 %v2658_v22, %s8788_s19  ;;  %v10524_v61 = vmul.f32 %v9896_v3, %v17153_v5  ;;  %v762_v22 = vsel %vm508_vm4, %v760_v42, %v17154_v30  ;;  %v10537_v21 = vsel %vm16814_vm3, %v17153_v5, %v17155_v57  ;;  %v2779_v42 = vsel %vm2410_vm11, %v2777_v32, %v17159_v39 }
 0x19b   :  { %v10509_v50 = vpop.permute.xlu0 %2039  ;;  %v16692_v20 = vrot.slane %v10506_v35, 1  ;;  %17156 = vst [vmem:[#allocation39_spill] sm:$0xff] %v10537_v21  ;;  %v16695_v30 = vrot.slane %v10520_v53, 4  ;;  %v17160_v57 = vrot.slane %v10502_v11, 1  ;;  %v10559_v51 = vmul.f32 %v9924_v41, %v10537_v21 }
 0x19c   :  { %17151 = vst [vmem:[#allocation20_spill] sm:$0xff] %v10509_v50  ;;  %v10511_v23 = vpop.permute.xlu1 %222  ;;  %v16694_v59 = vrot.slane %v10524_v61, 4  ;;  %v10563_v32 = vmul.f32 %v9933_v33, %v10537_v21  ;;  %v17163_v33 = vrot.slane %v10415_v48, 4 }
 0x19d   :  { %17152 = vst [vmem:[#allocation88_spill] sm:$0xff] %v10511_v23  ;;  %919 = vrot.lane.b32.xlu0 %v896_v28, %s8789_s23  ;;  %v725_v23 = vmul.f32 %v17118_v27, %v10388_v44 }
 0x19e   :  { %785 = vrot.lane.b32.xlu1 %v762_v22, %s8788_s19  ;;  %v898_v22 = vsel %vm508_vm4, %v17160_v57, %v16692_v20  ;;  %v2751_v57 = vmul.f32 %v17127_v46, %v10249_v56  ;;  %v16698_v20 = vrot.slane %v10559_v51, 4 }
 0x19f   :  { %v10540_v3 = vpop.permute.xlu0 %2175 }
 0x1a0   :  { %17157 = vst [vmem:[#allocation89_spill] sm:$0xff] %v10540_v3  ;;  %v10542_v28 = vpop.permute.xlu1 %2041  ;;  %v2780_v3 = vrot.slane %v2746_v54, 4  ;;  %v2916_v54 = vsel %vm2410_vm11, %v16695_v30, %v16694_v59  ;;  %v17166_v30 = vrot.slane %v10327_v60, 1  ;;  %v2787_v48 = vrot.slane %v2751_v57, 4 }
 0x1a1   :  { %17158 = vst [vmem:[#allocation90_spill] sm:$0xff] %v10542_v28  ;;  %2805 = vrot.lane.b32.xlu0 %v2779_v42, %s8789_s23  ;;  %v767_v42 = vrot.slane %v725_v23, 1 }
 0x1a2   :  { %921 = vrot.lane.b32.xlu1 %v898_v22, %s8789_s23  ;;  %v2782_v22 = vsel %vm2410_vm11, %v2780_v3, %v17163_v33  ;;  %v851_v3 = vmul.f32 %v17144_v18, %v10283_v62 }
 0x1a3   :  { %v10566_v27 = vpop.permute.xlu0 %126 }
 0x1a4   :  { %17161 = vst [vmem:[#allocation91_spill] sm:$0xff] %v10566_v27  ;;  %v10568_v39 = vpop.permute.xlu1 %2177  ;;  %v16697_v27 = vrot.slane %v10563_v32, 4 }
 0x1a5   :  { %17162 = vst [vmem:[#allocation92_spill] sm:$0xff] %v10568_v39  ;;  %2941 = vrot.lane.b32.xlu0 %v2916_v54, %s8790_s24  ;;  %v726_v39 = vmul.f32 %v17124_v7, %v10425_v12  ;;  %v768_v54 = vsel %vm508_vm4, %v17166_v30, %v767_v42  ;;  %v17169_v42 = vrot.slane %v10375_v34, 4  ;;  %v17171_v34 = vrot.slane %v10357_v0, 1 }
 0x1a6   :  { %2807 = vrot.lane.b32.xlu1 %v2782_v22, %s8789_s23  ;;  %v2918_v7 = vsel %vm2410_vm11, %v16698_v20, %v16697_v27  ;;  %v2752_v22 = vmul.f32 %v10393_v52, %v10289_v24  ;;  %v17174_v52 = vrot.slane %v10472_v13, 1  ;;  %v10649_v13 = vld [vmem:[%s16557_s0 + $0x58] sm:$0xff] }
 0x1a7   :  { %v10586_v59 = vpop.permute.xlu0 %2047  ;;  %v769_v33 = vrot.slane %v726_v39, 1  ;;  %v2788_v57 = vsel %vm2410_vm11, %v17169_v42, %v2787_v48  ;;  %v17170_v39 = vld [vmem:[#allocation13_spill] sm:$0xff]  ;;  %v852_v42 = vmul.f32 %v17150_v25, %v10312_v49 }
 0x1a8   :  { %17164 = vst [vmem:[#allocation93_spill] sm:$0xff] %v10586_v59  ;;  %v10588_v23 = vpop.permute.xlu1 %128 }
 0x1a9   :  { %17165 = vst [vmem:[#allocation94_spill] sm:$0xff] %v10588_v23  ;;  %791 = vrot.lane.b32.xlu0 %v768_v54, %s8788_s19  ;;  %v889_v54 = vrot.slane %v851_v3, 1  ;;  %v10614_v23 = vld [vmem:[%s16557_s0 + $0x50] sm:$0xff]  ;;  %v770_v48 = vsel %vm508_vm4, %v17171_v34, %v769_v33  ;;  %v2789_v3 = vrot.slane %v2752_v22, 4  ;;  %v2877_v33 = vmul.f32 %v17153_v5, %v10191_v40 }
 0x1aa   :  { %2943 = vrot.lane.b32.xlu1 %v2918_v7, %s8790_s24  ;;  %v10618_v27 = vmul.f32 %v10614_v23, %v17170_v39  ;;  %v10622_v7 = vmul.f32 %v17170_v39, %v17087_v16  ;;  %v17175_v22 = vrot.slane %v10419_v14, 4 }
 0x1ab   :  { %v10604_v60 = vpop.permute.xlu0 %216  ;;  %v891_v59 = vsel %vm508_vm4, %v889_v54, %v17174_v52  ;;  %v17176_v52 = vld [vmem:[#allocation23_spill] sm:$0xff] }
 0x1ac   :  { %17167 = vst [vmem:[#allocation95_spill] sm:$0xff] %v10604_v60  ;;  %v10606_v30 = vpop.permute.xlu1 %2049  ;;  %v16703_v0 = vrot.slane %v10622_v7, 1  ;;  %v2790_v34 = vsel %vm2410_vm11, %v17175_v22, %v2789_v3  ;;  %v10657_v54 = vmul.f32 %v17176_v52, %v17093_v1  ;;  %v2909_v3 = vrot.slane %v2877_v33, 4 }
 0x1ad   :  { %17168 = vst [vmem:[#allocation96_spill] sm:$0xff] %v10606_v30  ;;  %2813 = vrot.lane.b32.xlu0 %v2788_v57, %s8789_s23  ;;  %v1022_v57 = vrot.slane %v10618_v27, 1  ;;  %v10653_v27 = vmul.f32 %v10649_v13, %v17176_v52  ;;  %v17179_v22 = vrot.slane %v10502_v11, 1 }
 0x1ae   :  { %793 = vrot.lane.b32.xlu1 %v770_v48, %s8788_s19  ;;  %v892_v48 = vrot.slane %v852_v42, 1  ;;  %v857_v42 = vmul.f32 %v17144_v18, %v10388_v44  ;;  %v17182_v18 = vrot.slane %v10520_v53, 4 }
 0x1af   :  { %v10631_v20 = vpop.permute.xlu0 %318 }
 0x1b0   :  { %17172 = vst [vmem:[#allocation13_spill] sm:$0xff] %v10631_v20  ;;  %v10633_v60 = vpop.permute.xlu1 %218  ;;  %v16704_v20 = vrot.slane %v10657_v54, 1  ;;  %v899_v11 = vrot.slane %v857_v42, 1 }
 0x1b1   :  { %17173 = vst [vmem:[#allocation97_spill] sm:$0xff] %v10633_v60  ;;  %915 = vrot.lane.b32.xlu0 %v891_v59, %s8789_s23  ;;  %v1028_v59 = vsel %vm508_vm4, %v1022_v57, %v16703_v0  ;;  %v894_v60 = vsel %vm508_vm4, %v892_v48, %v17179_v22  ;;  %v2883_v48 = vmul.f32 %v17153_v5, %v10249_v56  ;;  %v17213_v5 = vld [vmem:[#allocation38_spill] sm:$0xff] }
 0x1b2   :  { %2815 = vrot.lane.b32.xlu1 %v2790_v34, %s8789_s23  ;;  %v1025_v34 = vrot.slane %v10653_v27, 1 }
 0x1b3   :  { %v10660_v40 = vpop.permute.xlu0 %2171  ;;  %v2919_v42 = vrot.slane %v2883_v48, 4 }
 0x1b4   :  { %17177 = vst [vmem:[#allocation23_spill] sm:$0xff] %v10660_v40  ;;  %v10662_v14 = vpop.permute.xlu1 %320 }
 0x1b5   :  { %17178 = vst [vmem:[#allocation98_spill] sm:$0xff] %v10662_v14  ;;  %1051 = vrot.lane.b32.xlu0 %v1028_v59, %s8790_s24  ;;  %v2878_v14 = vmul.f32 %v10537_v21, %v10220_v38  ;;  %v2911_v59 = vsel %vm2410_vm11, %v2909_v3, %v17182_v18  ;;  %v1030_v38 = vsel %vm508_vm4, %v1025_v34, %v16704_v20  ;;  %v17185_v3 = vrot.slane %v10476_v58, 1 }
 0x1b6   :  { %917 = vrot.lane.b32.xlu1 %v894_v60, %s8789_s23  ;;  %v858_v60 = vmul.f32 %v17150_v25, %v10425_v12  ;;  %v983_v18 = vmul.f32 %v17170_v39, %v10283_v62 }
 0x1b7   :  { %v10678_v0 = vpop.permute.xlu0 %2307  ;;  %v2912_v27 = vrot.slane %v2878_v14, 4  ;;  %v900_v56 = vsel %vm508_vm4, %v17185_v3, %v899_v11  ;;  %v17186_v14 = vrot.slane %v10559_v51, 4  ;;  %v17189_v11 = vrot.slane %v10524_v61, 4 }
 0x1b8   :  { %17180 = vst [vmem:[#allocation99_spill] sm:$0xff] %v10678_v0  ;;  %v10680_v33 = vpop.permute.xlu1 %2173  ;;  %v1021_v48 = vrot.slane %v983_v18, 1  ;;  %v989_v51 = vmul.f32 %v17170_v39, %v10388_v44  ;;  %v984_v3 = vmul.f32 %v17176_v52, %v10312_v49  ;;  %v17193_v44 = vld [vmem:[#allocation15_spill] sm:$0xff]  ;;  %v10869_v0 = vmul.f32 %v10649_v13, %v17213_v5 }
 0x1b9   :  { %17181 = vst [vmem:[#allocation100_spill] sm:$0xff] %v10680_v33  ;;  %2937 = vrot.lane.b32.xlu0 %v2911_v59, %s8790_s24  ;;  %v2914_v25 = vsel %vm2410_vm11, %v2912_v27, %v17186_v14  ;;  %v901_v59 = vrot.slane %v858_v60, 1  ;;  %v2920_v62 = vsel %vm2410_vm11, %v17189_v11, %v2919_v42  ;;  %v17190_v27 = vrot.slane %v10506_v35, 1 }
 0x1ba   :  { %1053 = vrot.lane.b32.xlu1 %v1030_v38, %s8790_s24  ;;  %v2884_v38 = vmul.f32 %v10537_v21, %v10289_v24  ;;  %v1023_v42 = vsel %vm508_vm4, %v1021_v48, %v1022_v57  ;;  %v1031_v18 = vrot.slane %v989_v51, 1  ;;  %v1223_v39 = vmul.f32 %v10614_v23, %v17193_v44  ;;  %v10744_v57 = vld [vmem:[%s16557_s0 + $0x40] sm:$0xfc] }
 0x1bb   :  { %v10694_v22 = vpop.permute.xlu0 %224  ;;  %v902_v24 = vsel %vm508_vm4, %v17190_v27, %v901_v59  ;;  %v1225_v35 = vmul.f32 %v17193_v44, %v17087_v16  ;;  %v17194_v14 = vrot.slane %v10563_v32, 4  ;;  %v990_v59 = vmul.f32 %v17176_v52, %v10425_v12 }
 0x1bc   :  { %17183 = vst [vmem:[#allocation101_spill] sm:$0xff] %v10694_v22  ;;  %v10696_v53 = vpop.permute.xlu1 %2309  ;;  %v2921_v60 = vrot.slane %v2884_v38, 4  ;;  %v1260_v48 = vrot.slane %v1223_v39, 2  ;;  %v1221_v12 = vmul.f32 %v17193_v44, %v10744_v57 }
 0x1bd   :  { %17184 = vst [vmem:[#allocation102_spill] sm:$0xff] %v10696_v53  ;;  %923 = vrot.lane.b32.xlu0 %v900_v56, %s8789_s23  ;;  %v1265_v51 = vrot.slane %v1225_v35, 2  ;;  %v1033_v27 = vrot.slane %v990_v59, 1  ;;  %v17201_v35 = vld [vmem:[#allocation17_spill] sm:$0xff] }
 0x1be   :  { %2939 = vrot.lane.b32.xlu1 %v2914_v25, %s8790_s24  ;;  %v2922_v49 = vsel %vm2410_vm11, %v17194_v14, %v2921_v60  ;;  %v1024_v25 = vrot.slane %v984_v3, 1  ;;  %v1259_v39 = vrot.slane %v1221_v12, 2  ;;  %v1355_v14 = vmul.f32 %v10614_v23, %v17201_v35  ;;  %v10788_v12 = vld [vmem:[%s16557_s0 + $0x70] sm:$0x3] }
 0x1bf   :  { %v10710_v20 = vpop.permute.xlu0 %2179 }
 0x1c0   :  { %17187 = vst [vmem:[#allocation103_spill] sm:$0xff] %v10710_v20  ;;  %v10712_v58 = vpop.permute.xlu1 %226  ;;  %v1026_v52 = vsel %vm508_vm4, %v1024_v25, %v1025_v34  ;;  %v1266_v34 = vsel %vm16807_vm5, %v1260_v48, %v1265_v51  ;;  %v17202_v25 = vrot.slane %v10657_v54, 1  ;;  %v1261_v54 = vsel %vm16807_vm5, %v1259_v39, %v1260_v48  ;;  %v10811_v48 = vld [vmem:[%s16557_s0 + $0x78] sm:$0x3]  ;;  %v17226_v20 = vld [vmem:[#allocation40_spill] sm:$0xff] }
 0x1c1   :  { %17188 = vst [vmem:[#allocation104_spill] sm:$0xff] %v10712_v58  ;;  %2945 = vrot.lane.b32.xlu0 %v2920_v62, %s8790_s24  ;;  %v17197_v62 = vrot.slane %v10622_v7, 1  ;;  %v10766_v7 = vld [vmem:[%s16557_s0 + $0x48] sm:$0xfc] }
 0x1c2   :  { %925 = vrot.lane.b32.xlu1 %v902_v24, %s8789_s23  ;;  %v17198_v24 = vld [vmem:[#allocation26_spill] sm:$0xff]  ;;  %v1034_v59 = vsel %vm508_vm4, %v17202_v25, %v1033_v27 }
 0x1c3   :  { %v10726_v56 = vpop.permute.xlu0 %314  ;;  %v1032_v32 = vsel %vm508_vm4, %v17197_v62, %v1031_v18  ;;  %v1224_v60 = vmul.f32 %v10649_v13, %v17198_v24  ;;  %v1226_v3 = vmul.f32 %v17198_v24, %v17093_v1  ;;  %v17210_v58 = vld [vmem:[#allocation18_spill] sm:$0xff] }
 0x1c4   :  { %17191 = vst [vmem:[#allocation105_spill] sm:$0xff] %v10726_v56  ;;  %v10728_v61 = vpop.permute.xlu1 %2181 }
 0x1c5   :  { %17192 = vst [vmem:[#allocation106_spill] sm:$0xff] %v10728_v61  ;;  %1047 = vrot.lane.b32.xlu0 %v1023_v42, %s8790_s24  ;;  %v1263_v62 = vrot.slane %v1224_v60, 2  ;;  %v1227_v60 = vmul.f32 %v17193_v44, %v10788_v12 }
 0x1c6   :  { %2947 = vrot.lane.b32.xlu1 %v2922_v49, %s8790_s24  ;;  %v10777_v49 = vmul.f32 %v17201_v35, %v17087_v16 }
 0x1c7   :  { %v10747_v38 = vpop.permute.xlu0 %416 }
 0x1c8   :  { %17195 = vst [vmem:[#allocation15_spill] sm:$0xff] %v10747_v38  ;;  %v10749_v11 = vpop.permute.xlu1 %316  ;;  %v16708_v27 = vrot.slane %v10777_v49, 2 }
 0x1c9   :  { %17196 = vst [vmem:[#allocation107_spill] sm:$0xff] %v10749_v11  ;;  %1055 = vrot.lane.b32.xlu0 %v1032_v32, %s8790_s24  ;;  %v1267_v32 = vrot.slane %v1226_v3, 2  ;;  %v17205_v11 = vld [vmem:[#allocation32_spill] sm:$0xff] }
 0x1ca   :  { %1049 = vrot.lane.b32.xlu1 %v1026_v52, %s8790_s24  ;;  %v1222_v52 = vmul.f32 %v17198_v24, %v10766_v7 }
 0x1cb   :  { %v10768_v42 = vpop.permute.xlu0 %2303  ;;  %v1268_v3 = vsel %vm16807_vm5, %v1263_v62, %v1267_v32 }
 0x1cc   :  { %17199 = vst [vmem:[#allocation26_spill] sm:$0xff] %v10768_v42  ;;  %v10770_v18 = vpop.permute.xlu1 %418  ;;  %v1262_v25 = vrot.slane %v1222_v52, 2  ;;  %v1269_v52 = vrot.slane %v1227_v60, 2  ;;  %v17230_v42 = vrot.slane %v9854_v10, 1 }
 0x1cd   :  { %17200 = vst [vmem:[#allocation108_spill] sm:$0xff] %v10770_v18  ;;  %1289 = vrot.lane.b32.xlu0 %v1266_v34, %s8787_s10  ;;  %v1392_v34 = vrot.slane %v1355_v14, 2  ;;  %v1228_v18 = vmul.f32 %v17198_v24, %v10811_v48 }
 0x1ce   :  { %1057 = vrot.lane.b32.xlu1 %v1034_v59, %s8790_s24  ;;  %v1356_v59 = vmul.f32 %v10649_v13, %v17205_v11  ;;  %v1270_v60 = vsel %vm16807_vm5, %v1265_v51, %v1269_v52  ;;  %v7644_v52 = vld [vmem:[%s16558_s1 + $0x17] ss:$8 sm:$0x3] }
 0x1cf   :  { %v10791_v16 = vpop.permute.xlu0 %322  ;;  %v1398_v14 = vsel %vm16807_vm5, %v1392_v34, %v16708_v27 }
 0x1d0   :  { %17203 = vst [vmem:[#allocation17_spill] sm:$0xff] %v10791_v16  ;;  %v10793_v56 = vpop.permute.xlu1 %2305  ;;  %v10805_v16 = vmul.f32 %v17205_v11, %v17093_v1  ;;  %v1353_v1 = vmul.f32 %v17201_v35, %v10744_v57 }
 0x1d1   :  { %17204 = vst [vmem:[#allocation109_spill] sm:$0xff] %v10793_v56  ;;  %1285 = vrot.lane.b32.xlu0 %v1261_v54, %s8787_s10  ;;  %v1264_v54 = vsel %vm16807_vm5, %v1262_v25, %v1263_v62  ;;  %v10840_v62 = vld [vmem:[%s16557_s0 + $0x60] sm:$0xff]  ;;  %v1271_v25 = vrot.slane %v1228_v18, 2  ;;  %v1359_v18 = vmul.f32 %v17201_v35, %v10788_v12  ;;  %v17241_v56 = vld [vmem:[#allocation19_spill] sm:$0xff] }
 0x1d2   :  { %1291 = vrot.lane.b32.xlu1 %v1268_v3, %s8787_s10  ;;  %v1395_v3 = vrot.slane %v1356_v59, 2  ;;  %v16710_v38 = vrot.slane %v10805_v16, 2  ;;  %v1391_v27 = vrot.slane %v1353_v1, 2  ;;  %v10844_v24 = vmul.f32 %v10840_v62, %v17210_v58 }
 0x1d3   :  { %v10813_v44 = vpop.permute.xlu0 %2311  ;;  %v1354_v59 = vmul.f32 %v17205_v11, %v10766_v7  ;;  %v10975_v40 = vmul.f32 %v10614_v23, %v17241_v56  ;;  %v10979_v33 = vmul.f32 %v10840_v62, %v17241_v56 }
 0x1d4   :  { %17206 = vst [vmem:[#allocation32_spill] sm:$0xff] %v10813_v44  ;;  %v10815_v39 = vpop.permute.xlu1 %324  ;;  %v1400_v51 = vsel %vm16807_vm5, %v1395_v3, %v16710_v38  ;;  %v17219_v38 = vld [vmem:[#allocation53_spill] sm:$0xff]  ;;  %v17222_v44 = vld [vmem:[#allocation59_spill] sm:$0xff]  ;;  %v17228_v30 = vrot.slane %v10844_v24, 2 }
 0x1d5   :  { %17207 = vst [vmem:[#allocation110_spill] sm:$0xff] %v10815_v39  ;;  %1421 = vrot.lane.b32.xlu0 %v1398_v14, %s8788_s19  ;;  %v10835_v14 = vmul.f32 %v10614_v23, %v17210_v58  ;;  %v1394_v21 = vrot.slane %v1354_v59, 2  ;;  %v10892_v59 = vld [vmem:[%s16557_s0 + $0x10] sm:$0xff] }
 0x1d6   :  { %1287 = vrot.lane.b32.xlu1 %v1264_v54, %s8787_s10 }
 0x1d7   :  { %v10828_v39 = vpop.permute.xlu0 %412  ;;  %v17229_v36 = vrot.slane %v10835_v14, 2 }
 0x1d8   :  { %17208 = vst [vmem:[#allocation111_spill] sm:$0xff] %v10828_v39  ;;  %v10830_v22 = vpop.permute.xlu1 %2313  ;;  %v17215_v39 = vld [vmem:[#allocation52_spill] sm:$0xff] }
 0x1d9   :  { %17209 = vst [vmem:[#allocation112_spill] sm:$0xff] %v10830_v22  ;;  %1293 = vrot.lane.b32.xlu0 %v1270_v60, %s8787_s10  ;;  %v1393_v60 = vsel %vm16807_vm5, %v1391_v27, %v1392_v34  ;;  %v10874_v34 = vld [vmem:[%s16557_s0 + $0x68] sm:$0xff]  ;;  %v42_v35 = vmul.f32 %v9924_v41, %v17215_v39  ;;  %v17223_v41 = vrot.slane %v17222_v44, 1  ;;  %v1485_v44 = vmul.f32 %v17210_v58, %v10744_v57 }
 0x1da   :  { %1423 = vrot.lane.b32.xlu1 %v1400_v51, %s8788_s19  ;;  %v1272_v51 = vsel %vm16807_vm5, %v1267_v32, %v1271_v25  ;;  %17214 = vst [vmem:[#allocation38_spill] sm:$0xff] %v10874_v34  ;;  %v10878_v27 = vmul.f32 %v10874_v34, %v17213_v5  ;;  %v17217_v32 = vld [vmem:[#allocation7_spill] sm:$0xff] }
 0x1db   :  { %v10856_v1 = vpop.permute.xlu0 %2545  ;;  %v10886_v25 = vrot.slane %v7644_v52, %v17217_v32 }
 0x1dc   :  { %17211 = vst [vmem:[#allocation18_spill] sm:$0xff] %v10856_v1  ;;  %v10858_v54 = vpop.permute.xlu1 %414  ;;  %v17220_v1 = vld [vmem:[#allocation69_spill] sm:$0xff] }
 0x1dd   :  { %17212 = vst [vmem:[#allocation113_spill] sm:$0xff] %v10858_v54  ;;  %1417 = vrot.lane.b32.xlu0 %v1393_v60, %s8788_s19  ;;  %v10883_v60 = vrot.slane %v7644_v52, %v17060_v55  ;;  %17218 = vst [vmem:[#allocation7_spill] sm:$0xff] %v10886_v25  ;;  %v41_v54 = vmul.f32 %v10892_v59, %v17219_v38  ;;  %v17221_v53 = vrot.slane %v17220_v1, 1  ;;  %v17225_v52 = vld [vmem:[#allocation41_spill] sm:$0xff]  ;;  %v1401_v1 = vrot.slane %v1359_v18, 2 }
 0x1de   :  { %1295 = vrot.lane.b32.xlu1 %v1272_v51, %s8787_s10  ;;  %v132_v51 = vsel %vm130_vm7, %v17226_v20, %v17225_v52  ;;  %v1530_v38 = vsel %vm16807_vm5, %v17229_v36, %v17228_v30  ;;  %v17231_v36 = vld [vmem:[#allocation58_spill] sm:$0xff]  ;;  %v1523_v20 = vrot.slane %v1485_v44, 2 }
 0x1df   :  { %17216 = vst [vmem:[#allocation114_spill] sm:$0xff] %v10883_v60  ;;  %v10901_v39 = vsel %vm508_vm4, %v17223_v41, %v17221_v53  ;;  %v10903_v22 = vpop.permute.xlu0 %420  ;;  %v1396_v53 = vsel %vm16807_vm5, %v1394_v21, %v1395_v3  ;;  %v17232_v30 = vrot.slane %v17231_v36, 1  ;;  %v10938_v21 = vld [vmem:[%s16557_s0 + $0x18] sm:$0xff]  ;;  %v151_v10 = vadd.f32 %v132_v51, %v41_v54 }
 0x1e0   :  { %17224 = vst [vmem:[#allocation69_spill] sm:$0xff] %v10903_v22  ;;  %v10908_v61 = vpop.permute.xlu1 %2547  ;;  %v1360_v22 = vmul.f32 %v17205_v11, %v10811_v48  ;;  %17233 = vst [vmem:[#allocation41_spill] sm:$0xff] %v10938_v21  ;;  %v10942_v11 = vmul.f32 %v10938_v21, %v10886_v25  ;;  %v17234_v3 = vld [vmem:[#allocation44_spill] sm:$0xff] }
 0x1e1   :  { %17227 = vst [vmem:[#allocation59_spill] sm:$0xff] %v10908_v61  ;;  %1553 = vrot.lane.b32.xlu0 %v1530_v38, %s8789_s23  ;;  %v152_v61 = vadd.f32 %v17225_v52, %v42_v35  ;;  %v10929_v18 = vsel %vm508_vm4, %v17232_v30, %v17230_v42  ;;  %v10933_v38 = vmul.f32 %v10892_v59, %v10883_v60  ;;  %v17235_v35 = vld [vmem:[#allocation43_spill] sm:$0xff]  ;;  %v10951_v52 = vld [vmem:[%s16557_s0 + $0x20] sm:$0xff]  ;;  %v10960_v30 = vld [vmem:[%s16557_s0 + $0x28] sm:$0xff] }
 0x1e2   :  { %1419 = vrot.lane.b32.xlu1 %v1396_v53, %s8788_s19  ;;  %v230_v42 = vsel %vm228_vm8, %v17235_v35, %v17234_v3  ;;  %17236 = vst [vmem:[#allocation40_spill] sm:$0xff] %v10951_v52  ;;  %v10955_v36 = vmul.f32 %v10951_v52, %v10883_v60  ;;  %17237 = vst [vmem:[#allocation58_spill] sm:$0xff] %v10960_v30  ;;  %v10964_v54 = vmul.f32 %v10960_v30, %v10886_v25 }
 0x1e3   :  { %v10966_v51 = vpop.permute.xlu0 %655  ;;  %v17240_v35 = vrot.slane %v10777_v49, 2  ;;  %v17242_v30 = vrot.slane %v10020_v43, 2  ;;  %v17243_v52 = vrot.slane %v9985_v8, 2  ;;  %v17244_v49 = vrot.slane %v10878_v27, 2 }
 0x1e4   :  { %17238 = vst [vmem:[#allocation44_spill] sm:$0xff] %v10966_v51  ;;  %v10968_v53 = vpop.permute.xlu1 %422  ;;  %v249_v50 = vadd.f32 %v230_v42, %v151_v10  ;;  %v250_v43 = vadd.f32 %v17234_v3, %v152_v61  ;;  %v1778_v8 = vrot.slane %v10933_v38, 3  ;;  %v1491_v61 = vmul.f32 %v17210_v58, %v10788_v12  ;;  %v17252_v58 = vld [vmem:[#allocation42_spill] sm:$0xff] }
 0x1e5   :  { %17239 = vst [vmem:[#allocation43_spill] sm:$0xff] %v10968_v53  ;;  %v1402_v41 = vsel %vm16807_vm5, %v17240_v35, %v1401_v1  ;;  %v10986_v51 = vsel %vm16807_vm5, %v17243_v52, %v17242_v30  ;;  %v17245_v1 = vrot.slane %v10869_v0, 2  ;;  %v1403_v35 = vrot.slane %v1360_v22, 2  ;;  %v17247_v30 = vld [vmem:[#allocation45_spill] sm:$0xff] }
 0x1e6   :  { %1425 = vrot.lane.b32.xlu0 %v1402_v41, %s8788_s19  ;;  %v1486_v53 = vmul.f32 %v17213_v5, %v10766_v7  ;;  %v17246_v41 = vld [vmem:[#allocation48_spill] sm:$0xff]  ;;  %v8729_v22 = vld [vmem:[%s16557_s0] sm:$0xf8]  ;;  %v11026_v38 = vmul.f32 %v10649_v13, %v17252_v58 }
 0x1e7   :  { %v1532_v44 = vsel %vm16807_vm5, %v17245_v1, %v17244_v49  ;;  %v328_v28 = vsel %vm326_vm9, %v17247_v30, %v17246_v41  ;;  %v1744_v10 = vmul.f32 %v8729_v22, %v10883_v60  ;;  %v11008_v42 = vpop.permute.xlu0 %2541  ;;  %v17250_v49 = vrot.slane %v10835_v14, 2  ;;  %v17256_v30 = vld [vmem:[#allocation50_spill] sm:$0xff] }
 0x1e8   :  { %1555 = vrot.lane.b32.xlu1 %v1532_v44, %s8789_s23  ;;  %17248 = vst [vmem:[#allocation19_spill] sm:$0xff] %v11008_v42  ;;  %v11013_v3 = vpop.permute.xlu1 %657  ;;  %v17251_v22 = vrot.slane %v10805_v16, 2  ;;  %v1526_v21 = vrot.slane %v1486_v53, 2  ;;  %v11030_v14 = vmul.f32 %v10874_v34, %v17252_v58  ;;  %v17253_v44 = vrot.slane %v10045_v63, 2  ;;  %v8730_v53 = vld [vmem:[%s16557_s0 + $0x8] sm:$0xf8] }
 0x1e9   :  { %17249 = vst [vmem:[#allocation48_spill] sm:$0xff] %v11013_v3  ;;  %v1525_v1 = vsel %vm16807_vm5, %v1523_v20, %v17250_v49  ;;  %v347_v20 = vadd.f32 %v328_v28, %v249_v50  ;;  %v348_v49 = vadd.f32 %v17246_v41, %v250_v43  ;;  %v17257_v28 = vrot.slane %v10955_v36, 3 }
 0x1ea   :  { %1549 = vrot.lane.b32.xlu0 %v1525_v1, %s8789_s23  ;;  %v1404_v52 = vsel %vm16807_vm5, %v17251_v22, %v1403_v35  ;;  %v17254_v1 = vrot.slane %v10001_v2, 2  ;;  %v1745_v35 = vmul.f32 %v8730_v53, %v10886_v25  ;;  %v17255_v22 = vld [vmem:[#allocation57_spill] sm:$0xff]  ;;  %v1777_v2 = vrot.slane %v1744_v10, 3 }
 0x1eb   :  { %v426_v50 = vsel %vm424_vm10, %v17256_v30, %v17255_v22  ;;  %v11051_v63 = vsel %vm1776_vm6, %v1778_v8, %v17257_v28  ;;  %v11053_v43 = vpop.permute.xlu0 %2677  ;;  %v1533_v41 = vrot.slane %v1491_v61, 2  ;;  %v17261_v53 = vrot.slane %v10942_v11, 3 }
 0x1ec   :  { %v11038_v16 = vsel %vm16807_vm5, %v17254_v1, %v17253_v44  ;;  %1427 = vrot.lane.b32.xlu1 %v1404_v52, %s8788_s19  ;;  %17258 = vst [vmem:[#allocation45_spill] sm:$0xff] %v11051_v63  ;;  %17259 = vst [vmem:[#allocation42_spill] sm:$0xff] %v11053_v43  ;;  %v446_v44 = vadd.f32 %v17255_v22, %v348_v49  ;;  %v17260_v1 = vrot.slane %v10964_v54, 3  ;;  %v11063_v3 = vpop.permute.xlu1 %2543  ;;  %v17264_v30 = vrot.slane %v10979_v33, 2 }
 0x1ed   :  { %17263 = vst [vmem:[#allocation50_spill] sm:$0xff] %v11063_v3  ;;  %v17265_v28 = vrot.slane %v10975_v40, 2  ;;  %v1617_v61 = vmul.f32 %v17241_v56, %v10744_v57  ;;  %v17266_v49 = vrot.slane %v10869_v0, 2  ;;  %v1492_v43 = vmul.f32 %v17213_v5, %v10811_v48  ;;  %v8732_v0 = vld [vmem:[%s16557_s0 + $0x38] sm:$0x7] }
 0x1ee   :  { %v11061_v52 = vsel %vm1776_vm6, %v17261_v53, %v17260_v1  ;;  %v1659_v1 = vrot.slane %v11026_v38, 2  ;;  %v1663_v53 = vrot.slane %v11030_v14, 2  ;;  %v445_v63 = vadd.f32 %v426_v50, %v347_v20  ;;  %v11092_v5 = vld [vmem:[%s16557_s0 + $0x40] sm:$0xf8] }
 0x1ef   :  { %17262 = vst [vmem:[#allocation57_spill] sm:$0xff] %v11061_v52  ;;  %v1662_v10 = vsel %vm16807_vm5, %v17265_v28, %v17264_v30  ;;  %v1528_v22 = vsel %vm16807_vm5, %v1526_v21, %v17266_v49  ;;  %v1780_v52 = vrot.slane %v1745_v35, 3  ;;  %v8731_v30 = vld [vmem:[%s16557_s0 + $0x30] sm:$0x7]  ;;  %v1751_v21 = vmul.f32 %v8732_v0, %v10886_v25  ;;  %v11097_v14 = vpop.permute.xlu0 %2549  ;;  %v17273_v0 = vld [vmem:[#allocation61_spill] sm:$0xff] }
 0x1f0   :  { %1685 = vrot.lane.b32.xlu0 %v1662_v10, %s8790_s24  ;;  %v1750_v57 = vmul.f32 %v8731_v30, %v10883_v60  ;;  %1551 = vrot.lane.b32.xlu1 %v1528_v22, %s8789_s23  ;;  %v11095_v38 = vsel %vm1776_vm6, %v1777_v2, %v1778_v8  ;;  %17268 = vst [vmem:[#allocation116_spill] sm:$0xff] %v11097_v14  ;;  %v17269_v20 = vrot.slane %v10844_v24, 2  ;;  %v11106_v10 = vpop.permute.xlu1 %2679  ;;  %v1655_v49 = vrot.slane %v1617_v61, 2  ;;  %v17271_v22 = vld [vmem:[#allocation21_spill] sm:$0xff]  ;;  %v17272_v61 = vld [vmem:[#allocation62_spill] sm:$0xff] }
 0x1f1   :  { %17267 = vst [vmem:[#allocation115_spill] sm:$0xff] %v11095_v38  ;;  %v1623_v50 = vmul.f32 %v17241_v56, %v10788_v12  ;;  %v1618_v28 = vmul.f32 %v17252_v58, %v10766_v7  ;;  %17270 = vst [vmem:[#allocation117_spill] sm:$0xff] %v11106_v10  ;;  %v1857_v30 = vmul.f32 %v10614_v23, %v17271_v22  ;;  %v1535_v7 = vrot.slane %v1492_v43, 2 }
 0x1f2   :  { %v1534_v35 = vsel %vm16807_vm5, %v17269_v20, %v1533_v41  ;;  %v11112_v8 = vmul.f32 %v10840_v62, %v17271_v22  ;;  %v1624_v24 = vmul.f32 %v17252_v58, %v10811_v48  ;;  %v552_v2 = vadd.f32 %v10929_v18, %v446_v44  ;;  %v17274_v18 = vld [vmem:[#allocation65_spill] sm:$0xff]  ;;  %v17275_v58 = vld [vmem:[#allocation64_spill] sm:$0xff] }
 0x1f3   :  { %v1664_v56 = vsel %vm16807_vm5, %v1659_v1, %v1663_v53  ;;  %v1855_v12 = vmul.f32 %v17271_v22, %v11092_v5  ;;  %v551_v41 = vadd.f32 %v10901_v39, %v445_v63  ;;  %v664_v20 = vsel %vm130_vm7, %v17273_v0, %v17272_v61  ;;  %v11130_v43 = vpop.permute.xlu0 %651 }
 0x1f4   :  { %1557 = vrot.lane.b32.xlu0 %v1534_v35, %s8789_s23  ;;  %v1787_v25 = vrot.slane %v1750_v57, 3  ;;  %v1789_v60 = vrot.slane %v1751_v21, 3  ;;  %1687 = vrot.lane.b32.xlu1 %v1664_v56, %s8790_s24  ;;  %v684_v48 = vadd.f32 %v17272_v61, %v552_v2  ;;  %v796_v44 = vsel %vm228_vm8, %v17275_v58, %v17274_v18  ;;  %17276 = vst [vmem:[#allocation21_spill] sm:$0xff] %v11130_v43  ;;  %v11132_v14 = vpop.permute.xlu1 %2551 }
 0x1f5   :  { %v1665_v35 = vrot.slane %v1623_v50, 2  ;;  %v1658_v10 = vrot.slane %v1618_v28, 2  ;;  %17277 = vst [vmem:[#allocation62_spill] sm:$0xff] %v11132_v14  ;;  %v17278_v39 = vrot.slane %v10975_v40, 2  ;;  %v1894_v57 = vrot.slane %v1857_v30, 3  ;;  %v17280_v50 = vld [vmem:[#allocation46_spill] sm:$0xff] }
 0x1f6   :  { %v16734_v21 = vrot.slane %v11112_v8, 3  ;;  %v1667_v56 = vrot.slane %v1624_v24, 2  ;;  %v683_v0 = vadd.f32 %v664_v20, %v551_v41  ;;  %v17279_v2 = vrot.slane %v10878_v27, 2  ;;  %v17282_v30 = vld [vmem:[#allocation22_spill] sm:$0xff] }
 0x1f7   :  { %v1657_v63 = vsel %vm16807_vm5, %v1655_v49, %v17278_v39  ;;  %v1893_v58 = vrot.slane %v1855_v12, 3  ;;  %v1858_v28 = vmul.f32 %v10649_v13, %v17280_v50  ;;  %v17281_v43 = vrot.slane %v10942_v11, 3  ;;  %v11165_v11 = vld [vmem:[%s16557_s0 + $0x48] sm:$0xf8] }
 0x1f8   :  { %1681 = vrot.lane.b32.xlu0 %v1657_v63, %s8790_s24  ;;  %v1536_v61 = vsel %vm16807_vm5, %v17279_v2, %v1535_v7  ;;  %v11152_v49 = vmul.f32 %v10874_v34, %v17280_v50  ;;  %v11156_v27 = vmul.f32 %v10614_v23, %v17282_v30  ;;  %v11160_v24 = vmul.f32 %v10840_v62, %v17282_v30  ;;  %v11183_v63 = vpop.permute.xlu0 %787  ;;  %v11185_v2 = vpop.permute.xlu1 %653 }
 0x1f9   :  { %v11147_v40 = vsel %vm1776_vm6, %v1780_v52, %v17281_v43  ;;  %1559 = vrot.lane.b32.xlu1 %v1536_v61, %s8789_s23  ;;  %v11170_v52 = vld [vmem:[%s16557_s0 + $0x70] sm:$0x7]  ;;  %v815_v7 = vadd.f32 %v796_v44, %v683_v0  ;;  %v816_v12 = vadd.f32 %v17274_v18, %v684_v48  ;;  %v17283_v41 = vrot.slane %v10955_v36, 3  ;;  %17287 = vst [vmem:[#allocation64_spill] sm:$0xff] %v11183_v63 }
 0x1fa   :  { %v17285_v43 = vrot.slane %v10964_v54, 3  ;;  %17288 = vst [vmem:[#allocation46_spill] sm:$0xff] %v11185_v2  ;;  %v17289_v61 = vrot.slane %v10979_v33, 2  ;;  %v1660_v48 = vsel %vm16807_vm5, %v1658_v10, %v1659_v1  ;;  %v1668_v36 = vsel %vm16807_vm5, %v1663_v53, %v1667_v56  ;;  %v17290_v10 = vld [vmem:[#allocation70_spill] sm:$0xff] }
 0x1fb   :  { %v11176_v20 = vsel %vm1776_vm6, %v17283_v41, %v1787_v25  ;;  %v1900_v25 = vsel %vm1776_vm6, %v1894_v57, %v16734_v21  ;;  %v1895_v54 = vsel %vm1776_vm6, %v1893_v58, %v1894_v57  ;;  %v1897_v33 = vrot.slane %v1858_v28, 3  ;;  %v17293_v58 = vld [vmem:[#allocation49_spill] sm:$0xff] }
 0x1fc   :  { %17284 = vst [vmem:[#allocation61_spill] sm:$0xff] %v11176_v20  ;;  %v11181_v39 = vsel %vm1776_vm6, %v17285_v43, %v1789_v60  ;;  %v1666_v44 = vsel %vm16807_vm5, %v17289_v61, %v1665_v35  ;;  %v11198_v60 = vld [vmem:[%s16557_s0 + $0x78] sm:$0x7]  ;;  %v1856_v18 = vmul.f32 %v17280_v50, %v11165_v11  ;;  %v1861_v1 = vmul.f32 %v17271_v22, %v11170_v52  ;;  %v11213_v57 = vpop.permute.xlu0 %2673 }
 0x1fd   :  { %17286 = vst [vmem:[#allocation65_spill] sm:$0xff] %v11181_v39  ;;  %1689 = vrot.lane.b32.xlu0 %v1666_v44, %s8790_s24  ;;  %v17291_v35 = vld [vmem:[#allocation68_spill] sm:$0xff]  ;;  %1683 = vrot.lane.b32.xlu1 %v1660_v48, %s8790_s24  ;;  %v1901_v56 = vrot.slane %v11152_v49, 3  ;;  %v2026_v0 = vrot.slane %v11156_v27, 3  ;;  %v2031_v41 = vrot.slane %v11160_v24, 3  ;;  %17292 = vst [vmem:[#allocation22_spill] sm:$0xff] %v11213_v57  ;;  %v1990_v28 = vmul.f32 %v10649_v13, %v17293_v58  ;;  %v11225_v49 = vpop.permute.xlu1 %789 }
 0x1fe   :  { %v928_v53 = vsel %vm326_vm9, %v17291_v35, %v17290_v10  ;;  %v11219_v22 = vmul.f32 %v10874_v34, %v17293_v58  ;;  %v1987_v43 = vmul.f32 %v17282_v30, %v11092_v5  ;;  %v1862_v61 = vmul.f32 %v17280_v50, %v11198_v60  ;;  %17294 = vst [vmem:[#allocation70_spill] sm:$0xff] %v11225_v49  ;;  %v17295_v27 = vld [vmem:[#allocation24_spill] sm:$0xff]  ;;  %v17296_v57 = vld [vmem:[#allocation63_spill] sm:$0xff] }
 0x1ff   :  { %v11229_v24 = vmul.f32 %v10614_v23, %v17295_v27  ;;  %v11233_v44 = vmul.f32 %v10840_v62, %v17295_v27  ;;  %v1988_v48 = vmul.f32 %v17293_v58, %v11165_v11  ;;  %v1993_v35 = vmul.f32 %v17282_v30, %v11170_v52 }
 0x200   :  { %v947_v21 = vadd.f32 %v928_v53, %v815_v7  ;;  %v948_v2 = vadd.f32 %v17290_v10, %v816_v12  ;;  %v1896_v50 = vrot.slane %v1856_v18, 3  ;;  %v1903_v63 = vrot.slane %v1861_v1, 3  ;;  %v11252_v7 = vpop.permute.xlu0 %2809 }
 0x201   :  { %1923 = vrot.lane.b32.xlu0 %v1900_v25, %s8787_s10  ;;  %1691 = vrot.lane.b32.xlu1 %v1668_v36, %s8790_s24  ;;  %v1902_v49 = vsel %vm1776_vm6, %v1897_v33, %v1901_v56  ;;  %v2032_v14 = vsel %vm1776_vm6, %v2026_v0, %v2031_v41  ;;  %v11246_v42 = vmul.f32 %v10649_v13, %v17296_v57  ;;  %v2029_v12 = vrot.slane %v1990_v28, 3  ;;  %v11255_v36 = vpop.permute.xlu1 %2675 }
 0x202   :  { %v11250_v30 = vmul.f32 %v10874_v34, %v17296_v57  ;;  %17297 = vst [vmem:[#allocation68_spill] sm:$0xff] %v11252_v7  ;;  %v2033_v25 = vrot.slane %v11219_v22, 3  ;;  %v2025_v18 = vrot.slane %v1987_v43, 3  ;;  %v1905_v1 = vrot.slane %v1862_v61, 3  ;;  %v17299_v61 = vld [vmem:[#allocation47_spill] sm:$0xff] }
 0x203   :  { %v2158_v10 = vrot.slane %v11229_v24, 3  ;;  %v16739_v53 = vrot.slane %v11233_v44, 3  ;;  %v2028_v3 = vrot.slane %v1988_v48, 3  ;;  %v2035_v20 = vrot.slane %v1993_v35, 3 }
 0x204   :  { %v1898_v39 = vsel %vm1776_vm6, %v1896_v50, %v1897_v33  ;;  %v17298_v38 = vrot.slane %v11112_v8, 3  ;;  %v2119_v22 = vmul.f32 %v17295_v27, %v11092_v5  ;;  %v1994_v43 = vmul.f32 %v17293_v58, %v11198_v60 }
 0x205   :  { %1919 = vrot.lane.b32.xlu0 %v1895_v54, %s8787_s10  ;;  %v1060_v24 = vsel %vm424_vm10, %v17299_v61, %v9989_v15  ;;  %1925 = vrot.lane.b32.xlu1 %v1902_v49, %s8787_s10  ;;  %v2161_v54 = vrot.slane %v11246_v42, 3  ;;  %v11276_v8 = vmul.f32 %v10614_v23, %v9304_v31  ;;  %v2027_v58 = vsel %vm1776_vm6, %v2025_v18, %v2026_v0  ;;  %v11287_v49 = vpop.permute.xlu1 %2811 }
 0x206   :  { %v1904_v28 = vsel %vm1776_vm6, %v17298_v38, %v1903_v63  ;;  %v11278_v38 = vpop.permute.xlu0 %659  ;;  %v2034_v63 = vsel %vm1776_vm6, %v2029_v12, %v2033_v25  ;;  %v1906_v48 = vsel %vm1776_vm6, %v1901_v56, %v1905_v1  ;;  %v11285_v35 = vmul.f32 %v10840_v62, %v9304_v31  ;;  %17301 = vst [vmem:[#allocation24_spill] sm:$0xff] %v11287_v49 }
 0x207   :  { %17300 = vst [vmem:[#allocation49_spill] sm:$0xff] %v11278_v38  ;;  %v11292_v42 = vsel %vm1776_vm6, %v2158_v10, %v16739_v53  ;;  %v11295_v50 = vsel %vm1776_vm6, %v2028_v3, %v2029_v12  ;;  %v11298_v61 = vsel %vm1776_vm6, %v2031_v41, %v2035_v20  ;;  %v2120_v56 = vmul.f32 %v17296_v57, %v11165_v11 }
 0x208   :  { %v1079_v0 = vadd.f32 %v1060_v24, %v947_v21  ;;  %v1080_v18 = vadd.f32 %v9989_v15, %v948_v2  ;;  %v2157_v1 = vrot.slane %v2119_v22, 3  ;;  %v2037_v33 = vrot.slane %v1994_v43, 3 }
 0x209   :  { %2055 = vrot.lane.b32.xlu0 %v2032_v14, %s8788_s19  ;;  %1921 = vrot.lane.b32.xlu1 %v1898_v39, %s8787_s10  ;;  %v17302_v53 = vrot.slane %v11250_v30, 3  ;;  %v2290_v20 = vrot.slane %v11276_v8, 3  ;;  %v2125_v41 = vmul.f32 %v17295_v27, %v11170_v52  ;;  %v2254_v21 = vmul.f32 %v10649_v13, %v9875_v6 }
 0x20a   :  { %v11315_v15 = vpop.permute.xlu0 %2681  ;;  %v2295_v14 = vrot.slane %v11285_v35, 3  ;;  %v2256_v39 = vmul.f32 %v10874_v34, %v9875_v6  ;;  %v2251_v2 = vmul.f32 %v9304_v31, %v11092_v5  ;;  %v2126_v12 = vmul.f32 %v17296_v57, %v11198_v60  ;;  %v11339_v5 = vld [vmem:[%s16557_s0 + $0x40] sm:$0xf0] }
 0x20b   :  { %v11308_v3 = vsel %vm1776_vm6, %v2161_v54, %v17302_v53  ;;  %v11324_v53 = vpop.permute.xlu1 %661  ;;  %v2257_v27 = vmul.f32 %v9304_v31, %v11170_v52  ;;  %v2252_v22 = vmul.f32 %v9875_v6, %v11165_v11  ;;  %v2491_v43 = vmul.f32 %v10614_v23, %v17094_v9  ;;  %17304 = vst [vmem:[#allocation47_spill] sm:$0xff] %v11339_v5 }
 0x20c   :  { %17303 = vst [vmem:[#allocation63_spill] sm:$0xff] %v11324_v53  ;;  %v11334_v24 = vmul.f32 %v10840_v62, %v17094_v9  ;;  %v1186_v57 = vadd.f32 %v11038_v16, %v1080_v18  ;;  %v11344_v31 = vsel %vm1776_vm6, %v2157_v1, %v2158_v10  ;;  %v11347_v11 = vsel %vm1776_vm6, %v2033_v25, %v2037_v33 }
 0x20d   :  { %1927 = vrot.lane.b32.xlu0 %v1904_v28, %s8787_s10  ;;  %v2160_v52 = vrot.slane %v2120_v56, 3  ;;  %v1185_v8 = vadd.f32 %v10986_v51, %v1079_v0  ;;  %2057 = vrot.lane.b32.xlu1 %v2034_v63, %s8788_s19  ;;  %v2167_v35 = vrot.slane %v2125_v41, 3  ;;  %v2293_v38 = vrot.slane %v2254_v21, 3  ;;  %v11376_v41 = vld [vmem:[%s16557_s0 + $0x48] sm:$0xf0] }
 0x20e   :  { %v2258_v53 = vmul.f32 %v9875_v6, %v11198_v60  ;;  %v11353_v7 = vpop.permute.xlu0 %783  ;;  %v2297_v16 = vrot.slane %v2256_v39, 3  ;;  %v2289_v28 = vrot.slane %v2251_v2, 3  ;;  %v2169_v18 = vrot.slane %v2126_v12, 3 }
 0x20f   :  { %17305 = vst [vmem:[#allocation118_spill] sm:$0xff] %v11353_v7  ;;  %v2489_v10 = vmul.f32 %v17094_v9, %v11339_v5  ;;  %v11357_v25 = vpop.permute.xlu1 %2683  ;;  %v2299_v33 = vrot.slane %v2257_v27, 3  ;;  %v2292_v56 = vrot.slane %v2252_v22, 3  ;;  %v2528_v51 = vrot.slane %v2491_v43, 4  ;;  %v11408_v43 = vld [vmem:[%s16557_s0 + $0x70] sm:$0xf] }
 0x210   :  { %v16741_v63 = vrot.slane %v11334_v24, 4  ;;  %v11362_v0 = vsel %vm1776_vm6, %v2290_v20, %v2295_v14  ;;  %v11365_v6 = vsel %vm1776_vm6, %v2160_v52, %v2161_v54  ;;  %v2492_v60 = vmul.f32 %v10649_v13, %v10148_v17  ;;  %v17323_v7 = vld [vmem:[#allocation74_spill] sm:$0xff] }
 0x211   :  { %2051 = vrot.lane.b32.xlu0 %v2027_v58, %s8788_s19  ;;  %v11371_v1 = vmul.f32 %v10874_v34, %v10148_v17  ;;  %1929 = vrot.lane.b32.xlu1 %v1906_v48, %s8787_s10  ;;  %v17307_v58 = vrot.slane %v11233_v44, 3  ;;  %v2301_v54 = vrot.slane %v2258_v53, 3  ;;  %v11386_v39 = vmul.f32 %v10614_v23, %v17107_v45 }
 0x212   :  { %v11390_v2 = vmul.f32 %v10840_v62, %v17107_v45  ;;  %v11392_v12 = vpop.permute.xlu0 %919  ;;  %v11395_v27 = vsel %vm1776_vm6, %v2293_v38, %v2297_v16  ;;  %v11398_v48 = vsel %vm1776_vm6, %v2289_v28, %v2290_v20  ;;  %v17310_v44 = vrot.slane %v11250_v30, 3 }
 0x213   :  { %17306 = vst [vmem:[#allocation119_spill] sm:$0xff] %v11371_v1  ;;  %v11382_v21 = vsel %vm1776_vm6, %v17307_v58, %v2167_v35  ;;  %17309 = vst [vmem:[#allocation121_spill] sm:$0xff] %v11392_v12  ;;  %v2527_v22 = vrot.slane %v2489_v10, 4  ;;  %v11410_v52 = vpop.permute.xlu1 %785  ;;  %v11413_v35 = vsel %vm1776_vm6, %v2295_v14, %v2299_v33  ;;  %v11416_v58 = vsel %vm1776_vm6, %v2292_v56, %v2293_v38  ;;  %v17314_v33 = vld [vmem:[#allocation60_spill] sm:$0xff] }
 0x214   :  { %17308 = vst [vmem:[#allocation120_spill] sm:$0xff] %v11390_v2  ;;  %v11403_v53 = vsel %vm1776_vm6, %v17310_v44, %v2169_v18  ;;  %17311 = vst [vmem:[#allocation122_spill] sm:$0xff] %v11410_v52  ;;  %v11421_v30 = vsel %vm2410_vm11, %v2528_v51, %v16741_v63  ;;  %v2490_v20 = vmul.f32 %v10148_v17, %v11376_v41  ;;  %v2531_v38 = vrot.slane %v2492_v60, 4  ;;  %v17312_v60 = vld [vmem:[#allocation66_spill] sm:$0xff]  ;;  %v17313_v44 = vld [vmem:[#allocation8_spill] sm:$0xff] }
 0x215   :  { %v1298_v28 = vsel %vm130_vm7, %v10064_v4, %v10093_v37  ;;  %v1297_v14 = vsel %vm130_vm7, %v10087_v19, %v10105_v26  ;;  %2187 = vrot.lane.b32.xlu0 %v11292_v42, %s8789_s23  ;;  %2053 = vrot.lane.b32.xlu1 %v11295_v50, %s8788_s19  ;;  %v11437_v10 = vsel %vm1776_vm6, %v2297_v16, %v2301_v54  ;;  %v17327_v12 = vld [vmem:[#allocation28_spill] sm:$0xff] }
 0x216   :  { %v2495_v56 = vmul.f32 %v17094_v9, %v11408_v43  ;;  %v1318_v19 = vadd.f32 %v10093_v37, %v1186_v57  ;;  %v1316_v42 = vadd.f32 %v10105_v26, %v10069_v47  ;;  %v1429_v63 = vsel %vm228_vm8, %v17313_v44, %v17312_v60  ;;  %v11449_v50 = vpop.permute.xlu0 %2805  ;;  %v11464_v47 = vld [vmem:[%s16557_s0 + $0x78] sm:$0xf]  ;;  %v17317_v57 = vld [vmem:[#allocation73_spill] sm:$0xff] }
 0x217   :  { %v11452_v16 = vsel %vm2410_vm11, %v2527_v22, %v2528_v51  ;;  %v1317_v54 = vadd.f32 %v1298_v28, %v1185_v8  ;;  %v1315_v4 = vadd.f32 %v1297_v14, %v17314_v33  ;;  %v11455_v18 = vpop.permute.xlu1 %921  ;;  %v2530_v9 = vrot.slane %v2490_v20, 4  ;;  %17316 = vst [vmem:[#allocation8_spill] sm:$0xff] %v11464_v47  ;;  %v17318_v51 = vld [vmem:[#allocation29_spill] sm:$0xff] }
 0x218   :  { %17315 = vst [vmem:[#allocation66_spill] sm:$0xff] %v11455_v18  ;;  %v11459_v37 = vmul.f32 %v10649_v13, %v10254_v29  ;;  %v1448_v26 = vadd.f32 %v17312_v60, %v1316_v42  ;;  %v1561_v8 = vsel %vm326_vm9, %v17318_v51, %v17317_v57  ;;  %v7649_v22 = vld [vmem:[%s16558_s1 + $0x24] ss:$8 sm:$0x3]  ;;  %v17319_v13 = vrot.slane %v11371_v1, 4  ;;  %v17328_v18 = vld [vmem:[#allocation11_spill] sm:$0xff] }
 0x219   :  { %2059 = vrot.lane.b32.xlu0 %v11298_v61, %s8788_s19  ;;  %v11482_v28 = vmul.f32 %v10874_v34, %v10254_v29  ;;  %v1447_v14 = vadd.f32 %v1429_v63, %v1315_v4  ;;  %2189 = vrot.lane.b32.xlu1 %v11308_v3, %s8789_s23  ;;  %v17320_v33 = vrot.slane %v11390_v2, 4  ;;  %v17321_v42 = vrot.slane %v11386_v39, 4  ;;  %v17329_v2 = vld [vmem:[#allocation31_spill] sm:$0xff] }
 0x21a   :  { %v11478_v20 = vsel %vm2410_vm11, %v2531_v38, %v17319_v13  ;;  %v2537_v61 = vrot.slane %v2495_v56, 4  ;;  %v11495_v44 = vmul.f32 %v17107_v45, %v11339_v5  ;;  %v1580_v51 = vadd.f32 %v17317_v57, %v1448_v26  ;;  %v17322_v13 = vld [vmem:[#allocation77_spill] sm:$0xff]  ;;  %v11501_v4 = vpop.permute.xlu0 %2941  ;;  %v17326_v57 = vld [vmem:[#allocation34_spill] sm:$0xff]  ;;  %v17351_v34 = vld [vmem:[#allocation51_spill] sm:$0xff] }
 0x21b   :  { %v11491_v60 = vsel %vm2410_vm11, %v17321_v42, %v17320_v33  ;;  %v1693_v63 = vsel %vm424_vm10, %v17323_v7, %v17322_v13  ;;  %17324 = vst [vmem:[#allocation60_spill] sm:$0xff] %v11501_v4  ;;  %v11505_v3 = vmul.f32 %v10148_v17, %v11464_v47  ;;  %v11509_v33 = vmul.f32 %v10614_v23, %v17127_v46  ;;  %v11514_v52 = vpop.permute.xlu1 %2807  ;;  %v17333_v7 = vld [vmem:[#allocation9_spill] sm:$0xff]  ;;  %v17353_v1 = vld [vmem:[#allocation23_spill] sm:$0xff] }
 0x21c   :  { %v1579_v56 = vadd.f32 %v1561_v8, %v1447_v14  ;;  %v11512_v42 = vrot.slane %v7649_v22, %v17060_v55  ;;  %v11517_v26 = vsel %vm2410_vm11, %v2530_v9, %v2531_v38  ;;  %v1430_v17 = vsel %vm228_vm8, %v17327_v12, %v17326_v57 }
 0x21d   :  { %v1299_v23 = vsel %vm130_vm7, %v17329_v2, %v17328_v18  ;;  %v1712_v8 = vadd.f32 %v17322_v13, %v1580_v51  ;;  %2183 = vrot.lane.b32.xlu0 %v11344_v31, %s8789_s23  ;;  %v11531_v38 = vrot.slane %v7649_v22, %v17217_v32  ;;  %2061 = vrot.lane.b32.xlu1 %v11347_v11, %s8788_s19  ;;  %v17331_v12 = vrot.slane %v11334_v24, 4  ;;  %v17332_v13 = vld [vmem:[#allocation55_spill] sm:$0xff]  ;;  %v17336_v24 = vld [vmem:[#allocation25_spill] sm:$0xff] }
 0x21e   :  { %17325 = vst [vmem:[#allocation73_spill] sm:$0xff] %v11512_v42  ;;  %v1711_v4 = vadd.f32 %v1693_v63, %v1579_v56  ;;  %v1450_v51 = vadd.f32 %v17326_v57, %v1318_v19  ;;  %v1320_v31 = vadd.f32 %v17328_v18, %v17332_v13  ;;  %v17334_v63 = vld [vmem:[#allocation67_spill] sm:$0xff]  ;;  %v11547_v56 = vpop.permute.xlu0 %791  ;;  %v1449_v14 = vadd.f32 %v1430_v17, %v1317_v54  ;;  %v8733_v19 = vld [vmem:[%s16557_s0 + $0x8] sm:$0xf0] }
 0x21f   :  { %17330 = vst [vmem:[#allocation29_spill] sm:$0xff] %v11531_v38  ;;  %v11538_v9 = vsel %vm2410_vm11, %v17331_v12, %v2537_v61  ;;  %v1431_v22 = vsel %vm228_vm8, %v17334_v63, %v17333_v7  ;;  %17335 = vst [vmem:[#allocation77_spill] sm:$0xff] %v11547_v56  ;;  %v1319_v47 = vadd.f32 %v1299_v23, %v17336_v24  ;;  %v11559_v57 = vpop.permute.xlu1 %2943  ;;  %v17338_v13 = vld [vmem:[#allocation75_spill] sm:$0xff]  ;;  %v17339_v63 = vld [vmem:[#allocation30_spill] sm:$0xff] }
 0x220   :  { %v11553_v61 = vmul.f32 %v10892_v59, %v11512_v42  ;;  %v2379_v18 = vmul.f32 %v8733_v19, %v11531_v38  ;;  %17337 = vst [vmem:[#allocation74_spill] sm:$0xff] %v11559_v57  ;;  %v1452_v12 = vadd.f32 %v17333_v7, %v1320_v31  ;;  %v1563_v54 = vsel %vm326_vm9, %v17339_v63, %v17338_v13  ;;  %v17340_v23 = vld [vmem:[#allocation82_spill] sm:$0xff]  ;;  %v17341_v24 = vld [vmem:[#allocation36_spill] sm:$0xff]  ;;  %v17342_v2 = vld [vmem:[#allocation115_spill] sm:$0xff] }
 0x221   :  { %v1818_v17 = vadd.f32 %v11147_v40, %v1712_v8  ;;  %v1931_v59 = vsel %vm130_vm7, %v17341_v24, %v17340_v23  ;;  %2319 = vrot.lane.b32.xlu0 %v11362_v0, %s8790_s24  ;;  %v1451_v11 = vadd.f32 %v1431_v22, %v1319_v47  ;;  %v1817_v19 = vadd.f32 %v17342_v2, %v1711_v4  ;;  %v17343_v56 = vld [vmem:[#allocation41_spill] sm:$0xff]  ;;  %v17344_v31 = vld [vmem:[#allocation78_spill] sm:$0xff]  ;;  %v17345_v0 = vld [vmem:[#allocation76_spill] sm:$0xff] }
 0x222   :  { %v11574_v57 = vmul.f32 %v17343_v56, %v11531_v38  ;;  %v8734_v7 = vld [vmem:[%s16557_s0] sm:$0xf0]  ;;  %2185 = vrot.lane.b32.xlu1 %v11365_v6, %s8789_s23  ;;  %v1584_v8 = vadd.f32 %v17338_v13, %v1452_v12  ;;  %v1695_v47 = vsel %vm424_vm10, %v17345_v0, %v17344_v31  ;;  %v17346_v2 = vld [vmem:[#allocation90_spill] sm:$0xff]  ;;  %v17347_v22 = vld [vmem:[#allocation20_spill] sm:$0xff]  ;;  %v11590_v63 = vpop.permute.xlu0 %2813  ;;  %v2414_v6 = vrot.slane %v2379_v18, 4 }
 0x223   :  { %v2378_v40 = vmul.f32 %v8734_v7, %v11512_v42  ;;  %v1950_v4 = vadd.f32 %v17340_v23, %v1818_v17  ;;  %v2063_v56 = vsel %vm228_vm8, %v17347_v22, %v17346_v2  ;;  %v1583_v24 = vadd.f32 %v1563_v54, %v1451_v11  ;;  %v17348_v7 = vld [vmem:[#allocation40_spill] sm:$0xff]  ;;  %v11596_v12 = vpop.permute.xlu1 %793  ;;  %v17350_v13 = vld [vmem:[#allocation27_spill] sm:$0xff]  ;;  %v17354_v18 = vld [vmem:[#allocation58_spill] sm:$0xff] }
 0x224   :  { %v1949_v5 = vadd.f32 %v1931_v59, %v1817_v19  ;;  %v11594_v49 = vmul.f32 %v17348_v7, %v11512_v42  ;;  %17349 = vst [vmem:[#allocation34_spill] sm:$0xff] %v11596_v12  ;;  %v1562_v0 = vsel %vm326_vm9, %v17351_v34, %v17350_v13  ;;  %v1716_v17 = vadd.f32 %v17344_v31, %v1584_v8  ;;  %v17352_v22 = vld [vmem:[#allocation100_spill] sm:$0xff]  ;;  %v17355_v8 = vld [vmem:[#allocation109_spill] sm:$0xff]  ;;  %v17356_v31 = vld [vmem:[#allocation26_spill] sm:$0xff] }
 0x225   :  { %v2082_v23 = vadd.f32 %v17346_v2, %v1950_v4  ;;  %v2195_v11 = vsel %vm326_vm9, %v17353_v1, %v17352_v22  ;;  %2191 = vrot.lane.b32.xlu0 %v11382_v21, %s8789_s23  ;;  %v1715_v54 = vadd.f32 %v1695_v47, %v1583_v24  ;;  %v11610_v19 = vmul.f32 %v17354_v18, %v11531_v38  ;;  %v17361_v4 = vld [vmem:[#allocation86_spill] sm:$0xff] }
 0x226   :  { %v2081_v59 = vadd.f32 %v2063_v56, %v1949_v5  ;;  %v16754_v7 = vrot.slane %v11574_v57, 4  ;;  %2321 = vrot.lane.b32.xlu1 %v11395_v27, %s8790_s24  ;;  %v2327_v1 = vsel %vm424_vm10, %v17356_v31, %v17355_v8  ;;  %v2411_v21 = vrot.slane %v2378_v40, 4  ;;  %v11620_v47 = vpop.permute.xlu0 %915  ;;  %v17360_v31 = vld [vmem:[#allocation65_spill] sm:$0xff]  ;;  %v17362_v40 = vld [vmem:[#allocation83_spill] sm:$0xff] }
 0x227   :  { %v2214_v34 = vadd.f32 %v17352_v22, %v2082_v23  ;;  %17357 = vst [vmem:[#allocation28_spill] sm:$0xff] %v11620_v47  ;;  %v1581_v5 = vadd.f32 %v1562_v0, %v1449_v14  ;;  %v1582_v2 = vadd.f32 %v17350_v13, %v1450_v51  ;;  %v11626_v27 = vpop.permute.xlu1 %2815  ;;  %v17358_v23 = vld [vmem:[#allocation33_spill] sm:$0xff]  ;;  %v17359_v22 = vld [vmem:[#allocation14_spill] sm:$0xff]  ;;  %v1822_v12 = vadd.f32 %v17360_v31, %v1716_v17  ;;  %v8736_v17 = vld [vmem:[%s16557_s0 + $0x38] sm:$0xf] }
 0x228   :  { %v2213_v56 = vadd.f32 %v2195_v11, %v2081_v59  ;;  %v2416_v24 = vsel %vm2410_vm11, %v2414_v6, %v16754_v7  ;;  %v1694_v18 = vsel %vm424_vm10, %v17359_v22, %v17358_v23  ;;  %v1933_v47 = vsel %vm130_vm7, %v17362_v40, %v17361_v4  ;;  %v17363_v51 = vld [vmem:[#allocation61_spill] sm:$0xff]  ;;  %v8735_v0 = vld [vmem:[%s16557_s0 + $0x30] sm:$0xf] }
 0x229   :  { %v2346_v14 = vadd.f32 %v17355_v8, %v2214_v34  ;;  %2315 = vrot.lane.b32.xlu0 %v11398_v48, %s8790_s24  ;;  %v1821_v13 = vadd.f32 %v17363_v51, %v1715_v54  ;;  %v2384_v11 = vmul.f32 %v8735_v0, %v11512_v42  ;;  %v2385_v59 = vmul.f32 %v8736_v17, %v11531_v38  ;;  %v17364_v34 = vld [vmem:[#allocation96_spill] sm:$0xff]  ;;  %v17365_v54 = vld [vmem:[#allocation93_spill] sm:$0xff]  ;;  %v17369_v38 = vld [vmem:[#allocation50_spill] sm:$0xff] }
 0x22a   :  { %v2345_v6 = vadd.f32 %v2327_v1, %v2213_v56  ;;  %2193 = vrot.lane.b32.xlu1 %v11403_v53, %s8789_s23  ;;  %v1954_v48 = vadd.f32 %v17361_v4, %v1822_v12  ;;  %v2065_v8 = vsel %vm228_vm8, %v17365_v54, %v17364_v34  ;;  %v17366_v56 = vrot.slane %v11553_v61, 4  ;;  %v11657_v31 = vpop.permute.xlu0 %1051  ;;  %v17367_v4 = vld [vmem:[#allocation106_spill] sm:$0xff]  ;;  %v17368_v54 = vld [vmem:[#allocation103_spill] sm:$0xff] }
 0x22b   :  { %v1713_v40 = vadd.f32 %v1694_v18, %v1581_v5  ;;  %v1714_v51 = vadd.f32 %v17358_v23, %v1582_v2  ;;  %v1953_v0 = vadd.f32 %v1933_v47, %v1821_v13  ;;  %v2419_v53 = vrot.slane %v11610_v19, 4  ;;  %v11661_v17 = vpop.permute.xlu1 %917  ;;  %v17370_v42 = vld [vmem:[#allocation19_spill] sm:$0xff]  ;;  %v17371_v13 = vld [vmem:[#allocation112_spill] sm:$0xff] }
 0x22c   :  { %v2413_v22 = vsel %vm2410_vm11, %v2411_v21, %v17366_v56  ;;  %v2086_v12 = vadd.f32 %v17364_v34, %v1954_v48  ;;  %v2197_v7 = vsel %vm326_vm9, %v17368_v54, %v17367_v4  ;;  %v2452_v1 = vadd.f32 %v2416_v24, %v2346_v14  ;;  %v17372_v48 = vld [vmem:[#allocation32_spill] sm:$0xff] }
 0x22d   :  { %v2565_v21 = vsel %vm130_vm7, %v17370_v42, %v17369_v38  ;;  %2323 = vrot.lane.b32.xlu0 %v11413_v35, %s8790_s24  ;;  %v2085_v5 = vadd.f32 %v2065_v8, %v1953_v0  ;;  %v2451_v47 = vadd.f32 %v2413_v22, %v2345_v6  ;;  %v2421_v2 = vrot.slane %v2384_v11, 4  ;;  %v17373_v42 = vld [vmem:[#allocation22_spill] sm:$0xff]  ;;  %v17374_v8 = vld [vmem:[#allocation57_spill] sm:$0xff]  ;;  %v17375_v11 = vld [vmem:[#allocation79_spill] sm:$0xff] }
 0x22e   :  { %v2423_v23 = vrot.slane %v2385_v59, 4  ;;  %2317 = vrot.lane.b32.xlu1 %v11416_v58, %s8790_s24  ;;  %v2218_v18 = vadd.f32 %v17367_v4, %v2086_v12  ;;  %v2329_v24 = vsel %vm424_vm10, %v17372_v48, %v17371_v13  ;;  %v2584_v14 = vadd.f32 %v17369_v38, %v2452_v1  ;;  %v2938_v35 = vpop.permute.xlu0 %2937  ;;  %v17376_v59 = vld [vmem:[#allocation10_spill] sm:$0xff]  ;;  %v17377_v12 = vld [vmem:[#allocation45_spill] sm:$0xff]  ;;  %v17379_v48 = vld [vmem:[#allocation84_spill] sm:$0xff] }
 0x22f   :  { %v2697_v34 = vsel %vm228_vm8, %v17373_v42, %v11255_v36  ;;  %v1820_v6 = vadd.f32 %v17374_v8, %v1714_v51  ;;  %v1932_v56 = vsel %vm130_vm7, %v17376_v59, %v17375_v11  ;;  %v2217_v58 = vadd.f32 %v2197_v7, %v2085_v5  ;;  %v11686_v0 = vpop.permute.xlu1 %1053  ;;  %v7654_v51 = vld [vmem:[%s16558_s1 + $0x31] ss:$8 sm:$0x3]  ;;  %v17384_v59 = vld [vmem:[#allocation92_spill] sm:$0xff]  ;;  %s8808_s1 = smov 60  }
 0x230   :  { %v2583_v22 = vadd.f32 %v2565_v21, %v2451_v47  ;;  %v1819_v4 = vadd.f32 %v17377_v12, %v1713_v40  ;;  %v2350_v54 = vadd.f32 %v17371_v13, %v2218_v18  ;;  %v2716_v38 = vadd.f32 %v11255_v36, %v2584_v14  ;;  %v17382_v8 = vld [vmem:[#allocation62_spill] sm:$0xff] }
 0x231   :  { %v2829_v1 = vsel %vm326_vm9, %v11449_v50, %v11514_v52  ;;  %2557 = vrot.lane.b32.xlu0 %v11421_v30, %s8787_s10  ;;  %v1952_v7 = vadd.f32 %v17375_v11, %v1820_v6  ;;  %v2349_v21 = vadd.f32 %v2329_v24, %v2217_v58  ;;  %v2424_v40 = vsel %vm2410_vm11, %v2419_v53, %v2423_v23  ;;  %v17380_v24 = vld [vmem:[#allocation81_spill] sm:$0xff] }
 0x232   :  { %v2715_v5 = vadd.f32 %v2697_v34, %v2583_v22  ;;  %2325 = vrot.lane.b32.xlu1 %v11437_v10, %s8790_s24  ;;  %v1951_v36 = vadd.f32 %v1932_v56, %v1819_v4  ;;  %v17378_v50 = vrot.slane %v11594_v49, 4  ;;  %v2848_v18 = vadd.f32 %v11514_v52, %v2716_v38  ;;  %v11709_v13 = vpop.permute.xlu0 %923  ;;  %v17383_v52 = vld [vmem:[#allocation116_spill] sm:$0xff]  ;;  %v17385_v56 = vld [vmem:[#allocation89_spill] sm:$0xff] }
 0x233   :  { %v11713_v30 = vmul.f32 %v10840_v62, %v17127_v46  ;;  %v2064_v23 = vsel %vm228_vm8, %v17380_v24, %v17379_v48  ;;  %v2084_v14 = vadd.f32 %v17379_v48, %v1952_v7  ;;  %v11720_v42 = vrot.slane %v7654_v51, %v17217_v32  ;;  %v2940_v34 = vpop.permute.xlu1 %2939  ;;  %v17387_v7 = vld [vmem:[#allocation102_spill] sm:$0xff] }
 0x234   :  { %v2422_v47 = vsel %vm2410_vm11, %v17378_v50, %v2421_v2  ;;  %v2847_v10 = vadd.f32 %v2829_v1, %v2715_v5  ;;  %v2456_v2 = vadd.f32 %v2424_v40, %v2350_v54  ;;  %v2567_v6 = vsel %vm130_vm7, %v17383_v52, %v17382_v8 }
 0x235   :  { %17381 = vst [vmem:[#allocation11_spill] sm:$0xff] %v11720_v42  ;;  %v2961_v11 = vsel %vm424_vm10, %v2938_v35, %v2940_v34  ;;  %v2980_v62 = vadd.f32 %v2940_v34, %v2848_v18  ;;  %2553 = vrot.lane.b32.xlu0 %v11452_v16, %s8787_s10  ;;  %v2196_v58 = vsel %vm326_vm9, %v17385_v56, %v17384_v59  ;;  %v2792_v24 = vrot.slane %v11509_v33, 4  ;;  %v11911_v33 = vld [vmem:[%s16557_s0 + $0x68] sm:$0xff] }
 0x236   :  { %v2455_v22 = vadd.f32 %v2422_v47, %v2349_v21  ;;  %v11732_v32 = vrot.slane %v7654_v51, %v17060_v55  ;;  %v2979_v12 = vadd.f32 %v2961_v11, %v2847_v10  ;;  %2559 = vrot.lane.b32.xlu1 %v11478_v20, %s8787_s10  ;;  %v2083_v4 = vadd.f32 %v2064_v23, %v1951_v36  ;;  %v2946_v38 = vpop.permute.xlu0 %2945  ;;  %v17388_v21 = vld [vmem:[#allocation99_spill] sm:$0xff] }
 0x237   :  { %v2588_v54 = vadd.f32 %v17382_v8, %v2456_v2  ;;  %v2699_v35 = vsel %vm228_vm8, %v11315_v15, %v11357_v25  ;;  %v3005_v16 = vadd.f32 %v11720_v42, %v2980_v62  ;;  %v2216_v1 = vadd.f32 %v17384_v59, %v2084_v14  ;;  %v11746_v20 = vpop.permute.xlu1 %925 }
 0x238   :  { %17386 = vst [vmem:[#allocation31_spill] sm:$0xff] %v11732_v32  ;;  %v2328_v51 = vsel %vm424_vm10, %v17388_v21, %v17387_v7  ;;  %v2587_v40 = vadd.f32 %v2567_v6, %v2455_v22  ;;  %v3004_v5 = vadd.f32 %v11732_v32, %v2979_v12  ;;  %v2215_v36 = vadd.f32 %v2196_v58, %v2083_v4  ;;  %v17396_v58 = vld [vmem:[#allocation59_spill] sm:$0xff]  ;;  %v17397_v22 = vld [vmem:[#allocation18_spill] sm:$0xff] }
 0x239   :  { %v2720_v50 = vadd.f32 %v11357_v25, %v2588_v54  ;;  %v2831_v15 = vsel %vm326_vm9, %v11590_v63, %v11626_v27  ;;  %v3017_v47 = vmax.f32 %v3005_v16, 0.0  ;;  %2689 = vrot.lane.b32.xlu0 %v11491_v60, %s8788_s19  ;;  %v2622_v23 = vmul.f32 %v10254_v29, %v11376_v41 }
 0x23a   :  { %v2719_v18 = vadd.f32 %v2699_v35, %v2587_v40  ;;  %v3016_v48 = vmax.f32 %v3004_v5, 0.0  ;;  %2555 = vrot.lane.b32.xlu1 %v11517_v26, %s8787_s10  ;;  %v2347_v14 = vadd.f32 %v2328_v51, %v2215_v36  ;;  %v2348_v25 = vadd.f32 %v17387_v7, %v2216_v1  ;;  %v11766_v2 = vpop.permute.xlu0 %1047  ;;  %v17399_v1 = vld [vmem:[#allocation119_spill] sm:$0xff]  ;;  %v17401_v51 = vld [vmem:[#allocation117_spill] sm:$0xff]  ;;  %v17402_v40 = vld [vmem:[#allocation42_spill] sm:$0xff] }
 0x23b   :  { %v17389_v10 = vrot.slane %v11594_v49, 4  ;;  %v17390_v63 = vrot.slane %v11553_v61, 4  ;;  %v2852_v60 = vadd.f32 %v11626_v27, %v2720_v50  ;;  %v17391_v26 = vrot.slane %v11574_v57, 4  ;;  %v2948_v49 = vpop.permute.xlu1 %2947 }
 0x23c   :  { %v2851_v52 = vadd.f32 %v2831_v15, %v2719_v18  ;;  %v11773_v6 = vcombine.low %v3016_v48, %v3017_v47  ;;  %v11775_v11 = vcombine.high %v3016_v48, %v3017_v47  ;;  %v2963_v61 = vsel %vm424_vm10, %v2946_v38, %v2948_v49  ;;  %v11814_v15 = vld [vmem:[%s16557_s0 + $0x58] sm:$0xff] }
 0x23d   :  { %v2418_v34 = vsel %vm2410_vm11, %v17390_v63, %v17389_v10  ;;  %v2420_v8 = vsel %vm2410_vm11, %v17391_v26, %v2419_v53  ;;  %v2984_v62 = vadd.f32 %v2948_v49, %v2852_v60  ;;  %2561 = vrot.lane.b32.xlu0 %v11538_v9, %s8787_s10  ;;  %v17392_v27 = vrot.slane %v11482_v28, 4  ;;  %v17403_v47 = vld [vmem:[#allocation35_spill] sm:$0xff]  ;;  %v17406_v63 = vld [vmem:[#allocation68_spill] sm:$0xff] }
 0x23e   :  { %v17393_v19 = vrot.slane %v11459_v37, 4  ;;  %v17394_v53 = vrot.slane %v11386_v39, 4  ;;  %v17395_v59 = vrot.slane %v11495_v44, 4  ;;  %v2566_v12 = vsel %vm130_vm7, %v17397_v22, %v17396_v58  ;;  %v11798_v38 = vpop.permute.xlu0 %1055 }
 0x23f   :  { %v2983_v4 = vadd.f32 %v2963_v61, %v2851_v52  ;;  %v2797_v9 = vrot.slane %v11713_v30, 4  ;;  %v2627_v54 = vmul.f32 %v17107_v45, %v11408_v43  ;;  %v2454_v35 = vadd.f32 %v2420_v8, %v2348_v25  ;;  %v11809_v50 = vpop.permute.xlu1 %1049  ;;  %v17404_v25 = vld [vmem:[#allocation38_spill] sm:$0xff] }
 0x240   :  { %v2668_v57 = vsel %vm2410_vm11, %v17393_v19, %v17392_v27  ;;  %v2661_v56 = vsel %vm2410_vm11, %v17395_v59, %v17394_v53  ;;  %v2453_v16 = vadd.f32 %v2418_v34, %v2347_v14  ;;  %v3009_v39 = vadd.f32 %v11720_v42, %v2984_v62  ;;  %v17407_v62 = vld [vmem:[#allocation47_spill] sm:$0xff]  ;;  %v17408_v19 = vld [vmem:[#allocation8_spill] sm:$0xff]  ;;  %v17409_v53 = vld [vmem:[#allocation74_spill] sm:$0xff] }
 0x241   :  { %2691 = vrot.lane.b32.xlu1 %v2668_v57, %s8788_s19  ;;  %v17398_v44 = vrot.slane %v11505_v3, 4  ;;  %v17400_v7 = vrot.slane %v17399_v1, 4  ;;  %v2698_v5 = vsel %vm228_vm8, %v17402_v40, %v17401_v51  ;;  %v3008_v36 = vadd.f32 %v11732_v32, %v2983_v4  ;;  %2685 = vrot.lane.b32.xlu0 %v2661_v56, %s8788_s19  ;;  %v17410_v59 = vld [vmem:[#allocation60_spill] sm:$0xff] }
 0x242   :  { %v2662_v45 = vrot.slane %v2622_v23, 4  ;;  %v11818_v3 = vmul.f32 %v11814_v15, %v17403_v47  ;;  %v2585_v18 = vadd.f32 %v2566_v12, %v2453_v16  ;;  %v2586_v48 = vadd.f32 %v17396_v58, %v2454_v35  ;;  %v17405_v23 = vld [vmem:[#allocation24_spill] sm:$0xff]  ;;  %v11836_v61 = vpop.permute.xlu0 %1289 }
 0x243   :  { %v2540_v21 = vsel %vm2410_vm11, %v17400_v7, %v17398_v44  ;;  %v3021_v14 = vmax.f32 %v3009_v39, 0.0  ;;  %v11824_v10 = vmul.f32 %v17404_v25, %v17403_v47  ;;  %v2830_v34 = vsel %vm326_vm9, %v17406_v63, %v17405_v23  ;;  %v11849_v12 = vpop.permute.xlu1 %1057 }
 0x244   :  { %v3020_v60 = vmax.f32 %v3008_v36, 0.0  ;;  %v2798_v26 = vsel %vm2410_vm11, %v2792_v24, %v2797_v9  ;;  %v2669_v8 = vrot.slane %v2627_v54, 4  ;;  %v2717_v52 = vadd.f32 %v2698_v5, %v2585_v18  ;;  %v11870_v36 = vld [vmem:[%s16557_s0 + $0x50] sm:$0xff]  ;;  %v11877_v18 = vld [vmem:[%s16557_s0 + $0x60] sm:$0xff] }
 0x245   :  { %2563 = vrot.lane.b32.xlu1 %v2540_v21, %s8787_s10  ;;  %v2718_v49 = vadd.f32 %v17401_v51, %v2586_v48  ;;  %v2753_v27 = vmul.f32 %v17127_v46, %v17407_v62  ;;  %v2628_v57 = vmul.f32 %v10254_v29, %v17408_v19  ;;  %v2962_v56 = vsel %vm424_vm10, %v17410_v59, %v17409_v53  ;;  %v17413_v21 = vld [vmem:[#allocation120_spill] sm:$0xff] }
 0x246   :  { %v11845_v58 = vcombine.low %v3020_v60, %v3021_v14  ;;  %v11847_v22 = vcombine.high %v3020_v60, %v3021_v14  ;;  %v17411_v4 = vrot.slane %v11459_v37, 4  ;;  %v2849_v35 = vadd.f32 %v2830_v34, %v2717_v52  ;;  %2821 = vrot.lane.b32.xlu0 %v2798_v26, %s8789_s23  ;;  %v11860_v7 = vpop.permute.xlu0 %1285 }
 0x247   :  { %v2850_v16 = vadd.f32 %v17405_v23, %v2718_v49  ;;  %v2795_v29 = vrot.slane %v11818_v3, 4  ;;  %v2799_v39 = vrot.slane %v11824_v10, 4  ;;  %17412 = vst [vmem:[#allocation55_spill] sm:$0xff] %v11860_v7  ;;  %v17414_v37 = vrot.slane %v17413_v21, 4  ;;  %v11865_v40 = vpop.permute.xlu1 %1291 }
 0x248   :  { %v2664_v54 = vsel %vm2410_vm11, %v2662_v45, %v17411_v4  ;;  %v2981_v44 = vadd.f32 %v2962_v56, %v2849_v35  ;;  %v2791_v5 = vrot.slane %v2753_v27, 4  ;;  %v17415_v45 = vld [vmem:[#allocation37_spill] sm:$0xff]  ;;  %v2671_v25 = vrot.slane %v2628_v57, 4 }
 0x249   :  { %2687 = vrot.lane.b32.xlu1 %v2664_v54, %s8788_s19  ;;  %v2982_v1 = vadd.f32 %v17409_v53, %v2850_v16  ;;  %v2670_v51 = vsel %vm2410_vm11, %v17414_v37, %v2669_v8  ;;  %v2887_v3 = vmul.f32 %v11870_v36, %v17415_v45  ;;  %v11881_v48 = vmul.f32 %v11877_v18, %v17415_v45  ;;  %v17417_v54 = vld [vmem:[#allocation39_spill] sm:$0xff] }
 0x24a   :  { %2693 = vrot.lane.b32.xlu0 %v2670_v51, %s8788_s19  ;;  %v2800_v14 = vsel %vm2410_vm11, %v2795_v29, %v2799_v39  ;;  %v2754_v23 = vmul.f32 %v17403_v47, %v11376_v41  ;;  %v8791_v63 = vmov 1983009808   ;;  %v3006_v60 = vadd.f32 %v11732_v32, %v2981_v44  ;;  %v11892_v8 = vpop.permute.xlu0 %1421 }
 0x24b   :  { %v3043_v34 = vunpack.c.l.s4 %v8791_v63  ;;  %v3007_v26 = vadd.f32 %v11720_v42, %v2982_v1  ;;  %v11894_v52 = vpop.permute.xlu1 %1287  ;;  %v2793_v49 = vsel %vm2410_vm11, %v2791_v5, %v2792_v24  ;;  %v2924_v27 = vrot.slane %v2887_v3, 4 }
 0x24c   :  { %v2929_v57 = vrot.slane %v11881_v48, 4  ;;  %v2759_v53 = vmul.f32 %v17127_v46, %v11408_v43  ;;  %v17416_v59 = vrot.slane %v11482_v28, 4  ;;  %v2794_v4 = vrot.slane %v2754_v23, 4 }
 0x24d   :  { %2823 = vrot.lane.b32.xlu1 %v2800_v14, %s8789_s23  ;;  %v2888_v35 = vmul.f32 %v11814_v15, %v17417_v54  ;;  %v2890_v24 = vmul.f32 %v11911_v33, %v17417_v54  ;;  %v3044_v46 = vunpack.c.0.s8 %v3043_v34  ;;  %v3018_v16 = vmax.f32 %v3006_v60, 0.0 }
 0x24e   :  { %2817 = vrot.lane.b32.xlu0 %v2793_v49, %s8789_s23  ;;  %v2672_v56 = vsel %vm2410_vm11, %v17416_v59, %v2671_v25  ;;  %v3019_v44 = vmax.f32 %v3007_v26, 0.0  ;;  %v11916_v28 = vpop.permute.xlu0 %1293  ;;  %v2930_v21 = vsel %vm2410_vm11, %v2924_v27, %v2929_v57  ;;  %v2801_v37 = vrot.slane %v2759_v53, 4  ;;  %v17419_v25 = vld [vmem:[#allocation5_spill] sm:$0xff] }
 0x24f   :  { %17418 = vst [vmem:[#allocation9_spill] sm:$0xff] %v11916_v28  ;;  %v11918_v1 = vpop.permute.xlu1 %1423  ;;  %v2885_v51 = vmul.f32 %v17415_v45, %v17407_v62  ;;  %v2796_v5 = vsel %vm2410_vm11, %v2794_v4, %v2795_v29  ;;  %v2927_v3 = vrot.slane %v2888_v35, 4  ;;  %v2931_v48 = vrot.slane %v2890_v24, 4 }
 0x250   :  { %v2760_v14 = vmul.f32 %v17403_v47, %v17408_v19  ;;  %v11929_v23 = vsub.s32 %v3044_v46, %v17419_v25  ;;  %v3058_v63 = vcombine.low %v3018_v16, %v3019_v44  ;;  %v2802_v62 = vsel %vm2410_vm11, %v2797_v9, %v2801_v37 }
 0x251   :  { %2695 = vrot.lane.b32.xlu1 %v2672_v56, %s8788_s19  ;;  %v2923_v29 = vrot.slane %v2885_v51, 4  ;;  %v2891_v26 = vmul.f32 %v17415_v45, %v11408_v43  ;;  %v2932_v47 = vsel %vm2410_vm11, %v2927_v3, %v2931_v48  ;;  %v2886_v53 = vmul.f32 %v17417_v54, %v11376_v41 }
 0x252   :  { %2953 = vrot.lane.b32.xlu0 %v2930_v21, %s8790_s24  ;;  %17420 = vst [vmem:[#allocation67_spill] sm:$0xff] %v11929_v23  ;;  %v11931_v34 = vpop.permute.xlu0 %1417  ;;  %v2803_v49 = vrot.slane %v2760_v14, 4  ;;  %v3059_v59 = vcombine.high %v3018_v16, %v3019_v44  ;;  %v3066_v56 = vrot.slane %v3058_v63, %v11929_v23  ;;  %v2892_v41 = vmul.f32 %v17417_v54, %v17408_v19 }
 0x253   :  { %17421 = vst [vmem:[#allocation25_spill] sm:$0xff] %v11931_v34  ;;  %v11933_v60 = vpop.permute.xlu1 %1295  ;;  %v2925_v4 = vsel %vm2410_vm11, %v2923_v29, %v2924_v27  ;;  %v2933_v43 = vrot.slane %v2891_v26, 4  ;;  %v2926_v35 = vrot.slane %v2886_v53, 4  ;;  %v3048_v46 = vrot.slane %v11773_v6, %v11929_v23  ;;  %v17487_v34 = vld [vmem:[#allocation113_spill] sm:$0xff] }
 0x254   :  { %17422 = vst [vmem:[#allocation75_spill] sm:$0xff] %v11933_v60  ;;  %v2804_v45 = vsel %vm2410_vm11, %v2799_v39, %v2803_v49  ;;  %v3073_v24 = vrot.slane %v3059_v59, %v11929_v23  ;;  %v7659_v27 = vrot.slane %v3066_v56, 9  ;;  %v3074_v21 = vcombine.high %v3066_v56, %v3066_v56 }
 0x255   :  { %2819 = vrot.lane.b32.xlu1 %v2796_v5, %s8789_s23  ;;  %v2934_v10 = vsel %vm2410_vm11, %v2929_v57, %v2933_v43  ;;  %v2928_v39 = vsel %vm2410_vm11, %v2926_v35, %v2927_v3  ;;  %v2935_v19 = vrot.slane %v2892_v41, 4  ;;  %v3056_v51 = vcombine.high %v3048_v46, %v3048_v46 }
 0x256   :  { %2825 = vrot.lane.b32.xlu0 %v2802_v62, %s8789_s23  ;;  %v11946_v30 = vpop.permute.xlu0 %1553  ;;  %v11971_v37 = vmax.f32 %v3066_v56, %v7659_v27  ;;  %v7661_v6 = vrot.slane %v3073_v24, 9  ;;  %v7660_v14 = vrot.slane %v3074_v21, 9  ;;  %v3055_v3 = vrot.slane %v11775_v11, %v11929_v23 }
 0x257   :  { %v11948_v9 = vpop.permute.xlu1 %1419  ;;  %v2936_v57 = vsel %vm2410_vm11, %v2931_v48, %v2935_v19  ;;  %v3084_v25 = vrot.slane %v11845_v58, %v11929_v23  ;;  %v7656_v29 = vrot.slane %v3056_v51, 9  ;;  %v7655_v49 = vrot.slane %v3048_v46, 9 }
 0x258   :  { %17423 = vst [vmem:[#allocation30_spill] sm:$0xff] %v11948_v9  ;;  %17426 = vst [vmem:[#allocation115_spill] sm:$0xff] %v11971_v37  ;;  %v11985_v62 = vmax.f32 %v3073_v24, %v7661_v6  ;;  %v3075_v53 = vcombine.high %v3073_v24, %v3073_v24  ;;  %v7657_v48 = vrot.slane %v3055_v3, 9  ;;  %v17488_v9 = vld [vmem:[#allocation111_spill] sm:$0xff] }
 0x259   :  { %2955 = vrot.lane.b32.xlu1 %v2932_v47, %s8790_s24  ;;  %v11989_v47 = vmax.f32 %v3074_v21, %v7660_v14  ;;  %v11997_v58 = vmax.f32 %v3056_v51, %v7656_v29  ;;  %v3092_v59 = vcombine.high %v3084_v25, %v3084_v25  ;;  %v3057_v21 = vcombine.high %v3055_v3, %v3055_v3 }
 0x25a   :  { %2949 = vrot.lane.b32.xlu0 %v2925_v4, %s8790_s24  ;;  %v11961_v16 = vpop.permute.xlu0 %1425  ;;  %17428 = vst [vmem:[#allocation78_spill] sm:$0xff] %v11985_v62  ;;  %v12001_v4 = vmax.f32 %v3048_v46, %v7655_v49  ;;  %v7662_v43 = vrot.slane %v3075_v53, 9  ;;  %v12011_v41 = vmax.f32 %v3055_v3, %v7657_v48  ;;  %v7663_v46 = vrot.slane %v3084_v25, 9 }
 0x25b   :  { %17424 = vst [vmem:[#allocation82_spill] sm:$0xff] %v11961_v16  ;;  %v11963_v44 = vpop.permute.xlu1 %1555  ;;  %17430 = vst [vmem:[#allocation90_spill] sm:$0xff] %v11989_v47  ;;  %v7664_v24 = vrot.slane %v3092_v59, 9  ;;  %v7658_v14 = vrot.slane %v3057_v21, 9  ;;  %v17470_v16 = vld [vmem:[#allocation91_spill] sm:$0xff] }
 0x25c   :  { %17432 = vst [vmem:[#allocation40_spill] sm:$0xff] %v11997_v58  ;;  %17433 = vst [vmem:[#allocation27_spill] sm:$0xff] %v12001_v4  ;;  %v12027_v51 = vmax.f32 %v3084_v25, %v7663_v46 }
 0x25d   :  { %2827 = vrot.lane.b32.xlu1 %v2804_v45, %s8789_s23  ;;  %v3091_v45 = vrot.slane %v11847_v22, %v11929_v23  ;;  %17435 = vst [vmem:[#allocation100_spill] sm:$0xff] %v12011_v41  ;;  %v12023_v22 = vmax.f32 %v3092_v59, %v7664_v24  ;;  %s8800_s23 = smov 20  }
 0x25e   :  { %2957 = vrot.lane.b32.xlu0 %v2934_v10, %s8790_s24  ;;  %v11969_v54 = vpop.permute.xlu0 %1549  ;;  %v12015_v10 = vmax.f32 %v3075_v53, %v7662_v43  ;;  %17441 = vst [vmem:[#allocation14_spill] sm:$0xff] %v12027_v51  ;;  %v12039_v53 = vmax.f32 %v3057_v21, %v7658_v14  ;;  %v17454_v14 = vld [vmem:[#allocation56_spill] sm:$0xff] }
 0x25f   :  { %17425 = vst [vmem:[#allocation36_spill] sm:$0xff] %v11969_v54  ;;  %v11973_v5 = vpop.permute.xlu1 %1427  ;;  %17439 = vst [vmem:[#allocation26_spill] sm:$0xff] %v12023_v22  ;;  %v7665_v19 = vrot.slane %v3091_v45, 9 }
 0x260   :  { %17427 = vst [vmem:[#allocation41_spill] sm:$0xff] %v11973_v5  ;;  %17437 = vst [vmem:[#allocation58_spill] sm:$0xff] %v12015_v10 }
 0x261   :  { %2951 = vrot.lane.b32.xlu1 %v2928_v39, %s8790_s24  ;;  %v12035_v29 = vmax.f32 %v3091_v45, %v7665_v19  ;;  %17445 = vst [vmem:[#allocation61_spill] sm:$0xff] %v12039_v53 }
 0x262   :  { %3300 = vrot.lane.b32.xlu0 %v11971_v37, %s8787_s10  ;;  %v11983_v63 = vpop.permute.xlu0 %1685 }
 0x263   :  { %v11987_v26 = vpop.permute.xlu1 %1551  ;;  %17443 = vst [vmem:[#allocation86_spill] sm:$0xff] %v12035_v29 }
 0x264   :  { %17429 = vst [vmem:[#allocation76_spill] sm:$0xff] %v11987_v26 }
 0x265   :  { %2959 = vrot.lane.b32.xlu1 %v2936_v57, %s8790_s24  ;;  %v3093_v57 = vcombine.high %v3091_v45, %v3091_v45 }
 0x266   :  { %3304 = vrot.lane.b32.xlu0 %v11985_v62, %s8787_s10  ;;  %v11995_v11 = vpop.permute.xlu0 %1557 }
 0x267   :  { %17431 = vst [vmem:[#allocation20_spill] sm:$0xff] %v11995_v11  ;;  %v11999_v56 = vpop.permute.xlu1 %1687  ;;  %v7666_v48 = vrot.slane %v3093_v57, 9 }
 0x269   :  { %3302 = vrot.lane.b32.xlu1 %v11989_v47, %s8787_s10  ;;  %v12049_v43 = vmax.f32 %v3093_v57, %v7666_v48 }
 0x26a   :  { %3294 = vrot.lane.b32.xlu0 %v11997_v58, %s8787_s10  ;;  %v12009_v35 = vpop.permute.xlu0 %1681  ;;  %v8744_v58 = vld [vmem:[%s16557_s0 + $0x78] sm:$0x1] }
 0x26b   :  { %17434 = vst [vmem:[#allocation51_spill] sm:$0xff] %v12009_v35  ;;  %v12013_v27 = vpop.permute.xlu1 %1559  ;;  %17448 = vst [vmem:[#allocation106_spill] sm:$0xff] %v12049_v43 }
 0x26c   :  { %17436 = vst [vmem:[#allocation23_spill] sm:$0xff] %v12013_v27  ;;  %v17467_v27 = vld [vmem:[#allocation88_spill] sm:$0xff] }
 0x26d   :  { %3292 = vrot.lane.b32.xlu1 %v12001_v4, %s8787_s10 }
 0x26e   :  { %3296 = vrot.lane.b32.xlu0 %v12011_v41, %s8787_s10  ;;  %v8743_v41 = vld [vmem:[%s16557_s0 + $0x70] sm:$0x1] }
 0x26f   :  { %v12021_v39 = vpop.permute.xlu0 %1689  ;;  %v12025_v6 = vpop.permute.xlu1 %1683  ;;  %v490_v4 = vmul.f32 %v8743_v41, %v17454_v14  ;;  %v17460_v41 = vld [vmem:[#allocation52_spill] sm:$0xff] }
 0x270   :  { %17438 = vst [vmem:[#allocation109_spill] sm:$0xff] %v12021_v39  ;;  %17440 = vst [vmem:[#allocation33_spill] sm:$0xff] %v12025_v6  ;;  %v17461_v39 = vld [vmem:[#allocation80_spill] sm:$0xff]  ;;  %v17469_v6 = vld [vmem:[#allocation94_spill] sm:$0xff] }
 0x271   :  { %3306 = vrot.lane.b32.xlu1 %v12015_v10, %s8787_s10  ;;  %v8741_v10 = vld [vmem:[%s16557_s0 + $0x40] sm:$0xfe] }
 0x272   :  { %3310 = vrot.lane.b32.xlu0 %v12023_v22, %s8787_s10  ;;  %v484_v62 = vmul.f32 %v8741_v10, %v17454_v14 }
 0x273   :  { %v12033_v3 = vpop.permute.xlu0 %1923  ;;  %v12037_v49 = vpop.permute.xlu1 %1691 }
 0x274   :  { %17442 = vst [vmem:[#allocation65_spill] sm:$0xff] %v12033_v3  ;;  %17444 = vst [vmem:[#allocation83_spill] sm:$0xff] %v12037_v49  ;;  %v17462_v49 = vld [vmem:[#allocation16_spill] sm:$0xff] }
 0x275   :  { %3308 = vrot.lane.b32.xlu1 %v12027_v51, %s8787_s10  ;;  %v17455_v51 = vld [vmem:[#allocation54_spill] sm:$0xff]  ;;  %v17482_v3 = vld [vmem:[#allocation108_spill] sm:$0xff] }
 0x276   :  { %3312 = vrot.lane.b32.xlu0 %v12035_v29, %s8787_s10  ;;  %v486_v29 = vmul.f32 %v11870_v36, %v17454_v14  ;;  %v487_v57 = vmul.f32 %v11814_v15, %v17455_v51  ;;  %v489_v22 = vmul.f32 %v11911_v33, %v17455_v51  ;;  %v491_v47 = vmul.f32 %v8744_v58, %v17455_v51 }
 0x277   :  { %v12045_v25 = vpop.permute.xlu0 %1919  ;;  %v12047_v59 = vpop.permute.xlu1 %1925  ;;  %v135_v58 = vsel %vm130_vm7, %v17462_v49, %v17461_v39 }
 0x278   :  { %17446 = vst [vmem:[#allocation96_spill] sm:$0xff] %v12045_v25  ;;  %17447 = vst [vmem:[#allocation93_spill] sm:$0xff] %v12047_v59  ;;  %v524_v10 = vrot.slane %v486_v29, 1  ;;  %v527_v23 = vrot.slane %v487_v57, 1  ;;  %v17465_v57 = vld [vmem:[#allocation85_spill] sm:$0xff]  ;;  %v17483_v59 = vld [vmem:[#allocation15_spill] sm:$0xff] }
 0x279   :  { %3298 = vrot.lane.b32.xlu1 %v12039_v53, %s8787_s10  ;;  %v8742_v53 = vld [vmem:[%s16557_s0 + $0x48] sm:$0xfe] }
 0x27a   :  { %v485_v55 = vmul.f32 %v8742_v53, %v17455_v51  ;;  %v531_v53 = vrot.slane %v489_v22, 1  ;;  %v8745_v51 = vld [vmem:[%s16557_s0 + $0x40] sm:$0xff]  ;;  %v535_v22 = vrot.slane %v491_v47, 1 }
 0x27b   :  { %v12053_v45 = vpop.permute.xlu0 %2055  ;;  %v12055_v24 = vpop.permute.xlu1 %1921 }
 0x27c   :  { %17449 = vst [vmem:[#allocation103_spill] sm:$0xff] %v12053_v45  ;;  %17450 = vst [vmem:[#allocation50_spill] sm:$0xff] %v12055_v24  ;;  %v533_v24 = vrot.slane %v490_v4, 1  ;;  %v17464_v4 = vld [vmem:[#allocation87_spill] sm:$0xff]  ;;  %v17468_v45 = vld [vmem:[#allocation12_spill] sm:$0xff] }
 0x27d   :  { %3314 = vrot.lane.b32.xlu1 %v12049_v43, %s8787_s10  ;;  %v488_v43 = vmul.f32 %v11877_v18, %v17454_v14  ;;  %v48_v14 = vmul.f32 %v11814_v15, %v17460_v41 }
 0x27f   :  { %v12057_v46 = vpop.permute.xlu0 %1927  ;;  %v12059_v21 = vpop.permute.xlu1 %2057  ;;  %v529_v42 = vrot.slane %v488_v43, 1 }
 0x280   :  { %17451 = vst [vmem:[#allocation19_spill] sm:$0xff] %v12057_v46  ;;  %17452 = vst [vmem:[#allocation112_spill] sm:$0xff] %v12059_v21  ;;  %v523_v46 = vrot.slane %v484_v62, 1 }
 0x281   :  { %v12120_v11 = vsel %vm508_vm4, %v524_v10, %v529_v42 }
 0x282   :  { %v12126_v47 = vsel %vm508_vm4, %v523_v46, %v524_v10  ;;  %v136_v46 = vsel %vm130_vm7, %v17470_v16, %v17469_v6  ;;  %v17473_v10 = vld [vmem:[#allocation13_spill] sm:$0xff] }
 0x283   :  { %v12061_v19 = vpop.permute.xlu0 %2051  ;;  %v12067_v48 = vpop.permute.xlu1 %1929 }
 0x284   :  { %17453 = vst [vmem:[#allocation32_spill] sm:$0xff] %v12061_v19  ;;  %17456 = vst [vmem:[#allocation22_spill] sm:$0xff] %v12067_v48  ;;  %v526_v48 = vrot.slane %v485_v55, 1  ;;  %v17459_v19 = vld [vmem:[#allocation53_spill] sm:$0xff] }
 0x285   :  { %v47_v25 = vmul.f32 %v11870_v36, %v17459_v19  ;;  %v45_v29 = vmul.f32 %v8745_v51, %v17459_v19  ;;  %v8746_v55 = vld [vmem:[%s16557_s0 + $0x48] sm:$0xff]  ;;  %v49_v49 = vmul.f32 %v11877_v18, %v17459_v19  ;;  %v158_v19 = vadd.f32 %v17461_v39, %v48_v14 }
 0x286   :  { %v46_v62 = vmul.f32 %v8746_v55, %v17460_v41  ;;  %v12123_v55 = vsel %vm508_vm4, %v527_v23, %v531_v53 }
 0x287   :  { %v12089_v37 = vpop.permute.xlu0 %2187  ;;  %v12091_v32 = vpop.permute.xlu1 %2053  ;;  %v256_v39 = vadd.f32 %v17467_v27, %v158_v19 }
 0x288   :  { %17457 = vst [vmem:[#allocation57_spill] sm:$0xff] %v12089_v37  ;;  %17458 = vst [vmem:[#allocation79_spill] sm:$0xff] %v12091_v32  ;;  %v134_v32 = vsel %vm130_vm7, %v17465_v57, %v17464_v4  ;;  %v50_v37 = vmul.f32 %v11911_v33, %v17460_v41  ;;  %v157_v57 = vadd.f32 %v135_v58, %v47_v25  ;;  %v17476_v58 = vld [vmem:[#allocation72_spill] sm:$0xff] }
 0x289   :  { %v233_v41 = vsel %vm228_vm8, %v17468_v45, %v17467_v27  ;;  %v155_v21 = vadd.f32 %v134_v32, %v45_v29  ;;  %v156_v35 = vadd.f32 %v17464_v4, %v46_v62  ;;  %v1121_v29 = vmul.f32 %v11814_v15, %v17476_v58  ;;  %v17478_v4 = vld [vmem:[#allocation95_spill] sm:$0xff] }
 0x28a   :  { %v255_v16 = vadd.f32 %v233_v41, %v157_v57  ;;  %v1123_v27 = vmul.f32 %v11911_v33, %v17476_v58  ;;  %v159_v62 = vadd.f32 %v136_v46, %v49_v49  ;;  %v17479_v46 = vld [vmem:[#allocation104_spill] sm:$0xff] }
 0x28b   :  { %v12108_v43 = vpop.permute.xlu0 %2059  ;;  %v12117_v51 = vpop.permute.xlu1 %2189 }
 0x28c   :  { %17463 = vst [vmem:[#allocation10_spill] sm:$0xff] %v12108_v43  ;;  %17466 = vst [vmem:[#allocation45_spill] sm:$0xff] %v12117_v51  ;;  %v12129_v43 = vsel %vm508_vm4, %v526_v48, %v527_v23  ;;  %v12136_v51 = vsel %vm508_vm4, %v529_v42, %v533_v24  ;;  %v12143_v23 = vsel %vm508_vm4, %v531_v53, %v535_v22  ;;  %v17472_v48 = vld [vmem:[#allocation98_spill] sm:$0xff]  ;;  %v17474_v42 = vld [vmem:[#allocation71_spill] sm:$0xff]  ;;  %vm3828_vm4 = vcmask 1045509  }
 0x28d   :  { %v331_v45 = vsel %vm326_vm9, %v17473_v10, %v17472_v48  ;;  %v1120_v32 = vmul.f32 %v11870_v36, %v17474_v42  ;;  %v1122_v24 = vmul.f32 %v11877_v18, %v17474_v42  ;;  %v160_v53 = vadd.f32 %v17469_v6, %v50_v37  ;;  %v17477_v22 = vld [vmem:[#allocation97_spill] sm:$0xff]  ;;  %v8748_v37 = vld [vmem:[%s16557_s0 + $0x48] sm:$0xfc] }
 0x28e   :  { %v232_v19 = vsel %vm228_vm8, %v17478_v4, %v17477_v22  ;;  %v8747_v10 = vld [vmem:[%s16557_s0 + $0x40] sm:$0xfc]  ;;  %v1119_v6 = vmul.f32 %v8748_v37, %v17476_v58  ;;  %v254_v57 = vadd.f32 %v17477_v22, %v156_v35  ;;  %v353_v41 = vadd.f32 %v331_v45, %v255_v16  ;;  %v8749_v37 = vld [vmem:[%s16557_s0 + $0x70] sm:$0x3] }
 0x28f   :  { %v12145_v25 = vpop.permute.xlu0 %2183  ;;  %v12155_v14 = vpop.permute.xlu1 %2061  ;;  %v354_v49 = vadd.f32 %v17472_v48, %v256_v39  ;;  %v1158_v54 = vrot.slane %v1120_v32, 2  ;;  %v1163_v26 = vrot.slane %v1122_v24, 2  ;;  %v1124_v35 = vmul.f32 %v8749_v37, %v17474_v42  ;;  %v17485_v39 = vld [vmem:[#allocation107_spill] sm:$0xff]  ;;  %v17486_v48 = vld [vmem:[#allocation105_spill] sm:$0xff] }
 0x290   :  { %17471 = vst [vmem:[#allocation84_spill] sm:$0xff] %v12145_v25  ;;  %17475 = vst [vmem:[#allocation81_spill] sm:$0xff] %v12155_v14  ;;  %v1118_v14 = vmul.f32 %v8747_v10, %v17474_v42  ;;  %v17480_v25 = vld [vmem:[#allocation101_spill] sm:$0xff]  ;;  %v429_v10 = vsel %vm424_vm10, %v17483_v59, %v17482_v3  ;;  %v1161_v16 = vrot.slane %v1121_v29, 2  ;;  %v1165_v22 = vrot.slane %v1123_v27, 2 }
 0x291   :  { %v234_v4 = vsel %vm228_vm8, %v17480_v25, %v17479_v46  ;;  %v330_v25 = vsel %vm326_vm9, %v17486_v48, %v17485_v39  ;;  %v8750_v59 = vld [vmem:[%s16557_s0 + $0x78] sm:$0x3]  ;;  %v253_v24 = vadd.f32 %v232_v19, %v155_v21  ;;  %v1160_v60 = vrot.slane %v1119_v6, 2 }
 0x292   :  { %v1125_v32 = vmul.f32 %v8750_v59, %v17476_v58  ;;  %v1157_v28 = vrot.slane %v1118_v14, 2  ;;  %v257_v42 = vadd.f32 %v234_v4, %v159_v62  ;;  %v451_v37 = vadd.f32 %v429_v10, %v353_v41  ;;  %v17490_v14 = vld [vmem:[#allocation110_spill] sm:$0xff]  ;;  %v17491_v62 = vld [vmem:[#allocation17_spill] sm:$0xff]  ;;  %v17492_v4 = vld [vmem:[#allocation43_spill] sm:$0xff] }
 0x293   :  { %v12178_v5 = vpop.permute.xlu0 %2319  ;;  %v428_v29 = vsel %vm424_vm10, %v17488_v9, %v17487_v34  ;;  %v351_v48 = vadd.f32 %v330_v25, %v253_v24  ;;  %v352_v7 = vadd.f32 %v17485_v39, %v254_v57  ;;  %v12205_v58 = vsel %vm16807_vm5, %v1158_v54, %v1163_v26  ;;  %v17493_v10 = vld [vmem:[#allocation69_spill] sm:$0xff]  ;;  %v17497_v24 = vld [vmem:[#allocation44_spill] sm:$0xff] }
 0x294   :  { %17481 = vst [vmem:[#allocation62_spill] sm:$0xff] %v12178_v5  ;;  %v12187_v45 = vpop.permute.xlu1 %2185  ;;  %v258_v5 = vadd.f32 %v17479_v46, %v160_v53  ;;  %v1167_v21 = vrot.slane %v1124_v35, 2  ;;  %v332_v19 = vsel %vm326_vm9, %v17491_v62, %v17490_v14  ;;  %v12214_v6 = vsel %vm16807_vm5, %v1161_v16, %v1165_v22  ;;  %v17499_v62 = vld [vmem:[#allocation70_spill] sm:$0xff] }
 0x295   :  { %17484 = vst [vmem:[#allocation116_spill] sm:$0xff] %v12187_v45  ;;  %v452_v45 = vadd.f32 %v17482_v3, %v354_v49  ;;  %v1169_v9 = vrot.slane %v1125_v32, 2  ;;  %v449_v41 = vadd.f32 %v428_v29, %v351_v48  ;;  %v450_v49 = vadd.f32 %v17487_v34, %v352_v7 }
 0x296   :  { %v356_v3 = vadd.f32 %v17490_v14, %v258_v5  ;;  %v12218_v57 = vsel %vm16807_vm5, %v1157_v28, %v1158_v54  ;;  %v12221_v46 = vsel %vm16807_vm5, %v1160_v60, %v1161_v16  ;;  %v430_v35 = vsel %vm424_vm10, %v17493_v10, %v17492_v4  ;;  %v17494_v28 = vld [vmem:[#allocation114_spill] sm:$0xff]  ;;  %v17496_v16 = vld [vmem:[#allocation48_spill] sm:$0xff] }
 0x297   :  { %v12201_v27 = vpop.permute.xlu0 %2191  ;;  %v558_v5 = vadd.f32 %v12123_v55, %v452_v45  ;;  %v557_v25 = vadd.f32 %v12120_v11, %v451_v37  ;;  %v355_v32 = vadd.f32 %v332_v19, %v257_v42  ;;  %v12232_v7 = vsel %vm16807_vm5, %v1163_v26, %v1167_v21  ;;  %v17498_v45 = vld [vmem:[#allocation7_spill] sm:$0xff]  ;;  %v8751_v21 = vld [vmem:[%s16557_s0 + $0x40] sm:$0xf8]  ;;  %v17500_v19 = vld [vmem:[#allocation64_spill] sm:$0xff] }
 0x298   :  { %17489 = vst [vmem:[#allocation92_spill] sm:$0xff] %v12201_v27  ;;  %v12207_v53 = vpop.permute.xlu1 %2321  ;;  %v454_v39 = vadd.f32 %v17492_v4, %v356_v3  ;;  %v1754_v34 = vmul.f32 %v11870_v36, %v17494_v28  ;;  %v1756_v60 = vmul.f32 %v11877_v18, %v17494_v28  ;;  %v667_v55 = vsel %vm130_vm7, %v17497_v24, %v17496_v16 }
 0x299   :  { %v12244_v11 = vsel %vm16807_vm5, %v1165_v22, %v1169_v9  ;;  %v1755_v42 = vmul.f32 %v11814_v15, %v17498_v45  ;;  %v12250_v26 = vmul.f32 %v11911_v33, %v17498_v45  ;;  %v453_v37 = vadd.f32 %v430_v35, %v355_v32  ;;  %v8753_v35 = vld [vmem:[%s16557_s0 + $0x70] sm:$0x7] }
 0x29a   :  { %v556_v29 = vadd.f32 %v12129_v43, %v450_v49  ;;  %v555_v48 = vadd.f32 %v12126_v47, %v449_v41  ;;  %v1752_v14 = vmul.f32 %v8751_v21, %v17494_v28  ;;  %v690_v22 = vadd.f32 %v17496_v16, %v558_v5  ;;  %v8752_v43 = vld [vmem:[%s16557_s0 + $0x48] sm:$0xf8]  ;;  %v17503_v16 = vld [vmem:[#allocation121_spill] sm:$0xff] }
 0x29b   :  { %v12229_v59 = vpop.permute.xlu0 %2315  ;;  %v799_v3 = vsel %vm228_vm8, %v17500_v19, %v17499_v62  ;;  %v560_v9 = vadd.f32 %v12143_v23, %v454_v39  ;;  %v1753_v47 = vmul.f32 %v8752_v43, %v17498_v45  ;;  %v689_v49 = vadd.f32 %v667_v55, %v557_v25  ;;  %v17502_v39 = vld [vmem:[#allocation66_spill] sm:$0xff] }
 0x29c   :  { %v12238_v54 = vpop.permute.xlu1 %2193  ;;  %v1792_v4 = vrot.slane %v1754_v34, 3  ;;  %v1797_v10 = vrot.slane %v1756_v60, 3  ;;  %v1758_v5 = vmul.f32 %v8753_v35, %v17494_v28  ;;  %v822_v23 = vadd.f32 %v17499_v62, %v690_v22  ;;  %v17504_v25 = vld [vmem:[#allocation46_spill] sm:$0xff]  ;;  %v17505_v34 = vld [vmem:[#allocation21_spill] sm:$0xff] }
 0x29d   :  { %17495 = vst [vmem:[#allocation89_spill] sm:$0xff] %v12238_v54  ;;  %v931_v24 = vsel %vm326_vm9, %v17503_v16, %v17502_v39  ;;  %v1795_v21 = vrot.slane %v1755_v42, 3  ;;  %v666_v60 = vsel %vm130_vm7, %v17505_v34, %v17504_v25  ;;  %v821_v55 = vadd.f32 %v799_v3, %v689_v49  ;;  %v8754_v42 = vld [vmem:[%s16557_s0 + $0x78] sm:$0x7]  ;;  %v17507_v3 = vld [vmem:[#allocation49_spill] sm:$0xff] }
 0x29e   :  { %v559_v43 = vadd.f32 %v12136_v51, %v453_v37  ;;  %v954_v28 = vadd.f32 %v17502_v39, %v822_v23  ;;  %v1063_v22 = vsel %vm424_vm10, %v11657_v31, %v11686_v0  ;;  %v1794_v62 = vrot.slane %v1753_v47, 3  ;;  %v17506_v34 = vld [vmem:[#allocation63_spill] sm:$0xff]  ;;  %v17509_v47 = vld [vmem:[#allocation122_spill] sm:$0xff] }
 0x29f   :  { %v12267_v41 = vpop.permute.xlu0 %2323  ;;  %v1759_v35 = vmul.f32 %v8754_v42, %v17498_v45  ;;  %v668_v51 = vsel %vm130_vm7, %v17507_v3, %v17506_v34  ;;  %v953_v37 = vadd.f32 %v931_v24, %v821_v55  ;;  %v1801_v49 = vrot.slane %v1758_v5, 3  ;;  %v17510_v39 = vld [vmem:[#allocation118_spill] sm:$0xff]  ;;  %v17513_v5 = vld [vmem:[#allocation77_spill] sm:$0xff] }
 0x2a0   :  { %17501 = vst [vmem:[#allocation102_spill] sm:$0xff] %v12267_v41  ;;  %v12273_v32 = vpop.permute.xlu1 %2317  ;;  %v1791_v41 = vrot.slane %v1752_v14, 3  ;;  %v12298_v14 = vsel %vm1776_vm6, %v1792_v4, %v1797_v10  ;;  %v688_v31 = vadd.f32 %v17504_v25, %v556_v29  ;;  %v798_v19 = vsel %vm228_vm8, %v17510_v39, %v17509_v47  ;;  %v17512_v3 = vld [vmem:[#allocation34_spill] sm:$0xff] }
 0x2a1   :  { %v1086_v45 = vadd.f32 %v11686_v0, %v954_v28  ;;  %v17511_v42 = vrot.slane %v12250_v26, 3  ;;  %v687_v24 = vadd.f32 %v666_v60, %v555_v48  ;;  %v692_v55 = vadd.f32 %v17506_v34, %v560_v9 }
 0x2a2   :  { %v1085_v54 = vadd.f32 %v1063_v22, %v953_v37  ;;  %v691_v29 = vadd.f32 %v668_v51, %v559_v43  ;;  %v12317_v25 = vsel %vm1776_vm6, %v1791_v41, %v1792_v4  ;;  %v12320_v39 = vsel %vm1776_vm6, %v1794_v62, %v1795_v21  ;;  %v17514_v41 = vld [vmem:[#allocation28_spill] sm:$0xff] }
 0x2a3   :  { %v12292_v16 = vpop.permute.xlu0 %2557  ;;  %v12310_v27 = vsel %vm1776_vm6, %v1795_v21, %v17511_v42  ;;  %v1803_v0 = vrot.slane %v1759_v35, 3  ;;  %v819_v42 = vadd.f32 %v798_v19, %v687_v24  ;;  %v820_v48 = vadd.f32 %v17509_v47, %v688_v31  ;;  %v17515_v35 = vld [vmem:[#allocation73_spill] sm:$0xff] }
 0x2a4   :  { %v12300_v23 = vpop.permute.xlu1 %2325  ;;  %v824_v9 = vadd.f32 %v17512_v3, %v692_v55  ;;  %v12327_v60 = vsel %vm1776_vm6, %v1797_v10, %v1801_v49  ;;  %v930_v4 = vsel %vm326_vm9, %v17514_v41, %v11661_v17  ;;  %v1192_v21 = vadd.f32 %v12214_v6, %v1086_v45 }
 0x2a5   :  { %17508 = vst [vmem:[#allocation99_spill] sm:$0xff] %v12300_v23  ;;  %v800_v23 = vsel %vm228_vm8, %v17513_v5, %v17512_v3  ;;  %v1301_v19 = vsel %vm130_vm7, %v11836_v61, %v11865_v40  ;;  %v952_v22 = vadd.f32 %v11661_v17, %v820_v48  ;;  %v1191_v62 = vadd.f32 %v12205_v58, %v1085_v54 }
 0x2a6   :  { %v823_v43 = vadd.f32 %v800_v23, %v691_v29  ;;  %v12342_v10 = vmul.f32 %v11870_v36, %v17515_v35  ;;  %v12346_v51 = vmul.f32 %v11877_v18, %v17515_v35  ;;  %v932_v6 = vsel %vm326_vm9, %v11709_v13, %v11746_v20  ;;  %v17516_v18 = vld [vmem:[#allocation29_spill] sm:$0xff] }
 0x2a7   :  { %v12322_v28 = vpop.permute.xlu0 %2553  ;;  %v1062_v61 = vsel %vm424_vm10, %v11766_v2, %v11809_v50  ;;  %v1324_v17 = vadd.f32 %v11865_v40, %v1192_v21  ;;  %v1433_v58 = vsel %vm228_vm8, %v11892_v8, %v11918_v1  ;;  %v951_v54 = vadd.f32 %v930_v4, %v819_v42  ;;  %v17519_v21 = vld [vmem:[#allocation30_spill] sm:$0xff] }
 0x2a8   :  { %v12329_v34 = vpop.permute.xlu1 %2559  ;;  %v1323_v37 = vadd.f32 %v1301_v19, %v1191_v62  ;;  %v12362_v49 = vmul.f32 %v11814_v15, %v17516_v18  ;;  %v12366_v13 = vmul.f32 %v11911_v33, %v17516_v18  ;;  %v1084_v2 = vadd.f32 %v11809_v50, %v952_v22  ;;  %v17520_v19 = vld [vmem:[#allocation25_spill] sm:$0xff]  ;;  %v8756_v22 = vld [vmem:[%s16557_s0 + $0x48] sm:$0xf0] }
 0x2a9   :  { %v1064_v40 = vsel %vm424_vm10, %v11798_v38, %v11849_v12  ;;  %v1456_v8 = vadd.f32 %v11918_v1, %v1324_v17  ;;  %v1565_v31 = vsel %vm326_vm9, %v11946_v30, %v11963_v44  ;;  %v955_v15 = vadd.f32 %v932_v6, %v823_v43 }
 0x2aa   :  { %v956_v47 = vadd.f32 %v11746_v20, %v824_v9  ;;  %v1083_v45 = vadd.f32 %v1062_v61, %v951_v54  ;;  %v1455_v33 = vadd.f32 %v1433_v58, %v1323_v37  ;;  %v1697_v50 = vsel %vm424_vm10, %v11983_v63, %v11999_v56  ;;  %v17518_v63 = vld [vmem:[#allocation55_spill] sm:$0xff]  ;;  %v17522_v54 = vld [vmem:[#allocation9_spill] sm:$0xff] }
 0x2ab   :  { %v12358_v36 = vpop.permute.xlu0 %2689  ;;  %v1588_v24 = vadd.f32 %v11963_v44, %v1456_v8  ;;  %v2426_v55 = vrot.slane %v12342_v10, 4  ;;  %v2431_v38 = vrot.slane %v12346_v51, 4  ;;  %v1087_v3 = vadd.f32 %v1064_v40, %v955_v15  ;;  %v17521_v58 = vld [vmem:[#allocation75_spill] sm:$0xff]  ;;  %v17523_v8 = vld [vmem:[#allocation76_spill] sm:$0xff] }
 0x2ac   :  { %v12368_v23 = vpop.permute.xlu1 %2555  ;;  %v1088_v30 = vadd.f32 %v11849_v12, %v956_v47  ;;  %v1587_v5 = vadd.f32 %v1565_v31, %v1455_v33  ;;  %v17517_v20 = vrot.slane %v12250_v26, 3  ;;  %v1190_v42 = vadd.f32 %v12221_v46, %v1084_v2  ;;  %v17524_v31 = vld [vmem:[#allocation36_spill] sm:$0xff]  ;;  %v17526_v33 = vld [vmem:[#allocation65_spill] sm:$0xff] }
 0x2ad   :  { %v1300_v48 = vsel %vm130_vm7, %v17518_v63, %v11894_v52  ;;  %v1720_v9 = vadd.f32 %v11999_v56, %v1588_v24  ;;  %v2429_v43 = vrot.slane %v12362_v49, 4  ;;  %v1189_v12 = vadd.f32 %v12218_v57, %v1083_v45  ;;  %v17525_v45 = vld [vmem:[#allocation93_spill] sm:$0xff]  ;;  %v17530_v63 = vld [vmem:[#allocation51_spill] sm:$0xff] }
 0x2ae   :  { %v12391_v29 = vsel %vm1776_vm6, %v17517_v20, %v1803_v0  ;;  %v1719_v41 = vadd.f32 %v1697_v50, %v1587_v5  ;;  %v2433_v26 = vrot.slane %v12366_v13, 4  ;;  %v8755_v0 = vld [vmem:[%s16557_s0 + $0x40] sm:$0xf0]  ;;  %v1322_v46 = vadd.f32 %v11894_v52, %v1190_v42 }
 0x2af   :  { %v12385_v1 = vpop.permute.xlu0 %2561  ;;  %v12407_v4 = vmul.f32 %v8755_v0, %v17515_v35  ;;  %v1432_v56 = vsel %vm228_vm8, %v17520_v19, %v17519_v21  ;;  %v12418_v57 = vsel %vm2410_vm11, %v2426_v55, %v2431_v38  ;;  %v2387_v62 = vmul.f32 %v8756_v22, %v17516_v18  ;;  %v17527_v50 = vld [vmem:[#allocation41_spill] sm:$0xff] }
 0x2b0   :  { %v1321_v52 = vadd.f32 %v1300_v48, %v1189_v12  ;;  %v1194_v61 = vadd.f32 %v12244_v11, %v1088_v30  ;;  %v1193_v17 = vadd.f32 %v12232_v7, %v1087_v3  ;;  %v1302_v37 = vsel %vm130_vm7, %v17522_v54, %v17521_v58  ;;  %v17528_v3 = vld [vmem:[#allocation82_spill] sm:$0xff]  ;;  %v17529_v42 = vld [vmem:[#allocation33_spill] sm:$0xff]  ;;  %v17532_v12 = vld [vmem:[#allocation103_spill] sm:$0xff] }
 0x2b1   :  { %v1454_v40 = vadd.f32 %v17519_v21, %v1322_v46  ;;  %v1564_v15 = vsel %vm326_vm9, %v17524_v31, %v17523_v8  ;;  %v1826_v47 = vadd.f32 %v12310_v27, %v1720_v9  ;;  %v1935_v11 = vsel %vm130_vm7, %v17526_v33, %v17525_v45  ;;  %v17531_v9 = vld [vmem:[#allocation112_spill] sm:$0xff]  ;;  %v17538_v33 = vld [vmem:[#allocation109_spill] sm:$0xff] }
 0x2b2   :  { %v1326_v7 = vadd.f32 %v17521_v58, %v1194_v61  ;;  %v1453_v24 = vadd.f32 %v1432_v56, %v1321_v52  ;;  %v1434_v30 = vsel %vm228_vm8, %v17528_v3, %v17527_v50  ;;  %v1825_v5 = vadd.f32 %v12298_v14, %v1719_v41  ;;  %v17533_v41 = vld [vmem:[#allocation23_spill] sm:$0xff]  ;;  %v17534_v52 = vld [vmem:[#allocation20_spill] sm:$0xff] }
 0x2b3   :  { %v12393_v44 = vpop.permute.xlu1 %2691  ;;  %v12424_v6 = vpop.permute.xlu0 %2685  ;;  %v1586_v20 = vadd.f32 %v17523_v8, %v1454_v40  ;;  %v1696_v48 = vsel %vm424_vm10, %v17530_v63, %v17529_v42  ;;  %v1958_v27 = vadd.f32 %v17525_v45, %v1826_v47  ;;  %v2067_v0 = vsel %vm228_vm8, %v17532_v12, %v17531_v9  ;;  %v17535_v40 = vld [vmem:[#allocation45_spill] sm:$0xff]  ;;  %v17537_v45 = vld [vmem:[#allocation83_spill] sm:$0xff]  ;;  %v17540_v12 = vld [vmem:[#allocation50_spill] sm:$0xff] }
 0x2b4   :  { %v1325_v21 = vadd.f32 %v1302_v37, %v1193_v17  ;;  %v1458_v19 = vadd.f32 %v17527_v50, %v1326_v7  ;;  %v1585_v56 = vadd.f32 %v1564_v15, %v1453_v24  ;;  %v1957_v22 = vadd.f32 %v1935_v11, %v1825_v5  ;;  %v17536_v8 = vld [vmem:[#allocation57_spill] sm:$0xff]  ;;  %v17539_v24 = vld [vmem:[#allocation62_spill] sm:$0xff]  ;;  %v8757_v63 = vld [vmem:[%s16557_s0 + $0x78] sm:$0xf] }
 0x2b5   :  { %v1566_v61 = vsel %vm326_vm9, %v17534_v52, %v17533_v41  ;;  %v1718_v58 = vadd.f32 %v17529_v42, %v1586_v20  ;;  %v2090_v54 = vadd.f32 %v17531_v9, %v1958_v27  ;;  %v2199_v31 = vsel %vm326_vm9, %v17536_v8, %v17535_v40  ;;  %v17542_v52 = vld [vmem:[#allocation79_spill] sm:$0xff] }
 0x2b6   :  { %v1457_v47 = vadd.f32 %v1434_v30, %v1325_v21  ;;  %v1590_v17 = vadd.f32 %v17533_v41, %v1458_v19  ;;  %v1717_v37 = vadd.f32 %v1696_v48, %v1585_v56  ;;  %v2089_v15 = vadd.f32 %v2067_v0, %v1957_v22  ;;  %v17541_v0 = vld [vmem:[#allocation96_spill] sm:$0xff] }
 0x2b7   :  { %v12431_v2 = vpop.permute.xlu1 %2563  ;;  %v1698_v11 = vsel %vm424_vm10, %v17538_v33, %v17537_v45  ;;  %v2222_v7 = vadd.f32 %v17535_v40, %v2090_v54  ;;  %v2331_v50 = vsel %vm424_vm10, %v17539_v24, %v12207_v53  ;;  %v2428_v3 = vrot.slane %v2387_v62, 4  ;;  %v8758_v54 = vld [vmem:[%s16557_s0 + $0x70] sm:$0xf]  ;;  %v17548_v24 = vld [vmem:[#allocation81_spill] sm:$0xff]  ;;  %s8792_s0 = smov 92  }
 0x2b8   :  { %v12454_v46 = vpop.permute.xlu0 %2821  ;;  %v1589_v20 = vadd.f32 %v1566_v61, %v1457_v47  ;;  %v1722_v30 = vadd.f32 %v17537_v45, %v1590_v17  ;;  %v2221_v42 = vadd.f32 %v2199_v31, %v2089_v15  ;;  %v12482_v48 = vmul.f32 %v8757_v63, %v17516_v18  ;;  %v17543_v61 = vld [vmem:[#allocation32_spill] sm:$0xff]  ;;  %v17544_v31 = vld [vmem:[#allocation22_spill] sm:$0xff]  ;;  %v17545_v47 = vld [vmem:[#allocation19_spill] sm:$0xff] }
 0x2b9   :  { %v1824_v9 = vadd.f32 %v12320_v39, %v1718_v58  ;;  %v1934_v62 = vsel %vm130_vm7, %v17541_v0, %v17540_v12  ;;  %v2354_v21 = vadd.f32 %v12207_v53, %v2222_v7  ;;  %v2434_v19 = vsel %vm2410_vm11, %v2429_v43, %v2433_v26  ;;  %v17547_v45 = vld [vmem:[#allocation84_spill] sm:$0xff] }
 0x2ba   :  { %v1721_v56 = vadd.f32 %v1698_v11, %v1589_v20  ;;  %v1823_v22 = vadd.f32 %v12317_v25, %v1717_v37  ;;  %v2353_v18 = vadd.f32 %v2331_v50, %v2221_v42  ;;  %v2425_v41 = vrot.slane %v12407_v4, 4  ;;  %v17549_v50 = vld [vmem:[#allocation10_spill] sm:$0xff] }
 0x2bb   :  { %v12457_v14 = vpop.permute.xlu1 %2687  ;;  %v1956_v39 = vadd.f32 %v17540_v12, %v1824_v9  ;;  %v2066_v58 = vsel %vm228_vm8, %v17543_v61, %v17542_v52  ;;  %v2430_v53 = vsel %vm2410_vm11, %v2428_v3, %v2429_v43  ;;  %v2392_v40 = vmul.f32 %v8758_v54, %v17515_v35  ;;  %v17546_v43 = vld [vmem:[#allocation116_spill] sm:$0xff] }
 0x2bc   :  { %v12475_v5 = vpop.permute.xlu0 %2693  ;;  %v1955_v8 = vadd.f32 %v1934_v62, %v1823_v22  ;;  %v1828_v4 = vadd.f32 %v12391_v29, %v1722_v30  ;;  %v1936_v17 = vsel %vm130_vm7, %v17545_v47, %v17544_v31  ;;  %v2437_v37 = vrot.slane %v12482_v48, 4 }
 0x2bd   :  { %v2088_v49 = vadd.f32 %v17542_v52, %v1956_v39  ;;  %v2198_v33 = vsel %vm326_vm9, %v17547_v45, %v17546_v43  ;;  %v2460_v11 = vadd.f32 %v2434_v19, %v2354_v21  ;;  %v2569_v35 = vsel %vm130_vm7, %v12292_v16, %v12329_v34  ;;  %v17551_v21 = vld [vmem:[#allocation92_spill] sm:$0xff] }
 0x2be   :  { %v1827_v29 = vadd.f32 %v12327_v60, %v1721_v56  ;;  %v2087_v7 = vadd.f32 %v2066_v58, %v1955_v8  ;;  %v2068_v3 = vsel %vm228_vm8, %v17549_v50, %v17548_v24  ;;  %v2459_v20 = vadd.f32 %v12418_v57, %v2353_v18  ;;  %v17550_v57 = vld [vmem:[#allocation89_spill] sm:$0xff] }
 0x2bf   :  { %v2824_v27 = vpop.permute.xlu1 %2823  ;;  %v2220_v30 = vadd.f32 %v17546_v43, %v2088_v49  ;;  %v2330_v42 = vsel %vm424_vm10, %v12229_v59, %v12273_v32  ;;  %v2592_v63 = vadd.f32 %v12329_v34, %v2460_v11  ;;  %v2701_v16 = vsel %vm228_vm8, %v12358_v36, %v12393_v44  ;;  %v17554_v11 = vld [vmem:[#allocation11_spill] sm:$0xff] }
 0x2c0   :  { %v2818_v25 = vpop.permute.xlu0 %2817  ;;  %v1959_v48 = vadd.f32 %v1936_v17, %v1827_v29  ;;  %v1960_v9 = vadd.f32 %v17544_v31, %v1828_v4  ;;  %v2219_v12 = vadd.f32 %v2198_v33, %v2087_v7  ;;  %v2591_v0 = vadd.f32 %v2569_v35, %v2459_v20  ;;  %v17552_v4 = vld [vmem:[#allocation99_spill] sm:$0xff] }
 0x2c1   :  { %v2200_v19 = vsel %vm326_vm9, %v17551_v21, %v17550_v57  ;;  %v2352_v56 = vadd.f32 %v12273_v32, %v2220_v30  ;;  %v2724_v59 = vadd.f32 %v12393_v44, %v2592_v63  ;;  %v2833_v34 = vsel %vm326_vm9, %v12454_v46, %v2824_v27  ;;  %v17553_v44 = vld [vmem:[#allocation102_spill] sm:$0xff] }
 0x2c2   :  { %v2091_v22 = vadd.f32 %v2068_v3, %v1959_v48  ;;  %v2092_v36 = vadd.f32 %v17548_v24, %v1960_v9  ;;  %v2351_v18 = vadd.f32 %v2330_v42, %v2219_v12  ;;  %v2723_v39 = vadd.f32 %v2701_v16, %v2591_v0  ;;  %v17555_v24 = vld [vmem:[#allocation31_spill] sm:$0xff] }
 0x2c3   :  { %v12512_v15 = vpop.permute.xlu1 %2695  ;;  %v2427_v52 = vsel %vm2410_vm11, %v2425_v41, %v2426_v55  ;;  %v2435_v61 = vrot.slane %v2392_v40, 4  ;;  %v2856_v58 = vadd.f32 %v2824_v27, %v2724_v59  ;;  %v2332_v31 = vsel %vm424_vm10, %v17553_v44, %v17552_v4  ;;  %v17556_v0 = vld [vmem:[#allocation67_spill] sm:$0xff] }
 0x2c4   :  { %v2954_v60 = vpop.permute.xlu0 %2953  ;;  %v2223_v8 = vadd.f32 %v2200_v19, %v2091_v22  ;;  %v2224_v32 = vadd.f32 %v17550_v57, %v2092_v36  ;;  %v2855_v46 = vadd.f32 %v2833_v34, %v2723_v39  ;;  %v2458_v17 = vadd.f32 %v2430_v53, %v2352_v56 }
 0x2c5   :  { %v2568_v49 = vsel %vm130_vm7, %v12322_v28, %v12368_v23  ;;  %v2457_v41 = vadd.f32 %v2427_v52, %v2351_v18  ;;  %v2438_v40 = vsel %vm2410_vm11, %v2433_v26, %v2437_v37  ;;  %v2700_v53 = vsel %vm228_vm8, %v12424_v6, %v12457_v14 }
 0x2c6   :  { %v2356_v27 = vadd.f32 %v17552_v4, %v2224_v32  ;;  %v2355_v45 = vadd.f32 %v2332_v31, %v2223_v8  ;;  %v2590_v33 = vadd.f32 %v12368_v23, %v2458_v17  ;;  %v2436_v7 = vsel %vm2410_vm11, %v2431_v38, %v2435_v61 }
 0x2c7   :  { %v2820_v62 = vpop.permute.xlu1 %2819  ;;  %v2589_v29 = vadd.f32 %v2568_v49, %v2457_v41  ;;  %v2570_v6 = vsel %vm130_vm7, %v12385_v1, %v12431_v2  ;;  %v2702_v16 = vsel %vm228_vm8, %v12475_v5, %v12512_v15  ;;  %vm3830_vm6 = vcmask 1046534  }
 0x2c8   :  { %v2826_v54 = vpop.permute.xlu0 %2825  ;;  %v2722_v26 = vadd.f32 %v12457_v14, %v2590_v33  ;;  %v2832_v37 = vsel %vm326_vm9, %v2818_v25, %v2820_v62  ;;  %v2462_v3 = vadd.f32 %v2438_v40, %v2356_v27  ;;  %v2461_v42 = vadd.f32 %v2436_v7, %v2355_v45 }
 0x2c9   :  { %v2721_v20 = vadd.f32 %v2700_v53, %v2589_v29  ;;  %vm3832_vm8 = vcmask 1047559  }
 0x2ca   :  { %v2854_v63 = vadd.f32 %v2820_v62, %v2722_v26  ;;  %v2594_v38 = vadd.f32 %v12431_v2, %v2462_v3  ;;  %v2593_v48 = vadd.f32 %v2570_v6, %v2461_v42  ;;  %v17557_v3 = vld [vmem:[#allocation115_spill] sm:$0xff] }
 0x2cb   :  { %v2956_v47 = vpop.permute.xlu1 %2955  ;;  %v2853_v14 = vadd.f32 %v2832_v37, %v2721_v20 }
 0x2cc   :  { %v2965_v10 = vsel %vm424_vm10, %v2954_v60, %v2956_v47  ;;  %v2988_v55 = vadd.f32 %v2956_v47, %v2856_v58  ;;  %v2950_v35 = vpop.permute.xlu0 %2949  ;;  %v2726_v1 = vadd.f32 %v12512_v15, %v2594_v38  ;;  %v2725_v19 = vadd.f32 %v2702_v16, %v2593_v48  ;;  %v17559_v38 = vld [vmem:[#allocation40_spill] sm:$0xff] }
 0x2cd   :  { %v2987_v43 = vadd.f32 %v2965_v10, %v2855_v46 }
 0x2ce   :  { %v3013_v28 = vadd.f32 %v17554_v11, %v2988_v55 }
 0x2cf   :  { %v3012_v13 = vadd.f32 %v17555_v24, %v2987_v43  ;;  %v2828_v50 = vpop.permute.xlu1 %2827 }
 0x2d0   :  { %v3025_v23 = vmax.f32 %v3013_v28, 0.0  ;;  %v2958_v51 = vpop.permute.xlu0 %2957  ;;  %v2834_v62 = vsel %vm326_vm9, %v2826_v54, %v2828_v50  ;;  %v2858_v5 = vadd.f32 %v2828_v50, %v2726_v1  ;;  %vm4311_vm9 = vcmask 1042432  }
 0x2d1   :  { %v3024_v30 = vmax.f32 %v3012_v13, 0.0  ;;  %v2857_v36 = vadd.f32 %v2834_v62, %v2725_v19  ;;  %v17562_v62 = vld [vmem:[#allocation6_spill] sm:$0xff] }
 0x2d3   :  { %v3112_v60 = vcombine.low %v3024_v30, %v3025_v23  ;;  %v2952_v25 = vpop.permute.xlu1 %2951  ;;  %v3113_v4 = vcombine.high %v3024_v30, %v3025_v23  ;;  %v17558_v30 = vld [vmem:[#allocation90_spill] sm:$0xff] }
 0x2d4   :  { %v2964_v9 = vsel %vm424_vm10, %v2950_v35, %v2952_v25  ;;  %v2986_v12 = vadd.f32 %v2952_v25, %v2854_v63  ;;  %v12581_v56 = vpop.permute.xlu0 %3300 }
 0x2d5   :  { %v3120_v57 = vrot.slane %v3112_v60, %v17556_v0  ;;  %v2985_v21 = vadd.f32 %v2964_v9, %v2853_v14  ;;  %v3127_v10 = vrot.slane %v3113_v4, %v17556_v0  ;;  %v3368_v6 = vmax.f32 %v17557_v3, %v12581_v56  ;;  %v17560_v14 = vld [vmem:[#allocation27_spill] sm:$0xff]  ;;  %v17561_v9 = vld [vmem:[#allocation100_spill] sm:$0xff] }
 0x2d6   :  { %v3011_v2 = vadd.f32 %v17554_v11, %v2986_v12 }
 0x2d7   :  { %v3010_v59 = vadd.f32 %v17555_v24, %v2985_v21  ;;  %v2960_v34 = vpop.permute.xlu1 %2959  ;;  %v7671_v22 = vrot.slane %v3120_v57, 9  ;;  %v3128_v15 = vcombine.high %v3120_v57, %v3120_v57  ;;  %v7673_v43 = vrot.slane %v3127_v10, 9 }
 0x2d8   :  { %v3023_v18 = vmax.f32 %v3011_v2, 0.0  ;;  %v2966_v39 = vsel %vm424_vm10, %v2958_v51, %v2960_v34  ;;  %v2990_v58 = vadd.f32 %v2960_v34, %v2858_v5  ;;  %v12585_v54 = vpop.permute.xlu0 %3304  ;;  %v3129_v50 = vcombine.high %v3127_v10, %v3127_v10  ;;  %v17563_v2 = vld [vmem:[#allocation61_spill] sm:$0xff] }
 0x2d9   :  { %v3022_v52 = vmax.f32 %v3010_v59, 0.0  ;;  %v2989_v61 = vadd.f32 %v2966_v39, %v2857_v36  ;;  %v12587_v8 = vmax.f32 %v3120_v57, %v7671_v22  ;;  %v7672_v32 = vrot.slane %v3128_v15, 9 }
 0x2da   :  { %v3015_v47 = vadd.f32 %v17554_v11, %v2990_v58  ;;  %v12609_v28 = vmax.f32 %v3127_v10, %v7673_v43  ;;  %v7674_v63 = vrot.slane %v3129_v50, 9  ;;  %v3743_v21 = vrot.slane %v3368_v6, %v17562_v62 }
 0x2db   :  { %v12589_v44 = vpop.permute.xlu1 %3302  ;;  %v3094_v31 = vcombine.low %v3022_v52, %v3023_v18  ;;  %3324 = vrot.lane.b32.xlu0 %v12587_v8, %s8787_s10  ;;  %v3014_v46 = vadd.f32 %v17555_v24, %v2989_v61  ;;  %v12595_v17 = vmax.f32 %v3128_v15, %v7672_v32  ;;  %v3095_v33 = vcombine.high %v3022_v52, %v3023_v18  ;;  %v17564_v32 = vld [vmem:[#allocation78_spill] sm:$0xff] }
 0x2dc   :  { %v12597_v49 = vpop.permute.xlu0 %3294  ;;  %v3027_v40 = vmax.f32 %v3015_v47, 0.0  ;;  %v3369_v42 = vmax.f32 %v17558_v30, %v12589_v44  ;;  %v12637_v1 = vmax.f32 %v3129_v50, %v7674_v63  ;;  %v3370_v4 = vmax.f32 %v17564_v32, %v12585_v54  ;;  %v17566_v47 = vld [vmem:[#allocation26_spill] sm:$0xff] }
 0x2dd   :  { %v3102_v27 = vrot.slane %v3094_v31, %v17556_v0  ;;  %3326 = vrot.lane.b32.xlu1 %v12595_v17, %s8787_s10  ;;  %v3026_v41 = vmax.f32 %v3014_v46, 0.0  ;;  %v3109_v24 = vrot.slane %v3095_v33, %v17556_v0  ;;  %v3365_v16 = vmax.f32 %v17559_v38, %v12597_v49  ;;  %v17565_v31 = vld [vmem:[#allocation58_spill] sm:$0xff] }
 0x2de   :  { %v3747_v19 = vrot.slane %v3369_v42, %v17562_v62  ;;  %v17569_v50 = vld [vmem:[#allocation106_spill] sm:$0xff]  ;;  %vm4312_vm10 = vcmask 1046532  }
 0x2df   :  { %v12600_v55 = vpop.permute.xlu1 %3292  ;;  %v7667_v11 = vrot.slane %v3102_v27, 9  ;;  %v3130_v35 = vcombine.low %v3026_v41, %v3027_v40  ;;  %3328 = vrot.lane.b32.xlu0 %v12609_v28, %s8787_s10  ;;  %v3110_v13 = vcombine.high %v3102_v27, %v3102_v27  ;;  %v3131_v20 = vcombine.high %v3026_v41, %v3027_v40  ;;  %v17568_v40 = vld [vmem:[#allocation86_spill] sm:$0xff]  ;;  %vm13052_vm5 = vmor %vm4311_vm9, %vm4312_vm10 }
 0x2e0   :  { %v12607_v53 = vpop.permute.xlu0 %3296  ;;  %v3364_v60 = vmax.f32 %v17560_v14, %v12600_v55  ;;  %v7669_v48 = vrot.slane %v3109_v24, 9  ;;  %v3731_v34 = vrot.slane %v3365_v16, %v17562_v62  ;;  %v3111_v61 = vcombine.high %v3109_v24, %v3109_v24 }
 0x2e1   :  { %v12611_v29 = vmax.f32 %v3102_v27, %v7667_v11  ;;  %v3138_v26 = vrot.slane %v3130_v35, %v17556_v0  ;;  %v7668_v37 = vrot.slane %v3110_v13, 9  ;;  %v3366_v12 = vmax.f32 %v17561_v9, %v12607_v53  ;;  %v17567_v27 = vld [vmem:[#allocation14_spill] sm:$0xff] }
 0x2e2   :  { %v3145_v59 = vrot.slane %v3131_v20, %v17556_v0  ;;  %v3727_v22 = vrot.slane %v3364_v60, %v17562_v62  ;;  %v12650_v36 = vmax.f32 %v3109_v24, %v7669_v48  ;;  %v7670_v35 = vrot.slane %v3111_v61, 9 }
 0x2e3   :  { %v12605_v45 = vpop.permute.xlu1 %3306  ;;  %3316 = vrot.lane.b32.xlu1 %v12611_v29, %s8787_s10  ;;  %v12633_v25 = vmax.f32 %v3110_v13, %v7668_v37  ;;  %v7675_v57 = vrot.slane %v3138_v26, 9  ;;  %v3735_v39 = vrot.slane %v3366_v12, %v17562_v62  ;;  %v3146_v52 = vcombine.high %v3138_v26, %v3138_v26 }
 0x2e4   :  { %v12621_v23 = vpop.permute.xlu0 %3310  ;;  %v3371_v46 = vmax.f32 %v17565_v31, %v12605_v45  ;;  %v3852_v24 = vsel %vm16975_vm12, %v3747_v19, %v3743_v21  ;;  %v3821_v13 = vsel %vm16975_vm12, %v3731_v34, %v3727_v22  ;;  %v12681_v20 = vmax.f32 %v3111_v61, %v7670_v35 }
 0x2e5   :  { %3318 = vrot.lane.b32.xlu0 %v12633_v25, %s8787_s10  ;;  %v12655_v15 = vmax.f32 %v3138_v26, %v7675_v57  ;;  %v3373_v10 = vmax.f32 %v17566_v47, %v12621_v23  ;;  %v7676_v11 = vrot.slane %v3146_v52, 9  ;;  %v3823_v37 = vsel %vm3822_vm13, %v3735_v39, %v3821_v13 }
 0x2e6   :  { %v7677_v42 = vrot.slane %v3145_v59, 9  ;;  %v3755_v63 = vrot.slane %v3371_v46, %v17562_v62  ;;  %v3147_v48 = vcombine.high %v3145_v59, %v3145_v59  ;;  %v3751_v12 = vrot.slane %v3370_v4, %v17562_v62 }
 0x2e7   :  { %v12615_v7 = vpop.permute.xlu1 %3308  ;;  %3330 = vrot.lane.b32.xlu1 %v12637_v1, %s8787_s10  ;;  %v12679_v6 = vmax.f32 %v3146_v52, %v7676_v11  ;;  %v3763_v16 = vrot.slane %v3373_v10, %v17562_v62  ;;  %vm4541_vm9 = vcmask 1040384   ;;  %vm4427_vm10 = vcmask 1045508  }
 0x2e8   :  { %v12652_v18 = vpop.permute.xlu0 %3312  ;;  %v3372_v41 = vmax.f32 %v17567_v27, %v12615_v7  ;;  %v7678_v61 = vrot.slane %v3147_v48, 9  ;;  %v3853_v46 = vsel %vm3822_vm13, %v3751_v12, %v3852_v24  ;;  %v12695_v10 = vmax.f32 %v3145_v59, %v7677_v42  ;;  %vm13206_vm3 = vmor %vm4541_vm9, %vm3826_vm15 }
 0x2e9   :  { %3320 = vrot.lane.b32.xlu0 %v12650_v36, %s8787_s10  ;;  %v3374_v43 = vmax.f32 %v17568_v40, %v12652_v18  ;;  %v3854_v4 = vsel %vm3824_vm14, %v3755_v63, %v3853_v46  ;;  %v3849_v24 = vsel %vm3828_vm4, %v3731_v34, %v3727_v22  ;;  %v3393_v46 = vrot.slane %v12589_v44, 2 }
 0x2ea   :  { %v3759_v60 = vrot.slane %v3372_v41, %v17562_v62 }
 0x2eb   :  { %v12627_v51 = vpop.permute.xlu1 %3298  ;;  %3332 = vrot.lane.b32.xlu1 %v12655_v15, %s8787_s10  ;;  %v3767_v57 = vrot.slane %v3374_v43, %v17562_v62  ;;  %v12699_v43 = vmax.f32 %v3147_v48, %v7678_v61 }
 0x2ec   :  { %v3367_v5 = vmax.f32 %v17563_v2, %v12627_v51  ;;  %v3834_v11 = vsel %vm16975_vm12, %v3763_v16, %v3759_v60  ;;  %v3855_v35 = vsel %vm3826_vm15, %v3759_v60, %v3854_v4 }
 0x2ed   :  { %3334 = vrot.lane.b32.xlu0 %v12679_v6, %s8787_s10  ;;  %v3835_v13 = vsel %vm3822_vm13, %v3767_v57, %v3834_v11 }
 0x2ee   :  { %v3739_v33 = vrot.slane %v3367_v5, %v17562_v62 }
 0x2ef   :  { %v12657_v58 = vpop.permute.xlu1 %3314  ;;  %3322 = vrot.lane.b32.xlu1 %v12681_v20, %s8787_s10 }
 0x2f0   :  { %v3375_v26 = vmax.f32 %v17569_v50, %v12657_v58  ;;  %v3825_v5 = vsel %vm3824_vm14, %v3739_v33, %v3823_v37  ;;  %v3856_v37 = vsel %vm3828_vm4, %v3763_v16, %v3855_v35  ;;  %v3391_v16 = vrot.slane %v12627_v51, 2 }
 0x2f1   :  { %v3827_v41 = vsel %vm3826_vm15, %v3743_v21, %v3825_v5  ;;  %3336 = vrot.lane.b32.xlu0 %v12695_v10, %s8787_s10  ;;  %v3417_v35 = vsel %vm130_vm7, %v12589_v44, %v3393_v46 }
 0x2f2   :  { %v3771_v52 = vrot.slane %v3375_v26, %v17562_v62  ;;  %v3829_v21 = vsel %vm3828_vm4, %v3747_v19, %v3827_v41  ;;  %v3850_v26 = vsel %vm3830_vm6, %v3735_v39, %v3849_v24  ;;  %v3857_v19 = vsel %vm3830_vm6, %v3767_v57, %v3856_v37 }
 0x2f3   :  { %3338 = vrot.lane.b32.xlu1 %v12699_v43, %s8787_s10  ;;  %v12718_v42 = vsel %vm3832_vm8, %v3739_v33, %v3850_v26  ;;  %v3831_v60 = vsel %vm3830_vm6, %v3751_v12, %v3829_v21  ;;  %s8793_s10 = smov 80   ;;  %v3389_v39 = vrot.slane %v12597_v49, 2  ;;  %v3388_v33 = vrot.slane %v12600_v55, 2 }
 0x2f4   :  { %v12709_v59 = vsel %vm3824_vm14, %v3771_v52, %v3835_v13  ;;  %v12725_v34 = vsel %vm3832_vm8, %v3771_v52, %v3857_v19  ;;  %v12730_v22 = vsel %vm3832_vm8, %v3755_v63, %v3831_v60  ;;  %v3390_v63 = vrot.slane %v12607_v53, 2 }
 0x2f5   :  { %17570 = vst [vmem:[#allocation59_spill] sm:$0xff] %v12709_v59  ;;  %3881 = vrot.lane.b32.xlu0 %v12709_v59, %s8790_s24  ;;  %17571 = vst [vmem:[#allocation18_spill] sm:$0xff] %v12730_v22  ;;  %v3413_v48 = vsel %vm130_vm7, %v12597_v49, %v3389_v39  ;;  %v3412_v12 = vsel %vm130_vm7, %v12600_v55, %v3388_v33  ;;  %v3415_v5 = vsel %vm130_vm7, %v12627_v51, %v3391_v16 }
 0x2f6   :  { %v3414_v57 = vsel %vm130_vm7, %v12607_v53, %v3390_v63  ;;  %v3392_v52 = vrot.slane %v12581_v56, 2  ;;  %v3461_v49 = vmax.f32 %v17559_v38, %v3413_v48  ;;  %v3460_v61 = vmax.f32 %v17560_v14, %v3412_v12 }
 0x2f7   :  { %3889 = vrot.lane.b32.xlu1 %v12718_v42, %s8792_s0  ;;  %v3462_v55 = vmax.f32 %v17561_v9, %v3414_v57  ;;  %v3463_v53 = vmax.f32 %v17563_v2, %v3415_v5  ;;  %v3397_v13 = vrot.slane %v12621_v23, 2  ;;  %v3396_v21 = vrot.slane %v12615_v7, 2 }
 0x2f8   :  { %v3416_v51 = vsel %vm130_vm7, %v12581_v56, %v3392_v52  ;;  %v3990_v4 = vrot.slane %v3461_v49, %v17562_v62  ;;  %v3395_v26 = vrot.slane %v12605_v45, 2  ;;  %v3465_v44 = vmax.f32 %v17558_v30, %v3417_v35 }
 0x2f9   :  { %3891 = vrot.lane.b32.xlu0 %v12725_v34, %s8792_s0  ;;  %v3998_v41 = vrot.slane %v3463_v53, %v17562_v62  ;;  %v3464_v11 = vmax.f32 %v17557_v3, %v3416_v51  ;;  %v3399_v37 = vrot.slane %v12657_v58, 2  ;;  %v3421_v39 = vsel %vm130_vm7, %v12621_v23, %v3397_v13 }
 0x2fa   :  { %v3419_v33 = vsel %vm130_vm7, %v12605_v45, %v3395_v26  ;;  %v4006_v48 = vrot.slane %v3465_v44, %v17562_v62 }
 0x2fb   :  { %3899 = vrot.lane.b32.xlu1 %v12730_v22, %s8793_s10  ;;  %v4002_v19 = vrot.slane %v3464_v11, %v17562_v62  ;;  %v3423_v12 = vsel %vm130_vm7, %v12657_v58, %v3399_v37  ;;  %v3467_v45 = vmax.f32 %v17565_v31, %v3419_v33 }
 0x2fc   :  { %v3471_v58 = vmax.f32 %v17569_v50, %v3423_v12 }
 0x2fd   :  { %3901 = vrot.lane.b32.xlu0 %v12709_v59, %s8793_s10  ;;  %v4014_v5 = vrot.slane %v3467_v45, %v17562_v62 }
 0x2fe   :  { %v4030_v52 = vrot.slane %v3471_v58, %v17562_v62 }
 0x2ff   :  { %3909 = vrot.lane.b32.xlu1 %v12718_v42, %s8794_s15 }
 0x301   :  { %3911 = vrot.lane.b32.xlu0 %v12725_v34, %s8794_s15 }
 0x303   :  { %3919 = vrot.lane.b32.xlu1 %v12730_v22, %s8795_s18 }
 0x305   :  { %3921 = vrot.lane.b32.xlu0 %v12709_v59, %s8795_s18 }
 0x307   :  { %3929 = vrot.lane.b32.xlu1 %v12718_v42, %s8796_s20 }
 0x309   :  { %3931 = vrot.lane.b32.xlu0 %v12725_v34, %s8796_s20 }
 0x30b   :  { %3939 = vrot.lane.b32.xlu1 %v12730_v22, %s8797_s21 }
 0x30d   :  { %3492 = vrot.lane.b32.xlu0 %v17557_v3, %s8798_s26 }
 0x30f   :  { %3494 = vrot.lane.b32.xlu1 %v17558_v30, %s8798_s26 }
 0x311   :  { %3588 = vrot.lane.b32.xlu0 %v17557_v3, %s8799_s27 }
 0x313   :  { %3590 = vrot.lane.b32.xlu1 %v17558_v30, %s8799_s27 }
 0x315   :  { %3484 = vrot.lane.b32.xlu0 %v17560_v14, %s8798_s26 }
 0x317   :  { %3486 = vrot.lane.b32.xlu1 %v17559_v38, %s8798_s26 }
 0x319   :  { %3496 = vrot.lane.b32.xlu0 %v17564_v32, %s8798_s26 }
 0x31b   :  { %3580 = vrot.lane.b32.xlu1 %v17560_v14, %s8799_s27  ;;  %v3994_v14 = vrot.slane %v3462_v55, %v17562_v62 }
 0x31d   :  { %3582 = vrot.lane.b32.xlu0 %v17559_v38, %s8799_s27  ;;  %v3986_v38 = vrot.slane %v3460_v61, %v17562_v62 }
 0x31f   :  { %3592 = vrot.lane.b32.xlu1 %v17564_v32, %s8799_s27  ;;  %v4079_v56 = vsel %vm16975_vm12, %v3990_v4, %v3986_v38 }
 0x320   :  { %v4080_v24 = vsel %vm3822_vm13, %v3994_v14, %v4079_v56 }
 0x321   :  { %3488 = vrot.lane.b32.xlu0 %v17561_v9, %s8798_s26  ;;  %v4081_v60 = vsel %vm3824_vm14, %v3998_v41, %v4080_v24 }
 0x322   :  { %v4082_v16 = vsel %vm3826_vm15, %v4002_v19, %v4081_v60 }
 0x323   :  { %3498 = vrot.lane.b32.xlu1 %v17565_v31, %s8798_s26 }
 0x325   :  { %3584 = vrot.lane.b32.xlu0 %v17561_v9, %s8799_s27  ;;  %v3394_v9 = vrot.slane %v12585_v54, 2 }
 0x327   :  { %3594 = vrot.lane.b32.xlu1 %v17565_v31, %s8799_s27  ;;  %v3418_v3 = vsel %vm130_vm7, %v12585_v54, %v3394_v9  ;;  %v3420_v54 = vsel %vm130_vm7, %v12615_v7, %v3396_v21  ;;  %v3469_v7 = vmax.f32 %v17566_v47, %v3421_v39 }
 0x328   :  { %v3466_v30 = vmax.f32 %v17564_v32, %v3418_v3  ;;  %v3468_v23 = vmax.f32 %v17567_v27, %v3420_v54  ;;  %v4083_v32 = vsel %vm3828_vm4, %v4006_v48, %v4082_v16 }
 0x329   :  { %3941 = vrot.lane.b32.xlu0 %v12709_v59, %s8797_s21 }
 0x32a   :  { %v4010_v57 = vrot.slane %v3466_v30, %v17562_v62 }
 0x32b   :  { %3949 = vrot.lane.b32.xlu1 %v12718_v42, %s8800_s23 }
 0x32c   :  { %v4084_v31 = vsel %vm3830_vm6, %v4010_v57, %v4083_v32 }
 0x32d   :  { %3490 = vrot.lane.b32.xlu0 %v17563_v2, %s8798_s26  ;;  %v4085_v49 = vsel %vm3832_vm8, %v4014_v5, %v4084_v31 }
 0x32f   :  { %3500 = vrot.lane.b32.xlu1 %v17567_v27, %s8798_s26 }
 0x331   :  { %3586 = vrot.lane.b32.xlu0 %v17563_v2, %s8799_s27  ;;  %v3398_v2 = vrot.slane %v12652_v18, 2 }
 0x333   :  { %3596 = vrot.lane.b32.xlu1 %v17567_v27, %s8799_s27  ;;  %v3422_v63 = vsel %vm130_vm7, %v12652_v18, %v3398_v2  ;;  %v4018_v27 = vrot.slane %v3468_v23, %v17562_v62 }
 0x334   :  { %v3470_v18 = vmax.f32 %v17568_v40, %v3422_v63 }
 0x335   :  { %3502 = vrot.lane.b32.xlu0 %v17566_v47, %s8798_s26 }
 0x337   :  { %3598 = vrot.lane.b32.xlu1 %v17566_v47, %s8799_s27  ;;  %v4022_v47 = vrot.slane %v3469_v7, %v17562_v62 }
 0x339   :  { %3504 = vrot.lane.b32.xlu0 %v17568_v40, %s8798_s26  ;;  %v4086_v61 = vsel %vm16975_vm12, %v4022_v47, %v4018_v27 }
 0x33b   :  { %3600 = vrot.lane.b32.xlu1 %v17568_v40, %s8799_s27  ;;  %v4026_v40 = vrot.slane %v3470_v18, %v17562_v62 }
 0x33d   :  { %3951 = vrot.lane.b32.xlu0 %v12725_v34, %s8800_s23  ;;  %v4087_v55 = vsel %vm3822_vm13, %v4026_v40, %v4086_v61 }
 0x33e   :  { %v4088_v53 = vsel %vm3824_vm14, %v4030_v52, %v4087_v55 }
 0x33f   :  { %3506 = vrot.lane.b32.xlu1 %v17569_v50, %s8798_s26 }
 0x341   :  { %3602 = vrot.lane.b32.xlu0 %v17569_v50, %s8799_s27 }
 0x343   :  { %4099 = vrot.lane.b32.xlu1 %v4085_v49, %s8801_s28 }
 0x345   :  { %4101 = vrot.lane.b32.xlu0 %v4088_v53, %s8801_s28 }
 0x34d   :  { %v12876_v46 = vpop.permute.xlu0 %3324 }
 0x34e   :  { %v3380_v56 = vmax.f32 %v12587_v8, %v12876_v46  ;;  %v3404_v59 = vrot.slane %v12876_v46, 2 }
 0x34f   :  { %v12878_v51 = vpop.permute.xlu1 %3326 }
 0x350   :  { %v3381_v9 = vmax.f32 %v12595_v17, %v12878_v51  ;;  %v3791_v60 = vrot.slane %v3380_v56, %v17562_v62 }
 0x351   :  { %v12882_v50 = vpop.permute.xlu0 %3328 }
 0x352   :  { %v3382_v21 = vmax.f32 %v12609_v28, %v12882_v50  ;;  %v3795_v26 = vrot.slane %v3381_v9, %v17562_v62 }
 0x354   :  { %v3799_v30 = vrot.slane %v3382_v21, %v17562_v62  ;;  %v3862_v16 = vsel %vm16975_vm12, %v3795_v26, %v3791_v60 }
 0x355   :  { %v12880_v4 = vpop.permute.xlu1 %3316 }
 0x356   :  { %v3376_v24 = vmax.f32 %v12611_v29, %v12880_v4  ;;  %v3863_v47 = vsel %vm3822_vm13, %v3799_v30, %v3862_v16 }
 0x357   :  { %v12884_v38 = vpop.permute.xlu0 %3318 }
 0x358   :  { %v3377_v11 = vmax.f32 %v12633_v25, %v12884_v38  ;;  %v3775_v33 = vrot.slane %v3376_v24, %v17562_v62 }
 0x359   :  { %v12886_v14 = vpop.permute.xlu1 %3330 }
 0x35a   :  { %v3383_v2 = vmax.f32 %v12637_v1, %v12886_v14  ;;  %v3779_v3 = vrot.slane %v3377_v11, %v17562_v62 }
 0x35b   :  { %v12890_v41 = vpop.permute.xlu0 %3320 }
 0x35c   :  { %v3378_v13 = vmax.f32 %v12650_v36, %v12890_v41  ;;  %v3803_v48 = vrot.slane %v3383_v2, %v17562_v62  ;;  %v3837_v12 = vsel %vm16975_vm12, %v3779_v3, %v3775_v33  ;;  %v3859_v49 = vsel %vm3828_vm4, %v3779_v3, %v3775_v33 }
 0x35d   :  { %v12894_v35 = vpop.permute.xlu1 %3332 }
 0x35e   :  { %v3783_v19 = vrot.slane %v3378_v13, %v17562_v62  ;;  %v3384_v39 = vmax.f32 %v12655_v15, %v12894_v35  ;;  %v3864_v40 = vsel %vm3824_vm14, %v3803_v48, %v3863_v47 }
 0x35f   :  { %v12908_v44 = vpop.permute.xlu0 %3334 }
 0x360   :  { %v3385_v54 = vmax.f32 %v12679_v6, %v12908_v44  ;;  %v3838_v18 = vsel %vm3822_vm13, %v3783_v19, %v3837_v12  ;;  %v3807_v32 = vrot.slane %v3384_v39, %v17562_v62  ;;  %v3860_v53 = vsel %vm3830_vm6, %v3783_v19, %v3859_v49 }
 0x361   :  { %v12910_v37 = vpop.permute.xlu1 %3322 }
 0x362   :  { %v3379_v63 = vmax.f32 %v12681_v20, %v12910_v37  ;;  %v3811_v7 = vrot.slane %v3385_v54, %v17562_v62  ;;  %v3865_v56 = vsel %vm3826_vm15, %v3807_v32, %v3864_v40 }
 0x363   :  { %v12927_v45 = vpop.permute.xlu0 %3336 }
 0x364   :  { %v3787_v23 = vrot.slane %v3379_v63, %v17562_v62  ;;  %v3386_v57 = vmax.f32 %v12695_v10, %v12927_v45  ;;  %v3844_v11 = vsel %vm16975_vm12, %v3811_v7, %v3807_v32  ;;  %v3866_v19 = vsel %vm3828_vm4, %v3811_v7, %v3865_v56 }
 0x365   :  { %v12933_v58 = vpop.permute.xlu1 %3338 }
 0x366   :  { %v3839_v27 = vsel %vm3824_vm14, %v3787_v23, %v3838_v18  ;;  %v3387_v31 = vmax.f32 %v12699_v43, %v12933_v58  ;;  %v3815_v52 = vrot.slane %v3386_v57, %v17562_v62  ;;  %v12950_v21 = vsel %vm3832_vm8, %v3787_v23, %v3860_v53 }
 0x367   :  { %v3840_v5 = vsel %vm3826_vm15, %v3791_v60, %v3839_v27  ;;  %v3882_v9 = vpop.permute.xlu0 %3881  ;;  %3893 = vrot.lane.b32.xlu0 %v12950_v21, %s8792_s0 }
 0x368   :  { %v3841_v61 = vsel %vm3828_vm4, %v3795_v26, %v3840_v5  ;;  %v3819_v55 = vrot.slane %v3387_v31, %v17562_v62  ;;  %v3845_v2 = vsel %vm3822_vm13, %v3815_v52, %v3844_v11  ;;  %v3867_v54 = vsel %vm3830_vm6, %v3815_v52, %v3866_v19 }
 0x369   :  { %v3842_v13 = vsel %vm3830_vm6, %v3799_v30, %v3841_v61  ;;  %v3890_v24 = vpop.permute.xlu1 %3889 }
 0x36a   :  { %v12956_v26 = vsel %vm3824_vm14, %v3819_v55, %v3845_v2  ;;  %v12959_v3 = vsel %vm3832_vm8, %v3803_v48, %v3842_v13  ;;  %v12972_v30 = vsel %vm3832_vm8, %v3819_v55, %v3867_v54  ;;  %v13025_v27 = vsel %vm2410_vm11, %v3882_v9, %v3890_v24 }
 0x36b   :  { %17572 = vst [vmem:[#allocation119_spill] sm:$0xff] %v12956_v26  ;;  %17573 = vst [vmem:[#allocation117_spill] sm:$0xff] %v12959_v3  ;;  %3885 = vrot.lane.b32.xlu1 %v12956_v26, %s8790_s24  ;;  %v12963_v60 = vpop.permute.xlu0 %3891  ;;  %3903 = vrot.lane.b32.xlu0 %v12959_v3, %s8793_s10  ;;  %v13033_v31 = vcombine.high %v13025_v27, %v13025_v27 }
 0x36c   :  { %17574 = vst [vmem:[#allocation42_spill] sm:$0xff] %v12963_v60  ;;  %17575 = vst [vmem:[#allocation35_spill] sm:$0xff] %v13025_v27  ;;  %v13037_v40 = vcombine.high %v12963_v60, %v12963_v60  ;;  %v4337_v61 = vrot.slane %v12963_v60, 5 }
 0x36d   :  { %v12966_v39 = vpop.permute.xlu1 %3899  ;;  %17576 = vst [vmem:[#allocation38_spill] sm:$0xff] %v13033_v31  ;;  %v7682_v49 = vrot.slane %v13033_v31, 9 }
 0x36e   :  { %v4340_v55 = vrot.slane %v13037_v40, 5  ;;  %v4339_v56 = vrot.slane %v4337_v61, 4 }
 0x36f   :  { %3895 = vrot.lane.b32.xlu1 %v12972_v30, %s8792_s0  ;;  %v12976_v33 = vpop.permute.xlu0 %3901  ;;  %3913 = vrot.lane.b32.xlu0 %v12950_v21, %s8794_s15  ;;  %v4338_v11 = vsel %vm13052_vm5, %v7682_v49, %v4337_v61  ;;  %v3402_v61 = vrot.slane %v12890_v41, 2  ;;  %s8813_s0 = smov 84  }
 0x370   :  { %v4341_v24 = vsel %vm13052_vm5, %v4339_v56, %v4340_v55  ;;  %v3403_v56 = vrot.slane %v12910_v37, 2 }
 0x371   :  { %v12980_v63 = vpop.permute.xlu1 %3909  ;;  %v13068_v2 = vcombine.low %v4338_v11, %v4341_v24  ;;  %v3400_v11 = vrot.slane %v12880_v4, 2  ;;  %v3426_v0 = vsel %vm130_vm7, %v12890_v41, %v3402_v61 }
 0x372   :  { %v3474_v41 = vmax.f32 %v12650_v36, %v3426_v0 }
 0x373   :  { %3905 = vrot.lane.b32.xlu1 %v12956_v26, %s8793_s10  ;;  %v12984_v16 = vpop.permute.xlu0 %3911  ;;  %3923 = vrot.lane.b32.xlu0 %v12959_v3, %s8795_s18  ;;  %17580 = vst [vmem:[#allocation68_spill] sm:$0xff] %v13068_v2  ;;  %v3427_v2 = vsel %vm130_vm7, %v12910_v37, %v3403_v56  ;;  %v3408_v37 = vrot.slane %v12894_v35, 2  ;;  %v3405_v56 = vrot.slane %v12878_v51, 2 }
 0x374   :  { %v3475_v61 = vmax.f32 %v12681_v20, %v3427_v2 }
 0x375   :  { %v12992_v12 = vpop.permute.xlu1 %3919 }
 0x377   :  { %3915 = vrot.lane.b32.xlu1 %v12972_v30, %s8794_s15  ;;  %v12990_v48 = vpop.permute.xlu0 %3921  ;;  %3933 = vrot.lane.b32.xlu0 %v12950_v21, %s8796_s20  ;;  %s8814_s15 = smov 90  }
 0x379   :  { %v13002_v23 = vpop.permute.xlu1 %3929 }
 0x37b   :  { %3925 = vrot.lane.b32.xlu1 %v12956_v26, %s8795_s18  ;;  %3943 = vrot.lane.b32.xlu0 %v12959_v3, %s8797_s21  ;;  %v13000_v7 = vpop.permute.xlu0 %3931  ;;  %s8815_s18 = smov 96  }
 0x37d   :  { %v13012_v32 = vpop.permute.xlu1 %3939 }
 0x37f   :  { %3935 = vrot.lane.b32.xlu1 %v12972_v30, %s8796_s20  ;;  %3518 = vrot.lane.b32.xlu0 %v12595_v17, %s8798_s26  ;;  %v13008_v18 = vpop.permute.xlu0 %3492 }
 0x381   :  { %v13022_v47 = vpop.permute.xlu1 %3494 }
 0x383   :  { %3516 = vrot.lane.b32.xlu1 %v12587_v8, %s8798_s26  ;;  %3614 = vrot.lane.b32.xlu0 %v12595_v17, %s8799_s27  ;;  %v13018_v57 = vpop.permute.xlu0 %3588 }
 0x385   :  { %v13043_v52 = vpop.permute.xlu1 %3590 }
 0x387   :  { %3612 = vrot.lane.b32.xlu1 %v12587_v8, %s8799_s27  ;;  %3510 = vrot.lane.b32.xlu0 %v12633_v25, %s8798_s26  ;;  %v13039_v5 = vpop.permute.xlu0 %3484 }
 0x389   :  { %v13062_v13 = vpop.permute.xlu1 %3486 }
 0x38b   :  { %3508 = vrot.lane.b32.xlu1 %v12611_v29, %s8798_s26  ;;  %3604 = vrot.lane.b32.xlu0 %v12611_v29, %s8799_s27  ;;  %v13056_v9 = vpop.permute.xlu0 %3496 }
 0x38c   :  { %17579 = vst [vmem:[#allocation24_spill] sm:$0xff] %v13056_v9 }
 0x38d   :  { %v13076_v54 = vpop.permute.xlu1 %3580 }
 0x38f   :  { %3520 = vrot.lane.b32.xlu1 %v12609_v28, %s8798_s26  ;;  %3616 = vrot.lane.b32.xlu0 %v12609_v28, %s8799_s27  ;;  %v13072_v19 = vpop.permute.xlu0 %3582 }
 0x391   :  { %v13088_v55 = vpop.permute.xlu1 %3592 }
 0x393   :  { %3606 = vrot.lane.b32.xlu1 %v12633_v25, %s8799_s27  ;;  %3512 = vrot.lane.b32.xlu0 %v12650_v36, %s8798_s26  ;;  %v13083_v49 = vpop.permute.xlu0 %3488 }
 0x395   :  { %v13111_v9 = vpop.permute.xlu1 %3498 }
 0x396   :  { %17581 = vst [vmem:[#allocation47_spill] sm:$0xff] %v13111_v9 }
 0x397   :  { %3869 = vrot.lane.b32.xlu1 %v12718_v42, %s8788_s19  ;;  %3608 = vrot.lane.b32.xlu0 %v12650_v36, %s8799_s27  ;;  %v3401_v42 = vrot.slane %v12884_v38, 2  ;;  %v13104_v27 = vpop.permute.xlu0 %3584 }
 0x399   :  { %v3425_v24 = vsel %vm130_vm7, %v12884_v38, %v3401_v42  ;;  %v3409_v42 = vrot.slane %v12908_v44, 2 }
 0x39a   :  { %v3473_v38 = vmax.f32 %v12633_v25, %v3425_v24  ;;  %v3428_v25 = vsel %vm130_vm7, %v12876_v46, %v3404_v59  ;;  %v3432_v59 = vsel %vm130_vm7, %v12894_v35, %v3408_v37  ;;  %v4046_v46 = vrot.slane %v3475_v61, %v17562_v62 }
 0x39b   :  { %3522 = vrot.lane.b32.xlu1 %v12637_v1, %s8798_s26  ;;  %3945 = vrot.lane.b32.xlu0 %v12956_v26, %s8797_s21  ;;  %v3424_v26 = vsel %vm130_vm7, %v12880_v4, %v3400_v11  ;;  %v3410_v11 = vrot.slane %v12927_v45, 2  ;;  %v3433_v36 = vsel %vm130_vm7, %v12908_v44, %v3409_v42  ;;  %v13131_v2 = vpop.permute.xlu0 %3941  ;;  %v3476_v42 = vmax.f32 %v12587_v8, %v3428_v25 }
 0x39c   :  { %v3472_v4 = vmax.f32 %v12611_v29, %v3424_v26  ;;  %v4038_v0 = vrot.slane %v3473_v38, %v17562_v62  ;;  %v3411_v29 = vrot.slane %v12933_v58, 2  ;;  %v3406_v26 = vrot.slane %v12882_v50, 2  ;;  %v13141_v38 = vpop.permute.xlu1 %3594 }
 0x39d   :  { %v3434_v44 = vsel %vm130_vm7, %v12927_v45, %v3410_v11  ;;  %v3481_v9 = vmax.f32 %v12679_v6, %v3433_v36  ;;  %v3407_v35 = vrot.slane %v12886_v14, 2  ;;  %v3480_v37 = vmax.f32 %v12655_v15, %v3432_v59 }
 0x39e   :  { %v4034_v24 = vrot.slane %v3472_v4, %v17562_v62  ;;  %v3435_v4 = vsel %vm130_vm7, %v12933_v58, %v3411_v29  ;;  %v3482_v8 = vmax.f32 %v12695_v10, %v3434_v44  ;;  %v4050_v11 = vrot.slane %v3476_v42, %v17562_v62 }
 0x39f   :  { %3618 = vrot.lane.b32.xlu1 %v12637_v1, %s8799_s27  ;;  %3514 = vrot.lane.b32.xlu0 %v12681_v20, %s8798_s26  ;;  %v4070_v58 = vrot.slane %v3481_v9, %v17562_v62  ;;  %v13165_v25 = vpop.permute.xlu0 %3490  ;;  %v4066_v36 = vrot.slane %v3480_v37, %v17562_v62  ;;  %v4569_v42 = vrot.slane %v13037_v40, 7  ;;  %v4455_v37 = vrot.slane %v13037_v40, 6 }
 0x3a0   :  { %v4074_v9 = vrot.slane %v3482_v8, %v17562_v62 }
 0x3a3   :  { %3953 = vrot.lane.b32.xlu1 %v12950_v21, %s8800_s23  ;;  %3610 = vrot.lane.b32.xlu0 %v12681_v20, %s8799_s27  ;;  %v4042_v20 = vrot.slane %v3474_v41, %v17562_v62  ;;  %v3429_v41 = vsel %vm130_vm7, %v12878_v51, %v3405_v56  ;;  %v3483_v56 = vmax.f32 %v12699_v43, %v3435_v4  ;;  %v7698_v4 = vrot.slane %v13033_v31, 10 }
 0x3a4   :  { %v3477_v51 = vmax.f32 %v12595_v17, %v3429_v41  ;;  %v13171_v17 = vpop.permute.xlu1 %3949  ;;  %v13195_v41 = vpop.permute.xlu0 %3586 }
 0x3a7   :  { %3524 = vrot.lane.b32.xlu1 %v12655_v15, %s8798_s26  ;;  %3526 = vrot.lane.b32.xlu0 %v12679_v6, %s8798_s26 }
 0x3ab   :  { %3620 = vrot.lane.b32.xlu1 %v12655_v15, %s8799_s27  ;;  %3871 = vrot.lane.b32.xlu0 %v12725_v34, %s8788_s19  ;;  %v4089_v34 = vsel %vm16975_vm12, %v4038_v0, %v4034_v24  ;;  %v3431_v15 = vsel %vm130_vm7, %v12886_v14, %v3407_v35  ;;  %v4452_v14 = vrot.slane %v12963_v60, 6  ;;  %v4096_v24 = vsel %vm16975_vm12, %v4070_v58, %v4066_v36  ;;  %v13200_v35 = vpop.permute.xlu1 %3500 }
 0x3ac   :  { %v4090_v45 = vsel %vm3822_vm13, %v4042_v20, %v4089_v34  ;;  %v13185_v20 = vcombine.high %v12966_v39, %v12966_v39  ;;  %v4097_v34 = vsel %vm3822_vm13, %v4074_v9, %v4096_v24 }
 0x3ad   :  { %v4091_v61 = vsel %vm3824_vm14, %v4046_v46, %v4090_v45  ;;  %v7714_v46 = vrot.slane %v13033_v31, 11  ;;  %v4454_v45 = vrot.slane %v4452_v14, 4 }
 0x3ae   :  { %v4092_v29 = vsel %vm3826_vm15, %v4050_v11, %v4091_v61  ;;  %v4344_v61 = vrot.slane %v13185_v20, 5 }
 0x3af   :  { %3622 = vrot.lane.b32.xlu1 %v12679_v6, %s8799_s27  ;;  %3624 = vrot.lane.b32.xlu0 %v12695_v10, %s8799_s27  ;;  %v3430_v6 = vsel %vm130_vm7, %v12882_v50, %v3406_v26  ;;  %v4566_v50 = vrot.slane %v12963_v60, 7  ;;  %v3479_v26 = vmax.f32 %v12637_v1, %v3431_v15  ;;  %vm4426_vm7 = vcmask 1041408  }
 0x3b0   :  { %v3478_v0 = vmax.f32 %v12609_v28, %v3430_v6  ;;  %v4078_v28 = vrot.slane %v3483_v56, %v17562_v62  ;;  %vm13221_vm9 = vmor %vm4426_vm7, %vm4427_vm10 }
 0x3b1   :  { %v4568_v44 = vrot.slane %v4566_v50, 4  ;;  %v4567_v58 = vsel %vm13206_vm3, %v7714_v46, %v4566_v50  ;;  %v4453_v50 = vsel %vm13221_vm9, %v7698_v4, %v4452_v14  ;;  %v4456_v9 = vsel %vm13221_vm9, %v4454_v45, %v4455_v37 }
 0x3b2   :  { %v4058_v1 = vrot.slane %v3478_v0, %v17562_v62  ;;  %v4098_v11 = vsel %vm3824_vm14, %v4078_v28, %v4097_v34  ;;  %v4459_v0 = vrot.slane %v13185_v20, 6  ;;  %v13244_v28 = vcombine.low %v4453_v50, %v4456_v9 }
 0x3b3   :  { %3528 = vrot.lane.b32.xlu1 %v12695_v10, %s8798_s26  ;;  %3530 = vrot.lane.b32.xlu0 %v12699_v43, %s8798_s26  ;;  %v4054_v10 = vrot.slane %v3477_v51, %v17562_v62  ;;  %v4062_v51 = vrot.slane %v3479_v26, %v17562_v62  ;;  %v4570_v56 = vsel %vm13206_vm3, %v4568_v44, %v4569_v42  ;;  %v4346_v26 = vrot.slane %v4344_v61, 4 }
 0x3b4   :  { %17587 = vst [vmem:[#allocation74_spill] sm:$0xff] %v13244_v28  ;;  %v4461_v24 = vrot.slane %v4459_v0, 4  ;;  %v4573_v14 = vrot.slane %v13185_v20, 7  ;;  %v13249_v46 = vcombine.low %v12966_v39, %v13185_v20  ;;  %v7683_v44 = vrot.slane %v12966_v39, 9 }
 0x3b5   :  { %v4093_v59 = vsel %vm3828_vm4, %v4054_v10, %v4092_v29  ;;  %v13235_v29 = vpop.permute.xlu0 %3502  ;;  %v13238_v10 = vcombine.low %v4567_v58, %v4570_v56  ;;  %v13263_v4 = vcombine.low %v12963_v60, %v13037_v40 }
 0x3b6   :  { %v4094_v6 = vsel %vm3830_vm6, %v4058_v1, %v4093_v59  ;;  %17588 = vst [vmem:[#allocation60_spill] sm:$0xff] %v13249_v46  ;;  %v7699_v1 = vrot.slane %v12966_v39, 10  ;;  %v4575_v45 = vrot.slane %v4573_v14, 4 }
 0x3b7   :  { %3955 = vrot.lane.b32.xlu1 %v12972_v30, %s8800_s23  ;;  %3879 = vrot.lane.b32.xlu0 %v12730_v22, %s8790_s24  ;;  %v4095_v36 = vsel %vm3832_vm8, %v4062_v51, %v4094_v6  ;;  %17586 = vst [vmem:[#allocation8_spill] sm:$0xff] %v13238_v10  ;;  %17589 = vst [vmem:[#allocation120_spill] sm:$0xff] %v13263_v4 }
 0x3b8   :  { %v4460_v56 = vsel %vm13221_vm9, %v7699_v1, %v4459_v0  ;;  %v4283_v0 = vcombine.high %v12984_v16, %v12984_v16 }
 0x3b9   :  { %v13257_v34 = vpop.permute.xlu0 %3504 }
 0x3ba   :  { %v4354_v1 = vrot.slane %v4283_v0, 5 }
 0x3bb   :  { %3626 = vrot.lane.b32.xlu1 %v12699_v43, %s8799_s27  ;;  %v4255_v43 = vsel %vm2410_vm11, %v12976_v33, %v12980_v63  ;;  %4105 = vrot.lane.b32.xlu0 %v4098_v11, %s8801_s28  ;;  %v13240_v63 = vpop.permute.xlu1 %3596  ;;  %v4345_v11 = vsel %vm13052_vm5, %v7683_v44, %v4344_v61  ;;  %s8816_s27 = smov 16  }
 0x3bc   :  { %v4347_v33 = vrot.slane %v4255_v43, 5  ;;  %v4462_v59 = vrot.slane %v4255_v43, 6  ;;  %v4576_v51 = vrot.slane %v4255_v43, 7  ;;  %v4282_v9 = vcombine.high %v4255_v43, %v4255_v43 }
 0x3bd   :  { %v13284_v61 = vpop.permute.xlu0 %3951 }
 0x3be   :  { %v4348_v42 = vsel %vm13052_vm5, %v4346_v26, %v4347_v33  ;;  %v4463_v37 = vsel %vm13221_vm9, %v4461_v24, %v4462_v59  ;;  %v4577_v50 = vsel %vm13206_vm3, %v4575_v45, %v4576_v51  ;;  %v4351_v26 = vrot.slane %v12984_v16, 5 }
 0x3bf   :  { %4103 = vrot.lane.b32.xlu1 %v4095_v36, %s8801_s28  ;;  %5982 = vrot.lane.b32.xlu0 %v13238_v10, %s8784_s17  ;;  %v13267_v6 = vpop.permute.xlu1 %3598  ;;  %v13273_v58 = vcombine.low %v4345_v11, %v4348_v42  ;;  %v13279_v40 = vcombine.low %v4460_v56, %v4463_v37  ;;  %v7715_v36 = vrot.slane %v12966_v39, 11  ;;  %v4466_v59 = vrot.slane %v12984_v16, 6  ;;  %s8809_s28 = smov 66  }
 0x3c0   :  { %v7684_v44 = vrot.slane %v4282_v9, 9  ;;  %v4353_v42 = vrot.slane %v4351_v26, 4  ;;  %v13303_v45 = vcombine.low %v13185_v20, %v4255_v43  ;;  %v4580_v51 = vrot.slane %v12984_v16, 7 }
 0x3c1   :  { %17590 = vst [vmem:[#allocation37_spill] sm:$0xff] %v13273_v58  ;;  %17591 = vst [vmem:[#allocation39_spill] sm:$0xff] %v13279_v40  ;;  %v4574_v24 = vsel %vm13206_vm3, %v7715_v36, %v4573_v14  ;;  %v13305_v37 = vpop.permute.xlu0 %3602  ;;  %v7700_v14 = vrot.slane %v4282_v9, 10  ;;  %v4468_v56 = vrot.slane %v4466_v59, 4  ;;  %v4469_v36 = vrot.slane %v4283_v0, 6 }
 0x3c2   :  { %v13297_v39 = vcombine.low %v4574_v24, %v4577_v50  ;;  %17593 = vst [vmem:[#allocation56_spill] sm:$0xff] %v13303_v45  ;;  %v4352_v20 = vsel %vm13052_vm5, %v7684_v44, %v4351_v26  ;;  %v4355_v43 = vsel %vm13052_vm5, %v4353_v42, %v4354_v1  ;;  %v7716_v50 = vrot.slane %v4282_v9, 11 }
 0x3c3   :  { %5932 = vrot.lane.b32.xlu1 %v13244_v28, %s8783_s16  ;;  %6082 = vrot.lane.b32.xlu0 %v13249_v46, %s8786_s25  ;;  %v13291_v33 = vpop.permute.xlu1 %3600  ;;  %v13321_v24 = vcombine.low %v4282_v9, %v12984_v16  ;;  %v4583_v46 = vrot.slane %v4283_v0, 7  ;;  %v13331_v44 = vcombine.low %v4352_v20, %v4355_v43  ;;  %v4284_v42 = vcombine.high %v12992_v12, %v12992_v12 }
 0x3c4   :  { %17592 = vst [vmem:[#allocation5_spill] sm:$0xff] %v13297_v39  ;;  %v4581_v1 = vsel %vm13206_vm3, %v7716_v50, %v4580_v51  ;;  %v4257_v43 = vsel %vm2410_vm11, %v12990_v48, %v13002_v23  ;;  %v13367_v48 = vcombine.low %v12984_v16, %v4283_v0 }
 0x3c5   :  { %17594 = vst [vmem:[#allocation54_spill] sm:$0xff] %v13321_v24  ;;  %v13327_v26 = vpop.permute.xlu0 %4101  ;;  %17595 = vst [vmem:[#allocation53_spill] sm:$0xff] %v13331_v44  ;;  %v4590_v10 = vrot.slane %v4257_v43, 7  ;;  %v13425_v28 = vcombine.low %v4284_v42, %v4257_v43 }
 0x3c6   :  { %17599 = vst [vmem:[#allocation87_spill] sm:$0xff] %v13367_v48 }
 0x3c7   :  { %6032 = vrot.lane.b32.xlu1 %v13263_v4, %s8785_s22  ;;  %6132 = vrot.lane.b32.xlu0 %v13273_v58, %s8802_s29  ;;  %v13310_v11 = vpop.permute.xlu1 %3506  ;;  %v4582_v58 = vrot.slane %v4580_v51, 4  ;;  %17607 = vst [vmem:[#allocation71_spill] sm:$0xff] %v13425_v28 }
 0x3cb   :  { %5934 = vrot.lane.b32.xlu1 %v13279_v40, %s8783_s16  ;;  %6182 = vrot.lane.b32.xlu0 %v13279_v40, %s8803_s30  ;;  %v4470_v40 = vsel %vm13221_vm9, %v4468_v56, %v4469_v36  ;;  %v13335_v9 = vpop.permute.xlu1 %4099  ;;  %v4358_v36 = vrot.slane %v4284_v42, 5 }
 0x3cf   :  { %5984 = vrot.lane.b32.xlu1 %v13297_v39, %s8784_s17  ;;  %6232 = vrot.lane.b32.xlu0 %v13297_v39, %s8804_s4  ;;  %v4467_v39 = vsel %vm13221_vm9, %v7700_v14, %v4466_v59  ;;  %v4584_v14 = vsel %vm13206_vm3, %v4582_v58, %v4583_v46  ;;  %v4360_v46 = vrot.slane %v4358_v36, 4  ;;  %v4361_v58 = vrot.slane %v4257_v43, 5 }
 0x3d0   :  { %v13339_v59 = vcombine.low %v4467_v39, %v4470_v40  ;;  %v13356_v40 = vcombine.low %v4581_v1, %v4584_v14  ;;  %v4473_v39 = vrot.slane %v4284_v42, 6  ;;  %v4476_v1 = vrot.slane %v4257_v43, 6 }
 0x3d2   :  { %17596 = vst [vmem:[#allocation52_spill] sm:$0xff] %v13339_v59  ;;  %17597 = vst [vmem:[#allocation80_spill] sm:$0xff] %v13356_v40  ;;  %v4475_v23 = vrot.slane %v4473_v39, 4 }
 0x3d3   :  { %6034 = vrot.lane.b32.xlu1 %v13303_v45, %s8785_s22  ;;  %6282 = vrot.lane.b32.xlu0 %v13303_v45, %s8805_s5  ;;  %v13378_v45 = vcombine.low %v12992_v12, %v4284_v42 }
 0x3d4   :  { %v4477_v4 = vsel %vm13221_vm9, %v4475_v23, %v4476_v1  ;;  %v7717_v1 = vrot.slane %v12992_v12, 11 }
 0x3d5   :  { %17600 = vst [vmem:[#allocation85_spill] sm:$0xff] %v13378_v45 }
 0x3d7   :  { %6084 = vrot.lane.b32.xlu1 %v13321_v24, %s8786_s25  ;;  %6134 = vrot.lane.b32.xlu0 %v13331_v44, %s8802_s29  ;;  %v4587_v24 = vrot.slane %v4284_v42, 7  ;;  %v4362_v44 = vsel %vm13052_vm5, %v4360_v46, %v4361_v58 }
 0x3d9   :  { %v13345_v56 = vpop.permute.xlu0 %3893  ;;  %v4589_v0 = vrot.slane %v4587_v24, 4 }
 0x3db   :  { %5936 = vrot.lane.b32.xlu1 %v13339_v59, %s8783_s16  ;;  %6184 = vrot.lane.b32.xlu0 %v13339_v59, %s8803_s30  ;;  %v7685_v59 = vrot.slane %v12992_v12, 9 }
 0x3dd   :  { %v13349_v20 = vpop.permute.xlu1 %3885  ;;  %v13358_v51 = vpop.permute.xlu0 %3903  ;;  %v4359_v31 = vsel %vm13052_vm5, %v7685_v59, %v4358_v36  ;;  %v4591_v59 = vsel %vm13206_vm3, %v4589_v0, %v4590_v10 }
 0x3de   :  { %v13392_v46 = vcombine.low %v4359_v31, %v4362_v44  ;;  %v4285_v31 = vcombine.high %v4257_v43, %v4257_v43  ;;  %v4286_v44 = vcombine.high %v13000_v7, %v13000_v7 }
 0x3df   :  { %5986 = vrot.lane.b32.xlu1 %v13356_v40, %s8784_s17  ;;  %6234 = vrot.lane.b32.xlu0 %v13356_v40, %s8804_s4  ;;  %v7701_v40 = vrot.slane %v12992_v12, 10 }
 0x3e0   :  { %17601 = vst [vmem:[#allocation88_spill] sm:$0xff] %v13392_v46  ;;  %v7718_v43 = vrot.slane %v4285_v31, 11 }
 0x3e1   :  { %v13364_v50 = vpop.permute.xlu1 %3895  ;;  %v13369_v14 = vpop.permute.xlu0 %3913  ;;  %v4474_v58 = vsel %vm13221_vm9, %v7701_v40, %v4473_v39  ;;  %v4365_v40 = vrot.slane %v13000_v7, 5  ;;  %v4480_v39 = vrot.slane %v13000_v7, 6 }
 0x3e2   :  { %17598 = vst [vmem:[#allocation16_spill] sm:$0xff] %v13364_v50  ;;  %v13400_v23 = vcombine.low %v4474_v58, %v4477_v4  ;;  %v4588_v4 = vsel %vm13206_vm3, %v7717_v1, %v4587_v24  ;;  %v7686_v58 = vrot.slane %v4285_v31, 9  ;;  %v7702_v1 = vrot.slane %v4285_v31, 10 }
 0x3e3   :  { %6036 = vrot.lane.b32.xlu1 %v13367_v48, %s8785_s22  ;;  %6284 = vrot.lane.b32.xlu0 %v13367_v48, %s8805_s5  ;;  %v13418_v10 = vcombine.low %v4588_v4, %v4591_v59  ;;  %v4594_v59 = vrot.slane %v13000_v7, 7  ;;  %v4482_v4 = vrot.slane %v4480_v39, 4 }
 0x3e4   :  { %17602 = vst [vmem:[#allocation12_spill] sm:$0xff] %v13400_v23 }
 0x3e5   :  { %v13382_v16 = vpop.permute.xlu1 %3905  ;;  %v13388_v60 = vpop.permute.xlu0 %3923  ;;  %17605 = vst [vmem:[#allocation98_spill] sm:$0xff] %v13418_v10 }
 0x3e7   :  { %6086 = vrot.lane.b32.xlu1 %v13378_v45, %s8786_s25  ;;  %6136 = vrot.lane.b32.xlu0 %v13392_v46, %s8802_s29  ;;  %v4367_v46 = vrot.slane %v4365_v40, 4  ;;  %v4368_v45 = vrot.slane %v4286_v44, 5 }
 0x3e9   :  { %v13398_v48 = vpop.permute.xlu1 %3915  ;;  %v13405_v36 = vpop.permute.xlu0 %3933  ;;  %v4369_v42 = vsel %vm13052_vm5, %v4367_v46, %v4368_v45 }
 0x3ea   :  { %17603 = vst [vmem:[#allocation94_spill] sm:$0xff] %v13405_v36  ;;  %v4596_v36 = vrot.slane %v4594_v59, 4 }
 0x3eb   :  { %5938 = vrot.lane.b32.xlu1 %v13400_v23, %s8783_s16  ;;  %6186 = vrot.lane.b32.xlu0 %v13400_v23, %s8803_s30  ;;  %v4483_v23 = vrot.slane %v4286_v44, 6 }
 0x3ed   :  { %v13416_v12 = vpop.permute.xlu1 %3925  ;;  %v13421_v0 = vpop.permute.xlu0 %3943 }
 0x3ee   :  { %17604 = vst [vmem:[#allocation91_spill] sm:$0xff] %v13416_v12  ;;  %17606 = vst [vmem:[#allocation13_spill] sm:$0xff] %v13421_v0  ;;  %v4366_v0 = vsel %vm13052_vm5, %v7686_v58, %v4365_v40  ;;  %v4484_v12 = vsel %vm13221_vm9, %v4482_v4, %v4483_v23  ;;  %v4597_v40 = vrot.slane %v4286_v44, 7  ;;  %v4595_v23 = vsel %vm13206_vm3, %v7718_v43, %v4594_v59 }
 0x3ef   :  { %5988 = vrot.lane.b32.xlu1 %v13418_v10, %s8784_s17  ;;  %6236 = vrot.lane.b32.xlu0 %v13418_v10, %s8804_s4  ;;  %v13455_v45 = vcombine.low %v4366_v0, %v4369_v42  ;;  %v13510_v43 = vcombine.low %v13000_v7, %v4286_v44 }
 0x3f1   :  { %v13429_v24 = vpop.permute.xlu1 %3935  ;;  %v13432_v22 = vpop.permute.xlu0 %3518  ;;  %17613 = vst [vmem:[#allocation108_spill] sm:$0xff] %v13455_v45  ;;  %17622 = vst [vmem:[#allocation69_spill] sm:$0xff] %v13510_v43 }
 0x3f2   :  { %17608 = vst [vmem:[#allocation72_spill] sm:$0xff] %v13429_v24  ;;  %17609 = vst [vmem:[#allocation97_spill] sm:$0xff] %v13432_v22  ;;  %v13445_v24 = vcombine.low %v4285_v31, %v13000_v7  ;;  %v4481_v22 = vsel %vm13221_vm9, %v7702_v1, %v4480_v39  ;;  %v13465_v39 = vcombine.high %v13012_v32, %v13012_v32 }
 0x3f3   :  { %6038 = vrot.lane.b32.xlu1 %v13425_v28, %s8785_s22  ;;  %6286 = vrot.lane.b32.xlu0 %v13425_v28, %s8805_s5  ;;  %v13461_v31 = vcombine.low %v4481_v22, %v4484_v12  ;;  %v4598_v1 = vsel %vm13206_vm3, %v4596_v36, %v4597_v40  ;;  %v13478_v22 = vsel %vm2410_vm11, %v13349_v20, %v13345_v56  ;;  %v4393_v40 = vrot.slane %v13364_v50, 5 }
 0x3f4   :  { %17611 = vst [vmem:[#allocation104_spill] sm:$0xff] %v13445_v24  ;;  %17616 = vst [vmem:[#allocation105_spill] sm:$0xff] %v13478_v22  ;;  %v13483_v12 = vsel %vm2410_vm11, %v13131_v2, %v13171_v17  ;;  %v13489_v36 = vcombine.low %v4595_v23, %v4598_v1  ;;  %v4671_v59 = vrot.slane %v13465_v39, 6  ;;  %v13494_v42 = vcombine.high %v13478_v22, %v13478_v22 }
 0x3f5   :  { %v13442_v10 = vpop.permute.xlu1 %3516  ;;  %v13451_v58 = vpop.permute.xlu0 %3614  ;;  %17615 = vst [vmem:[#allocation107_spill] sm:$0xff] %v13461_v31  ;;  %v4674_v2 = vrot.slane %v13483_v12, 6  ;;  %v13503_v17 = vcombine.high %v13364_v50, %v13364_v50  ;;  %v4685_v1 = vrot.slane %v13465_v39, 7  ;;  %v4688_v7 = vrot.slane %v13483_v12, 7 }
 0x3f6   :  { %17610 = vst [vmem:[#allocation95_spill] sm:$0xff] %v13442_v10  ;;  %17612 = vst [vmem:[#allocation101_spill] sm:$0xff] %v13451_v58  ;;  %v4673_v23 = vrot.slane %v4671_v59, 4  ;;  %v4395_v10 = vrot.slane %v4393_v40, 4 }
 0x3f7   :  { %6088 = vrot.lane.b32.xlu1 %v13445_v24, %s8786_s25  ;;  %6138 = vrot.lane.b32.xlu0 %v13455_v45, %s8802_s29  ;;  %17618 = vst [vmem:[#allocation111_spill] sm:$0xff] %v13489_v36  ;;  %17619 = vst [vmem:[#allocation110_spill] sm:$0xff] %v13494_v42  ;;  %v7729_v24 = vrot.slane %v13012_v32, 10  ;;  %v4657_v45 = vrot.slane %v13465_v39, 5  ;;  %v4687_v58 = vrot.slane %v4685_v1, 4 }
 0x3f8   :  { %v4675_v44 = vsel %vm13221_vm9, %v4673_v23, %v4674_v2 }
 0x3f9   :  { %v13459_v46 = vpop.permute.xlu1 %3612  ;;  %v13471_v4 = vpop.permute.xlu0 %3510 }
 0x3fa   :  { %17614 = vst [vmem:[#allocation15_spill] sm:$0xff] %v13459_v46  ;;  %v4672_v46 = vsel %vm13221_vm9, %v7729_v24, %v4671_v59  ;;  %v4659_v24 = vrot.slane %v4657_v45, 4 }
 0x3fb   :  { %5940 = vrot.lane.b32.xlu1 %v13461_v31, %s8783_s16  ;;  %6188 = vrot.lane.b32.xlu0 %v13461_v31, %s8803_s30  ;;  %v13520_v31 = vcombine.low %v13012_v32, %v13465_v39  ;;  %v13540_v2 = vcombine.low %v4672_v46, %v4675_v44  ;;  %v7727_v46 = vrot.slane %v13012_v32, 9  ;;  %v3628_v44 = vrot.slane %v13076_v54, 2 }
 0x3fc   :  { %v3534_v54 = vrot.slane %v13083_v49, 2 }
 0x3fd   :  { %v13487_v0 = vpop.permute.xlu1 %3508  ;;  %v13496_v56 = vpop.permute.xlu0 %3604  ;;  %17624 = vst [vmem:[#allocation48_spill] sm:$0xff] %v13520_v31  ;;  %17626 = vst [vmem:[#allocation7_spill] sm:$0xff] %v13540_v2 }
 0x3fe   :  { %17617 = vst [vmem:[#allocation113_spill] sm:$0xff] %v13487_v0  ;;  %17620 = vst [vmem:[#allocation17_spill] sm:$0xff] %v13496_v56  ;;  %v4689_v0 = vsel %vm13206_vm3, %v4687_v58, %v4688_v7  ;;  %v3533_v7 = vrot.slane %v13062_v13, 2  ;;  %v3532_v13 = vrot.slane %v13039_v5, 2 }
 0x3ff   :  { %5990 = vrot.lane.b32.xlu1 %v13489_v36, %s8784_s17  ;;  %6238 = vrot.lane.b32.xlu0 %v13489_v36, %s8804_s4  ;;  %v7690_v36 = vrot.slane %v13494_v42, 9 }
 0x401   :  { %v13507_v20 = vpop.permute.xlu1 %3520  ;;  %v13514_v22 = vpop.permute.xlu0 %3616  ;;  %v4394_v23 = vsel %vm13052_vm5, %v7690_v36, %v4393_v40 }
 0x402   :  { %17621 = vst [vmem:[#allocation43_spill] sm:$0xff] %v13507_v20  ;;  %17623 = vst [vmem:[#allocation114_spill] sm:$0xff] %v13514_v22  ;;  %v4396_v22 = vrot.slane %v13503_v17, 5  ;;  %v4660_v20 = vrot.slane %v13483_v12, 5 }
 0x403   :  { %6040 = vrot.lane.b32.xlu1 %v13510_v43, %s8785_s22  ;;  %6090 = vrot.lane.b32.xlu0 %v13520_v31, %s8786_s25 }
 0x404   :  { %v4397_v31 = vsel %vm13052_vm5, %v4395_v10, %v4396_v22  ;;  %v4661_v10 = vsel %vm13052_vm5, %v4659_v24, %v4660_v20  ;;  %v13580_v20 = vcombine.high %v13284_v61, %v13284_v61  ;;  %v4288_v24 = vcombine.high %v13483_v12, %v13483_v12 }
 0x405   :  { %v13530_v28 = vpop.permute.xlu1 %3606  ;;  %v13536_v56 = vpop.permute.xlu0 %3512  ;;  %v13549_v59 = vcombine.low %v4394_v23, %v4397_v31  ;;  %v4658_v31 = vsel %vm13052_vm5, %v7727_v46, %v4657_v45  ;;  %v3630_v23 = vrot.slane %v13104_v27, 2 }
 0x406   :  { %17625 = vst [vmem:[#allocation44_spill] sm:$0xff] %v13530_v28  ;;  %v7731_v28 = vrot.slane %v13012_v32, 11  ;;  %v13572_v40 = vcombine.low %v4658_v31, %v4661_v10  ;;  %v4716_v10 = vrot.slane %v13580_v20, 6  ;;  %v13608_v31 = vcombine.low %v13465_v39, %v13483_v12 }
 0x407   :  { %3873 = vrot.lane.b32.xlu1 %v12950_v21, %s8788_s19  ;;  %17627 = vst [vmem:[#allocation70_spill] sm:$0xff] %v13549_v59  ;;  %5942 = vrot.lane.b32.xlu0 %v13540_v2, %s8783_s16  ;;  %v7735_v5 = vrot.slane %v4288_v24, 10  ;;  %v4730_v39 = vrot.slane %v13580_v20, 7  ;;  %v13624_v12 = vcombine.low %v4288_v24, %v13284_v61 }
 0x408   :  { %v4686_v36 = vsel %vm13206_vm3, %v7731_v28, %v4685_v1  ;;  %17630 = vst [vmem:[#allocation121_spill] sm:$0xff] %v13572_v40  ;;  %v3629_v1 = vrot.slane %v13072_v19, 2  ;;  %v4727_v19 = vrot.slane %v13284_v61, 7  ;;  %17632 = vst [vmem:[#allocation21_spill] sm:$0xff] %v13608_v31 }
 0x409   :  { %v13553_v21 = vpop.permute.xlu1 %3869  ;;  %v13560_v22 = vpop.permute.xlu0 %3608  ;;  %v13564_v58 = vcombine.low %v4686_v36, %v4689_v0  ;;  %v4713_v0 = vrot.slane %v13284_v61, 6  ;;  %17633 = vst [vmem:[#allocation63_spill] sm:$0xff] %v13624_v12 }
 0x40a   :  { %v3677_v59 = vmax.f32 %v3533_v7, %v3629_v1 }
 0x40b   :  { %6288 = vrot.lane.b32.xlu1 %v13510_v43, %s8805_s5  ;;  %17628 = vst [vmem:[#allocation64_spill] sm:$0xff] %v13564_v58  ;;  %5992 = vrot.lane.b32.xlu0 %v13564_v58, %s8784_s17  ;;  %v4715_v36 = vrot.slane %v4713_v0, 4  ;;  %v3678_v43 = vmax.f32 %v3534_v54, %v3630_v23  ;;  %v4714_v7 = vsel %vm13221_vm9, %v7735_v5, %v4713_v0  ;;  %v4702_v23 = vrot.slane %v13580_v20, 5 }
 0x40c   :  { %v4140_v1 = vrot.slane %v3677_v59, %v17562_v62  ;;  %v13641_v59 = vcombine.high %v13335_v9, %v13335_v9  ;;  %v7737_v0 = vrot.slane %v4288_v24, 11 }
 0x40d   :  { %v13570_v32 = vpop.permute.xlu1 %3522  ;;  %v13574_v28 = vpop.permute.xlu0 %3945 }
 0x40e   :  { %17629 = vst [vmem:[#allocation66_spill] sm:$0xff] %v13570_v32  ;;  %v4728_v5 = vsel %vm13206_vm3, %v7737_v0, %v4727_v19  ;;  %v3536_v0 = vrot.slane %v13008_v18, 2  ;;  %v4769_v18 = vrot.slane %v13641_v59, 7 }
 0x40f   :  { %6140 = vrot.lane.b32.xlu1 %v13572_v40, %s8802_s29  ;;  %3875 = vrot.lane.b32.xlu0 %v12972_v30, %s8788_s19  ;;  %v3631_v30 = vrot.slane %v13195_v41, 2  ;;  %v3535_v41 = vrot.slane %v13165_v25, 2  ;;  %v3676_v40 = vmax.f32 %v3532_v13, %v3628_v44  ;;  %s8806_s19 = smov 54  }
 0x411   :  { %v13585_v45 = vpop.permute.xlu1 %3618  ;;  %v13593_v46 = vpop.permute.xlu0 %3514  ;;  %v3679_v49 = vmax.f32 %v3535_v41, %v3631_v30  ;;  %v4136_v30 = vrot.slane %v3676_v40, %v17562_v62  ;;  %v3633_v40 = vrot.slane %v13043_v52, 2 }
 0x412   :  { %17631 = vst [vmem:[#allocation46_spill] sm:$0xff] %v13585_v45  ;;  %v4729_v45 = vrot.slane %v4727_v19, 4  ;;  %v4755_v19 = vrot.slane %v13641_v59, 6 }
 0x413   :  { %6190 = vrot.lane.b32.xlu1 %v13540_v2, %s8803_s30  ;;  %6240 = vrot.lane.b32.xlu0 %v13564_v58, %s8804_s4  ;;  %v4699_v2 = vrot.slane %v13284_v61, 5  ;;  %v4717_v58 = vsel %vm13221_vm9, %v4715_v36, %v4716_v10  ;;  %v4144_v36 = vrot.slane %v3678_v43, %v17562_v62  ;;  %v4148_v54 = vrot.slane %v3679_v49, %v17562_v62 }
 0x414   :  { %v13636_v13 = vcombine.low %v4714_v7, %v4717_v58  ;;  %v4731_v41 = vsel %vm13206_vm3, %v4729_v45, %v4730_v39  ;;  %v4229_v58 = vsel %vm3828_vm4, %v4140_v1, %v4136_v30  ;;  %v7733_v49 = vrot.slane %v4288_v24, 9 }
 0x415   :  { %v13604_v27 = vpop.permute.xlu1 %3953  ;;  %v13612_v32 = vpop.permute.xlu0 %3610  ;;  %v4701_v44 = vrot.slane %v4699_v2, 4  ;;  %v4230_v45 = vsel %vm3830_vm6, %v4144_v36, %v4229_v58  ;;  %v13661_v52 = vcombine.low %v4728_v5, %v4731_v41  ;;  %v3632_v1 = vrot.slane %v13018_v57, 2 }
 0x416   :  { %17634 = vst [vmem:[#allocation49_spill] sm:$0xff] %v13636_v13  ;;  %v4231_v30 = vsel %vm3832_vm8, %v4148_v54, %v4230_v45  ;;  %v4700_v24 = vsel %vm13052_vm5, %v7733_v49, %v4699_v2  ;;  %v3635_v54 = vrot.slane %v13141_v38, 2  ;;  %v3636_v2 = vrot.slane %v13240_v63, 2 }
 0x417   :  { %6042 = vrot.lane.b32.xlu1 %v13608_v31, %s8785_s22  ;;  %6290 = vrot.lane.b32.xlu0 %v13608_v31, %s8805_s5  ;;  %v4703_v7 = vsel %vm13052_vm5, %v4701_v44, %v4702_v23  ;;  %17635 = vst [vmem:[#allocation122_spill] sm:$0xff] %v13661_v52  ;;  %v13671_v23 = vsel %vm2410_vm11, %v13327_v26, %v4231_v30  ;;  %v3540_v5 = vrot.slane %v13200_v35, 2  ;;  %v4757_v63 = vrot.slane %v4755_v19, 4 }
 0x418   :  { %v13677_v57 = vcombine.low %v4700_v24, %v4703_v7  ;;  %v13690_v26 = vcombine.low %v13284_v61, %v13580_v20  ;;  %v4758_v38 = vrot.slane %v13671_v23, 6  ;;  %v3680_v49 = vmax.f32 %v3536_v0, %v3632_v1 }
 0x419   :  { %v13621_v25 = vpop.permute.xlu1 %3524  ;;  %v13632_v10 = vpop.permute.xlu0 %3526  ;;  %v3637_v30 = vrot.slane %v13267_v6, 2  ;;  %v3684_v20 = vmax.f32 %v3540_v5, %v3636_v2  ;;  %v3638_v35 = vrot.slane %v13291_v33, 2  ;;  %v3542_v1 = vrot.slane %v13257_v34, 2 }
 0x41a   :  { %17636 = vst [vmem:[#allocation118_spill] sm:$0xff] %v13677_v57  ;;  %17639 = vst [vmem:[#allocation34_spill] sm:$0xff] %v13690_v26  ;;  %v13712_v6 = vcombine.low %v13335_v9, %v13641_v59  ;;  %v4772_v33 = vrot.slane %v13671_v23, 7  ;;  %v4771_v2 = vrot.slane %v4769_v18, 4  ;;  %v4152_v34 = vrot.slane %v3680_v49, %v17562_v62 }
 0x41b   :  { %6092 = vrot.lane.b32.xlu1 %v13624_v12, %s8786_s25  ;;  %5944 = vrot.lane.b32.xlu0 %v13636_v13, %s8783_s16  ;;  %v3537_v12 = vrot.slane %v13022_v47, 2  ;;  %v3634_v47 = vrot.slane %v13088_v55, 2  ;;  %v17638_v55 = vld [vmem:[#allocation47_spill] sm:$0xff]  ;;  %v3686_v5 = vmax.f32 %v3542_v1, %v3638_v35  ;;  %v7743_v35 = vrot.slane %v13335_v9, 11 }
 0x41c   :  { %17640 = vst [vmem:[#allocation77_spill] sm:$0xff] %v13712_v6 }
 0x41d   :  { %v13648_v43 = vpop.permute.xlu1 %3620  ;;  %v13657_v39 = vpop.permute.xlu0 %3871  ;;  %v3681_v44 = vmax.f32 %v3537_v12, %v3633_v40  ;;  %v17637_v12 = vld [vmem:[#allocation24_spill] sm:$0xff]  ;;  %v3539_v40 = vrot.slane %v17638_v55, 2  ;;  %v3541_v55 = vrot.slane %v13235_v29, 2  ;;  %v4759_v29 = vsel %vm13221_vm9, %v4757_v63, %v4758_v38 }
 0x41e   :  { %v3538_v41 = vrot.slane %v17637_v12, 2  ;;  %v4741_v12 = vrot.slane %v13641_v59, 5 }
 0x41f   :  { %3883 = vrot.lane.b32.xlu1 %v12959_v3, %s8790_s24  ;;  %5994 = vrot.lane.b32.xlu0 %v13661_v52, %s8784_s17  ;;  %v4156_v7 = vrot.slane %v3681_v44, %v17562_v62  ;;  %v3683_v61 = vmax.f32 %v3539_v40, %v3635_v54  ;;  %v3639_v44 = vrot.slane %v13305_v37, 2  ;;  %v7741_v54 = vrot.slane %v13335_v9, 10  ;;  %s8817_s24 = smov 64  }
 0x420   :  { %v3682_v45 = vmax.f32 %v3538_v41, %v3634_v47  ;;  %v3685_v0 = vmax.f32 %v3541_v55, %v3637_v30  ;;  %v3543_v41 = vrot.slane %v13310_v11, 2  ;;  %v4743_v38 = vrot.slane %v4741_v12, 4 }
 0x421   :  { %v13675_v36 = vpop.permute.xlu1 %3622  ;;  %v13684_v58 = vpop.permute.xlu0 %3624  ;;  %v4164_v63 = vrot.slane %v3683_v61, %v17562_v62  ;;  %v4168_v30 = vrot.slane %v3684_v20, %v17562_v62  ;;  %v4773_v55 = vsel %vm13206_vm3, %v4771_v2, %v4772_v33 }
 0x422   :  { %v4160_v37 = vrot.slane %v3682_v45, %v17562_v62  ;;  %v3687_v49 = vmax.f32 %v3543_v41, %v3639_v44  ;;  %v4232_v45 = vsel %vm16975_vm12, %v4156_v7, %v4152_v34  ;;  %v4172_v61 = vrot.slane %v3685_v0, %v17562_v62 }
 0x423   :  { %6142 = vrot.lane.b32.xlu1 %v13677_v57, %s8802_s29  ;;  %6044 = vrot.lane.b32.xlu0 %v13690_v26, %s8785_s22  ;;  %v4756_v57 = vsel %vm13221_vm9, %v7741_v54, %v4755_v19  ;;  %v4176_v44 = vrot.slane %v3686_v5, %v17562_v62  ;;  %v4770_v7 = vsel %vm13206_vm3, %v7743_v35, %v4769_v18  ;;  %v4508_v18 = vrot.slane %v13364_v50, 6 }
 0x424   :  { %v5930_v11 = vcombine.low %v4756_v57, %v4759_v29  ;;  %v4233_v19 = vsel %vm3822_vm13, %v4160_v37, %v4232_v45  ;;  %v7739_v57 = vrot.slane %v13335_v9, 9  ;;  %v4180_v33 = vrot.slane %v3687_v49, %v17562_v62 }
 0x425   :  { %v13699_v24 = vpop.permute.xlu1 %3528  ;;  %v13706_v47 = vpop.permute.xlu0 %3530  ;;  %v4234_v54 = vsel %vm3824_vm14, %v4164_v63, %v4233_v19  ;;  %v5980_v2 = vcombine.low %v4770_v7, %v4773_v55  ;;  %v6030_v63 = vcombine.low %v13641_v59, %v13671_v23  ;;  %v4510_v49 = vrot.slane %v4508_v18, 4 }
 0x426   :  { %v4235_v34 = vsel %vm3826_vm15, %v4168_v30, %v4234_v54  ;;  %v4742_v9 = vsel %vm13052_vm5, %v7739_v57, %v4741_v12  ;;  %v4511_v45 = vrot.slane %v13503_v17, 6  ;;  %v4622_v30 = vrot.slane %v13364_v50, 7 }
 0x427   :  { %6192 = vrot.lane.b32.xlu1 %v13636_v13, %s8803_s30  ;;  %6094 = vrot.lane.b32.xlu0 %v13712_v6, %s8786_s25  ;;  %v4744_v13 = vrot.slane %v13671_v23, 5  ;;  %v4236_v37 = vsel %vm3828_vm4, %v4172_v61, %v4235_v34  ;;  %v7706_v19 = vrot.slane %v13494_v42, 10  ;;  %v4625_v7 = vrot.slane %v13503_v17, 7 }
 0x428   :  { %v4237_v41 = vsel %vm3830_vm6, %v4176_v44, %v4236_v37  ;;  %v4624_v57 = vrot.slane %v4622_v30, 4 }
 0x429   :  { %v13723_v40 = vpop.permute.xlu1 %3955  ;;  %v13729_v31 = vpop.permute.xlu0 %3879  ;;  %v4745_v20 = vsel %vm13052_vm5, %v4743_v38, %v4744_v13  ;;  %v13767_v5 = vsel %vm3832_vm8, %v4180_v33, %v4237_v41  ;;  %v13771_v38 = vcombine.high %v13671_v23, %v13671_v23  ;;  %v4512_v23 = vsel %vm13221_vm9, %v4510_v49, %v4511_v45 }
 0x42a   :  { %v13763_v0 = vcombine.low %v4742_v9, %v4745_v20  ;;  %v13786_v55 = vcombine.high %v13767_v5, %v13767_v5  ;;  %v4783_v61 = vrot.slane %v13767_v5, 5  ;;  %v4797_v54 = vrot.slane %v13767_v5, 6 }
 0x42b   :  { %6242 = vrot.lane.b32.xlu1 %v13661_v52, %s8804_s4  ;;  %5946 = vrot.lane.b32.xlu0 %v5930_v11, %s8783_s16  ;;  %v6080_v59 = vcombine.low %v13771_v38, %v13767_v5  ;;  %v4509_v33 = vsel %vm13221_vm9, %v7706_v19, %v4508_v18  ;;  %v4626_v49 = vsel %vm13206_vm3, %v4624_v57, %v4625_v7  ;;  %v7745_v45 = vrot.slane %v13771_v38, 9 }
 0x42c   :  { %17641 = vst [vmem:[#allocation28_spill] sm:$0xff] %v13763_v0  ;;  %v4785_v34 = vrot.slane %v4783_v61, 4  ;;  %v4786_v9 = vrot.slane %v13786_v55, 5  ;;  %v13809_v41 = vcombine.low %v4509_v33, %v4512_v23  ;;  %v4799_v19 = vrot.slane %v4797_v54, 4 }
 0x42d   :  { %v13741_v1 = vpop.permute.xlu1 %3626  ;;  %v13751_v29 = vpop.permute.xlu0 %4105  ;;  %v4811_v57 = vrot.slane %v13767_v5, 7 }
 0x42e   :  { %17642 = vst [vmem:[#allocation73_spill] sm:$0xff] %v13809_v41  ;;  %v4787_v23 = vsel %vm13052_vm5, %v4785_v34, %v4786_v9 }
 0x42f   :  { %6292 = vrot.lane.b32.xlu1 %v13690_v26, %s8805_s5  ;;  %5996 = vrot.lane.b32.xlu0 %v5980_v2, %s8784_s17 }
 0x431   :  { %v13761_v13 = vpop.permute.xlu1 %4103  ;;  %v13773_v12 = vpop.permute.xlu0 %5982 }
 0x433   :  { %6144 = vrot.lane.b32.xlu1 %v13763_v0, %s8802_s29  ;;  %6046 = vrot.lane.b32.xlu0 %v6030_v63, %s8785_s22  ;;  %v13821_v0 = vcombine.high %v13358_v51, %v13358_v51 }
 0x435   :  { %v13782_v35 = vpop.permute.xlu1 %5932  ;;  %v13790_v44 = vpop.permute.xlu0 %6082  ;;  %v4515_v9 = vrot.slane %v13821_v0, 6 }
 0x437   :  { %6194 = vrot.lane.b32.xlu1 %v5930_v11, %s8803_s30  ;;  %6096 = vrot.lane.b32.xlu0 %v6080_v59, %s8786_s25  ;;  %v7722_v11 = vrot.slane %v13494_v42, 11  ;;  %v4800_v59 = vrot.slane %v13786_v55, 6  ;;  %v7747_v42 = vrot.slane %v13771_v38, 10 }
 0x439   :  { %v13799_v20 = vpop.permute.xlu1 %6032  ;;  %v13806_v37 = vpop.permute.xlu0 %6132 }
 0x43b   :  { %6244 = vrot.lane.b32.xlu1 %v5980_v2, %s8804_s4  ;;  %5948 = vrot.lane.b32.xlu0 %v13809_v41, %s8783_s16  ;;  %v4623_v2 = vsel %vm13206_vm3, %v7722_v11, %v4622_v30  ;;  %v4784_v41 = vsel %vm13052_vm5, %v7745_v45, %v4783_v61  ;;  %v4256_v30 = vsel %vm2410_vm11, %v13382_v16, %v13369_v14  ;;  %v4814_v61 = vrot.slane %v13786_v55, 7 }
 0x43c   :  { %v13831_v33 = vcombine.low %v4623_v2, %v4626_v49  ;;  %v6130_v34 = vcombine.low %v4784_v41, %v4787_v23  ;;  %v4813_v49 = vrot.slane %v4811_v57, 4  ;;  %v13852_v14 = vcombine.low %v13364_v50, %v13503_v17 }
 0x43d   :  { %v13816_v18 = vpop.permute.xlu1 %5934  ;;  %v13828_v7 = vpop.permute.xlu0 %6182  ;;  %v7749_v16 = vrot.slane %v13771_v38, 11  ;;  %v4518_v2 = vrot.slane %v4256_v30, 6  ;;  %v4798_v41 = vsel %vm13221_vm9, %v7747_v42, %v4797_v54  ;;  %v4517_v23 = vrot.slane %v4515_v9, 4 }
 0x43e   :  { %17643 = vst [vmem:[#allocation29_spill] sm:$0xff] %v13816_v18  ;;  %17644 = vst [vmem:[#allocation55_spill] sm:$0xff] %v13831_v33  ;;  %v13866_v17 = vcombine.low %v13358_v51, %v13821_v0  ;;  %v7707_v54 = vrot.slane %v13358_v51, 10  ;;  %v4403_v50 = vrot.slane %v4256_v30, 5 }
 0x43f   :  { %6294 = vrot.lane.b32.xlu1 %v6030_v63, %s8805_s5  ;;  %5998 = vrot.lane.b32.xlu0 %v13831_v33, %s8784_s17  ;;  %v4801_v63 = vsel %vm13221_vm9, %v4799_v19, %v4800_v59  ;;  %17646 = vst [vmem:[#allocation25_spill] sm:$0xff] %v13852_v14  ;;  %v4629_v33 = vrot.slane %v13821_v0, 7  ;;  %v4812_v42 = vsel %vm13206_vm3, %v7749_v16, %v4811_v57 }
 0x440   :  { %v6180_v59 = vcombine.low %v4798_v41, %v4801_v63  ;;  %17648 = vst [vmem:[#allocation9_spill] sm:$0xff] %v13866_v17  ;;  %v4400_v63 = vrot.slane %v13821_v0, 5  ;;  %v4519_v41 = vsel %vm13221_vm9, %v4517_v23, %v4518_v2  ;;  %v7723_v2 = vrot.slane %v13358_v51, 11 }
 0x441   :  { %v13841_v11 = vpop.permute.xlu1 %5984  ;;  %v13847_v45 = vpop.permute.xlu0 %6232  ;;  %v4631_v6 = vrot.slane %v4629_v33, 4 }
 0x442   :  { %17645 = vst [vmem:[#allocation30_spill] sm:$0xff] %v13841_v11  ;;  %v4402_v23 = vrot.slane %v4400_v63, 4 }
 0x443   :  { %6146 = vrot.lane.b32.xlu1 %v6130_v34, %s8802_s29  ;;  %6048 = vrot.lane.b32.xlu0 %v13852_v14, %s8785_s22  ;;  %v4815_v34 = vsel %vm13206_vm3, %v4813_v49, %v4814_v61  ;;  %v4632_v14 = vrot.slane %v4256_v30, 7 }
 0x444   :  { %v6230_v61 = vcombine.low %v4812_v42, %v4815_v34  ;;  %v7691_v42 = vrot.slane %v13358_v51, 9 }
 0x445   :  { %v13859_v19 = vpop.permute.xlu1 %6034  ;;  %v13868_v38 = vpop.permute.xlu0 %6282 }
 0x446   :  { %17647 = vst [vmem:[#allocation75_spill] sm:$0xff] %v13859_v19  ;;  %17649 = vst [vmem:[#allocation76_spill] sm:$0xff] %v13868_v38  ;;  %v4401_v51 = vsel %vm13052_vm5, %v7691_v42, %v4400_v63 }
 0x447   :  { %6196 = vrot.lane.b32.xlu1 %v6180_v59, %s8803_s30  ;;  %6098 = vrot.lane.b32.xlu0 %v13866_v17, %s8786_s25  ;;  %v4516_v59 = vsel %vm13221_vm9, %v7707_v54, %v4515_v9  ;;  %v4633_v17 = vsel %vm13206_vm3, %v4631_v6, %v4632_v14  ;;  %v6280_v9 = vcombine.low %v13767_v5, %v13786_v55 }
 0x448   :  { %v13886_v16 = vcombine.low %v4516_v59, %v4519_v41  ;;  %v4404_v54 = vsel %vm13052_vm5, %v4402_v23, %v4403_v50  ;;  %v4630_v41 = vsel %vm13206_vm3, %v7723_v2, %v4629_v33  ;;  %v4301_v14 = vcombine.high %v13398_v48, %v13398_v48 }
 0x449   :  { %v13879_v49 = vpop.permute.xlu1 %6084  ;;  %v13883_v57 = vpop.permute.xlu0 %6134  ;;  %v13905_v6 = vcombine.low %v4630_v41, %v4633_v17  ;;  %v4522_v59 = vrot.slane %v13398_v48, 6  ;;  %v13916_v5 = vcombine.low %v4401_v51, %v4404_v54  ;;  %v4300_v55 = vcombine.high %v4256_v30, %v4256_v30 }
 0x44a   :  { %17650 = vst [vmem:[#allocation36_spill] sm:$0xff] %v13879_v49  ;;  %17651 = vst [vmem:[#allocation93_spill] sm:$0xff] %v13883_v57  ;;  %v13919_v33 = vcombine.low %v13821_v0, %v4256_v30  ;;  %v4636_v2 = vrot.slane %v13398_v48, 7  ;;  %v4525_v63 = vrot.slane %v4301_v14, 6  ;;  %v4407_v54 = vrot.slane %v13398_v48, 5 }
 0x44b   :  { %6246 = vrot.lane.b32.xlu1 %v6230_v61, %s8804_s4  ;;  %17652 = vst [vmem:[#allocation65_spill] sm:$0xff] %v13886_v16  ;;  %5950 = vrot.lane.b32.xlu0 %v13886_v16, %s8783_s16  ;;  %17655 = vst [vmem:[#allocation33_spill] sm:$0xff] %v13905_v6  ;;  %v4524_v23 = vrot.slane %v4522_v59, 4  ;;  %v7708_v42 = vrot.slane %v4300_v55, 10  ;;  %v13936_v0 = vcombine.low %v4300_v55, %v13398_v48  ;;  %v7724_v52 = vrot.slane %v4300_v55, 11 }
 0x44c   :  { %17657 = vst [vmem:[#allocation112_spill] sm:$0xff] %v13916_v5  ;;  %17658 = vst [vmem:[#allocation103_spill] sm:$0xff] %v13919_v33  ;;  %v4638_v51 = vrot.slane %v4636_v2, 4 }
 0x44d   :  { %v13893_v34 = vpop.permute.xlu1 %5936  ;;  %v13902_v61 = vpop.permute.xlu0 %6184  ;;  %17662 = vst [vmem:[#allocation57_spill] sm:$0xff] %v13936_v0  ;;  %v4526_v30 = vsel %vm13221_vm9, %v4524_v23, %v4525_v63  ;;  %v4523_v3 = vsel %vm13221_vm9, %v7708_v42, %v4522_v59  ;;  %v7692_v23 = vrot.slane %v4300_v55, 9  ;;  %v4302_v59 = vcombine.high %v13388_v60, %v13388_v60 }
 0x44e   :  { %17653 = vst [vmem:[#allocation41_spill] sm:$0xff] %v13893_v34  ;;  %17654 = vst [vmem:[#allocation82_spill] sm:$0xff] %v13902_v61  ;;  %v13950_v34 = vcombine.low %v4523_v3, %v4526_v30  ;;  %v4637_v42 = vsel %vm13206_vm3, %v7724_v52, %v4636_v2  ;;  %v17669_v30 = vld [vmem:[#allocation94_spill] sm:$0xff] }
 0x44f   :  { %6296 = vrot.lane.b32.xlu1 %v6280_v9, %s8805_s5  ;;  %6000 = vrot.lane.b32.xlu0 %v13905_v6, %s8784_s17  ;;  %v4408_v55 = vsel %vm13052_vm5, %v7692_v23, %v4407_v54  ;;  %v4529_v2 = vrot.slane %v4302_v59, 6 }
 0x450   :  { %17665 = vst [vmem:[#allocation62_spill] sm:$0xff] %v13950_v34 }
 0x451   :  { %v13914_v50 = vpop.permute.xlu1 %5986  ;;  %v13921_v17 = vpop.permute.xlu0 %6234 }
 0x452   :  { %17656 = vst [vmem:[#allocation51_spill] sm:$0xff] %v13914_v50  ;;  %17659 = vst [vmem:[#allocation23_spill] sm:$0xff] %v13921_v17  ;;  %v4410_v50 = vrot.slane %v4301_v14, 5 }
 0x453   :  { %6148 = vrot.lane.b32.xlu1 %v13916_v5, %s8802_s29  ;;  %6050 = vrot.lane.b32.xlu0 %v13919_v33, %s8785_s22  ;;  %v4639_v5 = vrot.slane %v4301_v14, 7 }
 0x455   :  { %v13928_v9 = vpop.permute.xlu1 %6036  ;;  %v13931_v41 = vpop.permute.xlu0 %6284  ;;  %v4640_v63 = vsel %vm13206_vm3, %v4638_v51, %v4639_v5  ;;  %v17670_v51 = vld [vmem:[#allocation91_spill] sm:$0xff] }
 0x456   :  { %17660 = vst [vmem:[#allocation20_spill] sm:$0xff] %v13928_v9  ;;  %17661 = vst [vmem:[#allocation45_spill] sm:$0xff] %v13931_v41  ;;  %v4409_v9 = vrot.slane %v4407_v54, 4  ;;  %v13968_v5 = vcombine.low %v4637_v42, %v4640_v63  ;;  %v13986_v63 = vcombine.low %v13398_v48, %v4301_v14  ;;  %v4531_v42 = vrot.slane %v4529_v2, 4 }
 0x457   :  { %6198 = vrot.lane.b32.xlu1 %v13886_v16, %s8803_s30  ;;  %6100 = vrot.lane.b32.xlu0 %v13936_v0, %s8786_s25  ;;  %v4414_v48 = vrot.slane %v4302_v59, 5 }
 0x458   :  { %17668 = vst [vmem:[#allocation79_spill] sm:$0xff] %v13968_v5  ;;  %17674 = vst [vmem:[#allocation116_spill] sm:$0xff] %v13986_v63 }
 0x459   :  { %v13942_v26 = vpop.permute.xlu1 %6086  ;;  %v13946_v16 = vpop.permute.xlu0 %6136 }
 0x45a   :  { %17663 = vst [vmem:[#allocation83_spill] sm:$0xff] %v13942_v26  ;;  %17664 = vst [vmem:[#allocation109_spill] sm:$0xff] %v13946_v16 }
 0x45b   :  { %6248 = vrot.lane.b32.xlu1 %v13905_v6, %s8804_s4  ;;  %5952 = vrot.lane.b32.xlu0 %v13950_v34, %s8783_s16  ;;  %v4411_v6 = vsel %vm13052_vm5, %v4409_v9, %v4410_v50 }
 0x45c   :  { %v13979_v50 = vcombine.low %v4408_v55, %v4411_v6  ;;  %v13993_v6 = vcombine.low %v13388_v60, %v4302_v59 }
 0x45d   :  { %v13956_v0 = vpop.permute.xlu1 %5938  ;;  %v13964_v3 = vpop.permute.xlu0 %6186 }
 0x45e   :  { %17666 = vst [vmem:[#allocation50_spill] sm:$0xff] %v13956_v0  ;;  %17667 = vst [vmem:[#allocation96_spill] sm:$0xff] %v13964_v3  ;;  %v4258_v0 = vsel %vm2410_vm11, %v17670_v51, %v17669_v30  ;;  %v4643_v30 = vrot.slane %v4302_v59, 7  ;;  %v7709_v51 = vrot.slane %v13388_v60, 10  ;;  %v4323_v3 = vrot.slane %v13657_v39, 5 }
 0x45f   :  { %6298 = vrot.lane.b32.xlu1 %v13919_v33, %s8805_s5  ;;  %6002 = vrot.lane.b32.xlu0 %v13968_v5, %s8784_s17  ;;  %17672 = vst [vmem:[#allocation22_spill] sm:$0xff] %v13979_v50  ;;  %v4532_v54 = vrot.slane %v4258_v0, 6  ;;  %17676 = vst [vmem:[#allocation81_spill] sm:$0xff] %v13993_v6  ;;  %v4646_v33 = vrot.slane %v4258_v0, 7 }
 0x461   :  { %v13977_v52 = vpop.permute.xlu1 %5988  ;;  %v13981_v9 = vpop.permute.xlu0 %6236  ;;  %v4533_v14 = vsel %vm13221_vm9, %v4531_v42, %v4532_v54  ;;  %v7725_v54 = vrot.slane %v13388_v60, 11  ;;  %v4416_v42 = vrot.slane %v4414_v48, 4 }
 0x462   :  { %17671 = vst [vmem:[#allocation32_spill] sm:$0xff] %v13977_v52  ;;  %17673 = vst [vmem:[#allocation19_spill] sm:$0xff] %v13981_v9  ;;  %v4645_v52 = vrot.slane %v4643_v30, 4 }
 0x463   :  { %6150 = vrot.lane.b32.xlu1 %v13979_v50, %s8802_s29  ;;  %6052 = vrot.lane.b32.xlu0 %v13986_v63, %s8785_s22 }
 0x465   :  { %v13990_v23 = vpop.permute.xlu1 %6038  ;;  %v13995_v55 = vpop.permute.xlu0 %6286 }
 0x466   :  { %17675 = vst [vmem:[#allocation84_spill] sm:$0xff] %v13990_v23  ;;  %17677 = vst [vmem:[#allocation10_spill] sm:$0xff] %v13995_v55  ;;  %v4417_v23 = vrot.slane %v4258_v0, 5  ;;  %v4530_v55 = vsel %vm13221_vm9, %v7709_v51, %v4529_v2  ;;  %v7693_v2 = vrot.slane %v13388_v60, 9 }
 0x467   :  { %6200 = vrot.lane.b32.xlu1 %v13950_v34, %s8803_s30  ;;  %6102 = vrot.lane.b32.xlu0 %v13993_v6, %s8786_s25  ;;  %v14012_v34 = vcombine.low %v4530_v55, %v4533_v14  ;;  %v4647_v6 = vsel %vm13206_vm3, %v4645_v52, %v4646_v33  ;;  %v4644_v55 = vsel %vm13206_vm3, %v7725_v54, %v4643_v30  ;;  %v17684_v33 = vld [vmem:[#allocation72_spill] sm:$0xff] }
 0x468   :  { %v4418_v51 = vsel %vm13052_vm5, %v4416_v42, %v4417_v23  ;;  %v14034_v52 = vcombine.high %v17684_v33, %v17684_v33  ;;  %v4415_v60 = vsel %vm13052_vm5, %v7693_v2, %v4414_v48  ;;  %v4303_v54 = vcombine.high %v4258_v0, %v4258_v0 }
 0x469   :  { %v14004_v50 = vpop.permute.xlu1 %6088  ;;  %v14008_v9 = vpop.permute.xlu0 %6138  ;;  %17680 = vst [vmem:[#allocation99_spill] sm:$0xff] %v14012_v34  ;;  %v14043_v30 = vcombine.low %v4415_v60, %v4418_v51  ;;  %v14045_v42 = vcombine.low %v4302_v59, %v4258_v0  ;;  %v4421_v60 = vrot.slane %v17684_v33, 5  ;;  %v17690_v0 = vld [vmem:[#allocation18_spill] sm:$0xff] }
 0x46a   :  { %17678 = vst [vmem:[#allocation89_spill] sm:$0xff] %v14004_v50  ;;  %17679 = vst [vmem:[#allocation92_spill] sm:$0xff] %v14008_v9  ;;  %v4539_v48 = vrot.slane %v14034_v52, 6  ;;  %v7710_v51 = vrot.slane %v4303_v54, 10  ;;  %v14060_v59 = vcombine.high %v17690_v0, %v17690_v0  ;;  %v4653_v9 = vrot.slane %v14034_v52, 7 }
 0x46b   :  { %6250 = vrot.lane.b32.xlu1 %v13968_v5, %s8804_s4  ;;  %5954 = vrot.lane.b32.xlu0 %v14012_v34, %s8783_s16  ;;  %v14030_v5 = vcombine.low %v4644_v55, %v4647_v6  ;;  %17686 = vst [vmem:[#allocation90_spill] sm:$0xff] %v14043_v30  ;;  %17687 = vst [vmem:[#allocation40_spill] sm:$0xff] %v14045_v42  ;;  %v4650_v6 = vrot.slane %v17684_v33, 7  ;;  %v7726_v26 = vrot.slane %v4303_v54, 11  ;;  %v4423_v17 = vrot.slane %v4421_v60, 4 }
 0x46c   :  { %17691 = vst [vmem:[#allocation61_spill] sm:$0xff] %v14060_v59 }
 0x46d   :  { %v14019_v50 = vpop.permute.xlu1 %5940  ;;  %v14026_v14 = vpop.permute.xlu0 %6188  ;;  %17683 = vst [vmem:[#allocation31_spill] sm:$0xff] %v14030_v5 }
 0x46e   :  { %17681 = vst [vmem:[#allocation102_spill] sm:$0xff] %v14019_v50  ;;  %17682 = vst [vmem:[#allocation11_spill] sm:$0xff] %v14026_v14  ;;  %v4536_v50 = vrot.slane %v17684_v33, 6  ;;  %v14071_v14 = vcombine.high %v13657_v39, %v13657_v39 }
 0x46f   :  { %6300 = vrot.lane.b32.xlu1 %v13986_v63, %s8805_s5  ;;  %6004 = vrot.lane.b32.xlu0 %v14030_v5, %s8784_s17 }
 0x470   :  { %v4538_v63 = vrot.slane %v4536_v50, 4  ;;  %v4537_v41 = vsel %vm13221_vm9, %v7710_v51, %v4536_v50  ;;  %v4325_v51 = vrot.slane %v4323_v3, 4 }
 0x471   :  { %v14041_v23 = vpop.permute.xlu1 %5990  ;;  %v14048_v55 = vpop.permute.xlu0 %6238 }
 0x472   :  { %17685 = vst [vmem:[#allocation115_spill] sm:$0xff] %v14041_v23  ;;  %17688 = vst [vmem:[#allocation27_spill] sm:$0xff] %v14048_v55  ;;  %v4652_v55 = vrot.slane %v4650_v6, 4 }
 0x473   :  { %6152 = vrot.lane.b32.xlu1 %v14043_v30, %s8802_s29  ;;  %6054 = vrot.lane.b32.xlu0 %v14045_v42, %s8785_s22  ;;  %v14067_v30 = vcombine.low %v4303_v54, %v17684_v33 }
 0x474   :  { %v4654_v50 = vsel %vm13206_vm3, %v4652_v55, %v4653_v9 }
 0x475   :  { %v14055_v2 = vpop.permute.xlu1 %6040  ;;  %v14062_v23 = vpop.permute.xlu0 %6090  ;;  %17693 = vst [vmem:[#allocation58_spill] sm:$0xff] %v14067_v30 }
 0x476   :  { %17689 = vst [vmem:[#allocation100_spill] sm:$0xff] %v14055_v2  ;;  %17692 = vst [vmem:[#allocation78_spill] sm:$0xff] %v14062_v23  ;;  %v4540_v2 = vsel %vm13221_vm9, %v4538_v63, %v4539_v48  ;;  %v17694_v23 = vld [vmem:[#allocation59_spill] sm:$0xff]  ;;  %v4424_v63 = vrot.slane %v14034_v52, 5  ;;  %v7694_v48 = vrot.slane %v4303_v54, 9 }
 0x477   :  { %6202 = vrot.lane.b32.xlu1 %v14012_v34, %s8803_s30  ;;  %v14080_v16 = vsel %vm2410_vm11, %v17694_v23, %v13553_v21  ;;  %6104 = vrot.lane.b32.xlu0 %v14067_v30, %s8786_s25  ;;  %v14093_v21 = vcombine.low %v4537_v41, %v4540_v2  ;;  %v4316_v23 = vrot.slane %v14060_v59, 5  ;;  %v4651_v2 = vsel %vm13206_vm3, %v7726_v26, %v4650_v6 }
 0x478   :  { %v14098_v30 = vcombine.high %v14080_v16, %v14080_v16  ;;  %v4319_v41 = vrot.slane %v14080_v16, 5  ;;  %v14116_v9 = vcombine.low %v4651_v2, %v4654_v50  ;;  %v4422_v55 = vsel %vm13052_vm5, %v7694_v48, %v4421_v60 }
 0x479   :  { %v14084_v34 = vpop.permute.xlu1 %3873  ;;  %v14089_v61 = vpop.permute.xlu0 %5942  ;;  %17697 = vst [vmem:[#allocation86_spill] sm:$0xff] %v14093_v21  ;;  %v4318_v57 = vrot.slane %v4316_v23, 4  ;;  %v7679_v6 = vrot.slane %v17690_v0, 9 }
 0x47a   :  { %17695 = vst [vmem:[#allocation26_spill] sm:$0xff] %v14084_v34  ;;  %17696 = vst [vmem:[#allocation14_spill] sm:$0xff] %v14089_v61  ;;  %v4326_v34 = vrot.slane %v14071_v14, 5 }
 0x47b   :  { %6252 = vrot.lane.b32.xlu1 %v14030_v5, %s8804_s4  ;;  %5956 = vrot.lane.b32.xlu0 %v14093_v21, %s8783_s16  ;;  %v4425_v5 = vsel %vm13052_vm5, %v4423_v17, %v4424_v63  ;;  %17700 = vst [vmem:[#allocation47_spill] sm:$0xff] %v14116_v9  ;;  %v17703_v63 = vld [vmem:[#allocation13_spill] sm:$0xff]  ;;  %v4320_v60 = vsel %vm13052_vm5, %v4318_v57, %v4319_v41  ;;  %v4552_v57 = vrot.slane %v13657_v39, 7 }
 0x47c   :  { %v4327_v49 = vsel %vm13052_vm5, %v4325_v51, %v4326_v34  ;;  %v14127_v17 = vcombine.low %v4422_v55, %v4425_v5  ;;  %v14132_v50 = vcombine.high %v17703_v63, %v17703_v63  ;;  %v4438_v34 = vrot.slane %v13657_v39, 6 }
 0x47d   :  { %v14105_v54 = vpop.permute.xlu1 %6288  ;;  %v14112_v61 = vpop.permute.xlu0 %5992  ;;  %v14145_v5 = vcombine.low %v17684_v33, %v14034_v52  ;;  %v4317_v55 = vsel %vm13052_vm5, %v7679_v6, %v4316_v23  ;;  %v4431_v33 = vrot.slane %v14060_v59, 6  ;;  %v4441_v23 = vrot.slane %v14071_v14, 6 }
 0x47e   :  { %17698 = vst [vmem:[#allocation106_spill] sm:$0xff] %v14105_v54  ;;  %17699 = vst [vmem:[#allocation24_spill] sm:$0xff] %v14112_v61  ;;  %v7680_v54 = vrot.slane %v14098_v30, 9  ;;  %v4855_v41 = vcombine.low %v4317_v55, %v4320_v60  ;;  %v4440_v52 = vrot.slane %v4438_v34, 4  ;;  %v4434_v6 = vrot.slane %v14080_v16, 6 }
 0x47f   :  { %6302 = vrot.lane.b32.xlu1 %v14045_v42, %s8805_s5  ;;  %6006 = vrot.lane.b32.xlu0 %v14116_v9, %s8784_s17  ;;  %17702 = vst [vmem:[#allocation91_spill] sm:$0xff] %v14127_v17  ;;  %17705 = vst [vmem:[#allocation59_spill] sm:$0xff] %v14145_v5  ;;  %v4554_v55 = vrot.slane %v4552_v57, 4  ;;  %v7695_v61 = vrot.slane %v17690_v0, 10  ;;  %v4664_v11 = vrot.slane %v14132_v50, 5 }
 0x480   :  { %v4324_v48 = vsel %vm13052_vm5, %v7680_v54, %v4323_v3  ;;  %v14155_v3 = vsel %vm2410_vm11, %v13574_v28, %v13604_v27  ;;  %v4545_v27 = vrot.slane %v14060_v59, 7 }
 0x481   :  { %v14125_v26 = vpop.permute.xlu1 %6140  ;;  %v14139_v51 = vpop.permute.xlu0 %3875  ;;  %v14147_v2 = vcombine.low %v4324_v48, %v4327_v49  ;;  %v4678_v49 = vrot.slane %v14132_v50, 6  ;;  %v4681_v60 = vrot.slane %v14155_v3, 6 }
 0x482   :  { %17701 = vst [vmem:[#allocation94_spill] sm:$0xff] %v14125_v26  ;;  %17704 = vst [vmem:[#allocation72_spill] sm:$0xff] %v14139_v51  ;;  %v7730_v51 = vrot.slane %v17703_v63, 10 }
 0x483   :  { %6154 = vrot.lane.b32.xlu1 %v14127_v17, %s8802_s29  ;;  %6056 = vrot.lane.b32.xlu0 %v14145_v5, %s8785_s22  ;;  %v8088_v28 = vpack.i.bf16 %v14147_v2, %v4855_v41  ;;  %v4555_v17 = vrot.slane %v14071_v14, 7  ;;  %v4680_v26 = vrot.slane %v4678_v49, 4  ;;  %v4442_v41 = vsel %vm13221_vm9, %v4440_v52, %v4441_v23 }
 0x484   :  { %v7712_v52 = vrot.slane %v14098_v30, 11 }
 0x485   :  { %v14159_v54 = vpop.permute.xlu1 %6190  ;;  %v14165_v48 = vpop.permute.xlu0 %6240  ;;  %v4682_v18 = vsel %vm13221_vm9, %v4680_v26, %v4681_v60  ;;  %v4556_v23 = vsel %vm13206_vm3, %v4554_v55, %v4555_v17  ;;  %v4432_v26 = vsel %vm13221_vm9, %v7695_v61, %v4431_v33  ;;  %v4679_v17 = vsel %vm13221_vm9, %v7730_v51, %v4678_v49 }
 0x486   :  { %17706 = vst [vmem:[#allocation13_spill] sm:$0xff] %v14159_v54  ;;  %17707 = vst [vmem:[#allocation123_spill] sm:$0xff] %v14165_v48  ;;  %v4433_v54 = vrot.slane %v4431_v33, 4  ;;  %v4548_v48 = vrot.slane %v14080_v16, 7  ;;  %v4553_v55 = vsel %vm13206_vm3, %v7712_v52, %v4552_v57  ;;  %v4666_v51 = vrot.slane %v4664_v11, 4 }
 0x487   :  { %6204 = vrot.lane.b32.xlu1 %v14093_v21, %s8803_s30  ;;  %8089 = vrot.lane.b32.xlu0 %v8088_v28, %s8783_s16  ;;  %v7696_v21 = vrot.slane %v14098_v30, 10  ;;  %v14222_v33 = vcombine.low %v4553_v55, %v4556_v23  ;;  %v4692_v49 = vrot.slane %v14132_v50, 7  ;;  %v7732_v55 = vrot.slane %v17703_v63, 11 }
 0x488   :  { %v4435_v28 = vsel %vm13221_vm9, %v4433_v54, %v4434_v6  ;;  %v14202_v54 = vcombine.low %v17703_v63, %v14132_v50 }
 0x489   :  { %v14174_v42 = vpop.permute.xlu1 %6042  ;;  %v14182_v19 = vpop.permute.xlu0 %6290  ;;  %v4439_v38 = vsel %vm13221_vm9, %v7696_v21, %v4438_v34  ;;  %v7711_v21 = vrot.slane %v17690_v0, 11  ;;  %v4667_v34 = vrot.slane %v14155_v3, 5  ;;  %v4919_v61 = vcombine.low %v4432_v26, %v4435_v28 }
 0x48a   :  { %17708 = vst [vmem:[#allocation124_spill] sm:$0xff] %v14174_v42  ;;  %v4547_v42 = vrot.slane %v4545_v27, 4  ;;  %17709 = vst [vmem:[#allocation125_spill] sm:$0xff] %v14202_v54  ;;  %v14206_v6 = vcombine.low %v4439_v38, %v4442_v41  ;;  %v14220_v38 = vcombine.low %v4679_v17, %v4682_v18  ;;  %v7728_v18 = vrot.slane %v17703_v63, 9 }
 0x48b   :  { %6254 = vrot.lane.b32.xlu1 %v14116_v9, %s8804_s4  ;;  %6304 = vrot.lane.b32.xlu0 %v14145_v5, %s8805_s5  ;;  %v4546_v41 = vsel %vm13206_vm3, %v7711_v21, %v4545_v27  ;;  %v4695_v28 = vrot.slane %v14155_v3, 7  ;;  %v4668_v52 = vsel %vm13052_vm5, %v4666_v51, %v4667_v34  ;;  %v4694_v21 = vrot.slane %v4692_v49, 4 }
 0x48c   :  { %v4549_v60 = vsel %vm13206_vm3, %v4547_v42, %v4548_v48  ;;  %17711 = vst [vmem:[#allocation127_spill] sm:$0xff] %v14220_v38  ;;  %v8093_v57 = vpack.i.bf16 %v14206_v6, %v4919_v61  ;;  %v4665_v26 = vsel %vm13052_vm5, %v7728_v18, %v4664_v11  ;;  %v14250_v34 = vcombine.high %v13729_v31, %v13729_v31 }
 0x48d   :  { %v14198_v9 = vpop.permute.xlu1 %6092  ;;  %v14216_v5 = vpop.permute.xlu0 %5944  ;;  %v4983_v48 = vcombine.low %v4546_v41, %v4549_v60  ;;  %v14245_v60 = vcombine.low %v4665_v26, %v4668_v52  ;;  %v4696_v61 = vsel %vm13206_vm3, %v4694_v21, %v4695_v28  ;;  %v4693_v11 = vsel %vm13206_vm3, %v7732_v55, %v4692_v49 }
 0x48e   :  { %17710 = vst [vmem:[#allocation126_spill] sm:$0xff] %v14216_v5  ;;  %v14264_v63 = vcombine.low %v4693_v11, %v4696_v61  ;;  %v5047_v18 = vcombine.low %v14060_v59, %v14080_v16  ;;  %v14275_v28 = vcombine.low %v13729_v31, %v14250_v34  ;;  %v14283_v52 = vcombine.low %v14132_v50, %v14155_v3 }
 0x48f   :  { %6106 = vrot.lane.b32.xlu1 %v14202_v54, %s8786_s25  ;;  %5958 = vrot.lane.b32.xlu0 %v14220_v38, %s8783_s16  ;;  %v8098_v27 = vpack.i.bf16 %v14222_v33, %v4983_v48  ;;  %17713 = vst [vmem:[#allocation129_spill] sm:$0xff] %v14245_v60  ;;  %v4330_v48 = vrot.slane %v14250_v34, 5  ;;  %v4445_v16 = vrot.slane %v14250_v34, 6  ;;  %v14298_v55 = vcombine.low %v14098_v30, %v13657_v39 }
 0x490   :  { %17716 = vst [vmem:[#allocation132_spill] sm:$0xff] %v14264_v63  ;;  %17718 = vst [vmem:[#allocation134_spill] sm:$0xff] %v14283_v52  ;;  %v14302_v61 = vcombine.high %v14155_v3, %v14155_v3  ;;  %v7681_v3 = vrot.slane %v13729_v31, 9 }
 0x491   :  { %v14229_v42 = vpop.permute.xlu1 %3883  ;;  %v14236_v23 = vpop.permute.xlu0 %5994  ;;  %17720 = vst [vmem:[#allocation136_spill] sm:$0xff] %v14298_v55  ;;  %v4332_v50 = vrot.slane %v4330_v48, 4 }
 0x492   :  { %17712 = vst [vmem:[#allocation128_spill] sm:$0xff] %v14236_v23  ;;  %v7736_v23 = vrot.slane %v14302_v61, 10  ;;  %v4331_v0 = vsel %vm13052_vm5, %v7681_v3, %v4330_v48 }
 0x493   :  { %8094 = vrot.lane.b32.xlu1 %v8093_v57, %s8784_s17  ;;  %8099 = vrot.lane.b32.xlu0 %v8098_v27, %s8785_s22  ;;  %v14268_v57 = vcombine.low %v13657_v39, %v14071_v14  ;;  %v14287_v14 = vcombine.high %v13723_v40, %v13723_v40  ;;  %v4720_v27 = vrot.slane %v13723_v40, 6 }
 0x495   :  { %v14243_v17 = vpop.permute.xlu1 %6142  ;;  %v14254_v41 = vpop.permute.xlu0 %6044  ;;  %v8103_v21 = vpack.i.bf16 %v14268_v57, %v5047_v18  ;;  %v4723_v18 = vrot.slane %v14287_v14, 6 }
 0x496   :  { %17714 = vst [vmem:[#allocation130_spill] sm:$0xff] %v14254_v41  ;;  %v4447_v41 = vrot.slane %v4445_v16, 4 }
 0x497   :  { %6156 = vrot.lane.b32.xlu1 %v14245_v60, %s8802_s29  ;;  %6206 = vrot.lane.b32.xlu0 %v14220_v38, %s8803_s30  ;;  %v8108_v38 = vpack.i.bf16 %v14275_v28, %v14298_v55  ;;  %v17722_v60 = vld [vmem:[#allocation35_spill] sm:$0xff] }
 0x498   :  { %v4333_v54 = vrot.slane %v17722_v60, 5  ;;  %v4448_v30 = vrot.slane %v17722_v60, 6 }
 0x499   :  { %v14262_v51 = vpop.permute.xlu1 %6192  ;;  %v14277_v49 = vpop.permute.xlu0 %6094 }
 0x49a   :  { %17715 = vst [vmem:[#allocation131_spill] sm:$0xff] %v14262_v51  ;;  %17717 = vst [vmem:[#allocation133_spill] sm:$0xff] %v14277_v49  ;;  %v4722_v49 = vrot.slane %v4720_v27, 4  ;;  %v3642_v51 = vrot.slane %v13560_v22, 2  ;;  %v3546_v22 = vrot.slane %v13536_v56, 2 }
 0x49b   :  { %6008 = vrot.lane.b32.xlu1 %v14264_v63, %s8784_s17  ;;  %6058 = vrot.lane.b32.xlu0 %v14283_v52, %s8785_s22 }
 0x49c   :  { %v4724_v5 = vsel %vm13221_vm9, %v4722_v49, %v4723_v18  ;;  %v4734_v49 = vrot.slane %v13723_v40, 7  ;;  %v4709_v18 = vrot.slane %v14287_v14, 5 }
 0x49d   :  { %v14293_v26 = vpop.permute.xlu1 %6242  ;;  %v14304_v11 = vpop.permute.xlu0 %5946 }
 0x49e   :  { %17719 = vst [vmem:[#allocation135_spill] sm:$0xff] %v14293_v26  ;;  %17721 = vst [vmem:[#allocation137_spill] sm:$0xff] %v14304_v11  ;;  %v4706_v11 = vrot.slane %v13723_v40, 5 }
 0x49f   :  { %8104 = vrot.lane.b32.xlu1 %v8103_v21, %s8786_s25  ;;  %8109 = vrot.lane.b32.xlu0 %v8108_v38, %s8802_s29  ;;  %v4334_v21 = vsel %vm13052_vm5, %v4332_v50, %v4333_v54  ;;  %v7697_v38 = vrot.slane %v13729_v31, 10  ;;  %v4449_v54 = vsel %vm13221_vm9, %v4447_v41, %v4448_v30  ;;  %v4559_v30 = vrot.slane %v14250_v34, 7 }
 0x4a0   :  { %v14341_v59 = vcombine.low %v4331_v0, %v4334_v21  ;;  %v4708_v41 = vrot.slane %v4706_v11, 4 }
 0x4a1   :  { %v14312_v39 = vpop.permute.xlu1 %6292  ;;  %v14319_v55 = vpop.permute.xlu0 %5996  ;;  %v4446_v48 = vsel %vm13221_vm9, %v7697_v38, %v4445_v16  ;;  %v7734_v16 = vrot.slane %v14302_v61, 9  ;;  %v4736_v38 = vrot.slane %v4734_v49, 4 }
 0x4a2   :  { %17723 = vst [vmem:[#allocation35_spill] sm:$0xff] %v14312_v39  ;;  %17724 = vst [vmem:[#allocation138_spill] sm:$0xff] %v14319_v55  ;;  %v4721_v55 = vsel %vm13221_vm9, %v7736_v23, %v4720_v27  ;;  %v14354_v23 = vcombine.low %v4446_v48, %v4449_v54  ;;  %v8113_v27 = vpack.i.bf16 %v14341_v59, %v14147_v2  ;;  %v3545_v2 = vrot.slane %v13471_v4, 2 }
 0x4a3   :  { %6256 = vrot.lane.b32.xlu1 %v14264_v63, %s8804_s4  ;;  %6306 = vrot.lane.b32.xlu0 %v14283_v52, %s8805_s5  ;;  %v14337_v63 = vcombine.low %v14302_v61, %v13723_v40  ;;  %v14352_v52 = vcombine.low %v4721_v55, %v4724_v5  ;;  %v4710_v21 = vsel %vm13052_vm5, %v4708_v41, %v4709_v18  ;;  %v4561_v5 = vrot.slane %v4559_v30, 4  ;;  %v17733_v18 = vld [vmem:[#allocation17_spill] sm:$0xff] }
 0x4a4   :  { %v4562_v55 = vrot.slane %v17722_v60, 7  ;;  %v8118_v48 = vpack.i.bf16 %v14354_v23, %v14206_v6  ;;  %v4707_v41 = vsel %vm13052_vm5, %v7734_v16, %v4706_v11  ;;  %v3640_v26 = vrot.slane %v17733_v18, 2 }
 0x4a5   :  { %v14333_v50 = vpop.permute.xlu1 %6144  ;;  %17726 = vst [vmem:[#allocation140_spill] sm:$0xff] %v14337_v63  ;;  %v14348_v3 = vpop.permute.xlu0 %6046  ;;  %17728 = vst [vmem:[#allocation142_spill] sm:$0xff] %v14352_v52  ;;  %v14383_v6 = vcombine.low %v4707_v41, %v4710_v21  ;;  %v7713_v4 = vrot.slane %v13729_v31, 11  ;;  %v3547_v21 = vrot.slane %v13593_v46, 2  ;;  %v14415_v46 = vcombine.low %v13723_v40, %v14287_v14 }
 0x4a6   :  { %17725 = vst [vmem:[#allocation139_spill] sm:$0xff] %v14333_v50  ;;  %17727 = vst [vmem:[#allocation141_spill] sm:$0xff] %v14348_v3  ;;  %v17731_v3 = vld [vmem:[#allocation113_spill] sm:$0xff]  ;;  %v17732_v50 = vld [vmem:[#allocation44_spill] sm:$0xff]  ;;  %v4563_v11 = vsel %vm13206_vm3, %v4561_v5, %v4562_v55 }
 0x4a7   :  { %6108 = vrot.lane.b32.xlu1 %v14337_v63, %s8786_s25  ;;  %5960 = vrot.lane.b32.xlu0 %v14352_v52, %s8783_s16  ;;  %v4737_v63 = vrot.slane %v14287_v14, 7  ;;  %v3641_v39 = vrot.slane %v17732_v50, 2  ;;  %17734 = vst [vmem:[#allocation113_spill] sm:$0xff] %v14383_v6  ;;  %17738 = vst [vmem:[#allocation146_spill] sm:$0xff] %v14415_v46 }
 0x4a9   :  { %v14358_v0 = vpop.permute.xlu1 %6194  ;;  %v14367_v54 = vpop.permute.xlu0 %6096  ;;  %v4738_v50 = vsel %vm13206_vm3, %v4736_v38, %v4737_v63  ;;  %v3690_v63 = vmax.f32 %v3546_v22, %v3642_v51 }
 0x4aa   :  { %17729 = vst [vmem:[#allocation143_spill] sm:$0xff] %v14358_v0  ;;  %17730 = vst [vmem:[#allocation144_spill] sm:$0xff] %v14367_v54  ;;  %v3544_v0 = vrot.slane %v17731_v3, 2  ;;  %v3643_v54 = vrot.slane %v13612_v32, 2  ;;  %v7738_v3 = vrot.slane %v14302_v61, 11  ;;  %v3689_v32 = vmax.f32 %v3545_v2, %v3641_v39  ;;  %v17740_v2 = vld [vmem:[#allocation68_spill] sm:$0xff] }
 0x4ab   :  { %8114 = vrot.lane.b32.xlu1 %v8113_v27, %s8803_s30  ;;  %8119 = vrot.lane.b32.xlu0 %v8118_v48, %s8804_s4  ;;  %v4560_v61 = vsel %vm13206_vm3, %v7713_v4, %v4559_v30  ;;  %v4192_v30 = vrot.slane %v3690_v63, %v17562_v62  ;;  %v14436_v41 = vpack.i.bf16 %v17740_v2, %v14341_v59 }
 0x4ac   :  { %v4735_v31 = vsel %vm13206_vm3, %v7738_v3, %v4734_v49  ;;  %v14407_v5 = vcombine.low %v4560_v61, %v4563_v11  ;;  %v3688_v55 = vmax.f32 %v3544_v0, %v3640_v26  ;;  %v3691_v39 = vmax.f32 %v3547_v21, %v3643_v54  ;;  %v17744_v61 = vld [vmem:[#allocation101_spill] sm:$0xff] }
 0x4ad   :  { %v14381_v27 = vpop.permute.xlu1 %6244  ;;  %v14392_v16 = vpop.permute.xlu0 %5948  ;;  %v14405_v56 = vcombine.low %v4735_v31, %v4738_v50  ;;  %v4188_v51 = vrot.slane %v3689_v32, %v17562_v62  ;;  %v14420_v49 = vcombine.high %v13761_v13, %v13761_v13  ;;  %v14447_v50 = vcombine.low %v14250_v34, %v17722_v60 }
 0x4ae   :  { %17735 = vst [vmem:[#allocation44_spill] sm:$0xff] %v14392_v16  ;;  %v8123_v0 = vpack.i.bf16 %v14407_v5, %v14222_v33  ;;  %v4184_v54 = vrot.slane %v3688_v55, %v17562_v62  ;;  %v4196_v40 = vrot.slane %v3691_v39, %v17562_v62  ;;  %v3645_v63 = vrot.slane %v17744_v61, 2  ;;  %v17746_v39 = vld [vmem:[#allocation74_spill] sm:$0xff] }
 0x4af   :  { %6158 = vrot.lane.b32.xlu1 %v14383_v6, %s8802_s29  ;;  %6208 = vrot.lane.b32.xlu0 %v14352_v52, %s8803_s30  ;;  %17736 = vst [vmem:[#allocation17_spill] sm:$0xff] %v14405_v56  ;;  %v4762_v4 = vrot.slane %v14420_v49, 6  ;;  %v14460_v32 = vcombine.low %v13761_v13, %v14420_v49  ;;  %v8133_v34 = vpack.i.bf16 %v14447_v50, %v14268_v57  ;;  %v4748_v31 = vrot.slane %v14420_v49, 5  ;;  %v17749_v61 = vld [vmem:[#allocation114_spill] sm:$0xff] }
 0x4b0   :  { %v4239_v18 = vsel %vm3828_vm4, %v4188_v51, %v4184_v54  ;;  %v14476_v51 = vpack.i.bf16 %v17746_v39, %v14354_v23  ;;  %v7742_v54 = vrot.slane %v13761_v13, 10  ;;  %v6540_v23 = vld [vmem:[%s16559_s2 + $0x8] sm:$0xff] }
 0x4b1   :  { %v14403_v38 = vpop.permute.xlu1 %6294  ;;  %v14409_v48 = vpop.permute.xlu0 %5998  ;;  %v4240_v3 = vsel %vm3830_vm6, %v4192_v30, %v4239_v18  ;;  %17742 = vst [vmem:[#allocation148_spill] sm:$0xff] %v14460_v32  ;;  %v4764_v21 = vrot.slane %v4762_v4, 4  ;;  %v16955_v30 = vmov 0.0|0.0   ;;  %v4776_v18 = vrot.slane %v14420_v49, 7  ;;  %v17899_v8 = vld [vmem:[#allocation143_spill] sm:$0xff] }
 0x4b2   :  { %17737 = vst [vmem:[#allocation145_spill] sm:$0xff] %v14409_v48  ;;  %v4241_v11 = vsel %vm3832_vm8, %v4196_v40, %v4240_v3  ;;  %7943 = vmatprep.subr.bf16.mxu0 %v16955_v30  ;;  %v6539_v3 = vld [vmem:[%s16559_s2] sm:$0xff]  ;;  %v3646_v30 = vrot.slane %v17749_v61, 2  ;;  %v4763_v6 = vsel %vm13221_vm9, %v7742_v54, %v4762_v4  ;;  %v17754_v48 = vld [vmem:[#allocation66_spill] sm:$0xff] }
 0x4b3   :  { %6010 = vrot.lane.b32.xlu1 %v14405_v56, %s8784_s17  ;;  %6060 = vrot.lane.b32.xlu0 %v14415_v46, %s8785_s22  ;;  %v14452_v59 = vsel %vm2410_vm11, %v13751_v29, %v4241_v11  ;;  %v17748_v11 = vld [vmem:[#allocation43_spill] sm:$0xff]  ;;  %v4778_v54 = vrot.slane %v4776_v18, 4 }
 0x4b4   :  { %v4765_v29 = vrot.slane %v14452_v59, 6  ;;  %v4751_v4 = vrot.slane %v14452_v59, 5 }
 0x4b5   :  { %v14425_v26 = vpop.permute.xlu1 %6146  ;;  %v14431_v14 = vpop.permute.xlu0 %6048 }
 0x4b6   :  { %17739 = vst [vmem:[#allocation147_spill] sm:$0xff] %v14431_v14  ;;  %v4766_v40 = vsel %vm13221_vm9, %v4764_v21, %v4765_v29  ;;  %v7944_v29 = vpack.c.bf16 %v6540_v23, %v6539_v3  ;;  %v17759_v23 = vmov 0.0|0.0  }
 0x4b7   :  { %8124 = vrot.lane.b32.xlu1 %v8123_v0, %s8805_s5  ;;  %8129 = vrot.lane.b32.xlu0 %v14436_v41, %s8783_s16  ;;  %v17747_v0 = vld [vmem:[#allocation15_spill] sm:$0xff]  ;;  %v14506_v61 = vcombine.low %v4763_v6, %v4766_v40 }
 0x4b8   :  { %v3644_v57 = vrot.slane %v17747_v0, 2  ;;  %v17750_v0 = vld [vmem:[#allocation46_spill] sm:$0xff]  ;;  %7945 = vmatpush1.bf16.msra.mxu0 %v7944_v29  ;;  %v17761_v29 = vld [vmem:[#allocation8_spill] sm:$0xff] }
 0x4b9   :  { %v14443_v33 = vpop.permute.xlu1 %6196  ;;  %v14454_v22 = vpop.permute.xlu0 %6098  ;;  %7946 = vmatprep.subr.bf16.mxu0 %v17759_v23 }
 0x4ba   :  { %17741 = vst [vmem:[#allocation68_spill] sm:$0xff] %v14454_v22  ;;  %v17753_v22 = vld [vmem:[#allocation95_spill] sm:$0xff] }
 0x4bb   :  { %6258 = vrot.lane.b32.xlu1 %v14405_v56, %s8804_s4  ;;  %6110 = vrot.lane.b32.xlu0 %v14460_v32, %s8786_s25  ;;  %v3647_v32 = vrot.slane %v17750_v0, 2  ;;  %v17752_v56 = vld [vmem:[#allocation97_spill] sm:$0xff]  ;;  %v3548_v14 = vrot.slane %v17753_v22, 2  ;;  %v17756_v0 = vld [vmem:[#allocation42_spill] sm:$0xff] }
 0x4bc   :  { %v3549_v52 = vrot.slane %v17752_v56, 2 }
 0x4bd   :  { %v14464_v60 = vpop.permute.xlu1 %6246  ;;  %v14471_v55 = vpop.permute.xlu0 %5950  ;;  %v3692_v22 = vmax.f32 %v3548_v14, %v3644_v57  ;;  %v3552_v57 = vrot.slane %v13621_v25, 2 }
 0x4be   :  { %17743 = vst [vmem:[#allocation149_spill] sm:$0xff] %v14464_v60  ;;  %17745 = vst [vmem:[#allocation101_spill] sm:$0xff] %v14471_v55  ;;  %v4750_v55 = vrot.slane %v4748_v31, 4  ;;  %v3693_v56 = vmax.f32 %v3549_v52, %v3645_v63  ;;  %v4779_v52 = vrot.slane %v14452_v59, 7  ;;  %v7740_v63 = vrot.slane %v13761_v13, 9 }
 0x4bf   :  { %8134 = vrot.lane.b32.xlu1 %v8133_v34, %s8806_s19  ;;  %v3550_v34 = vrot.slane %v17748_v11, 2  ;;  %8139 = vrot.lane.b32.xlu0 %v14476_v51, %s8784_s17  ;;  %v3551_v11 = vrot.slane %v17754_v48, 2 }
 0x4c0   :  { %v4752_v14 = vsel %vm13052_vm5, %v4750_v55, %v4751_v4  ;;  %v14540_v55 = vpack.i.bf16 %v17761_v29, %v14407_v5  ;;  %v7744_v4 = vrot.slane %v13761_v13, 11  ;;  %v4780_v25 = vsel %vm13206_vm3, %v4778_v54, %v4779_v52  ;;  %v6544_v5 = vld [vmem:[%s16559_s2 + $0x28] sm:$0xff] }
 0x4c1   :  { %v14495_v21 = vpop.permute.xlu1 %6296  ;;  %v14502_v16 = vpop.permute.xlu0 %6000  ;;  %v3694_v48 = vmax.f32 %v3550_v34, %v3646_v30  ;;  %v14514_v60 = vmax.f32 %v3551_v11, %v3647_v32  ;;  %v6541_v32 = vld [vmem:[%s16559_s2 + $0x10] sm:$0xff]  ;;  %v6542_v30 = vld [vmem:[%s16559_s2 + $0x18] sm:$0xff]  ;;  %v3649_v34 = vrot.slane %v13675_v36, 2  ;;  %v6543_v36 = vld [vmem:[%s16559_s2 + $0x20] sm:$0xff] }
 0x4c2   :  { %17751 = vst [vmem:[#allocation74_spill] sm:$0xff] %v14495_v21  ;;  %17755 = vst [vmem:[#allocation15_spill] sm:$0xff] %v14502_v16  ;;  %v17757_v21 = vld [vmem:[#allocation38_spill] sm:$0xff]  ;;  %v7947_v11 = vpack.c.bf16 %v6542_v30, %v6541_v32  ;;  %v7950_v54 = vpack.c.bf16 %v6544_v5, %v6543_v36  ;;  %v4777_v32 = vsel %vm13206_vm3, %v7744_v4, %v4776_v18  ;;  %v3555_v30 = vrot.slane %v13706_v47, 2 }
 0x4c3   :  { %6308 = vrot.lane.b32.xlu1 %v14415_v46, %s8805_s5  ;;  %v14510_v3 = vcombine.low %v17757_v21, %v17756_v0  ;;  %5962 = vrot.lane.b32.xlu0 %v14506_v61, %s8783_s16  ;;  %v3648_v21 = vrot.slane %v13648_v43, 2  ;;  %v3554_v0 = vrot.slane %v13699_v24, 2  ;;  %v4749_v46 = vsel %vm13052_vm5, %v7740_v63, %v4748_v31 }
 0x4c4   :  { %v3651_v24 = vrot.slane %v13741_v1, 2  ;;  %v14560_v31 = vcombine.low %v4749_v46, %v4752_v14  ;;  %7948 = vmatpush1.bf16.msra.mxu0 %v7947_v11  ;;  %v3650_v63 = vrot.slane %v13684_v58, 2  ;;  %v5981_v46 = vcombine.low %v4777_v32, %v4780_v25 }
 0x4c5   :  { %17758 = vst [vmem:[#allocation43_spill] sm:$0xff] %v14510_v3  ;;  %v14518_v6 = vpop.permute.xlu1 %6148  ;;  %v8143_v40 = vpack.i.bf16 %v14510_v3, %v14275_v28  ;;  %v14535_v43 = vpop.permute.xlu0 %6050  ;;  %v3696_v52 = vmax.f32 %v3552_v57, %v3648_v21  ;;  %7949 = vmatprep.subr.bf16.mxu0 %v17759_v23  ;;  %v4204_v21 = vrot.slane %v3693_v56, %v17562_v62  ;;  %v6545_v56 = vld [vmem:[%s16559_s2 + $0x30] sm:$0xff] }
 0x4c6   :  { %17760 = vst [vmem:[#allocation114_spill] sm:$0xff] %v14535_v43  ;;  %17762 = vst [vmem:[#allocation46_spill] sm:$0xff] %v14560_v31  ;;  %v4208_v58 = vrot.slane %v3694_v48, %v17562_v62  ;;  %v3698_v14 = vmax.f32 %v3554_v0, %v3650_v63  ;;  %v4212_v18 = vrot.slane %v14514_v60, %v17562_v62  ;;  %v6546_v48 = vld [vmem:[%s16559_s2 + $0x38] sm:$0xff] }
 0x4c7   :  { %8144 = vrot.lane.b32.xlu1 %v8143_v40, %s8808_s1  ;;  %v3553_v40 = vrot.slane %v13632_v10, 2  ;;  %8149 = vrot.lane.b32.xlu0 %v14540_v55, %s8785_s22  ;;  %v4200_v10 = vrot.slane %v3692_v22, %v17562_v62  ;;  %v3699_v57 = vmax.f32 %v3555_v30, %v3651_v24  ;;  %v4216_v47 = vrot.slane %v3696_v52, %v17562_v62  ;;  %v17765_v0 = vld [vmem:[#allocation120_spill] sm:$0xff]  ;;  %v6548_v24 = vld [vmem:[%s16559_s2 + $0x48] sm:$0xff] }
 0x4c8   :  { %7951 = vmatpush1.bf16.msra.mxu0 %v7950_v54  ;;  %v14595_v4 = vpack.i.bf16 %v17765_v0, %v14447_v50  ;;  %v7953_v25 = vpack.c.bf16 %v6546_v48, %v6545_v56  ;;  %v4224_v5 = vrot.slane %v3698_v14, %v17562_v62  ;;  %v6549_v14 = vld [vmem:[%s16559_s2 + $0x50] sm:$0xff] }
 0x4c9   :  { %v14558_v13 = vpop.permute.xlu1 %6198  ;;  %v3697_v1 = vmax.f32 %v3553_v40, %v3649_v34  ;;  %v14568_v43 = vpop.permute.xlu0 %6100  ;;  %7952 = vmatprep.subr.bf16.mxu0 %v17759_v23  ;;  %v4242_v60 = vsel %vm16975_vm12, %v4204_v21, %v4200_v10  ;;  %v6547_v40 = vld [vmem:[%s16559_s2 + $0x40] sm:$0xff]  ;;  %vm6522_vm12 = vcmask 785408  }
 0x4ca   :  { %17763 = vst [vmem:[#allocation97_spill] sm:$0xff] %v14568_v43  ;;  %v4243_v36 = vsel %vm3822_vm13, %v4208_v58, %v4242_v60  ;;  %v7956_v52 = vpack.c.bf16 %v6548_v24, %v6547_v40  ;;  %v6551_v60 = vld [vmem:[%s16559_s2 + $0x60] sm:$0xff]  ;;  %vm5725_vm13 = vcmask 244736  }
 0x4cb   :  { %6160 = vrot.lane.b32.xlu1 %v14560_v31, %s8802_s29  ;;  %6012 = vrot.lane.b32.xlu0 %v5981_v46, %s8784_s17  ;;  %v4220_v34 = vrot.slane %v3697_v1, %v17562_v62  ;;  %v4244_v54 = vsel %vm3824_vm14, %v4212_v18, %v4243_v36  ;;  %v6031_v1 = vcombine.low %v14420_v49, %v14452_v59  ;;  %v6550_v49 = vld [vmem:[%s16559_s2 + $0x58] sm:$0xff]  ;;  %vm17780_vm14 = vcmask 195584  }
 0x4cc   :  { %7954 = vmatpush1.bf16.msra.mxu0 %v7953_v25  ;;  %v4245_v63 = vsel %vm3826_vm15, %v4216_v47, %v4244_v54  ;;  %v17770_v18 = vld [vmem:[#allocation60_spill] sm:$0xff]  ;;  %v7959_v47 = vpack.c.bf16 %v6550_v49, %v6549_v14  ;;  %vm17783_vm15 = vcmask 1045504   ;;  %vm17804_vm7 = vmmov %vm17780_vm14  ;;  %v17810_v31 = vld [vmem:[#allocation23_spill] sm:$0xff] }
 0x4cd   :  { %v14577_v22 = vpop.permute.xlu1 %6248  ;;  %v14589_v11 = vpop.permute.xlu0 %5952  ;;  %7955 = vmatprep.subr.bf16.mxu0 %v17759_v23  ;;  %v4246_v32 = vsel %vm3828_vm4, %v4220_v34, %v4245_v63  ;;  %v6552_v34 = vld [vmem:[%s16559_s2 + $0x68] sm:$0xff]  ;;  %vm5742_vm4 = vcmask 293888   ;;  %vm17822_vm10 = vmmov %vm17804_vm7 }
 0x4ce   :  { %17764 = vst [vmem:[#allocation95_spill] sm:$0xff] %v14589_v11  ;;  %v4247_v30 = vsel %vm3830_vm6, %v4224_v5, %v4246_v32  ;;  %v7962_v36 = vpack.c.bf16 %v6552_v34, %v6551_v60  ;;  %v17775_v32 = vld [vmem:[#allocation37_spill] sm:$0xff]  ;;  %vm5759_vm6 = vcmask 343040  }
 0x4cf   :  { %8154 = vrot.lane.b32.xlu1 %v14436_v41, %s8809_s28  ;;  %v4228_v41 = vrot.slane %v3699_v57, %v17562_v62  ;;  %8159 = vrot.lane.b32.xlu0 %v14595_v4, %s8786_s25  ;;  %v8168_v57 = vpack.i.bf16 %v17770_v18, %v14510_v3 }
 0x4d0   :  { %7957 = vmatpush1.bf16.msra.mxu0 %v7956_v52 }
 0x4d1   :  { %v14609_v50 = vpop.permute.xlu1 %6298  ;;  %v14614_v10 = vpop.permute.xlu0 %6002  ;;  %v14622_v21 = vsel %vm3832_vm8, %v4228_v41, %v4247_v30  ;;  %7958 = vmatprep.subr.bf16.mxu0 %v17759_v23  ;;  %v6554_v41 = vld [vmem:[%s16559_s2 + $0x78] sm:$0xff]  ;;  %v8178_v30 = vpack.i.bf16 %v17775_v32, %v17740_v2  ;;  %vm5776_vm8 = vcmask 392192  }
 0x4d2   :  { %17766 = vst [vmem:[#allocation66_spill] sm:$0xff] %v14609_v50  ;;  %17767 = vst [vmem:[#allocation42_spill] sm:$0xff] %v14614_v10  ;;  %v14642_v56 = vcombine.high %v14622_v21, %v14622_v21  ;;  %v4790_v48 = vrot.slane %v14622_v21, 5  ;;  %v4804_v34 = vrot.slane %v14622_v21, 6  ;;  %v17864_v10 = vld [vmem:[#allocation100_spill] sm:$0xff] }
 0x4d3   :  { %6210 = vrot.lane.b32.xlu1 %v14506_v61, %s8803_s30  ;;  %6062 = vrot.lane.b32.xlu0 %v6031_v1, %s8785_s22 }
 0x4d4   :  { %7960 = vmatpush1.bf16.msra.mxu0 %v7959_v47  ;;  %v4792_v24 = vrot.slane %v4790_v48, 4  ;;  %v4793_v54 = vrot.slane %v14642_v56, 5  ;;  %v6330_v47 = vsel %vm78_vm0, %v17740_v2, %v13782_v35  ;;  %v6556_v35 = vld [vmem:[%s16559_s2 + $0x88] sm:$0xff] }
 0x4d5   :  { %v14625_v58 = vpop.permute.xlu1 %6150  ;;  %v14634_v61 = vpop.permute.xlu0 %6052  ;;  %7961 = vmatprep.subr.bf16.mxu0 %v17759_v23 }
 0x4d6   :  { %17768 = vst [vmem:[#allocation38_spill] sm:$0xff] %v14625_v58  ;;  %17769 = vst [vmem:[#allocation8_spill] sm:$0xff] %v14634_v61  ;;  %v4794_v49 = vsel %vm13052_vm5, %v4792_v24, %v4793_v54 }
 0x4d7   :  { %8164 = vrot.lane.b32.xlu1 %v14476_v51, %s8810_s14  ;;  %v14653_v51 = vcombine.high %v14452_v59, %v14452_v59  ;;  %8169 = vrot.lane.b32.xlu0 %v8168_v57, %s8802_s29  ;;  %v6553_v59 = vld [vmem:[%s16559_s2 + $0x70] sm:$0xff] }
 0x4d8   :  { %7963 = vmatpush1.bf16.msra.mxu0 %v7962_v36  ;;  %v6555_v36 = vld [vmem:[%s16559_s2 + $0x80] sm:$0xff] }
 0x4d9   :  { %v14656_v25 = vpop.permute.xlu1 %6200  ;;  %v14659_v5 = vpop.permute.xlu0 %6102  ;;  %v6081_v40 = vcombine.low %v14653_v51, %v14622_v21  ;;  %7964 = vmatprep.subr.bf16.mxu0 %v17759_v23  ;;  %v7746_v14 = vrot.slane %v14653_v51, 9  ;;  %v7968_v24 = vpack.c.bf16 %v6556_v35, %v6555_v36  ;;  %v7748_v36 = vrot.slane %v14653_v51, 10 }
 0x4da   :  { %17771 = vst [vmem:[#allocation120_spill] sm:$0xff] %v14656_v25  ;;  %17772 = vst [vmem:[#allocation150_spill] sm:$0xff] %v14659_v5 }
 0x4db   :  { %6260 = vrot.lane.b32.xlu1 %v5981_v46, %s8804_s4  ;;  %6112 = vrot.lane.b32.xlu0 %v6081_v40, %s8786_s25  ;;  %v7965_v46 = vpack.c.bf16 %v6554_v41, %v6553_v59  ;;  %v4806_v41 = vrot.slane %v4804_v34, 4 }
 0x4dd   :  { %v14672_v52 = vpop.permute.xlu1 %6250  ;;  %v14675_v63 = vpop.permute.xlu0 %5954  ;;  %7966 = vmatpush1.bf16.msra.mxu0 %v7965_v46  ;;  %v4807_v46 = vrot.slane %v14642_v56, 6 }
 0x4de   :  { %17773 = vst [vmem:[#allocation151_spill] sm:$0xff] %v14672_v52  ;;  %17774 = vst [vmem:[#allocation152_spill] sm:$0xff] %v14675_v63  ;;  %7967 = vmatprep.subr.bf16.mxu0 %v17759_v23  ;;  %v17809_v23 = vld [vmem:[#allocation82_spill] sm:$0xff] }
 0x4df   :  { %8174 = vrot.lane.b32.xlu1 %v14540_v55, %s8811_s6  ;;  %8179 = vrot.lane.b32.xlu0 %v8178_v30, %s8803_s30  ;;  %v4791_v55 = vsel %vm13052_vm5, %v7746_v14, %v4790_v48  ;;  %v6346_v48 = vsel %vm176_vm1, %v6330_v47, %v13773_v12  ;;  %v4818_v30 = vrot.slane %v14622_v21, 7  ;;  %v16963_v14 = vmov 0.0   ;;  %v6557_v12 = vld [vmem:[%s16559_s2 + $0x90] sm:$0x3f] }
 0x4e0   :  { %v6131_v40 = vcombine.low %v4791_v55, %v4794_v49  ;;  %v6362_v54 = vsel %vm274_vm2, %v6346_v48, %v13799_v20  ;;  %v17782_v47 = vld [vmem:[#allocation39_spill] sm:$0xff]  ;;  %v4808_v35 = vsel %vm13221_vm9, %v4806_v41, %v4807_v46  ;;  %v4805_v48 = vsel %vm13221_vm9, %v7748_v36, %v4804_v34  ;;  %v17788_v34 = vld [vmem:[#allocation76_spill] sm:$0xff]  ;;  %v17867_v52 = vld [vmem:[#allocation78_spill] sm:$0xff] }
 0x4e1   :  { %v14688_v60 = vpop.permute.xlu1 %6300  ;;  %v14700_v2 = vpop.permute.xlu0 %6004  ;;  %7969 = vmatpush1.bf16.msra.mxu0 %v7968_v24  ;;  %v6378_v20 = vsel %vm17780_vm14, %v6362_v54, %v13790_v44  ;;  %v8188_v55 = vpack.i.bf16 %v17782_v47, %v17746_v39  ;;  %v17785_v39 = vld [vmem:[#allocation5_spill] sm:$0xff]  ;;  %v6181_v41 = vcombine.low %v4805_v48, %v4808_v35  ;;  %v7750_v46 = vrot.slane %v14653_v51, 11  ;;  %v17795_v48 = vld [vmem:[#allocation52_spill] sm:$0xff]  ;;  %vm17845_vm14 = vmmov %vm17804_vm7 }
 0x4e2   :  { %17776 = vst [vmem:[#allocation37_spill] sm:$0xff] %v14688_v60  ;;  %17777 = vst [vmem:[#allocation153_spill] sm:$0xff] %v14700_v2  ;;  %6635 = vmatprep.subr.mxu0 %v16963_v14  ;;  %v6394_v44 = vsel %vm5725_vm13, %v6378_v20, %v13806_v37  ;;  %v8198_v24 = vpack.i.bf16 %v17785_v39, %v17761_v29  ;;  %v17858_v2 = vld [vmem:[#allocation106_spill] sm:$0xff] }
 0x4e3   :  { %6310 = vrot.lane.b32.xlu1 %v6031_v1, %s8805_s5  ;;  %6162 = vrot.lane.b32.xlu0 %v6131_v40, %s8802_s29  ;;  %v4821_v40 = vrot.slane %v14642_v56, 7  ;;  %v6410_v37 = vsel %vm5742_vm4, %v6394_v44, %v13828_v7  ;;  %v4819_v36 = vsel %vm13206_vm3, %v7750_v46, %v4818_v30  ;;  %v17793_v44 = vld [vmem:[#allocation53_spill] sm:$0xff] }
 0x4e4   :  { %v6426_v29 = vsel %vm5759_vm6, %v6410_v37, %v13847_v45  ;;  %v17791_v45 = vld [vmem:[#allocation56_spill] sm:$0xff]  ;;  %v17797_v46 = vld [vmem:[#allocation29_spill] sm:$0xff] }
 0x4e5   :  { %v14708_v59 = vpop.permute.xlu1 %6152  ;;  %v14716_v1 = vpop.permute.xlu0 %6054  ;;  %7752 = vmatpush1.msk.msra.mxu0 %vm17783_vm15, %v6557_v12  ;;  %vm17879_vm15 = vmmov %vm17804_vm7 }
 0x4e6   :  { %17778 = vst [vmem:[#allocation154_spill] sm:$0xff] %v14708_v59  ;;  %17779 = vst [vmem:[#allocation155_spill] sm:$0xff] %v14716_v1  ;;  %v17863_v59 = vld [vmem:[#allocation7_spill] sm:$0xff] }
 0x4e7   :  { %8184 = vrot.lane.b32.xlu1 %v14595_v4, %s8813_s0  ;;  %8194 = vrot.lane.b32.xlu0 %v8168_v57, %s8814_s15  ;;  %v4820_v4 = vrot.slane %v4818_v30, 4  ;;  %v8203_v30 = vpack.i.bf16 %v17793_v44, %v17775_v32 }
 0x4e9   :  { %v14723_v49 = vpop.permute.xlu1 %6202  ;;  %v14734_v57 = vpop.permute.xlu0 %6104  ;;  %v4822_v12 = vsel %vm13206_vm3, %v4820_v4, %v4821_v40  ;;  %v8208_v4 = vpack.i.bf16 %v17791_v45, %v17765_v0  ;;  %v6281_v0 = vcombine.low %v14622_v21, %v14642_v56  ;;  %v17802_v56 = vld [vmem:[#allocation54_spill] sm:$0xff] }
 0x4ea   :  { %17781 = vst [vmem:[#allocation156_spill] sm:$0xff] %v14723_v49  ;;  %17784 = vst [vmem:[#allocation39_spill] sm:$0xff] %v14734_v57  ;;  %v6231_v51 = vcombine.low %v4819_v36, %v4822_v12  ;;  %v6331_v12 = vsel %vm78_vm0, %v17775_v32, %v17797_v46  ;;  %v17799_v36 = vld [vmem:[#allocation30_spill] sm:$0xff]  ;;  %v8218_v32 = vpack.i.bf16 %v17802_v56, %v17770_v18  ;;  %v17803_v46 = vld [vmem:[#allocation36_spill] sm:$0xff] }
 0x4eb   :  { %8189 = vrot.lane.b32.xlu1 %v8188_v55, %s8804_s4  ;;  %8199 = vrot.lane.b32.xlu0 %v8198_v24, %s8805_s5  ;;  %v6442_v55 = vsel %vm5776_vm8, %v6426_v29, %v17788_v34  ;;  %v17798_v34 = vld [vmem:[#allocation80_spill] sm:$0xff]  ;;  %v17862_v18 = vld [vmem:[#allocation115_spill] sm:$0xff] }
 0x4ed   :  { %v14742_v54 = vpop.permute.xlu1 %6252  ;;  %v14751_v20 = vpop.permute.xlu0 %5956 }
 0x4ee   :  { %17786 = vst [vmem:[#allocation5_spill] sm:$0xff] %v14742_v54  ;;  %17787 = vst [vmem:[#allocation157_spill] sm:$0xff] %v14751_v20  ;;  %v17860_v54 = vld [vmem:[#allocation102_spill] sm:$0xff] }
 0x4ef   :  { %6212 = vrot.lane.b32.xlu1 %v6181_v41, %s8803_s30  ;;  %6474 = vrot.lane.b32.xlu0 %v6442_v55, %s8815_s18  ;;  %v8213_v41 = vpack.i.bf16 %v17795_v48, %v17782_v47  ;;  %v8223_v55 = vpack.i.bf16 %v17798_v34, %v17785_v39  ;;  %v6347_v47 = vsel %vm176_vm1, %v6331_v12, %v17799_v36  ;;  %v17806_v39 = vld [vmem:[#allocation87_spill] sm:$0xff]  ;;  %v17807_v36 = vld [vmem:[#allocation93_spill] sm:$0xff] }
 0x4f0   :  { %v8233_v12 = vpack.i.bf16 %v17806_v39, %v17791_v45 }
 0x4f1   :  { %v14759_v7 = vpop.permute.xlu1 %6302  ;;  %v14761_v35 = vpop.permute.xlu0 %6006 }
 0x4f2   :  { %17789 = vst [vmem:[#allocation76_spill] sm:$0xff] %v14759_v7  ;;  %17790 = vst [vmem:[#allocation158_spill] sm:$0xff] %v14761_v35 }
 0x4f3   :  { %6262 = vrot.lane.b32.xlu1 %v6231_v51, %s8804_s4  ;;  %8209 = vrot.lane.b32.xlu0 %v8208_v4, %s8806_s19  ;;  %v17800_v51 = vld [vmem:[#allocation75_spill] sm:$0xff] }
 0x4f4   :  { %v6363_v4 = vsel %vm274_vm2, %v6347_v47, %v17800_v51 }
 0x4f5   :  { %v14767_v40 = vpop.permute.xlu1 %6154  ;;  %v14771_v24 = vpop.permute.xlu0 %6056  ;;  %v6379_v14 = vsel %vm17804_vm7, %v6363_v4, %v17803_v46 }
 0x4f6   :  { %17792 = vst [vmem:[#allocation56_spill] sm:$0xff] %v14767_v40  ;;  %17794 = vst [vmem:[#allocation53_spill] sm:$0xff] %v14771_v24  ;;  %v6395_v47 = vsel %vm5725_vm13, %v6379_v14, %v17807_v36  ;;  %v17821_v24 = vld [vmem:[#allocation83_spill] sm:$0xff] }
 0x4f7   :  { %8204 = vrot.lane.b32.xlu1 %v8203_v30, %s8783_s16  ;;  %8214 = vrot.lane.b32.xlu0 %v8213_v41, %s8784_s17  ;;  %v6411_v62 = vsel %vm5742_vm4, %v6395_v47, %v17809_v23  ;;  %v17815_v47 = vld [vmem:[#allocation41_spill] sm:$0xff]  ;;  %v17855_v40 = vld [vmem:[#allocation119_spill] sm:$0xff] }
 0x4f8   :  { %v6427_v4 = vsel %vm5759_vm6, %v6411_v62, %v17810_v31  ;;  %v17814_v62 = vld [vmem:[#allocation85_spill] sm:$0xff] }
 0x4f9   :  { %v14777_v37 = vpop.permute.xlu1 %6204  ;;  %v14784_v29 = vpop.permute.xlu0 %8089  ;;  %v8243_v31 = vpack.i.bf16 %v17814_v62, %v17802_v56 }
 0x4fa   :  { %17796 = vst [vmem:[#allocation52_spill] sm:$0xff] %v14777_v37  ;;  %v17844_v37 = vld [vmem:[#allocation89_spill] sm:$0xff] }
 0x4fb   :  { %6312 = vrot.lane.b32.xlu1 %v6281_v0, %s8805_s5  ;;  %8224 = vrot.lane.b32.xlu0 %v8223_v55, %s8785_s22 }
 0x4fd   :  { %v14794_v21 = vpop.permute.xlu1 %6254  ;;  %v14800_v0 = vpop.permute.xlu0 %6304 }
 0x4fe   :  { %17801 = vst [vmem:[#allocation29_spill] sm:$0xff] %v14794_v21  ;;  %17805 = vst [vmem:[#allocation80_spill] sm:$0xff] %v14800_v0  ;;  %v17842_v0 = vld [vmem:[#allocation84_spill] sm:$0xff] }
 0x4ff   :  { %8219 = vrot.lane.b32.xlu1 %v8218_v32, %s8808_s1  ;;  %8234 = vrot.lane.b32.xlu0 %v8233_v12, %s8786_s25  ;;  %v17812_v32 = vld [vmem:[#allocation45_spill] sm:$0xff] }
 0x500   :  { %v6443_v45 = vsel %vm5776_vm8, %v6427_v4, %v17812_v32  ;;  %v17817_v32 = vld [vmem:[#allocation51_spill] sm:$0xff] }
 0x501   :  { %v14808_v51 = vpop.permute.xlu1 %6106  ;;  %v14814_v46 = vpop.permute.xlu0 %5958 }
 0x502   :  { %17808 = vst [vmem:[#allocation30_spill] sm:$0xff] %v14808_v51  ;;  %17811 = vst [vmem:[#allocation75_spill] sm:$0xff] %v14814_v46  ;;  %v17818_v46 = vld [vmem:[#allocation20_spill] sm:$0xff] }
 0x503   :  { %8229 = vrot.lane.b32.xlu1 %v8203_v30, %s8809_s28  ;;  %6476 = vrot.lane.b32.xlu0 %v6443_v45, %s8815_s18  ;;  %v6332_v30 = vsel %vm78_vm0, %v17793_v44, %v17815_v47 }
 0x504   :  { %v6348_v45 = vsel %vm176_vm1, %v6332_v30, %v17817_v32 }
 0x505   :  { %v14820_v14 = vpop.permute.xlu1 %8094  ;;  %v14822_v36 = vpop.permute.xlu0 %8099 }
 0x507   :  { %8239 = vrot.lane.b32.xlu1 %v8213_v41, %s8810_s14  ;;  %8249 = vrot.lane.b32.xlu0 %v8223_v55, %s8811_s6  ;;  %v6364_v41 = vsel %vm274_vm2, %v6348_v45, %v17818_v46  ;;  %v17826_v45 = vld [vmem:[#allocation96_spill] sm:$0xff] }
 0x508   :  { %v6380_v47 = vsel %vm17822_vm10, %v6364_v41, %v17821_v24  ;;  %vm16979_vm10 = vcmask 539648  }
 0x509   :  { %v14826_v23 = vpop.permute.xlu1 %6156  ;;  %v14833_v4 = vpop.permute.xlu0 %6206 }
 0x50a   :  { %17813 = vst [vmem:[#allocation36_spill] sm:$0xff] %v14826_v23  ;;  %17816 = vst [vmem:[#allocation87_spill] sm:$0xff] %v14833_v4  ;;  %v17820_v23 = vld [vmem:[#allocation88_spill] sm:$0xff]  ;;  %v17824_v4 = vld [vmem:[#allocation109_spill] sm:$0xff] }
 0x50b   :  { %8244 = vrot.lane.b32.xlu1 %v8243_v31, %s8802_s29  ;;  %8259 = vrot.lane.b32.xlu0 %v8233_v12, %s8813_s0  ;;  %v8253_v51 = vpack.i.bf16 %v17820_v23, %v17793_v44  ;;  %v6396_v30 = vsel %vm5725_vm13, %v6380_v47, %v17824_v4  ;;  %v17825_v12 = vld [vmem:[#allocation12_spill] sm:$0xff]  ;;  %v17830_v47 = vld [vmem:[#allocation98_spill] sm:$0xff] }
 0x50c   :  { %v8263_v32 = vpack.i.bf16 %v17825_v12, %v17795_v48  ;;  %v6412_v44 = vsel %vm5742_vm4, %v6396_v30, %v17826_v45  ;;  %v8273_v48 = vpack.i.bf16 %v17830_v47, %v17798_v34  ;;  %v17834_v45 = vld [vmem:[#allocation108_spill] sm:$0xff] }
 0x50d   :  { %v14841_v55 = vpop.permute.xlu1 %6008  ;;  %v14847_v35 = vpop.permute.xlu0 %6058  ;;  %v17836_v34 = vld [vmem:[#allocation104_spill] sm:$0xff] }
 0x50e   :  { %17819 = vst [vmem:[#allocation93_spill] sm:$0xff] %v14841_v55  ;;  %17823 = vst [vmem:[#allocation82_spill] sm:$0xff] %v14847_v35  ;;  %v17827_v55 = vld [vmem:[#allocation19_spill] sm:$0xff] }
 0x50f   :  { %8254 = vrot.lane.b32.xlu1 %v8253_v51, %s8803_s30  ;;  %8269 = vrot.lane.b32.xlu0 %v8243_v31, %s8814_s15  ;;  %v6428_v24 = vsel %vm5759_vm6, %v6412_v44, %v17827_v55  ;;  %v17828_v51 = vld [vmem:[#allocation10_spill] sm:$0xff]  ;;  %v17832_v55 = vld [vmem:[#allocation71_spill] sm:$0xff]  ;;  %v8278_v44 = vpack.i.bf16 %v17834_v45, %v17820_v23 }
 0x510   :  { %v6444_v4 = vsel %vm5776_vm8, %v6428_v24, %v17828_v51  ;;  %v8283_v30 = vpack.i.bf16 %v17832_v55, %v17806_v39  ;;  %v8293_v51 = vpack.i.bf16 %v17836_v34, %v17814_v62  ;;  %v17837_v39 = vld [vmem:[#allocation107_spill] sm:$0xff]  ;;  %v17841_v62 = vld [vmem:[#allocation32_spill] sm:$0xff] }
 0x511   :  { %v14853_v46 = vpop.permute.xlu1 %8104  ;;  %v14861_v41 = vpop.permute.xlu0 %8109  ;;  %v8338_v5 = vpack.i.bf16 %v17863_v59, %v17837_v39 }
 0x512   :  { %v8106_v53 = vunpack.i.l.bf16 %v14853_v46 }
 0x513   :  { %8264 = vrot.lane.b32.xlu1 %v8263_v32, %s8804_s4  ;;  %6478 = vrot.lane.b32.xlu0 %v6444_v4, %s8815_s18 }
 0x515   :  { %v14867_v31 = vpop.permute.xlu1 %6256  ;;  %v14871_v35 = vpop.permute.xlu0 %6306 }
 0x516   :  { %17829 = vst [vmem:[#allocation23_spill] sm:$0xff] %v14867_v31  ;;  %17831 = vst [vmem:[#allocation45_spill] sm:$0xff] %v14871_v35  ;;  %v17840_v31 = vld [vmem:[#allocation111_spill] sm:$0xff] }
 0x517   :  { %8274 = vrot.lane.b32.xlu1 %v8273_v48, %s8805_s5  ;;  %8284 = vrot.lane.b32.xlu0 %v8283_v30, %s8806_s19  ;;  %v8288_v48 = vpack.i.bf16 %v17837_v39, %v17825_v12 }
 0x519   :  { %v14877_v32 = vpop.permute.xlu1 %6108  ;;  %v14881_v24 = vpop.permute.xlu0 %5960 }
 0x51a   :  { %17833 = vst [vmem:[#allocation41_spill] sm:$0xff] %v14877_v32  ;;  %17835 = vst [vmem:[#allocation51_spill] sm:$0xff] %v14881_v24  ;;  %v17838_v32 = vld [vmem:[#allocation50_spill] sm:$0xff] }
 0x51b   :  { %8279 = vrot.lane.b32.xlu1 %v8278_v44, %s8783_s16  ;;  %8294 = vrot.lane.b32.xlu0 %v8293_v51, %s8808_s1  ;;  %v6333_v24 = vsel %vm78_vm0, %v17820_v23, %v17838_v32  ;;  %v8298_v51 = vpack.i.bf16 %v17840_v31, %v17830_v47 }
 0x51c   :  { %v6349_v20 = vsel %vm176_vm1, %v6333_v24, %v17841_v62  ;;  %v17849_v24 = vld [vmem:[#allocation117_spill] sm:$0xff] }
 0x51d   :  { %v14887_v4 = vpop.permute.xlu1 %8114  ;;  %v14891_v30 = vpop.permute.xlu0 %8119  ;;  %v6365_v12 = vsel %vm274_vm2, %v6349_v20, %v17842_v0  ;;  %v14920_v20 = vcombine.high %v17849_v24, %v17849_v24  ;;  %v7687_v61 = vrot.slane %v17849_v24, 9 }
 0x51e   :  { %v6381_v23 = vsel %vm17845_vm14, %v6365_v12, %v17844_v37  ;;  %v17852_v37 = vld [vmem:[#allocation48_spill] sm:$0xff]  ;;  %vm16978_vm14 = vcmask 588800  }
 0x51f   :  { %8289 = vrot.lane.b32.xlu1 %v8288_v48, %s8784_s17  ;;  %8304 = vrot.lane.b32.xlu0 %v8278_v44, %s8809_s28  ;;  %v17847_v44 = vld [vmem:[#allocation69_spill] sm:$0xff]  ;;  %17850 = vst [vmem:[#allocation109_spill] sm:$0xff] %v14920_v20  ;;  %v8318_v12 = vpack.i.bf16 %v17852_v37, %v17836_v34  ;;  %v4601_v43 = vrot.slane %v14920_v20, 7 }
 0x520   :  { %v8308_v47 = vpack.i.bf16 %v17847_v44, %v17832_v55 }
 0x521   :  { %v14898_v35 = vpop.permute.xlu1 %6158  ;;  %v14906_v21 = vpop.permute.xlu0 %6208 }
 0x522   :  { %17839 = vst [vmem:[#allocation20_spill] sm:$0xff] %v14898_v35  ;;  %17843 = vst [vmem:[#allocation88_spill] sm:$0xff] %v14906_v21  ;;  %v17848_v35 = vld [vmem:[#allocation92_spill] sm:$0xff]  ;;  %v17854_v21 = vld [vmem:[#allocation26_spill] sm:$0xff] }
 0x523   :  { %8299 = vrot.lane.b32.xlu1 %v8298_v51, %s8785_s22  ;;  %8314 = vrot.lane.b32.xlu0 %v8288_v48, %s8810_s14  ;;  %v6397_v62 = vsel %vm5725_vm13, %v6381_v23, %v17848_v35  ;;  %v17853_v48 = vld [vmem:[#allocation11_spill] sm:$0xff]  ;;  %v14932_v55 = vsel %vm2410_vm11, %v17855_v40, %v17854_v21  ;;  %v17856_v35 = vld [vmem:[#allocation72_spill] sm:$0xff]  ;;  %vm17868_vm11 = vmmov %vm17804_vm7 }
 0x524   :  { %v14936_v23 = vcombine.high %v17856_v35, %v17856_v35  ;;  %v4379_v57 = vrot.slane %v17856_v35, 5  ;;  %v14948_v40 = vcombine.high %v14932_v55, %v14932_v55  ;;  %v4494_v7 = vrot.slane %v17856_v35, 6 }
 0x525   :  { %v14912_v32 = vpop.permute.xlu1 %6010  ;;  %v14922_v0 = vpop.permute.xlu0 %6060  ;;  %v4375_v49 = vrot.slane %v14932_v55, 5 }
 0x526   :  { %17846 = vst [vmem:[#allocation83_spill] sm:$0xff] %v14912_v32  ;;  %17851 = vst [vmem:[#allocation12_spill] sm:$0xff] %v14922_v0  ;;  %v6413_v32 = vsel %vm5742_vm4, %v6397_v62, %v17853_v48  ;;  %v17857_v0 = vld [vmem:[#allocation27_spill] sm:$0xff]  ;;  %v17859_v48 = vld [vmem:[#allocation121_spill] sm:$0xff]  ;;  %v4382_v63 = vrot.slane %v14936_v23, 5  ;;  %v4497_v39 = vrot.slane %v14936_v23, 6 }
 0x527   :  { %8309 = vrot.lane.b32.xlu1 %v8308_v47, %s8786_s25  ;;  %v6429_v1 = vsel %vm5759_vm6, %v6413_v32, %v17857_v0  ;;  %8319 = vrot.lane.b32.xlu0 %v8318_v12, %s8802_s29  ;;  %v8328_v56 = vpack.i.bf16 %v17859_v48, %v17834_v45  ;;  %v4372_v32 = vrot.slane %v14920_v20, 5  ;;  %v4381_v0 = vrot.slane %v4379_v57, 4 }
 0x528   :  { %v6445_v62 = vsel %vm5776_vm8, %v6429_v1, %v17858_v2  ;;  %v6334_v2 = vsel %vm78_vm0, %v17834_v45, %v17860_v54  ;;  %v4487_v45 = vrot.slane %v14920_v20, 6 }
 0x529   :  { %v14942_v34 = vpop.permute.xlu1 %8124  ;;  %v14950_v21 = vpop.permute.xlu0 %8129  ;;  %v4374_v54 = vrot.slane %v4372_v32, 4  ;;  %v4373_v3 = vsel %vm13052_vm5, %v7687_v61, %v4372_v32  ;;  %v7704_v61 = vrot.slane %v14948_v40, 10 }
 0x52b   :  { %6480 = vrot.lane.b32.xlu1 %v6445_v62, %s8815_s18  ;;  %8329 = vrot.lane.b32.xlu0 %v8328_v56, %s8803_s30  ;;  %v6350_v62 = vsel %vm176_vm1, %v6334_v2, %v17862_v18  ;;  %v7688_v56 = vrot.slane %v14948_v40, 9  ;;  %v4383_v18 = vsel %vm13052_vm5, %v4381_v0, %v4382_v63  ;;  %v4496_v2 = vrot.slane %v4494_v7, 4 }
 0x52c   :  { %v6366_v11 = vsel %vm274_vm2, %v6350_v62, %v17864_v10  ;;  %v17866_v62 = vld [vmem:[#allocation64_spill] sm:$0xff]  ;;  %v4376_v63 = vsel %vm13052_vm5, %v4374_v54, %v4375_v49  ;;  %v17869_v54 = vld [vmem:[#allocation94_spill] sm:$0xff] }
 0x52d   :  { %v14962_v1 = vpop.permute.xlu1 %6258  ;;  %v14972_v60 = vpop.permute.xlu0 %6110  ;;  %v4380_v0 = vsel %vm13052_vm5, %v7688_v56, %v4379_v57  ;;  %v6382_v25 = vsel %vm17868_vm11, %v6366_v11, %v17867_v52  ;;  %v4498_v49 = vsel %vm13221_vm9, %v4496_v2, %v4497_v39  ;;  %v4611_v57 = vrot.slane %v14936_v23, 7 }
 0x52e   :  { %17861 = vst [vmem:[#allocation96_spill] sm:$0xff] %v14962_v1  ;;  %17865 = vst [vmem:[#allocation19_spill] sm:$0xff] %v14972_v60  ;;  %v4608_v1 = vrot.slane %v17856_v35, 7  ;;  %v4490_v60 = vrot.slane %v14932_v55, 6  ;;  %v14998_v58 = vcombine.low %v4380_v0, %v4383_v18  ;;  %v6398_v11 = vsel %vm5725_vm13, %v6382_v25, %v17869_v54  ;;  %v17870_v0 = vld [vmem:[#allocation13_spill] sm:$0xff] }
 0x52f   :  { %8324 = vrot.lane.b32.xlu1 %v8298_v51, %s8811_s6  ;;  %8339 = vrot.lane.b32.xlu0 %v8338_v5, %s8804_s4  ;;  %v8348_v51 = vpack.i.bf16 %v17866_v62, %v17840_v31  ;;  %v4489_v31 = vrot.slane %v4487_v45, 4  ;;  %v7703_v56 = vrot.slane %v17849_v24, 10  ;;  %v4604_v18 = vrot.slane %v14932_v55, 7 }
 0x530   :  { %v4610_v32 = vrot.slane %v4608_v1, 4  ;;  %v6414_v16 = vsel %vm5742_vm4, %v6398_v11, %v17870_v0  ;;  %v4495_v39 = vsel %vm13221_vm9, %v7704_v61, %v4494_v7  ;;  %v7720_v54 = vrot.slane %v14948_v40, 11 }
 0x531   :  { %v14982_v10 = vpop.permute.xlu1 %8134  ;;  %v14995_v5 = vpop.permute.xlu0 %8139  ;;  %v4491_v2 = vsel %vm13221_vm9, %v4489_v31, %v4490_v60  ;;  %v17872_v31 = vld [vmem:[#allocation123_spill] sm:$0xff]  ;;  %v7719_v11 = vrot.slane %v17849_v24, 11  ;;  %v17888_v24 = vld [vmem:[#allocation18_spill] sm:$0xff]  ;;  %vm16977_vm11 = vcmask 637952  }
 0x532   :  { %v4612_v60 = vsel %vm13206_vm3, %v4610_v32, %v4611_v57  ;;  %v6430_v7 = vsel %vm5759_vm6, %v6414_v16, %v17872_v31 }
 0x533   :  { %8334 = vrot.lane.b32.xlu1 %v8308_v47, %s8813_s0  ;;  %8349 = vrot.lane.b32.xlu0 %v8348_v51, %s8805_s5  ;;  %v4863_v47 = vcombine.low %v4373_v3, %v4376_v63  ;;  %v15022_v3 = vcombine.low %v4495_v39, %v4498_v49  ;;  %v4488_v51 = vsel %vm13221_vm9, %v7703_v56, %v4487_v45  ;;  %v4603_v63 = vrot.slane %v4601_v43, 4 }
 0x534   :  { %v6446_v49 = vsel %vm5776_vm8, %v6430_v7, %v14182_v19  ;;  %v4602_v56 = vsel %vm13206_vm3, %v7719_v11, %v4601_v43  ;;  %v15064_v43 = vcombine.low %v17856_v35, %v14936_v23  ;;  %v17877_v7 = vld [vmem:[#allocation24_spill] sm:$0xff] }
 0x535   :  { %v15008_v52 = vpop.permute.xlu1 %6308  ;;  %v15018_v50 = vpop.permute.xlu0 %5962  ;;  %v8353_v25 = vpack.i.bf16 %v14998_v58, %v4863_v47  ;;  %v4605_v45 = vsel %vm13206_vm3, %v4603_v63, %v4604_v18  ;;  %v4609_v47 = vsel %vm13206_vm3, %v7720_v54, %v4608_v1  ;;  %v17873_v18 = vld [vmem:[#allocation21_spill] sm:$0xff]  ;;  %v15056_v1 = vcombine.high %v14229_v42, %v14229_v42  ;;  %v17875_v63 = vld [vmem:[#allocation14_spill] sm:$0xff] }
 0x536   :  { %17871 = vst [vmem:[#allocation10_spill] sm:$0xff] %v15018_v50  ;;  %v15045_v57 = vcombine.low %v4609_v47, %v4612_v60  ;;  %v8358_v0 = vpack.i.bf16 %v17873_v18, %v17847_v44  ;;  %v6335_v44 = vsel %vm78_vm0, %v17859_v48, %v17875_v63  ;;  %v17876_v60 = vld [vmem:[#allocation63_spill] sm:$0xff] }
 0x537   :  { %8344 = vrot.lane.b32.xlu1 %v8318_v12, %s8814_s15  ;;  %8354 = vrot.lane.b32.xlu0 %v8353_v25, %s8783_s16  ;;  %v4927_v12 = vcombine.low %v4488_v51, %v4491_v2  ;;  %v4991_v2 = vcombine.low %v4602_v56, %v4605_v45  ;;  %v5055_v51 = vcombine.low %v14920_v20, %v14932_v55  ;;  %v4386_v23 = vrot.slane %v15056_v1, 5  ;;  %v17880_v56 = vld [vmem:[#allocation118_spill] sm:$0xff] }
 0x538   :  { %v8368_v31 = vpack.i.bf16 %v17876_v60, %v17852_v37 }
 0x539   :  { %v15032_v61 = vpop.permute.xlu1 %8144  ;;  %v15041_v32 = vpop.permute.xlu0 %8149  ;;  %v8363_v16 = vpack.i.bf16 %v15022_v3, %v4927_v12  ;;  %v8373_v25 = vpack.i.bf16 %v15045_v57, %v4991_v2  ;;  %v6351_v12 = vsel %vm176_vm1, %v6335_v44, %v17877_v7  ;;  %v8383_v45 = vpack.i.bf16 %v15064_v43, %v5055_v51  ;;  %v17881_v2 = vld [vmem:[#allocation131_spill] sm:$0xff] }
 0x53a   :  { %v4388_v63 = vrot.slane %v4386_v23, 4  ;;  %v4501_v44 = vrot.slane %v15056_v1, 6  ;;  %v17882_v51 = vld [vmem:[#allocation135_spill] sm:$0xff] }
 0x53b   :  { %6482 = vrot.lane.b32.xlu1 %v6446_v49, %s8815_s18  ;;  %8364 = vrot.lane.b32.xlu0 %v8363_v16, %s8784_s17  ;;  %v17878_v49 = vld [vmem:[#allocation124_spill] sm:$0xff] }
 0x53c   :  { %v6367_v11 = vsel %vm274_vm2, %v6351_v12, %v17878_v49  ;;  %v17885_v12 = vld [vmem:[#allocation35_spill] sm:$0xff] }
 0x53d   :  { %v15050_v19 = vpop.permute.xlu1 %6160  ;;  %v15058_v39 = vpop.permute.xlu0 %6012  ;;  %v6383_v47 = vsel %vm17879_vm15, %v6367_v11, %v14198_v9  ;;  %v15108_v11 = vcombine.low %v14229_v42, %v15056_v1  ;;  %vm16976_vm15 = vcmask 687104  }
 0x53e   :  { %17874 = vst [vmem:[#allocation98_spill] sm:$0xff] %v15058_v39  ;;  %v6399_v37 = vsel %vm5725_vm13, %v6383_v47, %v14243_v17  ;;  %v17884_v17 = vld [vmem:[#allocation105_spill] sm:$0xff] }
 0x53f   :  { %8359 = vrot.lane.b32.xlu1 %v8358_v0, %s8806_s19  ;;  %8374 = vrot.lane.b32.xlu0 %v8373_v25, %s8785_s22  ;;  %v8378_v0 = vpack.i.bf16 %v17880_v56, %v17859_v48  ;;  %v6415_v25 = vsel %vm5742_vm4, %v6399_v37, %v17881_v2  ;;  %v4389_v7 = vrot.slane %v17884_v17, 5  ;;  %v4615_v48 = vrot.slane %v15056_v1, 7  ;;  %v17886_v37 = vld [vmem:[#allocation49_spill] sm:$0xff] }
 0x540   :  { %v7689_v2 = vrot.slane %v14229_v42, 9  ;;  %v4618_v50 = vrot.slane %v17884_v17, 7 }
 0x541   :  { %v15072_v54 = vpop.permute.xlu1 %8154  ;;  %v15081_v55 = vpop.permute.xlu0 %8159 }
 0x543   :  { %8369 = vrot.lane.b32.xlu1 %v8368_v31, %s8808_s1  ;;  %8384 = vrot.lane.b32.xlu0 %v8383_v45, %s8786_s25  ;;  %v6431_v31 = vsel %vm5759_vm6, %v6415_v25, %v17882_v51  ;;  %v8091_v45 = vunpack.i.l.bf16 %v14784_v29  ;;  %v8096_v25 = vunpack.i.l.bf16 %v14820_v14  ;;  %v4390_v51 = vsel %vm13052_vm5, %v4388_v63, %v4389_v7 }
 0x544   :  { %v6447_v49 = vsel %vm5776_vm8, %v6431_v31, %v17885_v12  ;;  %v4503_v31 = vrot.slane %v4501_v44, 4  ;;  %v17887_v12 = vld [vmem:[#allocation61_spill] sm:$0xff]  ;;  %v4387_v63 = vsel %vm13052_vm5, %v7689_v2, %v4386_v23  ;;  %v4617_v7 = vrot.slane %v4615_v48, 4  ;;  %v17891_v2 = vld [vmem:[#allocation126_spill] sm:$0xff]  ;;  %vm17893_vm5 = vmmov %vm17804_vm7 }
 0x545   :  { %v15090_v16 = vpop.permute.xlu1 %6210  ;;  %v15099_v9 = vpop.permute.xlu0 %6062  ;;  %v4823_v20 = vcombine.low %v17888_v24, %v17887_v12  ;;  %v8101_v12 = vunpack.i.l.bf16 %v14822_v36  ;;  %vm5810_vm7 = vcmask 490496  }
 0x546   :  { %17883 = vst [vmem:[#allocation71_spill] sm:$0xff] %v15099_v9 }
 0x547   :  { %8379 = vrot.lane.b32.xlu1 %v8378_v0, %s8809_s28  ;;  %6484 = vrot.lane.b32.xlu0 %v6447_v49, %s8815_s18  ;;  %v8388_v0 = vpack.i.bf16 %v17886_v37, %v17863_v59  ;;  %v17889_v49 = vld [vmem:[#allocation122_spill] sm:$0xff]  ;;  %v15129_v59 = vcombine.low %v14948_v40, %v17856_v35  ;;  %v4504_v37 = vrot.slane %v17884_v17, 6  ;;  %v5661_v24 = vsel %vm78_vm0, %v4823_v20, %v8091_v45 }
 0x548   :  { %v8398_v39 = vpack.i.bf16 %v17889_v49, %v17866_v62  ;;  %v15142_v40 = vcombine.low %v4387_v63, %v4390_v51  ;;  %v7705_v62 = vrot.slane %v14229_v42, 10  ;;  %v5677_v49 = vsel %vm176_vm1, %v5661_v24, %v8096_v25 }
 0x549   :  { %v15112_v47 = vpop.permute.xlu1 %8164  ;;  %v15122_v9 = vpop.permute.xlu0 %8169  ;;  %v8393_v35 = vpack.i.bf16 %v15108_v11, %v15129_v59  ;;  %v4505_v20 = vsel %vm13221_vm9, %v4503_v31, %v4504_v37  ;;  %v6336_v51 = vsel %vm78_vm0, %v17880_v56, %v17891_v2  ;;  %v7721_v63 = vrot.slane %v14229_v42, 11 }
 0x54a   :  { %v4502_v25 = vsel %vm13221_vm9, %v7705_v62, %v4501_v44  ;;  %v4619_v24 = vsel %vm13206_vm3, %v4617_v7, %v4618_v50  ;;  %v5693_v31 = vsel %vm274_vm2, %v5677_v49, %v8101_v12  ;;  %v8111_v37 = vunpack.i.l.bf16 %v14861_v41  ;;  %v17894_v50 = vld [vmem:[#allocation130_spill] sm:$0xff]  ;;  %v17895_v62 = vld [vmem:[#allocation77_spill] sm:$0xff]  ;;  %vm17897_vm9 = vmmov %vm17893_vm5 }
 0x54b   :  { %8389 = vrot.lane.b32.xlu1 %v8388_v0, %s8810_s14  ;;  %8399 = vrot.lane.b32.xlu0 %v8398_v39, %s8811_s6  ;;  %v17890_v39 = vld [vmem:[#allocation34_spill] sm:$0xff]  ;;  %v4929_v56 = vcombine.low %v4502_v25, %v4505_v20  ;;  %v5709_v15 = vsel %vm17893_vm5, %v5693_v31, %v8106_v53  ;;  %v8116_v44 = vunpack.i.l.bf16 %v14887_v4  ;;  %v8418_v49 = vpack.i.bf16 %v17895_v62, %v17876_v60  ;;  %v17896_v20 = vld [vmem:[#allocation133_spill] sm:$0xff]  ;;  %v17898_v53 = vld [vmem:[#allocation139_spill] sm:$0xff] }
 0x54c   :  { %v8408_v45 = vpack.i.bf16 %v17890_v39, %v17873_v18  ;;  %v8403_v18 = vpack.i.bf16 %v15142_v40, %v14998_v58  ;;  %v17892_v39 = vld [vmem:[#allocation128_spill] sm:$0xff]  ;;  %v4616_v58 = vsel %vm13206_vm3, %v7721_v63, %v4615_v48  ;;  %v5726_v25 = vsel %vm5725_vm13, %v5709_v15, %v8111_v37 }
 0x54d   :  { %v15138_v0 = vpop.permute.xlu1 %6260  ;;  %v15149_v23 = vpop.permute.xlu0 %6112  ;;  %v6352_v42 = vsel %vm176_vm1, %v6336_v51, %v17892_v39  ;;  %v15184_v2 = vcombine.low %v4616_v58, %v4619_v24  ;;  %v8121_v31 = vunpack.i.l.bf16 %v14891_v30  ;;  %v8413_v60 = vpack.i.bf16 %v4929_v56, %v15022_v3 }
 0x54e   :  { %v6368_v7 = vsel %vm274_vm2, %v6352_v42, %v17894_v50  ;;  %v5743_v63 = vsel %vm5742_vm4, %v5726_v25, %v8116_v44  ;;  %v8126_v24 = vunpack.i.l.bf16 %v14942_v34  ;;  %v8136_v37 = vunpack.i.l.bf16 %v14982_v10 }
 0x54f   :  { %8394 = vrot.lane.b32.xlu1 %v8393_v35, %s8802_s29  ;;  %8409 = vrot.lane.b32.xlu0 %v8408_v45, %s8813_s0  ;;  %v6384_v45 = vsel %vm17897_vm9, %v6368_v7, %v17896_v20  ;;  %v15206_v15 = vcombine.low %v15056_v1, %v17884_v17  ;;  %vm5793_vm3 = vcmask 441344   ;;  %v8146_v44 = vunpack.i.l.bf16 %v15032_v61 }
 0x550   :  { %v6400_v51 = vsel %vm5725_vm13, %v6384_v45, %v17898_v53  ;;  %v5760_v50 = vsel %vm5759_vm6, %v5743_v63, %v8121_v31  ;;  %v8423_v62 = vpack.i.bf16 %v15184_v2, %v15045_v57  ;;  %v17900_v53 = vld [vmem:[#allocation16_spill] sm:$0xff]  ;;  %v8092_v31 = vunpack.i.h.bf16 %v14784_v29 }
 0x551   :  { %v15165_v35 = vpop.permute.xlu1 %8174  ;;  %v15175_v12 = vpop.permute.xlu0 %8179  ;;  %v6416_v48 = vsel %vm5742_vm4, %v6400_v51, %v17899_v8  ;;  %v5777_v1 = vsel %vm5776_vm8, %v5760_v50, %v8126_v24  ;;  %v8433_v20 = vpack.i.bf16 %v15206_v15, %v15064_v43  ;;  %v17901_v51 = vld [vmem:[#allocation110_spill] sm:$0xff]  ;;  %v8097_v63 = vunpack.i.h.bf16 %v14820_v14 }
 0x552   :  { %v6432_v39 = vsel %vm5759_vm6, %v6416_v48, %v14381_v27  ;;  %v8156_v27 = vunpack.i.l.bf16 %v15072_v54  ;;  %v5794_v17 = vsel %vm5793_vm3, %v5777_v1, %v8136_v37  ;;  %v15231_v25 = vcombine.low %v17901_v51, %v17900_v53  ;;  %v17902_v48 = vld [vmem:[#allocation70_spill] sm:$0xff] }
 0x553   :  { %8404 = vrot.lane.b32.xlu1 %v8403_v18, %s8803_s30  ;;  %8419 = vrot.lane.b32.xlu0 %v8418_v49, %s8814_s15  ;;  %v6448_v3 = vsel %vm5776_vm8, %v6432_v39, %v14403_v38  ;;  %v8166_v38 = vunpack.i.l.bf16 %v15112_v47  ;;  %v8176_v49 = vunpack.i.l.bf16 %v15165_v35  ;;  %v5811_v45 = vsel %vm5810_vm7, %v5794_v17, %v8146_v44  ;;  %v17903_v44 = vld [vmem:[#allocation73_spill] sm:$0xff] }
 0x554   :  { %v8428_v43 = vpack.i.bf16 %v17902_v48, %v15142_v40  ;;  %v8443_v29 = vpack.i.bf16 %v15231_v25, %v15108_v11  ;;  %v8438_v50 = vpack.i.bf16 %v17903_v44, %v4929_v56  ;;  %vm5895_vm5 = vcmask 736256  }
 0x555   :  { %v15191_v18 = vpop.permute.xlu1 %6310  ;;  %v15201_v42 = vpop.permute.xlu0 %6162  ;;  %vm6563_vm9 = vcmask 179200   ;;  %v8107_v17 = vunpack.i.h.bf16 %v14853_v46  ;;  %v17905_v46 = vld [vmem:[#allocation55_spill] sm:$0xff] }
 0x556   :  { %v8448_v53 = vpack.i.bf16 %v17905_v46, %v15184_v2 }
 0x557   :  { %8414 = vrot.lane.b32.xlu1 %v8413_v60, %s8804_s4  ;;  %6486 = vrot.lane.b32.xlu0 %v6448_v3, %s8815_s18  ;;  %v5828_v60 = vsel %vm16979_vm10, %v5811_v45, %v8156_v27  ;;  %v17904_v27 = vld [vmem:[#allocation136_spill] sm:$0xff]  ;;  %v8112_v45 = vunpack.i.h.bf16 %v14861_v41  ;;  %v17909_v41 = vld [vmem:[#allocation138_spill] sm:$0xff] }
 0x558   :  { %v5845_v24 = vsel %vm16978_vm14, %v5828_v60, %v8166_v38  ;;  %v5662_v14 = vsel %vm78_vm0, %v17904_v27, %v8092_v31  ;;  %v8117_v31 = vunpack.i.h.bf16 %v14887_v4  ;;  %v17907_v60 = vld [vmem:[#allocation137_spill] sm:$0xff] }
 0x559   :  { %v15214_v7 = vpop.permute.xlu1 %8184  ;;  %v15222_v58 = vpop.permute.xlu0 %8194  ;;  %v5862_v39 = vsel %vm16977_vm11, %v5845_v24, %v8176_v49  ;;  %v5678_v38 = vsel %vm176_vm1, %v5662_v14, %v8097_v63  ;;  %v17908_v63 = vld [vmem:[#allocation28_spill] sm:$0xff]  ;;  %v17911_v27 = vld [vmem:[#allocation25_spill] sm:$0xff] }
 0x55a   :  { %v8186_v57 = vunpack.i.l.bf16 %v15214_v7  ;;  %v8196_v37 = vunpack.i.l.bf16 %v15222_v58  ;;  %v6337_v24 = vsel %vm78_vm0, %v17908_v63, %v17907_v60  ;;  %v8458_v14 = vpack.i.bf16 %v17911_v27, %v15206_v15  ;;  %v17915_v60 = vld [vmem:[#allocation74_spill] sm:$0xff] }
 0x55b   :  { %8424 = vrot.lane.b32.xlu1 %v8423_v62, %s8805_s5  ;;  %8434 = vrot.lane.b32.xlu0 %v8433_v20, %s8806_s19  ;;  %v8102_v62 = vunpack.i.h.bf16 %v14822_v36 }
 0x55c   :  { %v5879_v40 = vsel %vm16976_vm15, %v5862_v39, %v8186_v57  ;;  %vm17906_vm15 = vcmask 195584  }
 0x55d   :  { %v15236_v8 = vpop.permute.xlu1 %8189  ;;  %v15244_v3 = vpop.permute.xlu0 %8199  ;;  %v5896_v56 = vsel %vm5895_vm5, %v5879_v40, %v8196_v37  ;;  %v5694_v36 = vsel %vm274_vm2, %v5678_v38, %v8102_v62  ;;  %v17910_v37 = vld [vmem:[#allocation141_spill] sm:$0xff]  ;;  %v8122_v40 = vunpack.i.h.bf16 %v14891_v30  ;;  %v17912_v62 = vld [vmem:[#allocation144_spill] sm:$0xff] }
 0x55e   :  { %v5710_v51 = vsel %vm17906_vm15, %v5694_v36, %v8107_v17 }
 0x55f   :  { %8429 = vrot.lane.b32.xlu1 %v8428_v43, %s8783_s16  ;;  %8444 = vrot.lane.b32.xlu0 %v8443_v29, %s8808_s1  ;;  %v5727_v2 = vsel %vm5725_vm13, %v5710_v51, %v8112_v45  ;;  %v8147_v45 = vunpack.i.h.bf16 %v15032_v61  ;;  %v17914_v51 = vld [vmem:[#allocation149_spill] sm:$0xff] }
 0x560   :  { %v5744_v17 = vsel %vm5742_vm4, %v5727_v2, %v8117_v31 }
 0x561   :  { %v15255_v1 = vpop.permute.xlu1 %6212  ;;  %v6475_v49 = vpop.permute.xlu0 %6474  ;;  %v5761_v31 = vsel %vm5759_vm6, %v5744_v17, %v8122_v40  ;;  %v8187_v40 = vunpack.i.h.bf16 %v15214_v7  ;;  %v17917_v7 = vld [vmem:[#allocation65_spill] sm:$0xff] }
 0x562   :  { %7753 = vmatprep.mubr.msk.f32.mxu0 %vm6563_vm9, %v6475_v49  ;;  %v6523_v20 = vsel %vm6522_vm12, %v5896_v56, %v6475_v49  ;;  %v8127_v49 = vunpack.i.h.bf16 %v14942_v34 }
 0x563   :  { %8439 = vrot.lane.b32.xlu1 %v8438_v50, %s8784_s17  ;;  %8454 = vrot.lane.b32.xlu0 %v8428_v43, %s8809_s28  ;;  %v6353_v43 = vsel %vm176_vm1, %v6337_v24, %v17909_v41  ;;  %v8177_v41 = vunpack.i.h.bf16 %v15165_v35 }
 0x564   :  { %6664 = vmatmul.mubr.f32.vlgmr.msra.gmra.mrb[0].mxu0 %v6523_v20  ;;  %v6369_v29 = vsel %vm274_vm2, %v6353_v43, %v17910_v37  ;;  %v8137_v20 = vunpack.i.h.bf16 %v14982_v10  ;;  %v5778_v24 = vsel %vm5776_vm8, %v5761_v31, %v8127_v49  ;;  %v8161_v49 = vunpack.i.l.bf16 %v15081_v55 }
 0x565   :  { %v15266_v57 = vpop.permute.xlu1 %6262  ;;  %v15275_v39 = vpop.permute.xlu0 %8209  ;;  %v6385_v38 = vsel %vm17906_vm15, %v6369_v29, %v17912_v62  ;;  %v8131_v29 = vunpack.i.l.bf16 %v14950_v21  ;;  %v8141_v62 = vunpack.i.l.bf16 %v14995_v5  ;;  %vm17918_vm15 = vcmask 687104  }
 0x566   :  { %v6401_v56 = vsel %vm5725_vm13, %v6385_v38, %v14425_v26  ;;  %v8157_v26 = vunpack.i.h.bf16 %v15072_v54  ;;  %v5795_v61 = vsel %vm5793_vm3, %v5778_v24, %v8137_v20  ;;  %v17916_v54 = vld [vmem:[#allocation112_spill] sm:$0xff]  ;;  %v8151_v38 = vunpack.i.l.bf16 %v15041_v32 }
 0x567   :  { %8449 = vrot.lane.b32.xlu1 %v8448_v53, %s8785_s22  ;;  %8464 = vrot.lane.b32.xlu0 %v8438_v50, %s8810_s14  ;;  %v17913_v50 = vld [vmem:[#allocation9_spill] sm:$0xff]  ;;  %v6417_v15 = vsel %vm5742_vm4, %v6401_v56, %v14443_v33  ;;  %v8167_v33 = vunpack.i.h.bf16 %v15112_v47  ;;  %v8478_v37 = vpack.i.bf16 %v17916_v54, %v17902_v48  ;;  %v5812_v2 = vsel %vm5810_vm7, %v5795_v61, %v8147_v45 }
 0x568   :  { %v8468_v36 = vpack.i.bf16 %v17913_v50, %v15231_v25  ;;  %v6433_v34 = vsel %vm5759_vm6, %v6417_v15, %v17914_v51  ;;  %v5829_v47 = vsel %vm16979_vm10, %v5812_v2, %v8157_v26  ;;  %v8197_v20 = vunpack.i.h.bf16 %v15222_v58  ;;  %v17921_v61 = vld [vmem:[#allocation33_spill] sm:$0xff] }
 0x569   :  { %v15285_v4 = vpop.permute.xlu1 %8204  ;;  %v15296_v30 = vpop.permute.xlu0 %8214  ;;  %v6449_v63 = vsel %vm5776_vm8, %v6433_v34, %v17915_v60  ;;  %v5846_v17 = vsel %vm16978_vm14, %v5829_v47, %v8167_v33  ;;  %v8488_v45 = vpack.i.bf16 %v17917_v7, %v17903_v44  ;;  %v5663_v51 = vsel %vm78_vm0, %v14275_v28, %v8131_v29  ;;  %v17919_v44 = vld [vmem:[#allocation44_spill] sm:$0xff]  ;;  %v17922_v29 = vld [vmem:[#allocation145_spill] sm:$0xff] }
 0x56a   :  { %v5863_v56 = vsel %vm16977_vm11, %v5846_v17, %v8177_v41  ;;  %v8171_v34 = vunpack.i.l.bf16 %v15122_v9  ;;  %v5679_v26 = vsel %vm176_vm1, %v5663_v51, %v8141_v62  ;;  %v8181_v60 = vunpack.i.l.bf16 %v15175_v12  ;;  %v17924_v17 = vld [vmem:[#allocation68_spill] sm:$0xff] }
 0x56b   :  { %8459 = vrot.lane.b32.xlu1 %v8458_v14, %s8786_s25  ;;  %8469 = vrot.lane.b32.xlu0 %v8468_v36, %s8802_s29  ;;  %v5880_v31 = vsel %vm17918_vm15, %v5863_v56, %v8187_v40  ;;  %v6338_v28 = vsel %vm78_vm0, %v17902_v48, %v17919_v44  ;;  %vm17920_vm11 = vcmask 195584   ;;  %v8498_v41 = vpack.i.bf16 %v17921_v61, %v17905_v46  ;;  %v17923_v48 = vld [vmem:[#allocation147_spill] sm:$0xff] }
 0x56c   :  { %v6354_v2 = vsel %vm176_vm1, %v6338_v28, %v17922_v29  ;;  %vm17930_vm15 = vcmask 637952  }
 0x56d   :  { %v15309_v10 = vpop.permute.xlu1 %6312  ;;  %v15317_v43 = vpop.permute.xlu0 %8224  ;;  %v6370_v47 = vsel %vm274_vm2, %v6354_v2, %v17923_v48 }
 0x56f   :  { %6488 = vrot.lane.b32.xlu1 %v6449_v63, %s8815_s18  ;;  %8479 = vrot.lane.b32.xlu0 %v8478_v37, %s8803_s30  ;;  %v8191_v63 = vunpack.i.l.bf16 %v15236_v8  ;;  %v5897_v37 = vsel %vm5895_vm5, %v5880_v31, %v8197_v20  ;;  %v8211_v20 = vunpack.i.l.bf16 %v15275_v39  ;;  %v17925_v31 = vld [vmem:[#allocation22_spill] sm:$0xff] }
 0x571   :  { %v15328_v35 = vpop.permute.xlu1 %8219  ;;  %v15335_v15 = vpop.permute.xlu0 %8234 }
 0x572   :  { %v8221_v51 = vunpack.i.l.bf16 %v15328_v35 }
 0x573   :  { %8474 = vrot.lane.b32.xlu1 %v8448_v53, %s8811_s6  ;;  %8489 = vrot.lane.b32.xlu0 %v8488_v45, %s8804_s4  ;;  %v5695_v53 = vsel %vm274_vm2, %v5679_v26, %v8151_v38  ;;  %v8503_v26 = vpack.i.bf16 %v17925_v31, %v17916_v54 }
 0x574   :  { %v5711_v24 = vsel %vm17920_vm11, %v5695_v53, %v8161_v49  ;;  %v6386_v49 = vsel %vm17920_vm11, %v6370_v47, %v17924_v17  ;;  %v17928_v47 = vld [vmem:[#allocation103_spill] sm:$0xff]  ;;  %vm17933_vm11 = vcmask 687104  }
 0x575   :  { %v15347_v58 = vpop.permute.xlu1 %8229  ;;  %v6477_v33 = vpop.permute.xlu0 %6476  ;;  %v5728_v40 = vsel %vm5725_vm13, %v5711_v24, %v8171_v34  ;;  %v6402_v45 = vsel %vm5725_vm13, %v6386_v49, %v14518_v6 }
 0x576   :  { %7754 = vmatprep.mubr.msk.f32.mxu0 %vm6563_vm9, %v6477_v33  ;;  %v6524_v62 = vsel %vm6522_vm12, %v5897_v37, %v6477_v33  ;;  %v5745_v38 = vsel %vm5742_vm4, %v5728_v40, %v8181_v60  ;;  %v6418_v60 = vsel %vm5742_vm4, %v6402_v45, %v14558_v13  ;;  %v8231_v53 = vunpack.i.l.bf16 %v15347_v58 }
 0x577   :  { %8484 = vrot.lane.b32.xlu1 %v8458_v14, %s8813_s0  ;;  %v8201_v14 = vunpack.i.l.bf16 %v15244_v3  ;;  %8499 = vrot.lane.b32.xlu0 %v8498_v41, %s8805_s5  ;;  %v5762_v56 = vsel %vm5759_vm6, %v5745_v38, %v8191_v63  ;;  %v6434_v63 = vsel %vm5759_vm6, %v6418_v60, %v14577_v22  ;;  %v17927_v22 = vld [vmem:[#allocation62_spill] sm:$0xff]  ;;  %v8508_v38 = vpack.i.bf16 %v17928_v47, %v17911_v27  ;;  %v17932_v27 = vld [vmem:[#allocation57_spill] sm:$0xff] }
 0x578   :  { %6669 = vmatmul.mubr.f32.gmra.mrb[2].mxu0 %v6524_v62  ;;  %v8513_v37 = vpack.i.bf16 %v17927_v22, %v17917_v7  ;;  %v17929_v7 = vld [vmem:[#allocation79_spill] sm:$0xff]  ;;  %v8518_v60 = vpack.i.bf16 %v17932_v27, %v17913_v50 }
 0x579   :  { %v15369_v46 = vpop.permute.xlu1 %8239  ;;  %v15378_v34 = vpop.permute.xlu0 %8249  ;;  %v5779_v44 = vsel %vm5776_vm8, %v5762_v56, %v8201_v14  ;;  %v8523_v17 = vpack.i.bf16 %v17929_v7, %v17921_v61 }
 0x57a   :  { %v8241_v6 = vunpack.i.l.bf16 %v15369_v46  ;;  %v5796_v33 = vsel %vm5793_vm3, %v5779_v44, %v8211_v20  ;;  %v8251_v2 = vunpack.i.l.bf16 %v15378_v34  ;;  %v17931_v20 = vld [vmem:[#allocation101_spill] sm:$0xff] }
 0x57b   :  { %8494 = vrot.lane.b32.xlu1 %v8468_v36, %s8814_s15  ;;  %8504 = vrot.lane.b32.xlu0 %v8503_v26, %s8783_s16  ;;  %v17926_v36 = vld [vmem:[#allocation66_spill] sm:$0xff]  ;;  %v5813_v13 = vsel %vm5810_vm7, %v5796_v33, %v8221_v51  ;;  %v6339_v45 = vsel %vm78_vm0, %v17916_v54, %v17931_v20  ;;  %v17936_v33 = vld [vmem:[#allocation116_spill] sm:$0xff] }
 0x57c   :  { %v6450_v24 = vsel %vm5776_vm8, %v6434_v63, %v17926_v36  ;;  %v5830_v29 = vsel %vm16979_vm10, %v5813_v13, %v8231_v53  ;;  %v17934_v63 = vld [vmem:[#allocation15_spill] sm:$0xff]  ;;  %v8533_v13 = vpack.i.bf16 %v17936_v33, %v17928_v47  ;;  %v17940_v47 = vld [vmem:[#allocation120_spill] sm:$0xff] }
 0x57d   :  { %v15391_v28 = vpop.permute.xlu1 %8244  ;;  %v15397_v41 = vpop.permute.xlu0 %8259  ;;  %v5847_v40 = vsel %vm16978_vm14, %v5830_v29, %v8241_v6  ;;  %v6355_v61 = vsel %vm176_vm1, %v6339_v45, %v17934_v63  ;;  %v17935_v6 = vld [vmem:[#allocation114_spill] sm:$0xff]  ;;  %v17937_v29 = vld [vmem:[#allocation97_spill] sm:$0xff]  ;;  %v8162_v45 = vunpack.i.h.bf16 %v15081_v55 }
 0x57e   :  { %v8261_v62 = vunpack.i.l.bf16 %v15397_v41  ;;  %v5864_v49 = vsel %vm17930_vm15, %v5847_v40, %v8251_v2  ;;  %v6371_v36 = vsel %vm274_vm2, %v6355_v61, %v17935_v6  ;;  %vm17938_vm15 = vcmask 195584  }
 0x57f   :  { %6490 = vrot.lane.b32.xlu1 %v6450_v24, %s8815_s18  ;;  %8514 = vrot.lane.b32.xlu0 %v8513_v37, %s8784_s17  ;;  %v8132_v24 = vunpack.i.h.bf16 %v14950_v21  ;;  %v6387_v2 = vsel %vm17938_vm15, %v6371_v36, %v17937_v29  ;;  %v8142_v40 = vunpack.i.h.bf16 %v14995_v5  ;;  %v8152_v21 = vunpack.i.h.bf16 %v15041_v32  ;;  %v17941_v5 = vld [vmem:[#allocation151_spill] sm:$0xff]  ;;  %v17943_v32 = vld [vmem:[#allocation37_spill] sm:$0xff] }
 0x580   :  { %v5881_v53 = vsel %vm17933_vm11, %v5864_v49, %v8261_v62  ;;  %v8172_v61 = vunpack.i.h.bf16 %v15122_v9  ;;  %v8192_v29 = vunpack.i.h.bf16 %v15236_v8  ;;  %vm17944_vm11 = vmmov %vm17938_vm15  ;;  %v8212_v8 = vunpack.i.h.bf16 %v15275_v39  ;;  %v17946_v39 = vld [vmem:[#allocation95_spill] sm:$0xff] }
 0x581   :  { %v15407_v48 = vpop.permute.xlu1 %8254  ;;  %v15411_v14 = vpop.permute.xlu0 %8269  ;;  %vm17951_vm15 = vmmov %vm17944_vm11 }
 0x582   :  { %v8271_v56 = vunpack.i.l.bf16 %v15411_v14 }
 0x583   :  { %8509 = vrot.lane.b32.xlu1 %v8508_v38, %s8806_s19  ;;  %8524 = vrot.lane.b32.xlu0 %v8523_v17, %s8785_s22  ;;  %v17939_v38 = vld [vmem:[#allocation38_spill] sm:$0xff] }
 0x584   :  { %v5898_v44 = vsel %vm5895_vm5, %v5881_v53, %v8271_v56  ;;  %v6403_v49 = vsel %vm5725_vm13, %v6387_v2, %v17939_v38  ;;  %v17942_v53 = vld [vmem:[#allocation43_spill] sm:$0xff] }
 0x585   :  { %v15422_v51 = vpop.permute.xlu1 %8264  ;;  %v6479_v54 = vpop.permute.xlu0 %6478  ;;  %v6419_v20 = vsel %vm5742_vm4, %v6403_v49, %v17940_v47  ;;  %v5664_v63 = vsel %vm78_vm0, %v17942_v53, %v8132_v24  ;;  %v17945_v49 = vld [vmem:[#allocation81_spill] sm:$0xff]  ;;  %v8222_v47 = vunpack.i.h.bf16 %v15328_v35  ;;  %v17947_v35 = vld [vmem:[#allocation90_spill] sm:$0xff] }
 0x586   :  { %7755 = vmatprep.mubr.msk.f32.mxu0 %vm6563_vm9, %v6479_v54  ;;  %v6525_v62 = vsel %vm6522_vm12, %v5898_v44, %v6479_v54  ;;  %v5680_v36 = vsel %vm176_vm1, %v5664_v63, %v8142_v40  ;;  %v8182_v54 = vunpack.i.h.bf16 %v15175_v12  ;;  %v8202_v12 = vunpack.i.h.bf16 %v15244_v3  ;;  %v17948_v53 = vld [vmem:[#allocation42_spill] sm:$0xff] }
 0x587   :  { %8519 = vrot.lane.b32.xlu1 %v8518_v60, %s8808_s1  ;;  %8534 = vrot.lane.b32.xlu0 %v8533_v13, %s8786_s25  ;;  %v6435_v60 = vsel %vm5759_vm6, %v6419_v20, %v17941_v5  ;;  %v5696_v55 = vsel %vm274_vm2, %v5680_v36, %v8152_v21  ;;  %v8543_v21 = vpack.i.bf16 %v17945_v49, %v17932_v27  ;;  %v8232_v20 = vunpack.i.h.bf16 %v15347_v58 }
 0x588   :  { %6674 = vmatmul.mubr.f32.gmra.mrb[4].mxu0 %v6525_v62  ;;  %v6451_v6 = vsel %vm5776_vm8, %v6435_v60, %v17943_v32  ;;  %v5712_v9 = vsel %vm17944_vm11, %v5696_v55, %v8162_v45  ;;  %v8242_v45 = vunpack.i.h.bf16 %v15369_v46  ;;  %v8553_v58 = vpack.i.bf16 %v17947_v35, %v17925_v31  ;;  %v17949_v32 = vld [vmem:[#allocation8_spill] sm:$0xff]  ;;  %v17950_v55 = vld [vmem:[#allocation150_spill] sm:$0xff] }
 0x589   :  { %v15445_v56 = vpop.permute.xlu1 %8274  ;;  %v15455_v44 = vpop.permute.xlu0 %8284  ;;  %v5729_v2 = vsel %vm5725_vm13, %v5712_v9, %v8172_v61  ;;  %v8206_v61 = vunpack.i.l.bf16 %v15285_v4  ;;  %v8262_v9 = vunpack.i.h.bf16 %v15397_v41  ;;  %vm17957_vm11 = vcmask 637952  }
 0x58a   :  { %v5746_v40 = vsel %vm5742_vm4, %v5729_v2, %v8182_v54  ;;  %v8252_v54 = vunpack.i.h.bf16 %v15378_v34  ;;  %v17952_v2 = vld [vmem:[#allocation154_spill] sm:$0xff] }
 0x58b   :  { %8529 = vrot.lane.b32.xlu1 %v8503_v26, %s8809_s28  ;;  %6492 = vrot.lane.b32.xlu0 %v6451_v6, %s8815_s18  ;;  %v5763_v62 = vsel %vm5759_vm6, %v5746_v40, %v8192_v29 }
 0x58c   :  { %v5780_v3 = vsel %vm5776_vm8, %v5763_v62, %v8202_v12  ;;  %v8216_v12 = vunpack.i.l.bf16 %v15296_v30  ;;  %v8272_v62 = vunpack.i.h.bf16 %v15411_v14  ;;  %v8236_v14 = vunpack.i.l.bf16 %v15335_v15 }
 0x58d   :  { %v15465_v24 = vpop.permute.xlu1 %8279  ;;  %v15469_v26 = vpop.permute.xlu0 %8294  ;;  %v5797_v5 = vsel %vm5793_vm3, %v5780_v3, %v8212_v8  ;;  %v17953_v8 = vld [vmem:[#allocation99_spill] sm:$0xff] }
 0x58e   :  { %v5814_v46 = vsel %vm5810_vm7, %v5797_v5, %v8222_v47  ;;  %v8563_v47 = vpack.i.bf16 %v17953_v8, %v17927_v22  ;;  %v17958_v22 = vld [vmem:[#allocation76_spill] sm:$0xff] }
 0x58f   :  { %8539 = vrot.lane.b32.xlu1 %v8513_v37, %s8810_s14  ;;  %8549 = vrot.lane.b32.xlu0 %v8523_v17, %s8811_s6  ;;  %v6340_v17 = vsel %vm78_vm0, %v17925_v31, %v17946_v39  ;;  %v5831_v36 = vsel %vm16979_vm10, %v5814_v46, %v8232_v20  ;;  %v17954_v20 = vld [vmem:[#allocation156_spill] sm:$0xff]  ;;  %v8226_v39 = vunpack.i.l.bf16 %v15317_v43 }
 0x590   :  { %v6356_v63 = vsel %vm176_vm1, %v6340_v17, %v17948_v53  ;;  %v5848_v29 = vsel %vm16978_vm14, %v5831_v36, %v8242_v45  ;;  %v17955_v45 = vld [vmem:[#allocation60_spill] sm:$0xff]  ;;  %v17956_v17 = vld [vmem:[#allocation5_spill] sm:$0xff]  ;;  %v17960_v36 = vld [vmem:[#allocation31_spill] sm:$0xff] }
 0x591   :  { %v15477_v38 = vpop.permute.xlu1 %8289  ;;  %v15483_v37 = vpop.permute.xlu0 %8304  ;;  %v6372_v6 = vsel %vm274_vm2, %v6356_v63, %v17949_v32  ;;  %v5665_v41 = vsel %vm78_vm0, %v17955_v45, %v8206_v61  ;;  %v8246_v63 = vunpack.i.l.bf16 %v15391_v28  ;;  %v8256_v32 = vunpack.i.l.bf16 %v15407_v48  ;;  %v17963_v45 = vld [vmem:[#allocation91_spill] sm:$0xff] }
 0x592   :  { %v6388_v31 = vsel %vm17951_vm15, %v6372_v6, %v17950_v55  ;;  %vm17959_vm15 = vcmask 687104   ;;  %v5681_v46 = vsel %vm176_vm1, %v5665_v41, %v8216_v12  ;;  %v8578_v41 = vpack.i.bf16 %v17963_v45, %v17947_v35 }
 0x593   :  { %8544 = vrot.lane.b32.xlu1 %v8543_v21, %s8802_s29  ;;  %8559 = vrot.lane.b32.xlu0 %v8533_v13, %s8813_s0  ;;  %v6404_v40 = vsel %vm5725_vm13, %v6388_v31, %v17952_v2  ;;  %v5697_v31 = vsel %vm274_vm2, %v5681_v46, %v8226_v39 }
 0x594   :  { %v6420_v3 = vsel %vm5742_vm4, %v6404_v40, %v17954_v20  ;;  %v8276_v40 = vunpack.i.l.bf16 %v15445_v56 }
 0x595   :  { %v15493_v60 = vpop.permute.xlu1 %8299  ;;  %v15505_v13 = vpop.permute.xlu0 %8314  ;;  %v6436_v5 = vsel %vm5759_vm6, %v6420_v3, %v17956_v17  ;;  %v8286_v17 = vunpack.i.l.bf16 %v15455_v44 }
 0x596   :  { %v6452_v53 = vsel %vm5776_vm8, %v6436_v5, %v17958_v22 }
 0x597   :  { %8554 = vrot.lane.b32.xlu1 %v8553_v58, %s8803_s30  ;;  %8569 = vrot.lane.b32.xlu0 %v8543_v21, %s8814_s15  ;;  %v5865_v21 = vsel %vm17957_vm11, %v5848_v29, %v8252_v54  ;;  %v8573_v54 = vpack.i.bf16 %v17960_v36, %v17929_v7  ;;  %v8266_v29 = vunpack.i.l.bf16 %v15422_v51  ;;  %vm17961_vm11 = vcmask 195584   ;;  %v17962_v7 = vld [vmem:[#allocation40_spill] sm:$0xff] }
 0x598   :  { %v5882_v61 = vsel %vm17959_vm15, %v5865_v21, %v8262_v9  ;;  %v5713_v2 = vsel %vm17961_vm11, %v5697_v31, %v8236_v14  ;;  %v17964_v21 = vld [vmem:[#allocation58_spill] sm:$0xff]  ;;  %vm17970_vm15 = vcmask 637952   ;;  %vm17973_vm11 = vcmask 687104  }
 0x599   :  { %v15517_v34 = vpop.permute.xlu1 %8309  ;;  %v15530_v58 = vpop.permute.xlu0 %8319  ;;  %v5899_v55 = vsel %vm5895_vm5, %v5882_v61, %v8272_v62  ;;  %v5730_v62 = vsel %vm5725_vm13, %v5713_v2, %v8246_v63  ;;  %v8593_v22 = vpack.i.bf16 %v17964_v21, %v17945_v49  ;;  %v8207_v63 = vunpack.i.h.bf16 %v15285_v4 }
 0x59a   :  { %v5747_v20 = vsel %vm5742_vm4, %v5730_v62, %v8256_v32  ;;  %v8316_v61 = vunpack.i.l.bf16 %v15505_v13  ;;  %v17965_v32 = vld [vmem:[#allocation86_spill] sm:$0xff]  ;;  %v8217_v4 = vunpack.i.h.bf16 %v15296_v30 }
 0x59b   :  { %8564 = vrot.lane.b32.xlu1 %v8563_v47, %s8804_s4  ;;  %6494 = vrot.lane.b32.xlu0 %v6452_v53, %s8815_s18  ;;  %v8583_v47 = vpack.i.bf16 %v17962_v7, %v17936_v33  ;;  %v5764_v39 = vsel %vm5759_vm6, %v5747_v20, %v8266_v29  ;;  %v8296_v33 = vunpack.i.l.bf16 %v15469_v26  ;;  %v8306_v53 = vunpack.i.l.bf16 %v15483_v37  ;;  %v17968_v20 = vld [vmem:[#allocation54_spill] sm:$0xff] }
 0x59c   :  { %v5781_v5 = vsel %vm5776_vm8, %v5764_v39, %v8276_v40  ;;  %v17966_v40 = vld [vmem:[#allocation47_spill] sm:$0xff]  ;;  %v5666_v39 = vsel %vm78_vm0, %v17968_v20, %v8207_v63  ;;  %v17976_v20 = vld [vmem:[#allocation56_spill] sm:$0xff] }
 0x59d   :  { %v6481_v6 = vpop.permute.xlu1 %6480  ;;  %v15549_v12 = vpop.permute.xlu0 %8329 }
 0x59e   :  { %7756 = vmatprep.mubr.msk.f32.mxu0 %vm6563_vm9, %v6481_v6  ;;  %v6526_v9 = vsel %vm6522_vm12, %v5899_v55, %v6481_v6  ;;  %v8588_v6 = vpack.i.bf16 %v17965_v32, %v17953_v8  ;;  %v17967_v8 = vld [vmem:[#allocation152_spill] sm:$0xff] }
 0x59f   :  { %8574 = vrot.lane.b32.xlu1 %v8573_v54, %s8805_s5  ;;  %6679 = vmatmul.mubr.f32.gmra.mrb[6].mxu0 %v6526_v9  ;;  %v5798_v54 = vsel %vm5793_vm3, %v5781_v5, %v8286_v17  ;;  %v6341_v62 = vsel %vm78_vm0, %v17947_v35, %v17967_v8  ;;  %v8227_v17 = vunpack.i.h.bf16 %v15317_v43  ;;  %v8247_v43 = vunpack.i.h.bf16 %v15391_v28 }
 0x5a0   :  { %8584 = vrot.lane.b32.xlu0 %v8583_v47, %s8806_s19  ;;  %v5815_v31 = vsel %vm5810_vm7, %v5798_v54, %v8296_v33  ;;  %v15589_v47 = vpack.i.bf16 %v17966_v40, %v17960_v36  ;;  %v17969_v33 = vld [vmem:[#allocation153_spill] sm:$0xff]  ;;  %v8237_v36 = vunpack.i.h.bf16 %v15335_v15  ;;  %v17971_v54 = vld [vmem:[#allocation155_spill] sm:$0xff]  ;;  %v5682_v8 = vsel %vm176_vm1, %v5666_v39, %v8217_v4 }
 0x5a1   :  { %v15557_v3 = vpop.permute.xlu1 %8324  ;;  %v15565_v14 = vpop.permute.xlu0 %8339  ;;  %v5832_v2 = vsel %vm16979_vm10, %v5815_v31, %v8306_v53 }
 0x5a2   :  { %v8326_v55 = vunpack.i.l.bf16 %v15557_v3  ;;  %v5849_v5 = vsel %vm16978_vm14, %v5832_v2, %v8316_v61  ;;  %v17974_v2 = vld [vmem:[#allocation39_spill] sm:$0xff] }
 0x5a3   :  { %8579 = vrot.lane.b32.xlu1 %v8578_v41, %s8783_s16 }
 0x5a4   :  { %8594 = vrot.lane.b32.xlu0 %v8593_v22, %s8808_s1  ;;  %v6357_v22 = vsel %vm176_vm1, %v6341_v62, %v17969_v33  ;;  %v5866_v53 = vsel %vm17970_vm15, %v5849_v5, %v8326_v55  ;;  %vm17975_vm15 = vcmask 195584   ;;  %v8257_v62 = vunpack.i.h.bf16 %v15407_v48 }
 0x5a5   :  { %v15574_v46 = vpop.permute.xlu1 %8334  ;;  %v15582_v9 = vpop.permute.xlu0 %8349  ;;  %v6373_v63 = vsel %vm274_vm2, %v6357_v22, %v17971_v54  ;;  %v5698_v33 = vsel %vm274_vm2, %v5682_v8, %v8227_v17  ;;  %v8267_v22 = vunpack.i.h.bf16 %v15422_v51  ;;  %v8277_v48 = vunpack.i.h.bf16 %v15445_v56 }
 0x5a6   :  { %v8336_v29 = vunpack.i.l.bf16 %v15574_v46  ;;  %v6389_v55 = vsel %vm17975_vm15, %v6373_v63, %v17974_v2 }
 0x5a7   :  { %8589 = vrot.lane.b32.xlu1 %v8588_v6, %s8784_s17  ;;  %v6405_v5 = vsel %vm5725_vm13, %v6389_v55, %v17976_v20  ;;  %v8287_v55 = vunpack.i.h.bf16 %v15455_v44  ;;  %v8307_v44 = vunpack.i.h.bf16 %v15483_v37  ;;  %s8820_s17 = smov [#allocation2]  }
 0x5a8   :  { %8604 = vrot.lane.b32.xlu0 %v8578_v41, %s8809_s28  ;;  %v17972_v41 = vld [vmem:[#allocation59_spill] sm:$0xff]  ;;  %v5883_v15 = vsel %vm17973_vm11, %v5866_v53, %v8336_v29  ;;  %v17977_v53 = vld [vmem:[#allocation52_spill] sm:$0xff]  ;;  %vm17978_vm11 = vmmov %vm17975_vm15  ;;  %vm17988_vm15 = vcmask 637952  }
 0x5a9   :  { %v15599_v30 = vpop.permute.xlu1 %8344  ;;  %v15609_v31 = vpop.permute.xlu0 %8354  ;;  %v15615_v61 = vpack.i.bf16 %v17972_v41, %v17962_v7  ;;  %v6421_v54 = vsel %vm5742_vm4, %v6405_v5, %v17977_v53  ;;  %v5714_v4 = vsel %vm17978_vm11, %v5698_v33, %v8237_v36  ;;  %v8317_v53 = vunpack.i.h.bf16 %v15505_v13  ;;  %v17984_v13 = vld [vmem:[#allocation157_spill] sm:$0xff] }
 0x5aa   :  { %v8346_v35 = vunpack.i.l.bf16 %v15599_v30  ;;  %v8357_v7 = vunpack.i.h.bf16 %v15609_v31  ;;  %v5731_v51 = vsel %vm5725_vm13, %v5714_v4, %v8247_v43  ;;  %v8327_v4 = vunpack.i.h.bf16 %v15557_v3 }
 0x5ab   :  { %8599 = vrot.lane.b32.xlu1 %v15589_v47, %s8785_s22  ;;  %v5748_v56 = vsel %vm5742_vm4, %v5731_v51, %v8257_v62  ;;  %v8297_v62 = vunpack.i.h.bf16 %v15469_v26  ;;  %v8291_v26 = vunpack.i.l.bf16 %v15477_v38  ;;  %v8311_v3 = vunpack.i.l.bf16 %v15517_v34 }
 0x5ac   :  { %v5900_v28 = vsel %vm5895_vm5, %v5883_v15, %v8346_v35  ;;  %8614 = vrot.lane.b32.xlu0 %v8588_v6, %s8810_s14  ;;  %v17979_v35 = vld [vmem:[#allocation29_spill] sm:$0xff]  ;;  %v5765_v2 = vsel %vm5759_vm6, %v5748_v56, %v8267_v22  ;;  %v5670_v43 = vsel %vm78_vm0, %v15129_v59, %v8357_v7  ;;  %v6342_v56 = vsel %vm78_vm0, %v17963_v45, %v17984_v13 }
 0x5ad   :  { %v6483_v29 = vpop.permute.xlu1 %6482  ;;  %v6437_v17 = vsel %vm5759_vm6, %v6421_v54, %v17979_v35  ;;  %v15638_v63 = vpop.permute.xlu0 %8364  ;;  %v17980_v6 = vld [vmem:[#allocation125_spill] sm:$0xff]  ;;  %v5782_v5 = vsel %vm5776_vm8, %v5765_v2, %v8277_v48  ;;  %v8337_v35 = vunpack.i.h.bf16 %v15574_v46  ;;  %v8347_v2 = vunpack.i.h.bf16 %v15599_v30 }
 0x5ae   :  { %7757 = vmatprep.mubr.msk.f32.mxu0 %vm6563_vm9, %v6483_v29  ;;  %v6527_v39 = vsel %vm6522_vm12, %v5900_v28, %v6483_v29  ;;  %v15644_v15 = vpack.i.bf16 %v17980_v6, %v17964_v21  ;;  %v8367_v36 = vunpack.i.h.bf16 %v15638_v63  ;;  %v17981_v28 = vld [vmem:[#allocation80_spill] sm:$0xff]  ;;  %v17982_v59 = vld [vmem:[#allocation129_spill] sm:$0xff]  ;;  %v8281_v29 = vunpack.i.l.bf16 %v15465_v24 }
 0x5af   :  { %8609 = vrot.lane.b32.xlu1 %v15615_v61, %s8786_s25  ;;  %6684 = vmatmul.mubr.f32.gmra.mrb[8].mxu0 %v6527_v39  ;;  %v6453_v20 = vsel %vm5776_vm8, %v6437_v17, %v17981_v28  ;;  %v8628_v7 = vpack.i.bf16 %v17982_v59, %v17963_v45  ;;  %v5799_v54 = vsel %vm5793_vm3, %v5782_v5, %v8287_v55  ;;  %v8301_v39 = vunpack.i.l.bf16 %v15493_v60  ;;  %v17983_v17 = vld [vmem:[#allocation127_spill] sm:$0xff]  ;;  %v17986_v28 = vld [vmem:[#allocation85_spill] sm:$0xff] }
 0x5b0   :  { %8619 = vrot.lane.b32.xlu0 %v15644_v15, %s8802_s29  ;;  %v15661_v33 = vsel %vm176_vm1, %v5670_v43, %v8367_v36  ;;  %v5816_v48 = vsel %vm5810_vm7, %v5799_v54, %v8297_v62  ;;  %v8638_v51 = vpack.i.bf16 %v17983_v17, %v17965_v32  ;;  %v17985_v43 = vld [vmem:[#allocation158_spill] sm:$0xff]  ;;  %v5667_v32 = vsel %vm78_vm0, %v17986_v28, %v8281_v29  ;;  %v17987_v45 = vld [vmem:[#allocation53_spill] sm:$0xff] }
 0x5b1   :  { %v15654_v8 = vpop.permute.xlu1 %8359  ;;  %v15664_v22 = vpop.permute.xlu0 %8374  ;;  %v5833_v36 = vsel %vm16979_vm10, %v5816_v48, %v8307_v44  ;;  %v6358_v46 = vsel %vm176_vm1, %v6342_v56, %v17985_v43  ;;  %v5683_v62 = vsel %vm176_vm1, %v5667_v32, %v8291_v26  ;;  %v17990_v54 = vld [vmem:[#allocation30_spill] sm:$0xff]  ;;  %v17992_v56 = vld [vmem:[#allocation36_spill] sm:$0xff]  ;;  %v8341_v43 = vunpack.i.l.bf16 %v15565_v14  ;;  %v17996_v32 = vld [vmem:[#allocation93_spill] sm:$0xff] }
 0x5b2   :  { %v6374_v5 = vsel %vm274_vm2, %v6358_v46, %v17987_v45  ;;  %v5699_v29 = vsel %vm274_vm2, %v5683_v62, %v8301_v39  ;;  %v17997_v62 = vld [vmem:[#allocation23_spill] sm:$0xff] }
 0x5b3   :  { %6496 = vrot.lane.b32.xlu1 %v6453_v20, %s8815_s18  ;;  %v5850_v20 = vsel %vm16978_vm14, %v5833_v36, %v8317_v53  ;;  %v6390_v48 = vsel %vm17978_vm11, %v6374_v5, %v17990_v54  ;;  %v8321_v53 = vunpack.i.l.bf16 %v15530_v58  ;;  %vm17991_vm14 = vcmask 687104  }
 0x5b4   :  { %8629 = vrot.lane.b32.xlu0 %v8628_v7, %s8803_s30  ;;  %v5867_v30 = vsel %vm17988_vm15, %v5850_v20, %v8327_v4  ;;  %v6406_v26 = vsel %vm5725_vm13, %v6390_v48, %v17992_v56  ;;  %vm17993_vm15 = vmmov %vm17978_vm11  ;;  %v8361_v5 = vunpack.i.l.bf16 %v15654_v8 }
 0x5b5   :  { %v15675_v37 = vpop.permute.xlu1 %8369  ;;  %v15688_v55 = vpop.permute.xlu0 %8384  ;;  %v5884_v13 = vsel %vm17991_vm14, %v5867_v30, %v8337_v35  ;;  %v5715_v4 = vsel %vm17993_vm15, %v5699_v29, %v8311_v3  ;;  %v17994_v35 = vld [vmem:[#allocation75_spill] sm:$0xff]  ;;  %v8351_v3 = vunpack.i.l.bf16 %v15582_v9  ;;  %v17998_v29 = vld [vmem:[#allocation134_spill] sm:$0xff]  ;;  %vm18002_vm14 = vmmov %vm17978_vm11  ;;  %vm18005_vm11 = vcmask 588800  }
 0x5b6   :  { %v6343_v46 = vsel %vm78_vm0, %v17982_v59, %v17994_v35  ;;  %v5732_v45 = vsel %vm5725_vm13, %v5715_v4, %v8321_v53  ;;  %v18001_v35 = vld [vmem:[#allocation41_spill] sm:$0xff]  ;;  %vm18011_vm15 = vcmask 637952  }
 0x5b7   :  { %8624 = vrot.lane.b32.xlu1 %v15589_v47, %s8811_s6  ;;  %v17989_v47 = vld [vmem:[#allocation132_spill] sm:$0xff]  ;;  %v6359_v20 = vsel %vm176_vm1, %v6343_v46, %v17996_v32  ;;  %v18004_v32 = vld [vmem:[#allocation113_spill] sm:$0xff] }
 0x5b8   :  { %8639 = vrot.lane.b32.xlu0 %v8638_v51, %s8804_s4  ;;  %v8648_v7 = vpack.i.bf16 %v17989_v47, %v17966_v40  ;;  %v8331_v51 = vunpack.i.l.bf16 %v15549_v12  ;;  %v5901_v40 = vsel %vm5895_vm5, %v5884_v13, %v8347_v2  ;;  %v8653_v13 = vpack.i.bf16 %v17998_v29, %v17972_v41  ;;  %v18003_v46 = vld [vmem:[#allocation20_spill] sm:$0xff] }
 0x5b9   :  { %v15702_v44 = vpop.permute.xlu1 %8379  ;;  %v6485_v36 = vpop.permute.xlu0 %6484 }
 0x5ba   :  { %7758 = vmatprep.mubr.msk.f32.mxu0 %vm6563_vm9, %v6485_v36  ;;  %v6528_v39 = vsel %vm6522_vm12, %v5901_v40, %v6485_v36  ;;  %v5749_v54 = vsel %vm5742_vm4, %v5732_v45, %v8331_v51  ;;  %v8381_v53 = vunpack.i.l.bf16 %v15702_v44 }
 0x5bb   :  { %8634 = vrot.lane.b32.xlu1 %v15615_v61, %s8813_s0  ;;  %6689 = vmatmul.mubr.f32.gmra.mrb[10].mxu0 %v6528_v39  ;;  %v17995_v61 = vld [vmem:[#allocation87_spill] sm:$0xff]  ;;  %v5766_v56 = vsel %vm5759_vm6, %v5749_v54, %v8341_v43  ;;  %v18000_v39 = vld [vmem:[#allocation45_spill] sm:$0xff] }
 0x5bc   :  { %8649 = vrot.lane.b32.xlu0 %v8648_v7, %s8805_s5  ;;  %v6422_v2 = vsel %vm5742_vm4, %v6406_v26, %v17995_v61  ;;  %v8371_v7 = vunpack.i.l.bf16 %v15675_v37  ;;  %v17999_v26 = vld [vmem:[#allocation82_spill] sm:$0xff]  ;;  %v5783_v36 = vsel %vm5776_vm8, %v5766_v56, %v8351_v3  ;;  %v18007_v56 = vld [vmem:[#allocation88_spill] sm:$0xff] }
 0x5bd   :  { %v15726_v28 = vpop.permute.xlu1 %8389  ;;  %v6438_v30 = vsel %vm5759_vm6, %v6422_v2, %v17997_v62  ;;  %v15738_v48 = vpop.permute.xlu0 %8399  ;;  %v6375_v4 = vsel %vm274_vm2, %v6359_v20, %v17999_v26  ;;  %v5800_v43 = vsel %vm5793_vm3, %v5783_v36, %v8361_v5  ;;  %v8663_v20 = vpack.i.bf16 %v18004_v32, %v17982_v59 }
 0x5be   :  { %v8391_v51 = vunpack.i.l.bf16 %v15726_v28  ;;  %v6391_v41 = vsel %vm18002_vm14, %v6375_v4, %v18001_v35  ;;  %v5817_v2 = vsel %vm5810_vm7, %v5800_v43, %v8371_v7  ;;  %v8401_v62 = vunpack.i.l.bf16 %v15738_v48  ;;  %v18006_v7 = vld [vmem:[#allocation140_spill] sm:$0xff]  ;;  %v18008_v4 = vld [vmem:[#allocation51_spill] sm:$0xff] }
 0x5bf   :  { %8644 = vrot.lane.b32.xlu1 %v15644_v15, %s8814_s15  ;;  %v6454_v15 = vsel %vm5776_vm8, %v6438_v30, %v18000_v39  ;;  %v6407_v61 = vsel %vm5725_vm13, %v6391_v41, %v18003_v46  ;;  %v5834_v45 = vsel %vm16979_vm10, %v5817_v2, %v8381_v53  ;;  %v6344_v59 = vsel %vm78_vm0, %v18004_v32, %v18008_v4  ;;  %v18009_v53 = vld [vmem:[#allocation96_spill] sm:$0xff]  ;;  %v18010_v39 = vld [vmem:[#allocation83_spill] sm:$0xff]  ;;  %v18012_v46 = vld [vmem:[#allocation142_spill] sm:$0xff] }
 0x5c0   :  { %8654 = vrot.lane.b32.xlu0 %v8653_v13, %s8806_s19  ;;  %v5851_v30 = vsel %vm18005_vm11, %v5834_v45, %v8391_v51  ;;  %v8658_v13 = vpack.i.bf16 %v18006_v7, %v17980_v6  ;;  %v6423_v26 = vsel %vm5742_vm4, %v6407_v61, %v18007_v56  ;;  %v8668_v61 = vpack.i.bf16 %v18012_v46, %v17983_v17  ;;  %v18017_v4 = vld [vmem:[#allocation17_spill] sm:$0xff] }
 0x5c1   :  { %v15751_v40 = vpop.permute.xlu1 %8394  ;;  %v15761_v3 = vpop.permute.xlu0 %8409  ;;  %v6439_v36 = vsel %vm5759_vm6, %v6423_v26, %v18009_v53  ;;  %v5868_v35 = vsel %vm18011_vm15, %v5851_v30, %v8401_v62  ;;  %vm18013_vm14 = vcmask 687104   ;;  %v18015_v62 = vld [vmem:[#allocation19_spill] sm:$0xff]  ;;  %vm18016_vm11 = vcmask 195584  }
 0x5c2   :  { %v8411_v5 = vunpack.i.l.bf16 %v15761_v3  ;;  %v6455_v6 = vsel %vm5776_vm8, %v6439_v36, %v15008_v52  ;;  %v8282_v52 = vunpack.i.h.bf16 %v15465_v24  ;;  %v8292_v56 = vunpack.i.h.bf16 %v15477_v38  ;;  %vm18019_vm15 = vmmov %vm18016_vm11 }
 0x5c3   :  { %6498 = vrot.lane.b32.xlu1 %v6454_v15, %s8815_s18  ;;  %v6360_v15 = vsel %vm176_vm1, %v6344_v59, %v18010_v39  ;;  %v8302_v26 = vunpack.i.h.bf16 %v15493_v60  ;;  %v8673_v59 = vpack.i.bf16 %v18017_v4, %v17989_v47  ;;  %v8312_v53 = vunpack.i.h.bf16 %v15517_v34 }
 0x5c4   :  { %8664 = vrot.lane.b32.xlu0 %v8663_v20, %s8809_s28  ;;  %v5885_v2 = vsel %vm18013_vm14, %v5868_v35, %v8411_v5  ;;  %v18014_v20 = vld [vmem:[#allocation12_spill] sm:$0xff]  ;;  %v18020_v35 = vld [vmem:[#allocation10_spill] sm:$0xff]  ;;  %vm18025_vm14 = vmmov %vm18016_vm11 }
 0x5c5   :  { %v15771_v54 = vpop.permute.xlu1 %8404  ;;  %v15782_v51 = vpop.permute.xlu0 %8419  ;;  %v6376_v45 = vsel %vm274_vm2, %v6360_v15, %v18014_v20  ;;  %v8352_v20 = vunpack.i.h.bf16 %v15582_v9 }
 0x5c6   :  { %v8421_v41 = vunpack.i.l.bf16 %v15782_v51  ;;  %v6392_v30 = vsel %vm18016_vm11, %v6376_v45, %v18015_v62  ;;  %v18023_v45 = vld [vmem:[#allocation71_spill] sm:$0xff]  ;;  %vm18027_vm11 = vcmask 588800  }
 0x5c7   :  { %8659 = vrot.lane.b32.xlu1 %v8658_v13, %s8808_s1  ;;  %v6408_v5 = vsel %vm5725_vm13, %v6392_v30, %v15050_v19  ;;  %v18018_v19 = vld [vmem:[#allocation104_spill] sm:$0xff] }
 0x5c8   :  { %6500 = vrot.lane.b32.xlu0 %v6455_v6, %s8815_s18  ;;  %v5902_v32 = vsel %vm5895_vm5, %v5885_v2, %v8421_v41  ;;  %v6424_v38 = vsel %vm5742_vm4, %v6408_v5, %v15090_v16  ;;  %v5668_v60 = vsel %vm78_vm0, %v18018_v19, %v8282_v52  ;;  %v8322_v16 = vunpack.i.h.bf16 %v15530_v58  ;;  %v18021_v41 = vld [vmem:[#allocation46_spill] sm:$0xff] }
 0x5c9   :  { %v15792_v43 = vpop.permute.xlu1 %8414  ;;  %v6487_v13 = vpop.permute.xlu0 %6486  ;;  %v6440_v36 = vsel %vm5759_vm6, %v6424_v38, %v15138_v0  ;;  %v5684_v47 = vsel %vm176_vm1, %v5668_v60, %v8292_v56  ;;  %v8332_v6 = vunpack.i.h.bf16 %v15549_v12  ;;  %v6345_v46 = vsel %vm78_vm0, %v18021_v41, %v18020_v35  ;;  %v18022_v58 = vld [vmem:[#allocation98_spill] sm:$0xff] }
 0x5ca   :  { %7759 = vmatprep.mubr.msk.f32.mxu0 %vm6563_vm9, %v6487_v13  ;;  %v6529_v17 = vsel %vm6522_vm12, %v5902_v32, %v6487_v13  ;;  %v5700_v15 = vsel %vm274_vm2, %v5684_v47, %v8302_v26  ;;  %v6361_v32 = vsel %vm176_vm1, %v6345_v46, %v18022_v58  ;;  %v8362_v13 = vunpack.i.h.bf16 %v15654_v8 }
 0x5cb   :  { %8669 = vrot.lane.b32.xlu1 %v8668_v61, %s8810_s14  ;;  %6694 = vmatmul.mubr.f32.gmra.mrb[12].mxu0 %v6529_v17  ;;  %v5716_v0 = vsel %vm18019_vm15, %v5700_v15, %v8312_v53  ;;  %v6377_v12 = vsel %vm274_vm2, %v6361_v32, %v18023_v45  ;;  %v8372_v56 = vunpack.i.h.bf16 %v15675_v37  ;;  %v8382_v8 = vunpack.i.h.bf16 %v15702_v44 }
 0x5cc   :  { %5591 = vrot.lane.b32.xlu0 %v17998_v29, %s8813_s0  ;;  %v6456_v29 = vsel %vm5776_vm8, %v6440_v36, %v15191_v18  ;;  %v8342_v18 = vunpack.i.h.bf16 %v15565_v14  ;;  %v5733_v52 = vsel %vm5725_vm13, %v5716_v0, %v8322_v16  ;;  %v18024_v14 = vld [vmem:[#allocation148_spill] sm:$0xff]  ;;  %v8392_v38 = vunpack.i.h.bf16 %v15726_v28  ;;  %v18028_v0 = vld [vmem:[#allocation109_spill] sm:$0xff] }
 0x5cd   :  { %v15812_v24 = vpop.permute.xlu1 %8424  ;;  %v15823_v39 = vpop.permute.xlu0 %8434  ;;  %v5750_v30 = vsel %vm5742_vm4, %v5733_v52, %v8332_v6  ;;  %v8402_v60 = vunpack.i.h.bf16 %v15738_v48  ;;  %v8412_v47 = vunpack.i.h.bf16 %v15761_v3  ;;  %v8366_v15 = vunpack.i.l.bf16 %v15638_v63  ;;  %v18029_v6 = vld [vmem:[#allocation117_spill] sm:$0xff] }
 0x5ce   :  { %v5767_v5 = vsel %vm5759_vm6, %v5750_v30, %v8342_v18  ;;  %v4831_v35 = vcombine.low %v18029_v6, %v18028_v0  ;;  %v8376_v48 = vunpack.i.l.bf16 %v15664_v22  ;;  %v8386_v41 = vunpack.i.l.bf16 %v15688_v55 }
 0x5cf   :  { %8674 = vrot.lane.b32.xlu1 %v8673_v59, %s8811_s6  ;;  %v5784_v59 = vsel %vm5776_vm8, %v5767_v5, %v8352_v20  ;;  %vm18030_vm15 = vcmask 637952   ;;  %v8396_v3 = vunpack.i.l.bf16 %v15751_v40  ;;  %v8416_v45 = vunpack.i.l.bf16 %v15792_v43  ;;  %s8818_s6 = smov 112  }
 0x5d0   :  { %6502 = vrot.lane.b32.xlu0 %v6456_v29, %s8815_s18  ;;  %v8356_v29 = vunpack.i.l.bf16 %v15609_v31  ;;  %v8397_v0 = vunpack.i.h.bf16 %v15751_v40 }
 0x5d1   :  { %v15832_v34 = vpop.permute.xlu1 %8429  ;;  %v15841_v2 = vpop.permute.xlu0 %8444 }
 0x5d2   :  { %v8432_v61 = vunpack.i.h.bf16 %v15832_v34  ;;  %v5669_v18 = vsel %vm78_vm0, %v4831_v35, %v8356_v29 }
 0x5d3   :  { %5641 = vrot.lane.b32.xlu1 %v18006_v7, %s8814_s15  ;;  %v6393_v7 = vsel %vm18025_vm14, %v6377_v12, %v15149_v23  ;;  %v18026_v23 = vld [vmem:[#allocation146_spill] sm:$0xff]  ;;  %vm18031_vm14 = vcmask 687104  }
 0x5d4   :  { %5643 = vrot.lane.b32.xlu0 %v18024_v14, %s8814_s15  ;;  %v6409_v17 = vsel %vm5725_vm13, %v6393_v7, %v15201_v42  ;;  %v5672_v26 = vsel %vm78_vm0, %v15231_v25, %v8432_v61  ;;  %v5801_v25 = vsel %vm5793_vm3, %v5784_v59, %v8362_v13  ;;  %v8406_v61 = vunpack.i.l.bf16 %v15771_v54 }
 0x5d5   :  { %v15854_v62 = vpop.permute.xlu1 %8439  ;;  %v15867_v4 = vpop.permute.xlu0 %8454  ;;  %v6425_v37 = vsel %vm5742_vm4, %v6409_v17, %v15255_v1  ;;  %v5818_v19 = vsel %vm5810_vm7, %v5801_v25, %v8372_v56  ;;  %v8426_v13 = vunpack.i.l.bf16 %v15812_v24  ;;  %v8436_v17 = vunpack.i.l.bf16 %v15823_v39 }
 0x5d6   :  { %v8442_v9 = vunpack.i.h.bf16 %v15854_v62  ;;  %v6441_v44 = vsel %vm5759_vm6, %v6425_v37, %v15266_v57  ;;  %v5835_v1 = vsel %vm16979_vm10, %v5818_v19, %v8382_v8  ;;  %v8446_v8 = vunpack.i.l.bf16 %v15841_v2 }
 0x5d7   :  { %5593 = vrot.lane.b32.xlu1 %v18026_v23, %s8813_s0  ;;  %v6457_v36 = vsel %vm5776_vm8, %v6441_v44, %v15309_v10  ;;  %v5852_v57 = vsel %vm18027_vm11, %v5835_v1, %v8392_v38  ;;  %v8422_v10 = vunpack.i.h.bf16 %v15782_v51  ;;  %v5685_v51 = vsel %vm176_vm1, %v5669_v18, %v8366_v15 }
 0x5d8   :  { %v15876_v42 = vsel %vm176_vm1, %v5672_v26, %v8442_v9  ;;  %v5869_v46 = vsel %vm18030_vm15, %v5852_v57, %v8402_v60  ;;  %v5701_v20 = vsel %vm274_vm2, %v5685_v51, %v8376_v48  ;;  %vm18032_vm11 = vcmask 195584  }
 0x5d9   :  { %v15881_v53 = vpop.permute.xlu1 %8449  ;;  %v15888_v28 = vpop.permute.xlu0 %8464  ;;  %v5886_v63 = vsel %vm18031_vm14, %v5869_v46, %v8412_v47  ;;  %v5717_v52 = vsel %vm18032_vm11, %v5701_v20, %v8386_v41  ;;  %v8456_v23 = vunpack.i.l.bf16 %v15867_v4  ;;  %v8377_v60 = vunpack.i.h.bf16 %v15664_v22 }
 0x5da   :  { %v5903_v32 = vsel %vm5895_vm5, %v5886_v63, %v8422_v10  ;;  %v5734_v7 = vsel %vm5725_vm13, %v5717_v52, %v8396_v3  ;;  %v8466_v37 = vunpack.i.l.bf16 %v15888_v28  ;;  %vm18033_vm15 = vcmask 588800  }
 0x5db   :  { %6504 = vrot.lane.b32.xlu1 %v6457_v36, %s8815_s18  ;;  %v5751_v30 = vsel %vm5742_vm4, %v5734_v7, %v8406_v61  ;;  %v8387_v47 = vunpack.i.h.bf16 %v15688_v55  ;;  %vm18034_vm14 = vcmask 637952   ;;  %vm18035_vm11 = vcmask 687104  }
 0x5dc   :  { %v5768_v9 = vsel %vm5759_vm6, %v5751_v30, %v8416_v45  ;;  %v8407_v48 = vunpack.i.h.bf16 %v15771_v54  ;;  %v5702_v22 = vsel %vm274_vm2, %v15661_v33, %v8377_v60  ;;  %v8417_v46 = vunpack.i.h.bf16 %v15792_v43 }
 0x5dd   :  { %v15896_v16 = vpop.permute.xlu1 %8459  ;;  %v15903_v31 = vpop.permute.xlu0 %8469  ;;  %v5785_v5 = vsel %vm5776_vm8, %v5768_v9, %v8426_v13  ;;  %v8427_v3 = vunpack.i.h.bf16 %v15812_v24  ;;  %v8437_v43 = vunpack.i.h.bf16 %v15823_v39  ;;  %v8447_v24 = vunpack.i.h.bf16 %v15841_v2 }
 0x5de   :  { %v5802_v38 = vsel %vm5793_vm3, %v5785_v5, %v8436_v17  ;;  %v8431_v45 = vunpack.i.l.bf16 %v15832_v34  ;;  %v8441_v13 = vunpack.i.l.bf16 %v15854_v62  ;;  %v8451_v9 = vunpack.i.l.bf16 %v15881_v53 }
 0x5df   :  { %v5819_v25 = vsel %vm5810_vm7, %v5802_v38, %v8446_v8  ;;  %v8461_v17 = vunpack.i.l.bf16 %v15896_v16 }
 0x5e0   :  { %v5836_v1 = vsel %vm16979_vm10, %v5819_v25, %v8456_v23 }
 0x5e1   :  { %v6489_v58 = vpop.permute.xlu1 %6488  ;;  %v15917_v14 = vpop.permute.xlu0 %8479  ;;  %v5853_v29 = vsel %vm18033_vm15, %v5836_v1, %v8466_v37  ;;  %vm18036_vm15 = vcmask 195584  }
 0x5e2   :  { %7760 = vmatprep.mubr.msk.f32.mxu0 %vm6563_vm9, %v6489_v58  ;;  %v6530_v12 = vsel %vm6522_vm12, %v5903_v32, %v6489_v58  ;;  %v5718_v55 = vsel %vm18036_vm15, %v5702_v22, %v8387_v47  ;;  %v8457_v32 = vunpack.i.h.bf16 %v15867_v4  ;;  %vm18039_vm15 = vcmask 687104  }
 0x5e3   :  { %6699 = vmatmul.mubr.f32.gmra.mrb[14].mxu0 %v6530_v12  ;;  %v5735_v63 = vsel %vm5725_vm13, %v5718_v55, %v8397_v0  ;;  %v8467_v12 = vunpack.i.h.bf16 %v15888_v28  ;;  %v5671_v28 = vsel %vm78_vm0, %v15108_v11, %v8431_v45  ;;  %v8481_v25 = vunpack.i.l.bf16 %v15917_v14 }
 0x5e4   :  { %v5752_v54 = vsel %vm5742_vm4, %v5735_v63, %v8407_v48 }
 0x5e5   :  { %v8475_v56 = vpop.permute.xlu1 %8474  ;;  %v15925_v26 = vpop.permute.xlu0 %8489  ;;  %v5769_v33 = vsel %vm5759_vm6, %v5752_v54, %v8417_v46 }
 0x5e6   :  { %v8476_v44 = vunpack.i.l.bf16 %v8475_v56  ;;  %v5786_v58 = vsel %vm5776_vm8, %v5769_v33, %v8427_v3  ;;  %v8477_v7 = vunpack.i.h.bf16 %v8475_v56  ;;  %v5687_v56 = vsel %vm176_vm1, %v5671_v28, %v8441_v13 }
 0x5e7   :  { %v5803_v52 = vsel %vm5793_vm3, %v5786_v58, %v8437_v43  ;;  %v5703_v37 = vsel %vm274_vm2, %v5687_v56, %v8451_v9  ;;  %v8491_v1 = vunpack.i.l.bf16 %v15925_v26  ;;  %v8452_v9 = vunpack.i.h.bf16 %v15881_v53 }
 0x5e8   :  { %v5870_v15 = vsel %vm18034_vm14, %v5853_v29, %v8476_v44  ;;  %v5820_v30 = vsel %vm5810_vm7, %v5803_v52, %v8447_v24  ;;  %vm18037_vm14 = vcmask 588800   ;;  %v8472_v28 = vunpack.i.h.bf16 %v15903_v31 }
 0x5e9   :  { %v8485_v59 = vpop.permute.xlu1 %8484  ;;  %v15931_v19 = vpop.permute.xlu0 %8499  ;;  %v5837_v4 = vsel %vm16979_vm10, %v5820_v30, %v8457_v32  ;;  %vm18040_vm10 = vcmask 195584   ;;  %v8492_v53 = vunpack.i.h.bf16 %v15925_v26 }
 0x5ea   :  { %v8486_v36 = vunpack.i.l.bf16 %v8485_v59  ;;  %v8487_v2 = vunpack.i.h.bf16 %v8485_v59  ;;  %v5854_v62 = vsel %vm18037_vm14, %v5837_v4, %v8467_v12  ;;  %v8471_v59 = vunpack.i.l.bf16 %v15903_v31 }
 0x5eb   :  { %v5719_v44 = vsel %vm18040_vm10, %v5703_v37, %v8461_v17  ;;  %v8501_v29 = vunpack.i.l.bf16 %v15931_v19  ;;  %vm18041_vm10 = vcmask 539648   ;;  %v8462_v4 = vunpack.i.h.bf16 %v15896_v16 }
 0x5ec   :  { %v5887_v35 = vsel %vm18035_vm11, %v5870_v15, %v8486_v36  ;;  %vm18038_vm11 = vcmask 637952   ;;  %v5736_v47 = vsel %vm5725_vm13, %v5719_v44, %v8471_v59  ;;  %v8502_v59 = vunpack.i.h.bf16 %v15931_v19 }
 0x5ed   :  { %v8495_v57 = vpop.permute.xlu1 %8494  ;;  %v15939_v6 = vpop.permute.xlu0 %8504  ;;  %v5871_v8 = vsel %vm18038_vm11, %v5854_v62, %v8477_v7 }
 0x5ee   :  { %v8496_v10 = vunpack.i.l.bf16 %v8495_v57  ;;  %v8497_v5 = vunpack.i.h.bf16 %v8495_v57  ;;  %v5888_v38 = vsel %vm18039_vm15, %v5871_v8, %v8487_v2  ;;  %v8482_v8 = vunpack.i.h.bf16 %v15917_v14 }
 0x5f0   :  { %v5904_v41 = vsel %vm5895_vm5, %v5887_v35, %v8496_v10  ;;  %v5905_v11 = vsel %vm5895_vm5, %v5888_v38, %v8497_v5  ;;  %v5753_v10 = vsel %vm5742_vm4, %v5736_v47, %v8481_v25  ;;  %v5704_v5 = vsel %vm274_vm2, %v15876_v42, %v8452_v9 }
 0x5f1   :  { %v6491_v18 = vpop.permute.xlu1 %6490  ;;  %v15952_v51 = vpop.permute.xlu0 %8514  ;;  %v5770_v48 = vsel %vm5759_vm6, %v5753_v10, %v8491_v1 }
 0x5f2   :  { %7761 = vmatprep.mubr.msk.f32.mxu0 %vm6563_vm9, %v6491_v18  ;;  %v6531_v40 = vsel %vm6522_vm12, %v5904_v41, %v6491_v18  ;;  %v5787_v22 = vsel %vm5776_vm8, %v5770_v48, %v8501_v29  ;;  %v8516_v10 = vunpack.i.l.bf16 %v15952_v51 }
 0x5f3   :  { %6704 = vmatmul.mubr.f32.gmra.mrb[16].mxu0 %v6531_v40 }
 0x5f5   :  { %v15957_v61 = vpop.permute.xlu1 %8509  ;;  %v15962_v20 = vpop.permute.xlu0 %8524 }
 0x5f6   :  { %v8511_v15 = vunpack.i.l.bf16 %v15957_v61  ;;  %v8512_v38 = vunpack.i.h.bf16 %v15957_v61  ;;  %v8526_v48 = vunpack.i.l.bf16 %v15962_v20 }
 0x5f8   :  { %v5804_v55 = vsel %vm5793_vm3, %v5787_v22, %v8511_v15 }
 0x5f9   :  { %v15968_v39 = vpop.permute.xlu1 %8519  ;;  %v15974_v34 = vpop.permute.xlu0 %8534 }
 0x5fa   :  { %v8521_v0 = vunpack.i.l.bf16 %v15968_v39  ;;  %v8522_v31 = vunpack.i.h.bf16 %v15968_v39  ;;  %v8506_v39 = vunpack.i.l.bf16 %v15939_v6 }
 0x5fc   :  { %v5821_v3 = vsel %vm5810_vm7, %v5804_v55, %v8521_v0  ;;  %v5673_v55 = vsel %vm78_vm0, %v17913_v50, %v8506_v39 }
 0x5fd   :  { %v15981_v23 = vpop.permute.xlu1 %8529  ;;  %v6493_v36 = vpop.permute.xlu0 %6492 }
 0x5fe   :  { %7762 = vmatprep.mubr.msk.f32.mxu0 %vm6563_vm9, %v6493_v36  ;;  %v6532_v60 = vsel %vm6522_vm12, %v5905_v11, %v6493_v36  ;;  %v8531_v41 = vunpack.i.l.bf16 %v15981_v23  ;;  %v8532_v14 = vunpack.i.h.bf16 %v15981_v23 }
 0x5ff   :  { %6709 = vmatmul.mubr.f32.gmra.mrb[18].mxu0 %v6532_v60 }
 0x600   :  { %v5838_v63 = vsel %vm18041_vm10, %v5821_v3, %v8531_v41  ;;  %vm18042_vm10 = vcmask 195584   ;;  %v8536_v41 = vunpack.i.l.bf16 %v15974_v34 }
 0x601   :  { %v8540_v57 = vpop.permute.xlu1 %8539  ;;  %v8550_v35 = vpop.permute.xlu0 %8549  ;;  %v5720_v56 = vsel %vm18042_vm10, %v5704_v5, %v8462_v4  ;;  %vm18046_vm10 = vcmask 687104  }
 0x602   :  { %v8541_v46 = vunpack.i.l.bf16 %v8540_v57  ;;  %v8551_v54 = vunpack.i.l.bf16 %v8550_v35  ;;  %v5737_v16 = vsel %vm5725_vm13, %v5720_v56, %v8472_v28  ;;  %v8542_v11 = vunpack.i.h.bf16 %v8540_v57 }
 0x603   :  { %v5754_v42 = vsel %vm5742_vm4, %v5737_v16, %v8482_v8  ;;  %v8552_v29 = vunpack.i.h.bf16 %v8550_v35  ;;  %v8507_v35 = vunpack.i.h.bf16 %v15939_v6 }
 0x604   :  { %v5855_v33 = vsel %vm18037_vm14, %v5838_v63, %v8541_v46  ;;  %v5771_v25 = vsel %vm5759_vm6, %v5754_v42, %v8492_v53  ;;  %vm18043_vm14 = vcmask 539648   ;;  %v8517_v63 = vunpack.i.h.bf16 %v15952_v51 }
 0x605   :  { %v16000_v18 = vpop.permute.xlu1 %8544  ;;  %v8560_v40 = vpop.permute.xlu0 %8559  ;;  %v5872_v32 = vsel %vm18038_vm11, %v5855_v33, %v8551_v54  ;;  %v5788_v26 = vsel %vm5776_vm8, %v5771_v25, %v8502_v59  ;;  %vm18044_vm11 = vcmask 588800   ;;  %v5689_v54 = vsel %vm176_vm1, %v5673_v55, %v8516_v10 }
 0x606   :  { %v8561_v43 = vunpack.i.l.bf16 %v8560_v40  ;;  %v5805_v19 = vsel %vm5793_vm3, %v5788_v26, %v8512_v38  ;;  %v8562_v15 = vunpack.i.h.bf16 %v8560_v40  ;;  %v8546_v3 = vunpack.i.l.bf16 %v16000_v18 }
 0x607   :  { %v5822_v61 = vsel %vm5810_vm7, %v5805_v19, %v8522_v31  ;;  %v5705_v6 = vsel %vm274_vm2, %v5689_v54, %v8526_v48 }
 0x608   :  { %v5889_v52 = vsel %vm18039_vm15, %v5872_v32, %v8561_v43  ;;  %v5839_v60 = vsel %vm18043_vm14, %v5822_v61, %v8532_v14  ;;  %vm18045_vm15 = vcmask 637952   ;;  %v8527_v32 = vunpack.i.h.bf16 %v15962_v20 }
 0x609   :  { %v16006_v58 = vpop.permute.xlu1 %8554  ;;  %v8570_v24 = vpop.permute.xlu0 %8569  ;;  %v5856_v23 = vsel %vm18044_vm11, %v5839_v60, %v8542_v11  ;;  %vm18047_vm14 = vcmask 195584   ;;  %v5674_v20 = vsel %vm78_vm0, %v17932_v27, %v8507_v35 }
 0x60a   :  { %v8571_v45 = vunpack.i.l.bf16 %v8570_v24  ;;  %v8572_v0 = vunpack.i.h.bf16 %v8570_v24  ;;  %v5873_v22 = vsel %vm18045_vm15, %v5856_v23, %v8552_v29  ;;  %v8556_v33 = vunpack.i.l.bf16 %v16006_v58  ;;  %vm18048_vm11 = vmmov %vm18047_vm14 }
 0x60b   :  { %v5890_v40 = vsel %vm18046_vm10, %v5873_v22, %v8562_v15  ;;  %v5721_v51 = vsel %vm18047_vm14, %v5705_v6, %v8536_v41  ;;  %v5690_v4 = vsel %vm176_vm1, %v5674_v20, %v8517_v63  ;;  %v8557_v5 = vunpack.i.h.bf16 %v16006_v58 }
 0x60c   :  { %v5906_v13 = vsel %vm5895_vm5, %v5889_v52, %v8571_v45  ;;  %v5907_v24 = vsel %vm5895_vm5, %v5890_v40, %v8572_v0  ;;  %v8537_v52 = vunpack.i.h.bf16 %v15974_v34  ;;  %v5738_v9 = vsel %vm5725_vm13, %v5721_v51, %v8546_v3 }
 0x60d   :  { %v16009_v12 = vpop.permute.xlu1 %8564  ;;  %v6495_v7 = vpop.permute.xlu0 %6494  ;;  %v5755_v34 = vsel %vm5742_vm4, %v5738_v9, %v8556_v33  ;;  %v5706_v56 = vsel %vm274_vm2, %v5690_v4, %v8527_v32  ;;  %vm18049_vm15 = vcmask 539648   ;;  %vm18050_vm10 = vcmask 588800  }
 0x60e   :  { %7763 = vmatprep.mubr.msk.f32.mxu0 %vm6563_vm9, %v6495_v7  ;;  %v6533_v30 = vsel %vm6522_vm12, %v5906_v13, %v6495_v7  ;;  %v8566_v45 = vunpack.i.l.bf16 %v16009_v12  ;;  %v8567_v8 = vunpack.i.h.bf16 %v16009_v12  ;;  %vm18051_vm14 = vcmask 637952  }
 0x60f   :  { %6714 = vmatmul.mubr.f32.gmra.mrb[20].mxu0 %v6533_v30  ;;  %v8547_v30 = vunpack.i.h.bf16 %v16000_v18  ;;  %v5722_v18 = vsel %vm18048_vm11, %v5706_v56, %v8537_v52  ;;  %vm18052_vm11 = vcmask 687104  }
 0x610   :  { %v5772_v53 = vsel %vm5759_vm6, %v5755_v34, %v8566_v45 }
 0x611   :  { %v16016_v2 = vpop.permute.xlu1 %8574  ;;  %v5739_v42 = vsel %vm5725_vm13, %v5722_v18, %v8547_v30 }
 0x612   :  { %v16019_v17 = vpop.permute.xlu0 %8584  ;;  %v8576_v13 = vunpack.i.l.bf16 %v16016_v2  ;;  %v8577_v59 = vunpack.i.h.bf16 %v16016_v2  ;;  %v5756_v12 = vsel %vm5742_vm4, %v5739_v42, %v8557_v5 }
 0x613   :  { %v8586_v27 = vunpack.i.l.bf16 %v16019_v17  ;;  %v5773_v26 = vsel %vm5759_vm6, %v5756_v12, %v8567_v8  ;;  %v8587_v11 = vunpack.i.h.bf16 %v16019_v17 }
 0x614   :  { %v5789_v16 = vsel %vm5776_vm8, %v5772_v53, %v8576_v13  ;;  %v5790_v61 = vsel %vm5776_vm8, %v5773_v26, %v8577_v59 }
 0x615   :  { %v16024_v62 = vpop.permute.xlu1 %8579  ;;  %v5806_v2 = vsel %vm5793_vm3, %v5789_v16, %v8586_v27  ;;  %v5807_v41 = vsel %vm5793_vm3, %v5790_v61, %v8587_v11 }
 0x616   :  { %v16029_v37 = vpop.permute.xlu0 %8594  ;;  %v8581_v23 = vunpack.i.l.bf16 %v16024_v62  ;;  %v8582_v3 = vunpack.i.h.bf16 %v16024_v62 }
 0x617   :  { %v8596_v58 = vunpack.i.l.bf16 %v16029_v37  ;;  %v8597_v15 = vunpack.i.h.bf16 %v16029_v37 }
 0x618   :  { %v5675_v33 = vsel %vm78_vm0, %v17945_v49, %v8581_v23  ;;  %v5676_v9 = vsel %vm78_vm0, %v17964_v21, %v8582_v3  ;;  %vm18056_vm0 = vcmask 687104  }
 0x619   :  { %v16034_v44 = vpop.permute.xlu1 %8589  ;;  %v5823_v60 = vsel %vm5810_vm7, %v5806_v2, %v8596_v58 }
 0x61a   :  { %v16040_v36 = vpop.permute.xlu0 %8604  ;;  %v8591_v0 = vunpack.i.l.bf16 %v16034_v44  ;;  %v8592_v6 = vunpack.i.h.bf16 %v16034_v44 }
 0x61b   :  { %v8606_v31 = vunpack.i.l.bf16 %v16040_v36  ;;  %v8607_v40 = vunpack.i.h.bf16 %v16040_v36 }
 0x61c   :  { %v5691_v62 = vsel %vm176_vm1, %v5675_v33, %v8591_v0  ;;  %v5692_v56 = vsel %vm176_vm1, %v5676_v9, %v8592_v6 }
 0x61d   :  { %v16044_v1 = vpop.permute.xlu1 %8599  ;;  %v5840_v10 = vsel %vm18049_vm15, %v5823_v60, %v8606_v31 }
 0x61e   :  { %v16048_v47 = vpop.permute.xlu0 %8614  ;;  %v8601_v22 = vunpack.i.l.bf16 %v16044_v1  ;;  %v8602_v36 = vunpack.i.h.bf16 %v16044_v1 }
 0x61f   :  { %v8616_v25 = vunpack.i.l.bf16 %v16048_v47 }
 0x620   :  { %v5707_v52 = vsel %vm274_vm2, %v5691_v62, %v8601_v22  ;;  %v5708_v59 = vsel %vm274_vm2, %v5692_v56, %v8602_v36  ;;  %vm18058_vm2 = vmmov %vm18049_vm15 }
 0x621   :  { %v16053_v57 = vpop.permute.xlu1 %8609  ;;  %v5857_v17 = vsel %vm18050_vm10, %v5840_v10, %v8616_v25  ;;  %vm18053_vm10 = vcmask 195584  }
 0x622   :  { %v16058_v46 = vpop.permute.xlu0 %8619  ;;  %v8611_v37 = vunpack.i.l.bf16 %v16053_v57  ;;  %v8612_v5 = vunpack.i.h.bf16 %v16053_v57  ;;  %vm18057_vm1 = vmmov %vm18053_vm10 }
 0x623   :  { %v8621_v51 = vunpack.i.l.bf16 %v16058_v46  ;;  %v8622_v57 = vunpack.i.h.bf16 %v16058_v46 }
 0x624   :  { %v5723_v44 = vsel %vm18053_vm10, %v5707_v52, %v8611_v37  ;;  %vm18065_vm10 = vmmov %vm18056_vm0 }
 0x625   :  { %v6497_v43 = vpop.permute.xlu1 %6496  ;;  %v5740_v16 = vsel %vm5725_vm13, %v5723_v44, %v8621_v51 }
 0x626   :  { %7764 = vmatprep.mubr.msk.f32.mxu0 %vm6563_vm9, %v6497_v43  ;;  %v6534_v50 = vsel %vm6522_vm12, %v5907_v24, %v6497_v43  ;;  %v16077_v7 = vpop.permute.xlu0 %8629  ;;  %v5824_v43 = vsel %vm5810_vm7, %v5807_v41, %v8597_v15  ;;  %v8617_v24 = vunpack.i.h.bf16 %v16048_v47 }
 0x627   :  { %6719 = vmatmul.mubr.f32.gmra.mrb[22].mxu0 %v6534_v50  ;;  %v5841_v13 = vsel %vm18049_vm15, %v5824_v43, %v8607_v40  ;;  %v8631_v20 = vunpack.i.l.bf16 %v16077_v7  ;;  %v8632_v26 = vunpack.i.h.bf16 %v16077_v7 }
 0x629   :  { %v16086_v28 = vpop.permute.xlu1 %8624  ;;  %v5757_v42 = vsel %vm5742_vm4, %v5740_v16, %v8631_v20 }
 0x62a   :  { %v16096_v38 = vpop.permute.xlu0 %8639  ;;  %v8626_v19 = vunpack.i.l.bf16 %v16086_v28  ;;  %v8627_v45 = vunpack.i.h.bf16 %v16086_v28 }
 0x62b   :  { %v8641_v34 = vunpack.i.l.bf16 %v16096_v38 }
 0x62c   :  { %v5874_v35 = vsel %vm18051_vm14, %v5857_v17, %v8626_v19  ;;  %vm18054_vm14 = vcmask 588800   ;;  %v8642_v19 = vunpack.i.h.bf16 %v16096_v38 }
 0x62d   :  { %v8635_v14 = vpop.permute.xlu1 %8634  ;;  %v5858_v4 = vsel %vm18054_vm14, %v5841_v13, %v8617_v24  ;;  %v5774_v11 = vsel %vm5759_vm6, %v5757_v42, %v8641_v34 }
 0x62e   :  { %v8636_v29 = vunpack.i.l.bf16 %v8635_v14  ;;  %v16108_v39 = vpop.permute.xlu0 %8649  ;;  %v8637_v49 = vunpack.i.h.bf16 %v8635_v14  ;;  %v5724_v14 = vsel %vm18057_vm1, %v5708_v59, %v8612_v5 }
 0x62f   :  { %v8651_v53 = vunpack.i.l.bf16 %v16108_v39  ;;  %v8652_v60 = vunpack.i.h.bf16 %v16108_v39  ;;  %v5741_v23 = vsel %vm5725_vm13, %v5724_v14, %v8622_v57  ;;  %vm18059_vm13 = vmmov %vm18054_vm14 }
 0x630   :  { %v5891_v54 = vsel %vm18052_vm11, %v5874_v35, %v8636_v29  ;;  %vm18055_vm11 = vcmask 637952   ;;  %v5758_v17 = vsel %vm5742_vm4, %v5741_v23, %v8632_v26 }
 0x631   :  { %v8645_v48 = vpop.permute.xlu1 %8644  ;;  %v5875_v8 = vsel %vm18055_vm11, %v5858_v4, %v8627_v45  ;;  %v5791_v46 = vsel %vm5776_vm8, %v5774_v11, %v8651_v53  ;;  %v5775_v41 = vsel %vm5759_vm6, %v5758_v17, %v8642_v19  ;;  %vm18060_vm4 = vmmov %vm18055_vm11  ;;  %v7328_v17 = vld [vmem:[%s16559_s2 + $0x120] sm:$0xff] }
 0x632   :  { %v8646_v55 = vunpack.i.l.bf16 %v8645_v48  ;;  %v16121_v63 = vpop.permute.xlu0 %8654  ;;  %v8647_v30 = vunpack.i.h.bf16 %v8645_v48  ;;  %v5892_v58 = vsel %vm18056_vm0, %v5875_v8, %v8637_v49  ;;  %v5792_v35 = vsel %vm5776_vm8, %v5775_v41, %v8652_v60  ;;  %vm18061_vm6 = vmmov %vm18056_vm0 }
 0x633   :  { %v8656_v21 = vunpack.i.l.bf16 %v16121_v63  ;;  %v8657_v7 = vunpack.i.h.bf16 %v16121_v63  ;;  %vm18064_vm15 = vmmov %vm18060_vm4 }
 0x634   :  { %v5908_v32 = vsel %vm5895_vm5, %v5891_v54, %v8646_v55  ;;  %v5909_v25 = vsel %vm5895_vm5, %v5892_v58, %v8647_v30 }
 0x635   :  { %v6499_v50 = vpop.permute.xlu1 %6498  ;;  %v5808_v29 = vsel %vm5793_vm3, %v5791_v46, %v8656_v21  ;;  %v5809_v3 = vsel %vm5793_vm3, %v5792_v35, %v8657_v7  ;;  %vm18062_vm3 = vmmov %vm18058_vm2 }
 0x636   :  { %7765 = vmatprep.mubr.msk.f32.mxu0 %vm6563_vm9, %v6499_v50  ;;  %v6535_v47 = vsel %vm6522_vm12, %v5908_v32, %v6499_v50  ;;  %v8665_v1 = vpop.permute.xlu0 %8664  ;;  %v16183_v50 = vld [vmem:[%s16559_s2 + $0x298] ss:$0 sm:$0xff] }
 0x637   :  { %6724 = vmatmul.mubr.f32.gmra.mrb[24].mxu0 %v6535_v47  ;;  %v6665_v28 = vpop.f32.mrb[0].mxu0  ;;  %v8666_v48 = vunpack.i.l.bf16 %v8665_v1  ;;  %v8667_v43 = vunpack.i.h.bf16 %v8665_v1 }
 0x638   :  { %v6667_v27 = vpop.f32.mrb[1].mxu0  ;;  %v6666_v13 = vadd.f32 %v16183_v50, %v6665_v28 }
 0x639   :  { %v8660_v18 = vpop.permute.xlu1 %8659 }
 0x63a   :  { %v8661_v31 = vunpack.i.l.bf16 %v8660_v18  ;;  %v6501_v12 = vpop.permute.xlu0 %6500  ;;  %v8662_v38 = vunpack.i.h.bf16 %v8660_v18  ;;  %v6744_v34 = vmax.f32 %v6666_v13, 0.0 }
 0x63b   :  { %7766 = vmatprep.mubr.msk.f32.mxu0 %vm6563_vm9, %v6501_v12  ;;  %v6536_v2 = vsel %vm6522_vm12, %v5909_v25, %v6501_v12 }
 0x63c   :  { %6729 = vmatmul.mubr.f32.gmra.mrb[26].mxu0 %v6536_v2  ;;  %v5825_v15 = vsel %vm5810_vm7, %v5808_v29, %v8661_v31  ;;  %v5826_v63 = vsel %vm5810_vm7, %v5809_v3, %v8662_v38  ;;  %vm18063_vm7 = vmmov %vm18059_vm13 }
 0x63d   :  { %v8670_v61 = vpop.permute.xlu1 %8669  ;;  %v5842_v39 = vsel %vm18058_vm2, %v5825_v15, %v8666_v48  ;;  %v5843_v45 = vsel %vm18062_vm3, %v5826_v63, %v8667_v43  ;;  %v7311_v48 = vld [vmem:[%s16559_s2 + $0x98] sm:$0xff] }
 0x63e   :  { %v8671_v10 = vunpack.i.l.bf16 %v8670_v61  ;;  %v5592_v0 = vpop.permute.xlu0 %5591  ;;  %v8672_v54 = vunpack.i.h.bf16 %v8670_v61 }
 0x640   :  { %v5859_v40 = vsel %vm18059_vm13, %v5842_v39, %v8671_v10  ;;  %v5860_v52 = vsel %vm18063_vm7, %v5843_v45, %v8672_v54 }
 0x641   :  { %v8675_v22 = vpop.permute.xlu1 %8674 }
 0x642   :  { %v8676_v55 = vunpack.i.l.bf16 %v8675_v22  ;;  %v6503_v37 = vpop.permute.xlu0 %6502  ;;  %v8677_v24 = vunpack.i.h.bf16 %v8675_v22  ;;  %v7312_v22 = vld [vmem:[%s16559_s2 + $0xa0] sm:$0xff] }
 0x643   :  { %7767 = vmatprep.mubr.msk.f32.mxu0 %vm6563_vm9, %v6503_v37  ;;  %v7972_v35 = vpack.c.bf16 %v7312_v22, %v7311_v48 }
 0x644   :  { %v5876_v33 = vsel %vm18060_vm4, %v5859_v40, %v8676_v55  ;;  %v5877_v49 = vsel %vm18064_vm15, %v5860_v52, %v8677_v24  ;;  %v18066_v40 = vld [vmem:[#allocation67_spill] sm:$0xff] }
 0x645   :  { %v5642_v32 = vpop.permute.xlu1 %5641  ;;  %v5893_v6 = vsel %vm18061_vm6, %v5876_v33, %v5592_v0  ;;  %v7327_v0 = vld [vmem:[%s16559_s2 + $0x118] sm:$0xff] }
 0x646   :  { %v5910_v62 = vsel %vm5895_vm5, %v5893_v6, %v5642_v32  ;;  %v5644_v44 = vpop.permute.xlu0 %5643  ;;  %v7970_v41 = vpack.c.bf16 %v7328_v17, %v7327_v0 }
 0x647   :  { %v6537_v36 = vsel %vm6522_vm12, %v5910_v62, %v6503_v37 }
 0x648   :  { %6734 = vmatmul.mubr.f32.gmra.mrb[28].mxu0 %v6537_v36  ;;  %7971 = vmatprep.subr.bf16.mxu1 %v7970_v41 }
 0x649   :  { %v5594_v51 = vpop.permute.xlu1 %5593  ;;  %7973 = vmatpush3.bf16.msra.mxu1 %v7972_v35 }
 0x64a   :  { %v5894_v47 = vsel %vm18065_vm10, %v5877_v49, %v5594_v51 }
 0x64b   :  { %v6670_v20 = vpop.f32.mrb[2].mxu0  ;;  %v5911_v4 = vsel %vm5895_vm5, %v5894_v47, %v5644_v44  ;;  %vm18068_vm5 = vcmask 1041409  }
 0x64c   :  { %v6671_v30 = vadd.f32 %v16183_v50, %v6670_v20  ;;  %v6672_v1 = vpop.f32.mrb[3].mxu0  ;;  %vm18070_vm14 = vmmov %vm18068_vm5 }
 0x64d   :  { %v6505_v9 = vpop.permute.xlu1 %6504  ;;  %vm18071_vm11 = vmmov %vm18068_vm5 }
 0x64e   :  { %7768 = vmatprep.mubr.msk.f32.mxu0 %vm6563_vm9, %v6505_v9  ;;  %v6538_v5 = vsel %vm6522_vm12, %v5911_v4, %v6505_v9  ;;  %v6745_v56 = vmax.f32 %v6671_v30, 0.0  ;;  %vm18069_vm9 = vmmov %vm18068_vm5 }
 0x64f   :  { %6739 = vmatmul.mubr.f32.gmra.mrb[30].mxu0 %v6538_v5  ;;  %vm18072_vm0 = vmmov %vm18068_vm5 }
 0x650   :  { %v6760_v8 = vmax.f32 %v6744_v34, %v6745_v56  ;;  %vm18073_vm1 = vmmov %vm18072_vm0 }
 0x651   :  { %vm18074_vm2 = vmmov %vm18072_vm0 }
 0x652   :  { %v6776_v3 = vcombine.high %v6760_v8, %v6760_v8  ;;  %v6783_v37 = vrot.slane %v6760_v8, %v18066_v40  ;;  %vm18075_vm13 = vmmov %vm18072_vm0 }
 0x653   :  { %vm18076_vm4 = vmmov %vm18072_vm0 }
 0x654   :  { %v6790_v54 = vrot.slane %v6776_v3, %v18066_v40  ;;  %v6791_v32 = vcombine.high %v6783_v37, %v6783_v37  ;;  %v7769_v45 = vrot.slane %v6783_v37, 9  ;;  %vm18077_vm6 = vmmov %vm18072_vm0 }
 0x655   :  { %vm18078_vm3 = vmmov %vm18072_vm0 }
 0x656   :  { %v6792_v36 = vcombine.high %v6790_v54, %v6790_v54  ;;  %v7770_v51 = vrot.slane %v6791_v32, 9  ;;  %v7771_v49 = vrot.slane %v6790_v54, 9  ;;  %v7040_v20 = vmax.f32 %v6783_v37, %v7769_v45  ;;  %vm18079_vm7 = vmmov %vm18072_vm0 }
 0x657   :  { %vm18080_vm15 = vmmov %vm18072_vm0 }
 0x658   :  { %v7772_v44 = vrot.slane %v6792_v36, 9  ;;  %v7041_v4 = vmax.f32 %v6791_v32, %v7770_v51  ;;  %v7042_v5 = vmax.f32 %v6790_v54, %v7771_v49  ;;  %vm18081_vm10 = vmmov %vm18072_vm0 }
 0x65b   :  { %v6675_v53 = vpop.f32.mrb[4].mxu0 }
 0x65c   :  { %v6677_v27 = vpop.f32.mrb[5].mxu0  ;;  %v6676_v28 = vadd.f32 %v16183_v50, %v6675_v53 }
 0x65d   :  { %v7043_v27 = vmax.f32 %v6792_v36, %v7772_v44 }
 0x65e   :  { %v6746_v21 = vmax.f32 %v6676_v28, 0.0  ;;  %v18067_v28 = vld [vmem:[#allocation6_spill] sm:$0xff] }
 0x672   :  { %v6680_v18 = vpop.f32.mrb[6].mxu0 }
 0x673   :  { %v6681_v59 = vadd.f32 %v16183_v50, %v6680_v18  ;;  %v6682_v16 = vpop.f32.mrb[7].mxu0  ;;  %v7077_v18 = vrot.slane %v7040_v20, %v18067_v28 }
 0x675   :  { %v6747_v58 = vmax.f32 %v6681_v59, 0.0 }
 0x677   :  { %v16195_v57 = vmax.f32 %v6746_v21, %v6747_v58 }
 0x682   :  { %v6685_v42 = vpop.f32.mrb[8].mxu0 }
 0x683   :  { %v6687_v31 = vpop.f32.mrb[9].mxu0  ;;  %v6686_v12 = vadd.f32 %v16183_v50, %v6685_v42  ;;  %v7089_v42 = vrot.slane %v7041_v4, %v18067_v28 }
 0x684   :  { %v7103_v31 = vrot.slane %v7042_v5, %v18067_v28 }
 0x685   :  { %v6748_v11 = vmax.f32 %v6686_v12, 0.0 }
 0x68e   :  { %v6690_v25 = vpop.f32.mrb[10].mxu0 }
 0x68f   :  { %v6691_v14 = vadd.f32 %v16183_v50, %v6690_v25  ;;  %v6692_v26 = vpop.f32.mrb[11].mxu0 }
 0x691   :  { %v6749_v2 = vmax.f32 %v6691_v14, 0.0 }
 0x693   :  { %v16199_v19 = vmax.f32 %v6748_v11, %v6749_v2 }
 0x69e   :  { %v6695_v46 = vpop.f32.mrb[12].mxu0 }
 0x69f   :  { %v6697_v61 = vpop.f32.mrb[13].mxu0  ;;  %v6696_v60 = vadd.f32 %v16183_v50, %v6695_v46 }
 0x6a1   :  { %v6750_v15 = vmax.f32 %v6696_v60, 0.0  ;;  %v7117_v60 = vrot.slane %v7043_v27, %v18067_v28 }
 0x6b6   :  { %v6700_v29 = vpop.f32.mrb[14].mxu0 }
 0x6b7   :  { %v6701_v23 = vadd.f32 %v16183_v50, %v6700_v29  ;;  %v6702_v7 = vpop.f32.mrb[15].mxu0 }
 0x6b8   :  { %v6793_v7 = vcombine.high %v16195_v57, %v16195_v57 }
 0x6b9   :  { %v6751_v10 = vmax.f32 %v6701_v23, 0.0 }
 0x6ba   :  { %v6807_v0 = vrot.slane %v6793_v7, %v18066_v40 }
 0x6bb   :  { %v16212_v38 = vmax.f32 %v6750_v15, %v6751_v10  ;;  %v6800_v15 = vrot.slane %v16195_v57, %v18066_v40 }
 0x6bc   :  { %v7775_v54 = vrot.slane %v6807_v0, 9 }
 0x6bd   :  { %v6808_v22 = vcombine.high %v6800_v15, %v6800_v15  ;;  %v7773_v3 = vrot.slane %v6800_v15, 9 }
 0x6be   :  { %v7046_v45 = vmax.f32 %v6807_v0, %v7775_v54 }
 0x6c0   :  { %v7159_v5 = vrot.slane %v7046_v45, %v18067_v28  ;;  %v7314_v45 = vld [vmem:[%s16559_s2 + $0xb0] sm:$0xff] }
 0x6c6   :  { %v6705_v39 = vpop.f32.mrb[16].mxu0 }
 0x6c7   :  { %v6707_v55 = vpop.f32.mrb[17].mxu0  ;;  %v6706_v63 = vadd.f32 %v16183_v50, %v6705_v39 }
 0x6c8   :  { %v6809_v55 = vcombine.high %v6807_v0, %v6807_v0 }
 0x6c9   :  { %v6752_v6 = vmax.f32 %v6706_v63, 0.0  ;;  %v7774_v63 = vrot.slane %v6808_v22, 9 }
 0x6ca   :  { %v7776_v57 = vrot.slane %v6809_v55, 9 }
 0x6cb   :  { %v7045_v36 = vmax.f32 %v6808_v22, %v7774_v63 }
 0x6cd   :  { %v7145_v4 = vrot.slane %v7045_v36, %v18067_v28 }
 0x6d2   :  { %v6710_v33 = vpop.f32.mrb[18].mxu0 }
 0x6d3   :  { %v6711_v43 = vadd.f32 %v16183_v50, %v6710_v33  ;;  %v6712_v24 = vpop.f32.mrb[19].mxu0 }
 0x6d4   :  { %v7044_v24 = vmax.f32 %v6800_v15, %v7773_v3 }
 0x6d5   :  { %v6753_v62 = vmax.f32 %v6711_v43, 0.0 }
 0x6d6   :  { %v7131_v44 = vrot.slane %v7044_v24, %v18067_v28 }
 0x6d7   :  { %v6764_v52 = vmax.f32 %v6752_v6, %v6753_v62 }
 0x6d9   :  { %v6844_v47 = vcombine.high %v6764_v52, %v6764_v52  ;;  %v6851_v13 = vrot.slane %v6764_v52, %v18066_v40 }
 0x6db   :  { %v6858_v30 = vrot.slane %v6844_v47, %v18066_v40  ;;  %v6859_v1 = vcombine.high %v6851_v13, %v6851_v13  ;;  %v7785_v9 = vrot.slane %v6851_v13, 9 }
 0x6dd   :  { %v6860_v34 = vcombine.high %v6858_v30, %v6858_v30  ;;  %v7786_v56 = vrot.slane %v6859_v1, 9  ;;  %v7787_v8 = vrot.slane %v6858_v30, 9  ;;  %v7056_v53 = vmax.f32 %v6851_v13, %v7785_v9 }
 0x6de   :  { %v7047_v13 = vmax.f32 %v6809_v55, %v7776_v57  ;;  %v7313_v57 = vld [vmem:[%s16559_s2 + $0xa8] sm:$0xff] }
 0x6df   :  { %v7788_v59 = vrot.slane %v6860_v34, 9  ;;  %v7057_v16 = vmax.f32 %v6859_v1, %v7786_v56  ;;  %v7058_v21 = vmax.f32 %v6858_v30, %v7787_v8  ;;  %v7081_v58 = vrot.slane %v7056_v53, %v18067_v28 }
 0x6e1   :  { %v7059_v12 = vmax.f32 %v6860_v34, %v7788_v59  ;;  %v7093_v25 = vrot.slane %v7057_v16, %v18067_v28  ;;  %v7107_v14 = vrot.slane %v7058_v21, %v18067_v28  ;;  %v16230_v26 = vsel %vm18068_vm5, %v7081_v58, %v7077_v18  ;;  %vm18082_vm5 = vmmov %vm18072_vm0 }
 0x6e2   :  { %v6715_v11 = vpop.f32.mrb[20].mxu0  ;;  %v7173_v21 = vrot.slane %v7047_v13, %v18067_v28  ;;  %v7976_v13 = vpack.c.bf16 %v7314_v45, %v7313_v57 }
 0x6e3   :  { %v6717_v2 = vpop.f32.mrb[21].mxu0  ;;  %v16233_v46 = vsel %vm18069_vm9, %v7093_v25, %v7089_v42  ;;  %v16236_v61 = vsel %vm18070_vm14, %v7107_v14, %v7103_v31  ;;  %v7121_v29 = vrot.slane %v7059_v12, %v18067_v28  ;;  %v6716_v10 = vadd.f32 %v16183_v50, %v6715_v11  ;;  %vm18083_vm9 = vmmov %vm18072_vm0 }
 0x6e4   :  { %v6810_v42 = vcombine.high %v16199_v19, %v16199_v19  ;;  %v6817_v12 = vrot.slane %v16199_v19, %v18066_v40  ;;  %vm7292_vm14 = vcmask 130048  }
 0x6e5   :  { %v16241_v23 = vsel %vm18071_vm11, %v7121_v29, %v7117_v60  ;;  %v6754_v35 = vmax.f32 %v6716_v10, 0.0  ;;  %vm7294_vm11 = vcmask 261120  }
 0x6e6   :  { %v6824_v14 = vrot.slane %v6810_v42, %v18066_v40  ;;  %v6825_v29 = vcombine.high %v6817_v12, %v6817_v12  ;;  %v7777_v0 = vrot.slane %v6817_v12, 9 }
 0x6e8   :  { %v6826_v10 = vcombine.high %v6824_v14, %v6824_v14 }
 0x6ea   :  { %v7780_v19 = vrot.slane %v6826_v10, 9 }
 0x6fa   :  { %v6720_v17 = vpop.f32.mrb[22].mxu0 }
 0x6fb   :  { %v6721_v48 = vadd.f32 %v16183_v50, %v6720_v17  ;;  %v6722_v41 = vpop.f32.mrb[23].mxu0 }
 0x6fc   :  { %v7779_v41 = vrot.slane %v6824_v14, 9 }
 0x6fd   :  { %v6755_v39 = vmax.f32 %v6721_v48, 0.0  ;;  %v7778_v48 = vrot.slane %v6825_v29, 9 }
 0x6fe   :  { %v7050_v54 = vmax.f32 %v6824_v14, %v7779_v41  ;;  %v7336_v41 = vld [vmem:[%s16559_s2 + $0x160] sm:$0xff] }
 0x6ff   :  { %v6765_v37 = vmax.f32 %v6754_v35, %v6755_v39  ;;  %v7048_v39 = vmax.f32 %v6817_v12, %v7777_v0  ;;  %v7049_v63 = vmax.f32 %v6825_v29, %v7778_v48  ;;  %v7335_v48 = vld [vmem:[%s16559_s2 + $0x158] sm:$0xff] }
 0x701   :  { %v6861_v33 = vcombine.high %v6765_v37, %v6765_v37  ;;  %v6868_v43 = vrot.slane %v6765_v37, %v18066_v40 }
 0x703   :  { %v6875_v32 = vrot.slane %v6861_v33, %v18066_v40  ;;  %v6876_v6 = vcombine.high %v6868_v43, %v6868_v43  ;;  %v7789_v62 = vrot.slane %v6868_v43, 9  ;;  %v7329_v33 = vld [vmem:[%s16559_s2 + $0x128] sm:$0xff] }
 0x705   :  { %v6877_v52 = vcombine.high %v6875_v32, %v6875_v32  ;;  %v7790_v51 = vrot.slane %v6876_v6, 9  ;;  %v7791_v49 = vrot.slane %v6875_v32, 9  ;;  %v7060_v47 = vmax.f32 %v6868_v43, %v7789_v62  ;;  %v7330_v43 = vld [vmem:[%s16559_s2 + $0x130] sm:$0xff] }
 0x707   :  { %v7792_v20 = vrot.slane %v6877_v52, 9  ;;  %v7061_v30 = vmax.f32 %v6876_v6, %v7790_v51  ;;  %v7062_v1 = vmax.f32 %v6875_v32, %v7791_v49  ;;  %v7135_v9 = vrot.slane %v7060_v47, %v18067_v28 }
 0x708   :  { %v7187_v51 = vrot.slane %v7048_v39, %v18067_v28  ;;  %v7974_v47 = vpack.c.bf16 %v7330_v43, %v7329_v33  ;;  %v7986_v43 = vpack.c.bf16 %v7336_v41, %v7335_v48 }
 0x709   :  { %v7063_v34 = vmax.f32 %v6877_v52, %v7792_v20  ;;  %v16257_v56 = vsel %vm18072_vm0, %v7135_v9, %v7131_v44  ;;  %v7149_v8 = vrot.slane %v7061_v30, %v18067_v28  ;;  %v7163_v53 = vrot.slane %v7062_v1, %v18067_v28  ;;  %v7331_v9 = vld [vmem:[%s16559_s2 + $0x138] sm:$0xff] }
 0x70a   :  { %v6725_v27 = vpop.f32.mrb[24].mxu0  ;;  %v7051_v52 = vmax.f32 %v6826_v10, %v7780_v19  ;;  %7975 = vmatprep.subr.bf16.mxu1 %v7974_v47  ;;  %v7322_v47 = vld [vmem:[%s16559_s2 + $0xf0] sm:$0xff]  ;;  %vm7297_vm0 = vcmask 523264  }
 0x70b   :  { %v6727_v18 = vpop.f32.mrb[25].mxu0  ;;  %v16262_v59 = vsel %vm18073_vm1, %v7149_v8, %v7145_v4  ;;  %v16265_v16 = vsel %vm18074_vm2, %v7163_v53, %v7159_v5  ;;  %v7177_v58 = vrot.slane %v7063_v34, %v18067_v28  ;;  %v6726_v25 = vadd.f32 %v16183_v50, %v6725_v27  ;;  %v7332_v4 = vld [vmem:[%s16559_s2 + $0x140] sm:$0xff]  ;;  %v7315_v5 = vld [vmem:[%s16559_s2 + $0xb8] sm:$0xff]  ;;  %7977 = vmatpush3.bf16.msra.mxu1 %v7976_v13 }
 0x70c   :  { %v6827_v34 = vcombine.high %v16212_v38, %v16212_v38  ;;  %v7199_v8 = vrot.slane %v7049_v63, %v18067_v28  ;;  %v7213_v53 = vrot.slane %v7050_v54, %v18067_v28  ;;  %v7978_v27 = vpack.c.bf16 %v7332_v4, %v7331_v9  ;;  %v7316_v18 = vld [vmem:[%s16559_s2 + $0xc0] sm:$0xff] }
 0x70d   :  { %v16272_v31 = vsel %vm18075_vm13, %v7177_v58, %v7173_v21  ;;  %v6756_v7 = vmax.f32 %v6726_v25, 0.0  ;;  %v7333_v21 = vld [vmem:[%s16559_s2 + $0x148] sm:$0xff]  ;;  %v7334_v58 = vld [vmem:[%s16559_s2 + $0x150] sm:$0xff]  ;;  %v7980_v29 = vpack.c.bf16 %v7316_v18, %v7315_v5  ;;  %vm7299_vm1 = vcmask 654336  }
 0x70e   :  { %7979 = vmatprep.subr.bf16.mxu1 %v7978_v27  ;;  %v7324_v27 = vld [vmem:[%s16559_s2 + $0x100] sm:$0xff]  ;;  %vm7602_vm2 = vcmask 74752  }
 0x70f   :  { %v6730_v11 = vpop.f32.mrb[26].mxu0  ;;  %7981 = vmatpush3.bf16.msra.mxu1 %v7980_v29 }
 0x710   :  { %v6731_v2 = vadd.f32 %v16183_v50, %v6730_v11  ;;  %v6732_v60 = vpop.f32.mrb[27].mxu0  ;;  %v6834_v11 = vrot.slane %v16212_v38, %v18066_v40 }
 0x711   :  { %v7227_v60 = vrot.slane %v7051_v52, %v18067_v28 }
 0x712   :  { %v6757_v15 = vmax.f32 %v6731_v2, 0.0  ;;  %v6842_v54 = vcombine.high %v6834_v11, %v6834_v11 }
 0x714   :  { %v6766_v17 = vmax.f32 %v6756_v7, %v6757_v15  ;;  %v7317_v7 = vld [vmem:[%s16559_s2 + $0xc8] sm:$0xff]  ;;  %v7318_v15 = vld [vmem:[%s16559_s2 + $0xd0] sm:$0xff]  ;;  %v7782_v45 = vrot.slane %v6842_v54, 9 }
 0x715   :  { %v7984_v63 = vpack.c.bf16 %v7318_v15, %v7317_v7 }
 0x716   :  { %v6878_v22 = vcombine.high %v6766_v17, %v6766_v17  ;;  %v6885_v35 = vrot.slane %v6766_v17, %v18066_v40  ;;  %v7982_v17 = vpack.c.bf16 %v7334_v58, %v7333_v21  ;;  %v7053_v18 = vmax.f32 %v6842_v54, %v7782_v45 }
 0x718   :  { %v6892_v55 = vrot.slane %v6878_v22, %v18066_v40  ;;  %v6893_v3 = vcombine.high %v6885_v35, %v6885_v35  ;;  %v7793_v37 = vrot.slane %v6885_v35, 9  ;;  %v6841_v22 = vrot.slane %v6827_v34, %v18066_v40  ;;  %7983 = vmatprep.subr.bf16.mxu1 %v7982_v17 }
 0x719   :  { %7985 = vmatpush3.bf16.msra.mxu1 %v7984_v63  ;;  %v7255_v17 = vrot.slane %v7053_v18, %v18067_v28  ;;  %v7419_v18 = vld [vmem:[%s16559_s2 + $0x198] sm:$0xff] }
 0x71a   :  { %v6894_v24 = vcombine.high %v6892_v55, %v6892_v55  ;;  %v7794_v32 = vrot.slane %v6893_v3, 9  ;;  %v7795_v6 = vrot.slane %v6892_v55, 9  ;;  %v7064_v62 = vmax.f32 %v6885_v35, %v7793_v37  ;;  %7987 = vmatprep.subr.bf16.mxu1 %v7986_v43 }
 0x71b   :  { %v6735_v36 = vpop.f32.mrb[28].mxu0  ;;  %v7783_v52 = vrot.slane %v6841_v22, 9 }
 0x71c   :  { %v6737_v49 = vpop.f32.mrb[29].mxu0  ;;  %v7796_v44 = vrot.slane %v6894_v24, 9  ;;  %v7065_v20 = vmax.f32 %v6893_v3, %v7794_v32  ;;  %v7066_v30 = vmax.f32 %v6892_v55, %v7795_v6  ;;  %v7191_v1 = vrot.slane %v7064_v62, %v18067_v28 }
 0x71d   :  { %v6736_v2 = vadd.f32 %v16183_v50, %v6735_v36  ;;  %v6843_v32 = vcombine.high %v6841_v22, %v6841_v22  ;;  %v7781_v6 = vrot.slane %v6834_v11, 9  ;;  %v7321_v49 = vld [vmem:[%s16559_s2 + $0xe8] sm:$0xff]  ;;  %v7054_v21 = vmax.f32 %v6841_v22, %v7783_v52 }
 0x71e   :  { %v7067_v42 = vmax.f32 %v6894_v24, %v7796_v44  ;;  %v7203_v12 = vrot.slane %v7065_v20, %v18067_v28  ;;  %v7217_v25 = vrot.slane %v7066_v30, %v18067_v28  ;;  %v16320_v14 = vsel %vm18076_vm4, %v7191_v1, %v7187_v51  ;;  %v7337_v24 = vld [vmem:[%s16559_s2 + $0x168] sm:$0xff]  ;;  %v7339_v20 = vld [vmem:[%s16559_s2 + $0x178] sm:$0xff]  ;;  %v7340_v30 = vld [vmem:[%s16559_s2 + $0x180] sm:$0xff] }
 0x71f   :  { %v7784_v1 = vrot.slane %v6843_v32, 9  ;;  %v7052_v9 = vmax.f32 %v6834_v11, %v7781_v6  ;;  %v7994_v58 = vpack.c.bf16 %v7340_v30, %v7339_v20  ;;  %v7341_v11 = vld [vmem:[%s16559_s2 + $0x188] sm:$0xff]  ;;  %v7269_v48 = vrot.slane %v7054_v21, %v18067_v28  ;;  %v7420_v21 = vld [vmem:[%s16559_s2 + $0x1a0] sm:$0xff] }
 0x720   :  { %v7204_v10 = vsel %vm18077_vm6, %v7203_v12, %v7199_v8  ;;  %v7218_v0 = vsel %vm18078_vm3, %v7217_v25, %v7213_v53  ;;  %v7231_v38 = vrot.slane %v7067_v42, %v18067_v28  ;;  %v7992_v8 = vpack.c.bf16 %v7322_v47, %v7321_v49  ;;  %v7323_v53 = vld [vmem:[%s16559_s2 + $0xf8] sm:$0xff]  ;;  %v7325_v22 = vld [vmem:[%s16559_s2 + $0x108] sm:$0xff] }
 0x721   :  { %v8678_v19 = vpack.i.bf16 %v16233_v46, %v7204_v10  ;;  %v8683_v39 = vpack.i.bf16 %v16236_v61, %v7218_v0  ;;  %v7319_v46 = vld [vmem:[%s16559_s2 + $0xd8] sm:$0xff]  ;;  %v6758_v61 = vmax.f32 %v6736_v2, 0.0  ;;  %v7342_v2 = vld [vmem:[%s16559_s2 + $0x190] sm:$0xff]  ;;  %v7241_v29 = vrot.slane %v7052_v9, %v18067_v28 }
 0x722   :  { %v6740_v35 = vpop.f32.mrb[30].mxu0  ;;  %v7232_v37 = vsel %vm18079_vm7, %v7231_v38, %v7227_v60  ;;  %v7055_v60 = vmax.f32 %v6843_v32, %v7784_v1  ;;  %v7996_v7 = vpack.c.bf16 %v7324_v27, %v7323_v53  ;;  %v7998_v41 = vpack.c.bf16 %v7342_v2, %v7341_v11 }
 0x723   :  { %v6741_v55 = vadd.f32 %v16183_v50, %v6740_v35  ;;  %v6742_v3 = vpop.f32.mrb[31].mxu0  ;;  %8679 = vrot.lane.b32.xlu0 %v8678_v19, %s8816_s27  ;;  %8684 = vrot.lane.b32.xlu1 %v8683_v39, %s8797_s21  ;;  %v8688_v33 = vpack.i.bf16 %v16241_v23, %v7232_v37  ;;  %v7320_v50 = vld [vmem:[%s16559_s2 + $0xe0] sm:$0xff]  ;;  %v7338_v23 = vld [vmem:[%s16559_s2 + $0x170] sm:$0xff]  ;;  %v8003_v11 = vpack.c.bf16 %v7420_v21, %v7419_v18 }
 0x724   :  { %v7988_v36 = vpack.c.bf16 %v7320_v50, %v7319_v46  ;;  %v7990_v51 = vpack.c.bf16 %v7338_v23, %v7337_v24  ;;  %v7326_v35 = vld [vmem:[%s16559_s2 + $0x110] sm:$0xff]  ;;  %v7283_v63 = vrot.slane %v7055_v60, %v18067_v28  ;;  %v18084_v24 = vmov 0.0|0.0  }
 0x725   :  { %v6759_v57 = vmax.f32 %v6741_v55, 0.0  ;;  %v8000_v46 = vpack.c.bf16 %v7326_v35, %v7325_v22  ;;  %v7427_v22 = vld [vmem:[%s16559_s2 + $0x1d8] sm:$0xff]  ;;  %v7428_v35 = vld [vmem:[%s16559_s2 + $0x1e0] sm:$0xff] }
 0x726   :  { %7989 = vmatpush3.bf16.msra.mxu1 %v7988_v36 }
 0x727   :  { %v6767_v62 = vmax.f32 %v6758_v61, %v6759_v57  ;;  %8689 = vrot.lane.b32.xlu0 %v8688_v33, %s8805_s5  ;;  %7991 = vmatprep.subr.bf16.mxu1 %v7990_v51 }
 0x729   :  { %v6895_v13 = vcombine.high %v6767_v62, %v6767_v62  ;;  %v6902_v44 = vrot.slane %v6767_v62, %v18066_v40 }
 0x72a   :  { %7993 = vmatpush3.bf16.msra.mxu1 %v7992_v8 }
 0x72b   :  { %v6909_v4 = vrot.slane %v6895_v13, %v18066_v40  ;;  %v6910_v5 = vcombine.high %v6902_v44, %v6902_v44  ;;  %v7797_v34 = vrot.slane %v6902_v44, 9  ;;  %7995 = vmatprep.subr.bf16.mxu1 %v7994_v58 }
 0x72d   :  { %v6911_v42 = vcombine.high %v6909_v4, %v6909_v4  ;;  %v7798_v12 = vrot.slane %v6910_v5, 9  ;;  %v7799_v25 = vrot.slane %v6909_v4, 9  ;;  %v7068_v40 = vmax.f32 %v6902_v44, %v7797_v34 }
 0x72e   :  { %7997 = vmatpush3.bf16.msra.mxu1 %v7996_v7  ;;  %v7422_v7 = vld [vmem:[%s16559_s2 + $0x1b0] sm:$0xff] }
 0x72f   :  { %v7800_v15 = vrot.slane %v6911_v42, 9  ;;  %v7069_v10 = vmax.f32 %v6910_v5, %v7798_v12  ;;  %v7070_v0 = vmax.f32 %v6909_v4, %v7799_v25  ;;  %v7245_v38 = vrot.slane %v7068_v40, %v18067_v28  ;;  %7999 = vmatprep.subr.bf16.mxu1 %v7998_v41 }
 0x731   :  { %v7071_v19 = vmax.f32 %v6911_v42, %v7800_v15  ;;  %v7246_v39 = vsel %vm18080_vm15, %v7245_v38, %v7241_v29  ;;  %v7259_v55 = vrot.slane %v7069_v10, %v18067_v28  ;;  %v7273_v3 = vrot.slane %v7070_v0, %v18067_v28  ;;  %v7421_v29 = vld [vmem:[%s16559_s2 + $0x1a8] sm:$0xff]  ;;  %v7423_v10 = vld [vmem:[%s16559_s2 + $0x1b8] sm:$0xff]  ;;  %v7424_v0 = vld [vmem:[%s16559_s2 + $0x1c0] sm:$0xff] }
 0x732   :  { %v8693_v37 = vpack.i.bf16 %v16257_v56, %v7246_v39  ;;  %8001 = vmatpush3.bf16.msra.mxu1 %v8000_v46  ;;  %v8006_v15 = vpack.c.bf16 %v7422_v7, %v7421_v29  ;;  %v8009_v38 = vpack.c.bf16 %v7424_v0, %v7423_v10  ;;  %v7429_v39 = vld [vmem:[%s16559_s2 + $0x1e8] sm:$0xff]  ;;  %v18085_v46 = vmov 0.0  }
 0x733   :  { %v7260_v54 = vsel %vm18081_vm10, %v7259_v55, %v7255_v17  ;;  %v7274_v33 = vsel %vm18082_vm5, %v7273_v3, %v7269_v48  ;;  %v7287_v43 = vrot.slane %v7071_v19, %v18067_v28  ;;  %8002 = vmatprep.subr.bf16.mxu1 %v18084_v24  ;;  %v7425_v17 = vld [vmem:[%s16559_s2 + $0x1c8] sm:$0xff]  ;;  %v7426_v48 = vld [vmem:[%s16559_s2 + $0x1d0] sm:$0xff]  ;;  %v8015_v19 = vpack.c.bf16 %v7428_v35, %v7427_v22 }
 0x734   :  { %8694 = vrot.lane.b32.xlu1 %v8693_v37, %s8817_s24  ;;  %v8698_v50 = vpack.i.bf16 %v16262_v59, %v7260_v54  ;;  %v8703_v61 = vpack.i.bf16 %v16265_v16, %v7274_v33  ;;  %v8012_v41 = vpack.c.bf16 %v7426_v48, %v7425_v17  ;;  %v7430_v55 = vld [vmem:[%s16559_s2 + $0x1f0] sm:$0xff]  ;;  %v7431_v37 = vld [vmem:[%s16559_s2 + $0x1f8] sm:$0xff]  ;;  %v7433_v54 = vld [vmem:[%s16559_s2 + $0x208] sm:$0xff] }
 0x735   :  { %v7288_v57 = vsel %vm18083_vm9, %v7287_v43, %v7283_v63  ;;  %v8018_v3 = vpack.c.bf16 %v7430_v55, %v7429_v39  ;;  %v7432_v63 = vld [vmem:[%s16559_s2 + $0x200] sm:$0xff]  ;;  %v7434_v43 = vld [vmem:[%s16559_s2 + $0x210] sm:$0xff] }
 0x736   :  { %8699 = vrot.lane.b32.xlu0 %v8698_v50, %s8793_s10  ;;  %v8708_v56 = vpack.i.bf16 %v16272_v31, %v7288_v57  ;;  %v8021_v33 = vpack.c.bf16 %v7432_v63, %v7431_v37  ;;  %v8024_v50 = vpack.c.bf16 %v7434_v43, %v7433_v54  ;;  %v7801_v57 = vld [vmem:[%s16559_s2 + $0x299] ss:$0 sm:$0xff] }
 0x738   :  { %8704 = vrot.lane.b32.xlu1 %v8703_v61, %s8815_s18 }
 0x73a   :  { %8709 = vrot.lane.b32.xlu0 %v8708_v56, %s8818_s6 }
 0x795   :  { %v8680_v28 = vpop.permute.xlu0 %8679  ;;  %v8685_v59 = vpop.permute.xlu1 %8684 }
 0x796   :  { %v8682_v23 = vunpack.i.h.bf16 %v8680_v28  ;;  %v8681_v32 = vunpack.i.l.bf16 %v8680_v28  ;;  %v8687_v6 = vunpack.i.h.bf16 %v8685_v59  ;;  %v8686_v62 = vunpack.i.l.bf16 %v8685_v59 }
 0x798   :  { %v7293_v36 = vsel %vm7292_vm14, %v16230_v26, %v8682_v23  ;;  %v7304_v31 = vsel %vm7292_vm14, %v16320_v14, %v8681_v32  ;;  %v7511_v23 = vld [vmem:[%s16559_s2 + $0x218] sm:$0xff]  ;;  %v7512_v32 = vld [vmem:[%s16559_s2 + $0x220] sm:$0xff] }
 0x799   :  { %v8690_v16 = vpop.permute.xlu0 %8689  ;;  %v7295_v49 = vsel %vm7294_vm11, %v7293_v36, %v8687_v6  ;;  %v7305_v47 = vsel %vm7294_vm11, %v7304_v31, %v8686_v62  ;;  %v7513_v62 = vld [vmem:[%s16559_s2 + $0x228] sm:$0xff]  ;;  %v7514_v36 = vld [vmem:[%s16559_s2 + $0x230] sm:$0xff] }
 0x79a   :  { %v8692_v45 = vunpack.i.h.bf16 %v8690_v16  ;;  %v8691_v52 = vunpack.i.l.bf16 %v8690_v16  ;;  %v8027_v16 = vpack.c.bf16 %v7512_v32, %v7511_v23  ;;  %v8030_v31 = vpack.c.bf16 %v7514_v36, %v7513_v62 }
 0x79c   :  { %v7296_v20 = vsel %vm5776_vm8, %v7295_v49, %v8692_v45  ;;  %v7306_v30 = vsel %vm5776_vm8, %v7305_v47, %v8691_v52  ;;  %vm7302_vm8 = vcmask 916480   ;;  %v7515_v45 = vld [vmem:[%s16559_s2 + $0x238] sm:$0xff]  ;;  %v7516_v52 = vld [vmem:[%s16559_s2 + $0x240] sm:$0xff]  ;;  %v7517_v49 = vld [vmem:[%s16559_s2 + $0x248] sm:$0xff] }
 0x79d   :  { %v7518_v47 = vld [vmem:[%s16559_s2 + $0x250] sm:$0xff] }
 0x7a6   :  { %v8695_v51 = vpop.permute.xlu1 %8694 }
 0x7a7   :  { %v8697_v13 = vunpack.i.h.bf16 %v8695_v51  ;;  %v8696_v44 = vunpack.i.l.bf16 %v8695_v51  ;;  %v8033_v51 = vpack.c.bf16 %v7516_v52, %v7515_v45 }
 0x7a8   :  { %v8700_v1 = vpop.permute.xlu0 %8699 }
 0x7a9   :  { %v7298_v9 = vsel %vm7297_vm0, %v7296_v20, %v8697_v13  ;;  %v7307_v4 = vsel %vm7297_vm0, %v7306_v30, %v8696_v44  ;;  %v8702_v5 = vunpack.i.h.bf16 %v8700_v1  ;;  %v8701_v26 = vunpack.i.l.bf16 %v8700_v1  ;;  %v7519_v44 = vld [vmem:[%s16559_s2 + $0x258] sm:$0xff]  ;;  %v7520_v20 = vld [vmem:[%s16559_s2 + $0x260] sm:$0xff]  ;;  %v7521_v1 = vld [vmem:[%s16559_s2 + $0x268] sm:$0xff] }
 0x7aa   :  { %v8705_v34 = vpop.permute.xlu1 %8704  ;;  %v8036_v13 = vpack.c.bf16 %v7518_v47, %v7517_v49  ;;  %v8039_v30 = vpack.c.bf16 %v7520_v20, %v7519_v44 }
 0x7ab   :  { %v8707_v14 = vunpack.i.h.bf16 %v8705_v34  ;;  %v8706_v8 = vunpack.i.l.bf16 %v8705_v34  ;;  %v7308_v53 = vsel %vm7299_vm1, %v7307_v4, %v8701_v26  ;;  %v7300_v27 = vsel %vm7299_vm1, %v7298_v9, %v8702_v5  ;;  %v7522_v9 = vld [vmem:[%s16559_s2 + $0x270] sm:$0xff]  ;;  %v7523_v5 = vld [vmem:[%s16559_s2 + $0x278] sm:$0xff]  ;;  %v7524_v26 = vld [vmem:[%s16559_s2 + $0x280] sm:$0xff] }
 0x7ac   :  { %v8710_v58 = vpop.permute.xlu0 %8709  ;;  %v8042_v4 = vpack.c.bf16 %v7522_v9, %v7521_v1  ;;  %v8045_v34 = vpack.c.bf16 %v7524_v26, %v7523_v5 }
 0x7ad   :  { %v8712_v42 = vunpack.i.h.bf16 %v8710_v58  ;;  %v8711_v12 = vunpack.i.l.bf16 %v8710_v58  ;;  %v7309_v25 = vsel %vm6522_vm12, %v7308_v53, %v8706_v8  ;;  %v7301_v40 = vsel %vm6522_vm12, %v7300_v27, %v8707_v14  ;;  %v7525_v14 = vld [vmem:[%s16559_s2 + $0x288] sm:$0xff]  ;;  %v7526_v8 = vld [vmem:[%s16559_s2 + $0x290] sm:$0xff]  ;;  %v7802_v27 = vld [vmem:[%s16559_s2 + $0x29a] ss:$0 sm:$0xff] }
 0x7ae   :  { %vm8819_vm12 = vmmov 0   ;;  %v8048_v53 = vpack.c.bf16 %v7526_v8, %v7525_v14 }
 0x7af   :  { %v7310_v2 = vsel %vm7302_vm8, %v7309_v25, %v8711_v12  ;;  %v7303_v60 = vsel %vm7302_vm8, %v7301_v40, %v8712_v42 }
 0x7b0   :  { %7412 = vmatprep.mubr.f32.mxu1 %v7310_v2 }
 0x7b1   :  { %7413 = vmatmul.mubr.f32.vlgmr.msra.gmra.mrb[0].mxu1 %v7303_v60 }
 0x7b2   :  { %8004 = vmatpush3.bf16.msra.mxu1 %v8003_v11  ;;  %7905 = vmatprep.mubr.msk.f32.mxu1 %vm8819_vm12, %v18085_v46 }
 0x7b3   :  { %8005 = vmatprep.subr.bf16.mxu1 %v18084_v24 }
 0x7b6   :  { %8007 = vmatpush3.bf16.msra.mxu1 %v8006_v15 }
 0x7b7   :  { %8008 = vmatprep.subr.bf16.mxu1 %v18084_v24 }
 0x7ba   :  { %8010 = vmatpush3.bf16.msra.mxu1 %v8009_v38 }
 0x7bb   :  { %8011 = vmatprep.subr.bf16.mxu1 %v18084_v24 }
 0x7be   :  { %8013 = vmatpush3.bf16.msra.mxu1 %v8012_v41 }
 0x7bf   :  { %8014 = vmatprep.subr.bf16.mxu1 %v18084_v24 }
 0x7c2   :  { %8016 = vmatpush3.bf16.msra.mxu1 %v8015_v19 }
 0x7c3   :  { %8017 = vmatprep.subr.bf16.mxu1 %v18084_v24 }
 0x7c6   :  { %8019 = vmatpush3.bf16.msra.mxu1 %v8018_v3 }
 0x7c7   :  { %8020 = vmatprep.subr.bf16.mxu1 %v18084_v24 }
 0x7ca   :  { %8022 = vmatpush3.bf16.msra.mxu1 %v8021_v33 }
 0x7cb   :  { %8023 = vmatprep.subr.bf16.mxu1 %v18084_v24 }
 0x7ce   :  { %8025 = vmatpush3.bf16.msra.mxu1 %v8024_v50 }
 0x7cf   :  { %8026 = vmatprep.subr.bf16.mxu1 %v18084_v24 }
 0x884   :  { %v7836_v61 = vpop.f32.mrb[0].mxu1 }
 0x885   :  { %v7837_v56 = vpop.f32.mrb[1].mxu1 }
 0x886   :  { %v7838_v28 = vadd.f32 %v7837_v56, %v7836_v61 }
 0x888   :  { %v7415_v59 = vadd.f32 %v7838_v28, %v7801_v57 }
 0x88a   :  { %v7418_v6 = vmax.f32 %v7415_v59, 0.0 }
 0x88c   :  { %7906 = vmatmul.mubr.f32.vlgmr.msra.gmra.mrb[2].mxu1 %v7418_v6 }
 0x88d   :  { %8028 = vmatpush3.bf16.msra.mxu1 %v8027_v16  ;;  %7940 = vmatprep.mubr.msk.f32.mxu1 %vm8819_vm12, %v18085_v46 }
 0x88e   :  { %8029 = vmatprep.subr.bf16.mxu1 %v18084_v24 }
 0x891   :  { %8031 = vmatpush3.bf16.msra.mxu1 %v8030_v31 }
 0x892   :  { %8032 = vmatprep.subr.bf16.mxu1 %v18084_v24 }
 0x895   :  { %8034 = vmatpush3.bf16.msra.mxu1 %v8033_v51 }
 0x896   :  { %8035 = vmatprep.subr.bf16.mxu1 %v18084_v24 }
 0x899   :  { %8037 = vmatpush3.bf16.msra.mxu1 %v8036_v13 }
 0x89a   :  { %8038 = vmatprep.subr.bf16.mxu1 %v18084_v24 }
 0x89d   :  { %8040 = vmatpush3.bf16.msra.mxu1 %v8039_v30 }
 0x89e   :  { %8041 = vmatprep.subr.bf16.mxu1 %v18084_v24 }
 0x8a1   :  { %8043 = vmatpush3.bf16.msra.mxu1 %v8042_v4 }
 0x8a2   :  { %8044 = vmatprep.subr.bf16.mxu1 %v18084_v24 }
 0x8a5   :  { %8046 = vmatpush3.bf16.msra.mxu1 %v8045_v34 }
 0x8a6   :  { %8047 = vmatprep.subr.bf16.mxu1 %v18084_v24  ;;  %v7803_v24 = vld [vmem:[%s16559_s2 + $0x29b] ss:$0 sm:$0xff]  ;;  %s7622_s2 = sshll.u32 %s8820_s17, 4  ;;  %s7623_s2 = int_to_ptr.vmem [resolvable:$true] %s7622_s2 }
 0x8a7   :  { %s8759_s22 = scalar_lea.vmem %s7623_s2, 32  ;;  %p8764_p1 = scmp.lt.s32.totalorder %s7623_s2, %s7623_s2 }
 0x8a8   :  { %p8760_p0 = scmp.ne.s32.totalorder %s7623_s2, %s8759_s22  ;;  %p8765_p2 = scmp.lt.s32.totalorder %s8759_s22, %s8759_s22 }
 0x8a9   :  { %8049 = vmatpush3.bf16.msra.mxu1 %v8048_v53 }
 0x8aa   :  { %p8766_p3 = por %p8765_p2, %p8764_p1 }
 0x8ac   :  { %p8767_p4 = pnand %p8766_p3, %p8760_p0 }
 0x95f   :  { %v7506_v18 = vpop.f32.mrb[2].mxu1 }
 0x960   :  { %v7507_v21 = vadd.f32 %v7802_v27, %v7506_v18  ;;  %v7907_v58 = vpop.f32.mrb[3].mxu1 }
 0x962   :  { %v7510_v42 = vmax.f32 %v7507_v21, 0.0 }
 0x964   :  { %7941 = vmatmul.mubr.f32.vlgmr.msra.gmra.mrb[4].mxu1 %v7510_v42 }
 0xa37   :  { %v7598_v12 = vpop.f32.mrb[4].mxu1 }
 0xa38   :  { %v7599_v25 = vadd.f32 %v7803_v24, %v7598_v12  ;;  %v7942_v40 = vpop.f32.mrb[5].mxu1 }
 0xa3a   :  { %v7603_v11 = vsel %vm7602_vm2, %v7599_v25, -inf }
 0xa3b   :  { %7604 = vmax.xlane.f32.xlu1 %v7603_v11 }
 0xac8   :  { %v7605_v2 = vpop.xlane.xlu1 %7604 }
 0xac9   :  { %v7606_v60 = vsub.f32 %v7599_v25, %v7605_v2 }
 0xacb   :  { %v7607_v29 = vmul.f32 1.442695, %v7606_v60 }
 0xacd   :  { %8713 = vpow2.f32 %v7607_v29 }
 0xad7   :  { %v8714_v7 = vpop.eup %8713 }
 0xad8   :  { %v7609_v15 = vsel %vm7602_vm2, %v8714_v7, 0.0 }
 0xad9   :  { %7610 = vadd.xlane.f32.xlu0 %v7609_v15 }
 0xb66   :  { %v7611_v10 = vpop.xlane.xlu0 %7610 }
 0xb67   :  { %8715 = vlog2.f32 %v7611_v10 }
 0xb71   :  { %v8716_v0 = vpop.eup %8715 }
 0xb72   :  { %v7613_v38 = vmul.f32 0.6931472, %v8716_v0 }
 0xb74   :  { %v7614_v17 = vsub.f32 %v7606_v60, %v7613_v38 }
 0xb76   :  { %7615 = vst.msk [vmem:[#allocation2] sm:$0x3] %vm7602_vm2, %v7614_v17 }
 0xb77   :  { %8770 = shalt.err (!%p8767_p4)
}
 0xb78   :  { %s8771_s29 = scalar_lea.hbm %s16560_s3, 32 }
 0xb79   :  { %p8772_p5 = scmp.ne.s32.totalorder %s16560_s3, %s8771_s29  ;;  %p8775_p6 = scmp.lt.u32.totalorder %s8771_s29, %s16560_s3 }
 0xb7b   :  { %p8777_p7 = pnand %p8775_p6, %p8772_p5 }
 0xb7d   :  { %8780 = shalt.err (!%p8777_p7)
}
 0xb7e   :  { %7625 = dma.vmem_to_hbm [thread:$0]  %s7623_s2, 32, %s16560_s3, [#allocation3]  }
 0xb7f   :  { %8781 = dma.done.wait [#allocation3], 32  }
 0xb80   :  { %8782 = vsyncadd [#allocation3], 4294967264 }
 0xb81   :  { %7629 = vsyncpa [#allocation3], 1 }

</bundles_post_ra>
